<compile_context>
chip_gen: v7x
topology: tpu7x:2x2x1
jax: 0.10.0
libtpu: 0.0.40
codegen_flags: <defaults>
</compile_context>

<pallas_src>
import jax
import jax.numpy as jnp
from jax.experimental import pallas as pl
from jax.experimental.pallas import tpu as pltpu

LRELU_SLOPE = 0.2   # TODO(synk): assumed slope; PyTorch default would be 0.01
IN_EPS = 1e-5
CPAD = 128          # channel padding -> lane-dense vregs everywhere


# ----------------------------- fused kernel --------------------------------------

def _make_disc_kernel(num_body, H, W):
    WP = W + 2                 # padded width  (row stride of the flat slab)
    HWP = H * WP               # number of "flat output rows" computed per conv
    OFF = WP + 1               # flat offset of output (y=0, x=0) in the next slab
    inv_hw = 1.0 / (H * W)

    def kernel(*refs):
        x_ref = refs[0]                       # (rows_pad, CPAD) f32, padded input image
        w_head = refs[1]                      # (9*CPAD, CPAD) bf16
        w_body = refs[2:2 + num_body]         # each (9*CPAD, CPAD) bf16
        w_tail = refs[2 + num_body]           # (9*CPAD, CPAD) bf16
        b_tail = refs[3 + num_body]           # (1,) f32 in SMEM
        o_ref = refs[4 + num_body]            # (HWP, 1) f32
        buf_a = refs[5 + num_body]            # (rows_pad, CPAD) f32 scratch
        buf_b = refs[6 + num_body]            # (rows_pad, CPAD) f32 scratch

        # Zero the ping-pong slabs once per image: only the 1-pixel zero-padding border
        # (and alignment rows) rely on it; the interior is rewritten by every layer.
        buf_a[...] = jnp.zeros_like(buf_a)
        buf_b[...] = jnp.zeros_like(buf_b)

        # Within every group of WP flat rows only the first W are genuine conv outputs;
        # the last two land on the zero-padding columns of the next layer's slab.
        col = jax.lax.broadcasted_iota(jnp.int32, (HWP, 1), 0) % WP
        valid = col < W                                          # (HWP, 1) bool

        def conv(src_ref, w_ref):
            # im2col: 9 contiguous row-shifted views, concatenated along lanes
            # (each piece is 128-lane aligned), then ONE MXU matmul.
            taps = [src_ref[dy * WP + dx: dy * WP + dx + HWP, :].astype(jnp.bfloat16)
                    for dy in range(3) for dx in range(3)]
            patches = jnp.concatenate(taps, axis=1)              # (HWP, 9*CPAD) bf16
            return jnp.dot(patches, w_ref[...],
                           preferred_element_type=jnp.float32)   # (HWP, CPAD) f32

        def inorm_lrelu(r):
            # InstanceNorm statistics over the H*W valid positions only (f32 math).
            m = jnp.where(valid, r, 0.0)
            mean = jnp.sum(m, axis=0, keepdims=True) * inv_hw
            c = jnp.where(valid, r - mean, 0.0)
            var = jnp.sum(c * c, axis=0, keepdims=True) * inv_hw
            y = c * jax.lax.rsqrt(var + IN_EPS)
            return jnp.where(y >= 0.0, y, LRELU_SLOPE * y)       # masked rows stay 0

        # head: conv(pad=1) -> InstanceNorm -> LeakyReLU (conv bias cancelled by IN).
        act = inorm_lrelu(conv(x_ref, w_head))
        buf_a[OFF:OFF + HWP, :] = act.astype(buf_a.dtype)

        # body blocks, ping-ponging between the two VMEM slabs.
        src, dst = buf_a, buf_b
        for w_ref in w_body:
            act = inorm_lrelu(conv(src, w_ref))
            dst[OFF:OFF + HWP, :] = act.astype(dst.dtype)
            src, dst = dst, src

        # tail: plain Conv2d(64 -> 1) + bias; real output is padded channel 0.
        r = conv(src, w_tail)
        o_ref[...] = (r[:, 0:1] + b_tail[0]).astype(o_ref.dtype)

    return kernel


# ----------------------------- wrapper --------------------------------------------

def semantic_discriminator_forward(params, x_nchw):
    N, C, H, W = x_nchw.shape
    assert C <= CPAD
    HP, WP = H + 2, W + 2
    HWP = H * WP
    rows_need = max(HP * WP, (2 * WP + 2) + HWP)     # covers every shifted im2col read
    rows_pad = -(-rows_need // 8) * 8                # sublane-aligned slab height

    # --- one-time weight packing: HWIO -> zero-padded (9*CPAD, CPAD) bf16 ------------
    def pack_w(w):
        cin, cout = w.shape[2], w.shape[3]
        wp = jnp.zeros((3, 3, CPAD, CPAD), jnp.float32).at[:, :, :cin, :cout].set(w)
        return wp.reshape(9 * CPAD, CPAD).astype(jnp.bfloat16)

    w_head = pack_w(params["head_w"])
    w_body = [pack_w(w) for (w, _) in params["body"]]
    w_tail = pack_w(params["tail_w"])
    b_tail = params["tail_b"].reshape(1).astype(jnp.float32)
    num_body = len(w_body)

    # --- input layout: NCHW -> zero-padded, row-flattened (N, rows_pad, CPAD) f32 ----
    x = jnp.transpose(x_nchw, (0, 2, 3, 1))                          # NHWC
    x = jnp.pad(x, ((0, 0), (1, 1), (1, 1), (0, CPAD - C)))          # (N, HP, WP, CPAD)
    x = x.reshape(N, HP * WP, CPAD)
    x = jnp.pad(x, ((0, 0), (0, rows_pad - HP * WP), (0, 0))).astype(jnp.float32)

    kernel = _make_disc_kernel(num_body, H, W)

    img_map = lambda n: (n, 0, 0)
    w_spec = pl.BlockSpec((9 * CPAD, CPAD), lambda n: (0, 0))
    in_specs = ([pl.BlockSpec((None, rows_pad, CPAD), img_map), w_spec]
                + [w_spec] * num_body
                + [w_spec, pl.BlockSpec(memory_space=pltpu.MemorySpace.SMEM)])

    flops = 2 * N * (2 + num_body) * HWP * (9 * CPAD) * CPAD
    bytes_accessed = (x.size * 4 + (2 + num_body) * 9 * CPAD * CPAD * 2 + N * HWP * 4)

    out_flat = pl.pallas_call(
        kernel,
        out_shape=jax.ShapeDtypeStruct((N, HWP, 1), jnp.float32),
        grid=(N,),
        in_specs=in_specs,
        out_specs=pl.BlockSpec((None, HWP, 1), img_map),
        scratch_shapes=[pltpu.VMEM((rows_pad, CPAD), jnp.float32),
                        pltpu.VMEM((rows_pad, CPAD), jnp.float32)],
        compiler_params=pltpu.CompilerParams(dimension_semantics=("parallel",)),
        cost_estimate=pl.CostEstimate(flops=flops, transcendentals=0,
                                      bytes_accessed=bytes_accessed),
    )(x, w_head, *w_body, w_tail, b_tail)

    # Drop the 2 garbage columns per flat row (tiny; 1 KB/image) and reshape to NCHW.
    out = out_flat.reshape(N, H, WP)[:, :, :W]
    return out.reshape(N, 1, H, W)


# ----------------------------- synthetic parameters --------------------------------

def init_params(key, nc_im, num_layer, nfc=64):
    def conv_init(k, cin, cout):
        kw, kb = jax.random.split(k)
        w = jax.random.normal(kw, (3, 3, cin, cout), jnp.float32) * 0.05
        b = jax.random.normal(kb, (cout,), jnp.float32) * 0.05
        return w, b

    keys = jax.random.split(key, num_layer)
    params = {}
    params["head_w"], params["head_b"] = conv_init(keys[0], nc_im, nfc)
    params["body"] = [conv_init(keys[i + 1], nfc, nfc) for i in range(num_layer - 2)]
    params["tail_w"], params["tail_b"] = conv_init(keys[num_layer - 1], nfc, 1)
    return params


# ----------------------------- pure-JAX reference (validation only) ----------------

def ref_forward(params, x_nchw, operand_dtype=jnp.bfloat16):
    x = jnp.transpose(x_nchw, (0, 2, 3, 1))

    def conv_same(x, w, b):
        y = jax.lax.conv_general_dilated(
            x.astype(operand_dtype), w.astype(operand_dtype), (1, 1), "SAME",
            dimension_numbers=("NHWC", "HWIO", "NHWC"),
            preferred_element_type=jnp.float32)
        return y + b.reshape(1, 1, 1, -1).astype(jnp.float32)

    def in_lrelu(y):
        m = jnp.mean(y, axis=(1, 2), keepdims=True)
        v = jnp.mean((y - m) ** 2, axis=(1, 2), keepdims=True)
        y = (y - m) * jax.lax.rsqrt(v + IN_EPS)
        return jnp.where(y >= 0, y, LRELU_SLOPE * y)

    x = in_lrelu(conv_same(x, params["head_w"], params["head_b"]))
    for w, b in params["body"]:
        x = in_lrelu(conv_same(x, w, b))
    y = conv_same(x, params["tail_w"], params["tail_b"])
    return jnp.transpose(y, (0, 3, 1, 2))


# ----------------------------- main -------------------------------------------------

if __name__ == "__main__":
    NC_IM, NUM_LAYER, N, HW = 3, 3, 2, 16    # opt.nc_im=3, opt.num_layer=3

    key = jax.random.PRNGKey(0)
    kp, kx = jax.random.split(key)
    params = init_params(kp, NC_IM, NUM_LAYER)
    x = jax.random.normal(kx, (N, NC_IM, HW, HW), jnp.float32)

    forward = jax.jit(semantic_discriminator_forward)
    out = jax.block_until_ready(forward(params, x))
    assert out.shape == (N, 1, HW, HW), out.shape

    # Tight check vs a reference using the same bf16-operand / f32-accumulate convs.
    ref_bf16 = jax.block_until_ready(ref_forward(params, x, jnp.bfloat16))
    err = float(jnp.max(jnp.abs(out - ref_bf16)))
    assert err < 1e-2, f"mismatch vs bf16-operand reference: {err}"

    # Loose sanity check vs a fully f32 reference (only bf16 MXU rounding differs).
    ref_f32 = jax.block_until_ready(ref_forward(params, x, jnp.float32))
    err32 = float(jnp.max(jnp.abs(out - ref_f32)))
    assert err32 < 2e-1, f"mismatch vs f32 reference: {err32}"

    print("KERNEL_OK")
</pallas_src>

<mosaic_0001>
module attributes {stable_mosaic.version = 11 : i64} {
  func.func @kernel(%arg0: i32, %arg1: memref<1x328x128xf32, #tpu.memory_space<vmem>>, %arg2: memref<1152x128xbf16, #tpu.memory_space<vmem>>, %arg3: memref<1152x128xbf16, #tpu.memory_space<vmem>>, %arg4: memref<1152x128xbf16, #tpu.memory_space<vmem>>, %arg5: memref<1xf32, #tpu.memory_space<smem>>, %arg6: memref<1x288x1xf32, #tpu.memory_space<vmem>>, %arg7: memref<328x128xf32, #tpu.memory_space<vmem>>, %arg8: memref<328x128xf32, #tpu.memory_space<vmem>>) attributes {dimension_semantics = [#tpu.dimension_semantics<parallel>], iteration_bounds = array<i64: 2>, scalar_prefetch = 0 : i64, scratch_operands = 2 : i64, tpu.core_type = #tpu.core_type<tc>, window_params = [{transform_indices = @transform_0, window_bounds = array<i64: 1, 328, 128>}, {pipeline_mode = #tpu.pipeline_mode<synchronous>, transform_indices = @transform_1, window_bounds = array<i64: 1152, 128>}, {pipeline_mode = #tpu.pipeline_mode<synchronous>, transform_indices = @transform_2, window_bounds = array<i64: 1152, 128>}, {pipeline_mode = #tpu.pipeline_mode<synchronous>, transform_indices = @transform_3, window_bounds = array<i64: 1152, 128>}, {transform_indices = @transform_4, window_bounds = array<i64: 1>}, {transform_indices = @transform_5, window_bounds = array<i64: 1, 288, 1>}]} {
    %cst = arith.constant 0.000000e+00 : f32
    %0 = vector.broadcast %cst : f32 to vector<328x128xf32>
    %c0 = arith.constant 0 : index
    %c0_0 = arith.constant 0 : index
    %1 = vector.load %arg7[%c0, %c0_0] : memref<328x128xf32, #tpu.memory_space<vmem>>, vector<328x128xf32>
    tpu.vector_store %arg7[%c0, %c0_0], %0 {strides = array<i32>} : memref<328x128xf32, #tpu.memory_space<vmem>>, vector<328x128xf32>,
    %cst_1 = arith.constant 0.000000e+00 : f32
    %2 = vector.broadcast %cst_1 : f32 to vector<328x128xf32>
    %c0_2 = arith.constant 0 : index
    %c0_3 = arith.constant 0 : index
    %3 = vector.load %arg8[%c0_2, %c0_3] : memref<328x128xf32, #tpu.memory_space<vmem>>, vector<328x128xf32>
    tpu.vector_store %arg8[%c0_2, %c0_3], %2 {strides = array<i32>} : memref<328x128xf32, #tpu.memory_space<vmem>>, vector<328x128xf32>,
    %4 = tpu.iota {dimensions = array<i32: 0>} : vector<288x1xi32>
    %c18_i32 = arith.constant 18 : i32
    %c0_i32 = arith.constant 0 : i32
    %5 = arith.cmpi eq, %c18_i32, %c0_i32 : i32
    %c1_i32 = arith.constant 1 : i32
    %6 = arith.select %5, %c1_i32, %c18_i32 : i32
    %7 = vector.broadcast %6 : i32 to vector<288x1xi32>
    %8 = arith.remsi %4, %7 : vector<288x1xi32>
    %c0_i32_4 = arith.constant 0 : i32
    %9 = vector.broadcast %c0_i32_4 : i32 to vector<288x1xi32>
    %10 = arith.cmpi ne, %8, %9 : vector<288x1xi32>
    %c0_i32_5 = arith.constant 0 : i32
    %11 = vector.broadcast %c0_i32_5 : i32 to vector<288x1xi32>
    %12 = arith.cmpi slt, %8, %11 : vector<288x1xi32>
    %c0_i32_6 = arith.constant 0 : i32
    %13 = arith.cmpi slt, %6, %c0_i32_6 : i32
    %14 = vector.broadcast %13 : i1 to vector<288x1xi1>
    %15 = vector.broadcast %14 : vector<288x1xi1> to vector<288x1xi1>
    %16 = arith.xori %12, %15 : vector<288x1xi1>
    %17 = arith.andi %16, %10 : vector<288x1xi1>
    %18 = vector.broadcast %6 : i32 to vector<288x1xi32>
    %19 = arith.addi %8, %18 : vector<288x1xi32>
    %20 = arith.select %17, %19, %8 : vector<288x1xi1>, vector<288x1xi32>
    %c16_i32 = arith.constant 16 : i32
    %21 = vector.broadcast %c16_i32 : i32 to vector<288x1xi32>
    %22 = arith.cmpi slt, %20, %21 : vector<288x1xi32>
    %c0_7 = arith.constant 0 : index
    %c0_8 = arith.constant 0 : index
    %c0_9 = arith.constant 0 : index
    %23 = vector.load %arg1[%c0_7, %c0_8, %c0_9] : memref<1x328x128xf32, #tpu.memory_space<vmem>>, vector<1x288x128xf32>
    %24 = vector.shape_cast %23 : vector<1x288x128xf32> to vector<288x128xf32>
    %25 = arith.truncf %24 : vector<288x128xf32> to vector<288x128xbf16>
    %c0_10 = arith.constant 0 : index
    %c1 = arith.constant 1 : index
    %c0_11 = arith.constant 0 : index
    %26 = vector.load %arg1[%c0_10, %c1, %c0_11] : memref<1x328x128xf32, #tpu.memory_space<vmem>>, vector<1x288x128xf32>
    %27 = vector.shape_cast %26 : vector<1x288x128xf32> to vector<288x128xf32>
    %28 = arith.truncf %27 : vector<288x128xf32> to vector<288x128xbf16>
    %c0_12 = arith.constant 0 : index
    %c2 = arith.constant 2 : index
    %c0_13 = arith.constant 0 : index
    %29 = vector.load %arg1[%c0_12, %c2, %c0_13] : memref<1x328x128xf32, #tpu.memory_space<vmem>>, vector<1x288x128xf32>
    %30 = vector.shape_cast %29 : vector<1x288x128xf32> to vector<288x128xf32>
    %31 = arith.truncf %30 : vector<288x128xf32> to vector<288x128xbf16>
    %c0_14 = arith.constant 0 : index
    %c18 = arith.constant 18 : index
    %c0_15 = arith.constant 0 : index
    %32 = vector.load %arg1[%c0_14, %c18, %c0_15] : memref<1x328x128xf32, #tpu.memory_space<vmem>>, vector<1x288x128xf32>
    %33 = vector.shape_cast %32 : vector<1x288x128xf32> to vector<288x128xf32>
    %34 = arith.truncf %33 : vector<288x128xf32> to vector<288x128xbf16>
    %c0_16 = arith.constant 0 : index
    %c19 = arith.constant 19 : index
    %c0_17 = arith.constant 0 : index
    %35 = vector.load %arg1[%c0_16, %c19, %c0_17] : memref<1x328x128xf32, #tpu.memory_space<vmem>>, vector<1x288x128xf32>
    %36 = vector.shape_cast %35 : vector<1x288x128xf32> to vector<288x128xf32>
    %37 = arith.truncf %36 : vector<288x128xf32> to vector<288x128xbf16>
    %c0_18 = arith.constant 0 : index
    %c20 = arith.constant 20 : index
    %c0_19 = arith.constant 0 : index
    %38 = vector.load %arg1[%c0_18, %c20, %c0_19] : memref<1x328x128xf32, #tpu.memory_space<vmem>>, vector<1x288x128xf32>
    %39 = vector.shape_cast %38 : vector<1x288x128xf32> to vector<288x128xf32>
    %40 = arith.truncf %39 : vector<288x128xf32> to vector<288x128xbf16>
    %c0_20 = arith.constant 0 : index
    %c36 = arith.constant 36 : index
    %c0_21 = arith.constant 0 : index
    %41 = vector.load %arg1[%c0_20, %c36, %c0_21] : memref<1x328x128xf32, #tpu.memory_space<vmem>>, vector<1x288x128xf32>
    %42 = vector.shape_cast %41 : vector<1x288x128xf32> to vector<288x128xf32>
    %43 = arith.truncf %42 : vector<288x128xf32> to vector<288x128xbf16>
    %c0_22 = arith.constant 0 : index
    %c37 = arith.constant 37 : index
    %c0_23 = arith.constant 0 : index
    %44 = vector.load %arg1[%c0_22, %c37, %c0_23] : memref<1x328x128xf32, #tpu.memory_space<vmem>>, vector<1x288x128xf32>
    %45 = vector.shape_cast %44 : vector<1x288x128xf32> to vector<288x128xf32>
    %46 = arith.truncf %45 : vector<288x128xf32> to vector<288x128xbf16>
    %c0_24 = arith.constant 0 : index
    %c38 = arith.constant 38 : index
    %c0_25 = arith.constant 0 : index
    %47 = vector.load %arg1[%c0_24, %c38, %c0_25] : memref<1x328x128xf32, #tpu.memory_space<vmem>>, vector<1x288x128xf32>
    %48 = vector.shape_cast %47 : vector<1x288x128xf32> to vector<288x128xf32>
    %49 = arith.truncf %48 : vector<288x128xf32> to vector<288x128xbf16>
    %50 = tpu.concatenate %25, %28, %31, %34, %37, %40, %43, %46, %49 in 1 : vector<288x128xbf16>, vector<288x128xbf16>, vector<288x128xbf16>, vector<288x128xbf16>, vector<288x128xbf16>, vector<288x128xbf16>, vector<288x128xbf16>, vector<288x128xbf16>, vector<288x128xbf16> -> vector<288x1152xbf16>
    %c0_26 = arith.constant 0 : index
    %c0_27 = arith.constant 0 : index
    %51 = vector.load %arg2[%c0_26, %c0_27] : memref<1152x128xbf16, #tpu.memory_space<vmem>>, vector<1152x128xbf16>
    %cst_28 = arith.constant dense<0.000000e+00> : vector<288x128xf32>
    %52 = tpu.matmul %50, %51, %cst_28 {dimension_numbers = #tpu.dot_dimension_numbers<[1], [0], [0], [1], [0, 0, 1, 1], [], []>} : vector<288x1152xbf16>, vector<1152x128xbf16>, vector<288x128xf32> -> vector<288x128xf32>
    %cst_29 = arith.constant 0.000000e+00 : f32
    %53 = vector.shape_cast %22 : vector<288x1xi1> to vector<288x1xi1>
    %54 = vector.broadcast %53 : vector<288x1xi1> to vector<288x128xi1>
    %55 = vector.broadcast %cst_29 : f32 to vector<288x128xf32>
    %56 = arith.select %54, %52, %55 : vector<288x128xi1>, vector<288x128xf32>
    %cst_30 = arith.constant dense<0.000000e+00> : vector<128xf32>
    %57 = vector.multi_reduction <add>, %56, %cst_30 [0] : vector<288x128xf32> to vector<128xf32>
    %58 = vector.shape_cast %57 : vector<128xf32> to vector<1x128xf32>
    %cst_31 = arith.constant 3.906250e-03 : f32
    %59 = vector.broadcast %cst_31 : f32 to vector<1x128xf32>
    %60 = arith.mulf %58, %59 : vector<1x128xf32>
    %61 = vector.broadcast %60 : vector<1x128xf32> to vector<288x128xf32>
    %62 = arith.subf %52, %61 : vector<288x128xf32>
    %cst_32 = arith.constant 0.000000e+00 : f32
    %63 = vector.shape_cast %22 : vector<288x1xi1> to vector<288x1xi1>
    %64 = vector.broadcast %63 : vector<288x1xi1> to vector<288x128xi1>
    %65 = vector.broadcast %cst_32 : f32 to vector<288x128xf32>
    %66 = arith.select %64, %62, %65 : vector<288x128xi1>, vector<288x128xf32>
    %67 = arith.mulf %66, %66 : vector<288x128xf32>
    %cst_33 = arith.constant dense<0.000000e+00> : vector<128xf32>
    %68 = vector.multi_reduction <add>, %67, %cst_33 [0] : vector<288x128xf32> to vector<128xf32>
    %69 = vector.shape_cast %68 : vector<128xf32> to vector<1x128xf32>
    %cst_34 = arith.constant 3.906250e-03 : f32
    %70 = vector.broadcast %cst_34 : f32 to vector<1x128xf32>
    %71 = arith.mulf %69, %70 : vector<1x128xf32>
    %cst_35 = arith.constant 9.99999974E-6 : f32
    %72 = vector.broadcast %cst_35 : f32 to vector<1x128xf32>
    %73 = arith.addf %71, %72 : vector<1x128xf32>
    %74 = math.rsqrt %73 : vector<1x128xf32>
    %75 = vector.broadcast %74 : vector<1x128xf32> to vector<288x128xf32>
    %76 = arith.mulf %66, %75 : vector<288x128xf32>
    %cst_36 = arith.constant 0.000000e+00 : f32
    %77 = vector.broadcast %cst_36 : f32 to vector<288x128xf32>
    %78 = arith.cmpf oge, %76, %77 : vector<288x128xf32>
    %cst_37 = arith.constant 2.000000e-01 : f32
    %79 = vector.broadcast %cst_37 : f32 to vector<288x128xf32>
    %80 = arith.mulf %79, %76 : vector<288x128xf32>
    %81 = arith.select %78, %76, %80 : vector<288x128xi1>, vector<288x128xf32>
    %c19_38 = arith.constant 19 : index
    %c0_39 = arith.constant 0 : index
    %82 = vector.load %arg7[%c19_38, %c0_39] : memref<328x128xf32, #tpu.memory_space<vmem>>, vector<288x128xf32>
    tpu.vector_store %arg7[%c19_38, %c0_39], %81 {strides = array<i32>} : memref<328x128xf32, #tpu.memory_space<vmem>>, vector<288x128xf32>,
    %c0_40 = arith.constant 0 : index
    %c0_41 = arith.constant 0 : index
    %83 = vector.load %arg7[%c0_40, %c0_41] : memref<328x128xf32, #tpu.memory_space<vmem>>, vector<288x128xf32>
    %84 = arith.truncf %83 : vector<288x128xf32> to vector<288x128xbf16>
    %c1_42 = arith.constant 1 : index
    %c0_43 = arith.constant 0 : index
    %85 = vector.load %arg7[%c1_42, %c0_43] : memref<328x128xf32, #tpu.memory_space<vmem>>, vector<288x128xf32>
    %86 = arith.truncf %85 : vector<288x128xf32> to vector<288x128xbf16>
    %c2_44 = arith.constant 2 : index
    %c0_45 = arith.constant 0 : index
    %87 = vector.load %arg7[%c2_44, %c0_45] : memref<328x128xf32, #tpu.memory_space<vmem>>, vector<288x128xf32>
    %88 = arith.truncf %87 : vector<288x128xf32> to vector<288x128xbf16>
    %c18_46 = arith.constant 18 : index
    %c0_47 = arith.constant 0 : index
    %89 = vector.load %arg7[%c18_46, %c0_47] : memref<328x128xf32, #tpu.memory_space<vmem>>, vector<288x128xf32>
    %90 = arith.truncf %89 : vector<288x128xf32> to vector<288x128xbf16>
    %c19_48 = arith.constant 19 : index
    %c0_49 = arith.constant 0 : index
    %91 = vector.load %arg7[%c19_48, %c0_49] : memref<328x128xf32, #tpu.memory_space<vmem>>, vector<288x128xf32>
    %92 = arith.truncf %91 : vector<288x128xf32> to vector<288x128xbf16>
    %c20_50 = arith.constant 20 : index
    %c0_51 = arith.constant 0 : index
    %93 = vector.load %arg7[%c20_50, %c0_51] : memref<328x128xf32, #tpu.memory_space<vmem>>, vector<288x128xf32>
    %94 = arith.truncf %93 : vector<288x128xf32> to vector<288x128xbf16>
    %c36_52 = arith.constant 36 : index
    %c0_53 = arith.constant 0 : index
    %95 = vector.load %arg7[%c36_52, %c0_53] : memref<328x128xf32, #tpu.memory_space<vmem>>, vector<288x128xf32>
    %96 = arith.truncf %95 : vector<288x128xf32> to vector<288x128xbf16>
    %c37_54 = arith.constant 37 : index
    %c0_55 = arith.constant 0 : index
    %97 = vector.load %arg7[%c37_54, %c0_55] : memref<328x128xf32, #tpu.memory_space<vmem>>, vector<288x128xf32>
    %98 = arith.truncf %97 : vector<288x128xf32> to vector<288x128xbf16>
    %c38_56 = arith.constant 38 : index
    %c0_57 = arith.constant 0 : index
    %99 = vector.load %arg7[%c38_56, %c0_57] : memref<328x128xf32, #tpu.memory_space<vmem>>, vector<288x128xf32>
    %100 = arith.truncf %99 : vector<288x128xf32> to vector<288x128xbf16>
    %101 = tpu.concatenate %84, %86, %88, %90, %92, %94, %96, %98, %100 in 1 : vector<288x128xbf16>, vector<288x128xbf16>, vector<288x128xbf16>, vector<288x128xbf16>, vector<288x128xbf16>, vector<288x128xbf16>, vector<288x128xbf16>, vector<288x128xbf16>, vector<288x128xbf16> -> vector<288x1152xbf16>
    %c0_58 = arith.constant 0 : index
    %c0_59 = arith.constant 0 : index
    %102 = vector.load %arg3[%c0_58, %c0_59] : memref<1152x128xbf16, #tpu.memory_space<vmem>>, vector<1152x128xbf16>
    %cst_60 = arith.constant dense<0.000000e+00> : vector<288x128xf32>
    %103 = tpu.matmul %101, %102, %cst_60 {dimension_numbers = #tpu.dot_dimension_numbers<[1], [0], [0], [1], [0, 0, 1, 1], [], []>} : vector<288x1152xbf16>, vector<1152x128xbf16>, vector<288x128xf32> -> vector<288x128xf32>
    %cst_61 = arith.constant 0.000000e+00 : f32
    %104 = vector.shape_cast %22 : vector<288x1xi1> to vector<288x1xi1>
    %105 = vector.broadcast %104 : vector<288x1xi1> to vector<288x128xi1>
    %106 = vector.broadcast %cst_61 : f32 to vector<288x128xf32>
    %107 = arith.select %105, %103, %106 : vector<288x128xi1>, vector<288x128xf32>
    %cst_62 = arith.constant dense<0.000000e+00> : vector<128xf32>
    %108 = vector.multi_reduction <add>, %107, %cst_62 [0] : vector<288x128xf32> to vector<128xf32>
    %109 = vector.shape_cast %108 : vector<128xf32> to vector<1x128xf32>
    %cst_63 = arith.constant 3.906250e-03 : f32
    %110 = vector.broadcast %cst_63 : f32 to vector<1x128xf32>
    %111 = arith.mulf %109, %110 : vector<1x128xf32>
    %112 = vector.broadcast %111 : vector<1x128xf32> to vector<288x128xf32>
    %113 = arith.subf %103, %112 : vector<288x128xf32>
    %cst_64 = arith.constant 0.000000e+00 : f32
    %114 = vector.shape_cast %22 : vector<288x1xi1> to vector<288x1xi1>
    %115 = vector.broadcast %114 : vector<288x1xi1> to vector<288x128xi1>
    %116 = vector.broadcast %cst_64 : f32 to vector<288x128xf32>
    %117 = arith.select %115, %113, %116 : vector<288x128xi1>, vector<288x128xf32>
    %118 = arith.mulf %117, %117 : vector<288x128xf32>
    %cst_65 = arith.constant dense<0.000000e+00> : vector<128xf32>
    %119 = vector.multi_reduction <add>, %118, %cst_65 [0] : vector<288x128xf32> to vector<128xf32>
    %120 = vector.shape_cast %119 : vector<128xf32> to vector<1x128xf32>
    %cst_66 = arith.constant 3.906250e-03 : f32
    %121 = vector.broadcast %cst_66 : f32 to vector<1x128xf32>
    %122 = arith.mulf %120, %121 : vector<1x128xf32>
    %cst_67 = arith.constant 9.99999974E-6 : f32
    %123 = vector.broadcast %cst_67 : f32 to vector<1x128xf32>
    %124 = arith.addf %122, %123 : vector<1x128xf32>
    %125 = math.rsqrt %124 : vector<1x128xf32>
    %126 = vector.broadcast %125 : vector<1x128xf32> to vector<288x128xf32>
    %127 = arith.mulf %117, %126 : vector<288x128xf32>
    %cst_68 = arith.constant 0.000000e+00 : f32
    %128 = vector.broadcast %cst_68 : f32 to vector<288x128xf32>
    %129 = arith.cmpf oge, %127, %128 : vector<288x128xf32>
    %cst_69 = arith.constant 2.000000e-01 : f32
    %130 = vector.broadcast %cst_69 : f32 to vector<288x128xf32>
    %131 = arith.mulf %130, %127 : vector<288x128xf32>
    %132 = arith.select %129, %127, %131 : vector<288x128xi1>, vector<288x128xf32>
    %c19_70 = arith.constant 19 : index
    %c0_71 = arith.constant 0 : index
    %133 = vector.load %arg8[%c19_70, %c0_71] : memref<328x128xf32, #tpu.memory_space<vmem>>, vector<288x128xf32>
    tpu.vector_store %arg8[%c19_70, %c0_71], %132 {strides = array<i32>} : memref<328x128xf32, #tpu.memory_space<vmem>>, vector<288x128xf32>,
    %c0_72 = arith.constant 0 : index
    %c0_73 = arith.constant 0 : index
    %134 = vector.load %arg8[%c0_72, %c0_73] : memref<328x128xf32, #tpu.memory_space<vmem>>, vector<288x128xf32>
    %135 = arith.truncf %134 : vector<288x128xf32> to vector<288x128xbf16>
    %c1_74 = arith.constant 1 : index
    %c0_75 = arith.constant 0 : index
    %136 = vector.load %arg8[%c1_74, %c0_75] : memref<328x128xf32, #tpu.memory_space<vmem>>, vector<288x128xf32>
    %137 = arith.truncf %136 : vector<288x128xf32> to vector<288x128xbf16>
    %c2_76 = arith.constant 2 : index
    %c0_77 = arith.constant 0 : index
    %138 = vector.load %arg8[%c2_76, %c0_77] : memref<328x128xf32, #tpu.memory_space<vmem>>, vector<288x128xf32>
    %139 = arith.truncf %138 : vector<288x128xf32> to vector<288x128xbf16>
    %c18_78 = arith.constant 18 : index
    %c0_79 = arith.constant 0 : index
    %140 = vector.load %arg8[%c18_78, %c0_79] : memref<328x128xf32, #tpu.memory_space<vmem>>, vector<288x128xf32>
    %141 = arith.truncf %140 : vector<288x128xf32> to vector<288x128xbf16>
    %c19_80 = arith.constant 19 : index
    %c0_81 = arith.constant 0 : index
    %142 = vector.load %arg8[%c19_80, %c0_81] : memref<328x128xf32, #tpu.memory_space<vmem>>, vector<288x128xf32>
    %143 = arith.truncf %142 : vector<288x128xf32> to vector<288x128xbf16>
    %c20_82 = arith.constant 20 : index
    %c0_83 = arith.constant 0 : index
    %144 = vector.load %arg8[%c20_82, %c0_83] : memref<328x128xf32, #tpu.memory_space<vmem>>, vector<288x128xf32>
    %145 = arith.truncf %144 : vector<288x128xf32> to vector<288x128xbf16>
    %c36_84 = arith.constant 36 : index
    %c0_85 = arith.constant 0 : index
    %146 = vector.load %arg8[%c36_84, %c0_85] : memref<328x128xf32, #tpu.memory_space<vmem>>, vector<288x128xf32>
    %147 = arith.truncf %146 : vector<288x128xf32> to vector<288x128xbf16>
    %c37_86 = arith.constant 37 : index
    %c0_87 = arith.constant 0 : index
    %148 = vector.load %arg8[%c37_86, %c0_87] : memref<328x128xf32, #tpu.memory_space<vmem>>, vector<288x128xf32>
    %149 = arith.truncf %148 : vector<288x128xf32> to vector<288x128xbf16>
    %c38_88 = arith.constant 38 : index
    %c0_89 = arith.constant 0 : index
    %150 = vector.load %arg8[%c38_88, %c0_89] : memref<328x128xf32, #tpu.memory_space<vmem>>, vector<288x128xf32>
    %151 = arith.truncf %150 : vector<288x128xf32> to vector<288x128xbf16>
    %152 = tpu.concatenate %135, %137, %139, %141, %143, %145, %147, %149, %151 in 1 : vector<288x128xbf16>, vector<288x128xbf16>, vector<288x128xbf16>, vector<288x128xbf16>, vector<288x128xbf16>, vector<288x128xbf16>, vector<288x128xbf16>, vector<288x128xbf16>, vector<288x128xbf16> -> vector<288x1152xbf16>
    %c0_90 = arith.constant 0 : index
    %c0_91 = arith.constant 0 : index
    %153 = vector.load %arg4[%c0_90, %c0_91] : memref<1152x128xbf16, #tpu.memory_space<vmem>>, vector<1152x128xbf16>
    %cst_92 = arith.constant dense<0.000000e+00> : vector<288x128xf32>
    %154 = tpu.matmul %152, %153, %cst_92 {dimension_numbers = #tpu.dot_dimension_numbers<[1], [0], [0], [1], [0, 0, 1, 1], [], []>} : vector<288x1152xbf16>, vector<1152x128xbf16>, vector<288x128xf32> -> vector<288x128xf32>
    %155 = vector.extract_strided_slice %154 {offsets = [0, 0], sizes = [288, 1], strides = [1, 1]} : vector<288x128xf32> to vector<288x1xf32>
    %c0_93 = arith.constant 0 : index
    %156 = memref.load %arg5[%c0_93] : memref<1xf32, #tpu.memory_space<smem>>
    %157 = vector.broadcast %156 : f32 to vector<288x1xf32>
    %158 = arith.addf %155, %157 : vector<288x1xf32>
    %c0_94 = arith.constant 0 : index
    %c0_95 = arith.constant 0 : index
    %c0_96 = arith.constant 0 : index
    %159 = vector.load %arg6[%c0_94, %c0_95, %c0_96] : memref<1x288x1xf32, #tpu.memory_space<vmem>>, vector<1x288x1xf32>
    %160 = vector.shape_cast %159 : vector<1x288x1xf32> to vector<288x1xf32>
    %161 = vector.shape_cast %158 : vector<288x1xf32> to vector<1x288x1xf32>
    tpu.vector_store %arg6[%c0_94, %c0_95, %c0_96], %161 {strides = array<i32>} : memref<1x288x1xf32, #tpu.memory_space<vmem>>, vector<1x288x1xf32>,
    return
  }
  func.func @transform_0(%arg0: i32) -> (i32, i32, i32) {
    %c0_i32 = arith.constant 0 : i32
    %c0_i32_0 = arith.constant 0 : i32
    %c0_i32_1 = arith.constant 0 : i32
    return %arg0, %c0_i32, %c0_i32_0 : i32, i32, i32
  }
  func.func @transform_1(%arg0: i32) -> (i32, i32) {
    %c0_i32 = arith.constant 0 : i32
    %c0_i32_0 = arith.constant 0 : i32
    %c0_i32_1 = arith.constant 0 : i32
    return %c0_i32, %c0_i32_0 : i32, i32
  }
  func.func @transform_2(%arg0: i32) -> (i32, i32) {
    %c0_i32 = arith.constant 0 : i32
    %c0_i32_0 = arith.constant 0 : i32
    %c0_i32_1 = arith.constant 0 : i32
    return %c0_i32, %c0_i32_0 : i32, i32
  }
  func.func @transform_3(%arg0: i32) -> (i32, i32) {
    %c0_i32 = arith.constant 0 : i32
    %c0_i32_0 = arith.constant 0 : i32
    %c0_i32_1 = arith.constant 0 : i32
    return %c0_i32, %c0_i32_0 : i32, i32
  }
  func.func @transform_4(%arg0: i32) -> i32 {
    %c0_i32 = arith.constant 0 : i32
    %c0_i32_0 = arith.constant 0 : i32
    return %c0_i32 : i32
  }
  func.func @transform_5(%arg0: i32) -> (i32, i32, i32) {
    %c0_i32 = arith.constant 0 : i32
    %c0_i32_0 = arith.constant 0 : i32
    %c0_i32_1 = arith.constant 0 : i32
    return %arg0, %c0_i32, %c0_i32_0 : i32, i32, i32
  }
}

</mosaic_0001>

<bundles_post_ra>
// kernel: semantic_discriminator_forward.1
= control target key start
LH: loop header
LB: loop body
LE: loop exit
PB: predicated region body
PF: predicated region fallthrough
CT: control target
= control target key end

     0   :  { %s8961_s20 = smov 0   ;;  %s13485_s0 = inlined_call_operand.vmem [shape: f32[2,328,128], index: 0, kind: input, shape index: {}]   ;;  %s13486_s1 = inlined_call_operand.vmem [shape: bf16[1152,128], index: 1, kind: input, shape index: {}]   ;;  %s13487_s2 = inlined_call_operand.vmem [shape: bf16[1152,128], index: 2, kind: input, shape index: {}]   ;;  %s13488_s3 = inlined_call_operand.vmem [shape: bf16[1152,128], index: 3, kind: input, shape index: {}]   ;;  %s13489_s4 = inlined_call_operand.<no memory space> [shape: f32[1], index: 4, kind: input, shape index: {}]   ;;  %s13490_s5 = inlined_call_operand.vmem [shape: f32[2,288,1], index: 5, kind: output, shape index: {}]  }
   0x1   :  { %10 = sst [smem:[#allocation4]] %s13489_s4 }
   0x2 LB: > { %s7515_s21 = sadd.s32 4294967295, %s8924_s20   ;;  %p7519_p0 = scmp.ge.s32.totalorder %s8924_s20, 1  ;;  %s8924_s20 = sphi %s8961_s20, %s16_s20  }
   0x3   : > { %p188_p1 = scmp.lt.s32.totalorder %s8924_s20, 3 }
   0x5   : > { %p189_p2 = pnand %p7519_p0, %p188_p1 }
   0x7   : > { %192 = sbr.rel (%p189_p2) target bundleno = 2540 (0x9ec), region = 40 }
   0xe   : > { %v8680_v0 = vld [vmem:[%s13486_s1] sm:$0xff]   ;;  %v13491_v1 = vmov 0   ;;  %p216_p3 = scmp.lt.s32.totalorder %s7515_s21, 1  ;;  %v8681_v2 = vld [vmem:[%s13486_s1 + $0x8] sm:$0xff]   ;;  %v8682_v3 = vld [vmem:[%s13486_s1 + $0x10] sm:$0xff]   ;;  %s7385_s13 = sld [smem:[#allocation4]] }
   0xf   : > { %1918 = vmatprep.subr.bf16.mxu0 %v13491_v1  ;;  %v8683_v4 = vld [vmem:[%s13486_s1 + $0x18] sm:$0xff]   ;;  %v8684_v5 = vld [vmem:[%s13486_s1 + $0x20] sm:$0xff]   ;;  %v8685_v9 = vld [vmem:[%s13486_s1 + $0x28] sm:$0xff]  }
  0x10   : > { %1919 = vmatpush1.bf16.msra.mxu0 %v8680_v0  ;;  %s14132_s21 = smov (!%p216_p3, %s7515_s21), 1  ;;  %v8686_v10 = vld [vmem:[%s13486_s1 + $0x30] sm:$0xff]   ;;  %v8687_v11 = vld [vmem:[%s13486_s1 + $0x38] sm:$0xff]   ;;  %v8688_v12 = vld [vmem:[%s13486_s1 + $0x40] sm:$0xff]  }
  0x11   : > { %1920 = vmatprep.subr.bf16.mxu0 %v13491_v1  ;;  %s8596_s27 = smul.u32 328, %s14132_s21  ;;  %v8689_v13 = vld [vmem:[%s13486_s1 + $0x48] sm:$0xff]   ;;  %v8690_v14 = vld [vmem:[%s13486_s1 + $0x50] sm:$0xff]   ;;  %v8691_v15 = vld [vmem:[%s13486_s1 + $0x58] sm:$0xff]  }
  0x12   : > { %v8692_v16 = vld [vmem:[%s13486_s1 + $0x60] sm:$0xff]   ;;  %v8693_v17 = vld [vmem:[%s13486_s1 + $0x68] sm:$0xff]   ;;  %v8694_v18 = vld [vmem:[%s13486_s1 + $0x70] sm:$0xff]   ;;  %s8597_s14 = smul.u32 288, %s14132_s21 }
  0x13   : > { %s8991_s7 = scalar_lea.vmem %s13485_s0, %s8596_s27  ;;  %v8695_v19 = vld [vmem:[%s13486_s1 + $0x78] sm:$0xff]   ;;  %v8696_v24 = vld [vmem:[%s13486_s1 + $0x80] sm:$0xff]   ;;  %v8697_v29 = vld [vmem:[%s13486_s1 + $0x88] sm:$0xff]  }
  0x14   : > { %1921 = vmatpush1.bf16.msra.mxu0 %v8681_v2  ;;  %v1012_v6 = vld [vmem:[%s8991_s7 + $0x1] sm:$0xff]  ;;  %v1013_v7 = vld [vmem:[%s8991_s7 + $0x9] sm:$0xff]  ;;  %v1014_v22 = vld [vmem:[%s8991_s7 + $0x11] sm:$0xff]  ;;  %s13309_s17 = scalar_lea.vmem %s13490_s5, %s8597_s14 }
  0x15   : > { %1922 = vmatprep.subr.bf16.mxu0 %v13491_v1  ;;  %v1048_v8 = vpack.c.bf16 %v1013_v7, %v1012_v6  ;;  %v958_v20 = vld [vmem:[%s8991_s7] sm:$0xff]  ;;  %v959_v21 = vld [vmem:[%s8991_s7 + $0x8] sm:$0xff]  ;;  %v960_v27 = vld [vmem:[%s8991_s7 + $0x10] sm:$0xff] }
  0x16   : > { %v1015_v23 = vld [vmem:[%s8991_s7 + $0x19] sm:$0xff]  ;;  %v994_v25 = vpack.c.bf16 %v959_v21, %v958_v20  ;;  %v1016_v30 = vld [vmem:[%s8991_s7 + $0x21] sm:$0xff]  ;;  %v1017_v31 = vld [vmem:[%s8991_s7 + $0x29] sm:$0xff] }
  0x17   : > { %1950 = vmatprep.mubr.bf16.mxu0 %v1048_v8  ;;  %v1049_v26 = vpack.c.bf16 %v1015_v23, %v1014_v22  ;;  %v961_v28 = vld [vmem:[%s8991_s7 + $0x18] sm:$0xff]  ;;  %v8698_v32 = vld [vmem:[%s13486_s1 + $0x90] sm:$0xff]   ;;  %v1050_v34 = vpack.c.bf16 %v1017_v31, %v1016_v30  ;;  %v962_v35 = vld [vmem:[%s8991_s7 + $0x20] sm:$0xff] }
  0x18   : > { %1923 = vmatpush1.bf16.msra.mxu0 %v8682_v3  ;;  %v995_v33 = vpack.c.bf16 %v961_v28, %v960_v27  ;;  %v963_v36 = vld [vmem:[%s8991_s7 + $0x28] sm:$0xff]  ;;  %v1018_v37 = vld [vmem:[%s8991_s7 + $0x31] sm:$0xff]  ;;  %v1019_v38 = vld [vmem:[%s8991_s7 + $0x39] sm:$0xff] }
  0x19   : > { %1924 = vmatprep.subr.bf16.mxu0 %v13491_v1  ;;  %v8699_v39 = vld [vmem:[%s13486_s1 + $0x98] sm:$0xff]   ;;  %v8700_v40 = vld [vmem:[%s13486_s1 + $0xa0] sm:$0xff]   ;;  %v996_v41 = vpack.c.bf16 %v963_v36, %v962_v35  ;;  %v1051_v42 = vpack.c.bf16 %v1019_v38, %v1018_v37  ;;  %v964_v43 = vld [vmem:[%s8991_s7 + $0x30] sm:$0xff] }
  0x1a   : > { %v965_v44 = vld [vmem:[%s8991_s7 + $0x38] sm:$0xff]  ;;  %v1020_v45 = vld [vmem:[%s8991_s7 + $0x41] sm:$0xff]  ;;  %v1021_v46 = vld [vmem:[%s8991_s7 + $0x49] sm:$0xff] }
  0x1b   : > { %v8701_v47 = vld [vmem:[%s13486_s1 + $0xa8] sm:$0xff]   ;;  %v8702_v48 = vld [vmem:[%s13486_s1 + $0xb0] sm:$0xff]   ;;  %v997_v49 = vpack.c.bf16 %v965_v44, %v964_v43  ;;  %v1052_v50 = vpack.c.bf16 %v1021_v46, %v1020_v45  ;;  %v966_v51 = vld [vmem:[%s8991_s7 + $0x40] sm:$0xff] }
  0x1c   : > { %1925 = vmatpush1.bf16.msra.mxu0 %v8683_v4  ;;  %v967_v52 = vld [vmem:[%s8991_s7 + $0x48] sm:$0xff]  ;;  %v1022_v53 = vld [vmem:[%s8991_s7 + $0x51] sm:$0xff]  ;;  %v1023_v54 = vld [vmem:[%s8991_s7 + $0x59] sm:$0xff] }
  0x1d   : > { %1926 = vmatprep.subr.bf16.mxu0 %v13491_v1  ;;  %v8703_v55 = vld [vmem:[%s13486_s1 + $0xb8] sm:$0xff]   ;;  %v8704_v56 = vld [vmem:[%s13486_s1 + $0xc0] sm:$0xff]   ;;  %v998_v57 = vpack.c.bf16 %v967_v52, %v966_v51  ;;  %v1053_v58 = vpack.c.bf16 %v1023_v54, %v1022_v53  ;;  %v968_v59 = vld [vmem:[%s8991_s7 + $0x50] sm:$0xff] }
  0x1e   : > { %v969_v60 = vld [vmem:[%s8991_s7 + $0x58] sm:$0xff]  ;;  %v1024_v61 = vld [vmem:[%s8991_s7 + $0x61] sm:$0xff]  ;;  %v1025_v62 = vld [vmem:[%s8991_s7 + $0x69] sm:$0xff] }
  0x1f   : > { %v8705_v63 = vld [vmem:[%s13486_s1 + $0xc8] sm:$0xff]   ;;  %v8706_v0 = vld [vmem:[%s13486_s1 + $0xd0] sm:$0xff]   ;;  %v999_v2 = vpack.c.bf16 %v969_v60, %v968_v59  ;;  %v1054_v3 = vpack.c.bf16 %v1025_v62, %v1024_v61  ;;  %v970_v4 = vld [vmem:[%s8991_s7 + $0x60] sm:$0xff] }
  0x20   : > { %1927 = vmatpush1.bf16.msra.mxu0 %v8684_v5  ;;  %v971_v5 = vld [vmem:[%s8991_s7 + $0x68] sm:$0xff]  ;;  %v1026_v6 = vld [vmem:[%s8991_s7 + $0x71] sm:$0xff]  ;;  %v1027_v7 = vld [vmem:[%s8991_s7 + $0x79] sm:$0xff] }
  0x21   : > { %1928 = vmatprep.subr.bf16.mxu0 %v13491_v1  ;;  %v8707_v8 = vld [vmem:[%s13486_s1 + $0xd8] sm:$0xff]   ;;  %v974_v20 = vld [vmem:[%s8991_s7 + $0x80] sm:$0xff]  ;;  %v975_v21 = vld [vmem:[%s8991_s7 + $0x88] sm:$0xff] }
  0x22   : > { %v1030_v22 = vld [vmem:[%s8991_s7 + $0x91] sm:$0xff]  ;;  %v1031_v23 = vld [vmem:[%s8991_s7 + $0x99] sm:$0xff]  ;;  %v1033_v30 = vld [vmem:[%s8991_s7 + $0xa9] sm:$0xff] }
  0x23   : > { %v976_v27 = vld [vmem:[%s8991_s7 + $0x90] sm:$0xff]  ;;  %v977_v28 = vld [vmem:[%s8991_s7 + $0x98] sm:$0xff]  ;;  %v982_v45 = vld [vmem:[%s8991_s7 + $0xc0] sm:$0xff] }
  0x24   : > { %1929 = vmatpush1.bf16.msra.mxu0 %v8685_v9  ;;  %v8708_v9 = vld [vmem:[%s13486_s1 + $0xe0] sm:$0xff]   ;;  %v1003_v31 = vpack.c.bf16 %v977_v28, %v976_v27  ;;  %v1034_v35 = vld [vmem:[%s8991_s7 + $0xb1] sm:$0xff]  ;;  %v983_v46 = vld [vmem:[%s8991_s7 + $0xc8] sm:$0xff] }
  0x25   : > { %1930 = vmatprep.subr.bf16.mxu0 %v13491_v1  ;;  %v1035_v36 = vld [vmem:[%s8991_s7 + $0xb9] sm:$0xff]  ;;  %v984_v51 = vld [vmem:[%s8991_s7 + $0xd0] sm:$0xff]  ;;  %v1040_v53 = vld [vmem:[%s8991_s7 + $0xe1] sm:$0xff] }
  0x26   : > { %v1059_v38 = vpack.c.bf16 %v1035_v36, %v1034_v35  ;;  %v985_v52 = vld [vmem:[%s8991_s7 + $0xd8] sm:$0xff]  ;;  %v1041_v54 = vld [vmem:[%s8991_s7 + $0xe9] sm:$0xff] }
  0x27   : > { %v1042_v59 = vld [vmem:[%s8991_s7 + $0xf1] sm:$0xff]  ;;  %v1043_v60 = vld [vmem:[%s8991_s7 + $0xf9] sm:$0xff]  ;;  %v8717_v35 = vld [vmem:[%s13486_s1 + $0x128] sm:$0xff]  }
  0x28   : > { %1931 = vmatpush1.bf16.msra.mxu0 %v8686_v10  ;;  %v1000_v10 = vpack.c.bf16 %v971_v5, %v970_v4  ;;  %v1063_v62 = vpack.c.bf16 %v1043_v60, %v1042_v59  ;;  %v1073_v27 = vld [vmem:[%s8991_s7 + $0x3a] sm:$0xff]  ;;  %v1076_v36 = vld [vmem:[%s8991_s7 + $0x52] sm:$0xff] }
  0x29   : > { %1932 = vmatprep.subr.bf16.mxu0 %v13491_v1  ;;  %v8726_v59 = vld [vmem:[%s13486_s1 + $0x170] sm:$0xff]   ;;  %v8727_v60 = vld [vmem:[%s13486_s1 + $0x178] sm:$0xff]  }
  0x2c   : > { %1933 = vmatpush1.bf16.msra.mxu0 %v8687_v11  ;;  %v1055_v11 = vpack.c.bf16 %v1027_v7, %v1026_v6  ;;  %v990_v6 = vld [vmem:[%s8991_s7 + $0x100] sm:$0xff]  ;;  %v991_v7 = vld [vmem:[%s8991_s7 + $0x108] sm:$0xff] }
  0x2d   : > { %1934 = vmatprep.subr.bf16.mxu0 %v13491_v1 }
  0x30   : > { %1935 = vmatpush1.bf16.msra.mxu0 %v8688_v12  ;;  %v972_v12 = vld [vmem:[%s8991_s7 + $0x70] sm:$0xff] }
  0x31   : > { %1936 = vmatprep.subr.bf16.mxu0 %v13491_v1 }
  0x34   : > { %1937 = vmatpush1.bf16.msra.mxu0 %v8689_v13  ;;  %v973_v13 = vld [vmem:[%s8991_s7 + $0x78] sm:$0xff] }
  0x35   : > { %1938 = vmatprep.subr.bf16.mxu0 %v13491_v1 }
  0x38   : > { %1939 = vmatpush1.bf16.msra.mxu0 %v8690_v14  ;;  %v1028_v14 = vld [vmem:[%s8991_s7 + $0x81] sm:$0xff] }
  0x39   : > { %1940 = vmatprep.subr.bf16.mxu0 %v13491_v1 }
  0x3c   : > { %1941 = vmatpush1.bf16.msra.mxu0 %v8691_v15  ;;  %v1029_v15 = vld [vmem:[%s8991_s7 + $0x89] sm:$0xff] }
  0x3d   : > { %1942 = vmatprep.subr.bf16.mxu0 %v13491_v1 }
  0x40   : > { %1943 = vmatpush1.bf16.msra.mxu0 %v8692_v16  ;;  %v8709_v16 = vld [vmem:[%s13486_s1 + $0xe8] sm:$0xff]  }
  0x41   : > { %1944 = vmatprep.subr.bf16.mxu0 %v13491_v1 }
  0x44   : > { %1945 = vmatpush1.bf16.msra.mxu0 %v8693_v17  ;;  %v8710_v17 = vld [vmem:[%s13486_s1 + $0xf0] sm:$0xff]  }
  0x45   : > { %1946 = vmatprep.subr.bf16.mxu0 %v13491_v1 }
  0x48   : > { %1947 = vmatpush1.bf16.msra.mxu0 %v8694_v18  ;;  %v1001_v18 = vpack.c.bf16 %v973_v13, %v972_v12  ;;  %v992_v12 = vld [vmem:[%s8991_s7 + $0x110] sm:$0xff]  ;;  %v993_v13 = vld [vmem:[%s8991_s7 + $0x118] sm:$0xff] }
  0x49   : > { %1948 = vmatprep.subr.bf16.mxu0 %v13491_v1 }
  0x4c   : > { %1949 = vmatpush1.bf16.msra.mxu0 %v8695_v19  ;;  %v1056_v19 = vpack.c.bf16 %v1029_v15, %v1028_v14  ;;  %v1068_v14 = vld [vmem:[%s8991_s7 + $0x12] sm:$0xff]  ;;  %v1069_v15 = vld [vmem:[%s8991_s7 + $0x1a] sm:$0xff] }
  0x4d   : > { %2095 = vmatprep.subr.bf16.mxu0 %v13491_v1 }
  0x4f   : > { %1951 = vmatmul.mubr.bf16.vlgmr.msra.gmra.mrb[0].mxu0 %v994_v25  ;;  %v1002_v25 = vpack.c.bf16 %v975_v21, %v974_v20  ;;  %v1070_v20 = vld [vmem:[%s8991_s7 + $0x22] sm:$0xff]  ;;  %v1071_v21 = vld [vmem:[%s8991_s7 + $0x2a] sm:$0xff] }
  0x50   : > { %2096 = vmatpush1.bf16.msra.mxu0 %v8696_v24  ;;  %1958 = vmatprep.mubr.bf16.mxu0 %v1049_v26  ;;  %v8711_v24 = vld [vmem:[%s13486_s1 + $0xf8] sm:$0xff]   ;;  %v1057_v26 = vpack.c.bf16 %v1031_v23, %v1030_v22  ;;  %v8712_v23 = vld [vmem:[%s13486_s1 + $0x100] sm:$0xff]  }
  0x51   : > { %2097 = vmatprep.subr.bf16.mxu0 %v13491_v1 }
  0x54   : > { %2098 = vmatpush1.bf16.msra.mxu0 %v8697_v29  ;;  %v1032_v29 = vld [vmem:[%s8991_s7 + $0xa1] sm:$0xff] }
  0x55   : > { %2099 = vmatprep.subr.bf16.mxu0 %v13491_v1 }
  0x57   : > { %1959 = vmatmul.mubr.bf16.gmra.mrb[4].mxu0 %v995_v33  ;;  %v978_v33 = vld [vmem:[%s8991_s7 + $0xa0] sm:$0xff] }
  0x58   : > { %1966 = vmatprep.mubr.bf16.mxu0 %v1050_v34  ;;  %2100 = vmatpush1.bf16.msra.mxu0 %v8698_v32  ;;  %v1058_v32 = vpack.c.bf16 %v1033_v30, %v1032_v29  ;;  %v979_v34 = vld [vmem:[%s8991_s7 + $0xa8] sm:$0xff]  ;;  %v8714_v29 = vld [vmem:[%s13486_s1 + $0x110] sm:$0xff]   ;;  %v8715_v30 = vld [vmem:[%s13486_s1 + $0x118] sm:$0xff]  }
  0x59   : > { %2101 = vmatprep.subr.bf16.mxu0 %v13491_v1  ;;  %v1004_v37 = vpack.c.bf16 %v979_v34, %v978_v33  ;;  %v8716_v34 = vld [vmem:[%s13486_s1 + $0x120] sm:$0xff]  }
  0x5c   : > { %2102 = vmatpush1.bf16.msra.mxu0 %v8699_v39  ;;  %v980_v39 = vld [vmem:[%s8991_s7 + $0xb0] sm:$0xff] }
  0x5d   : > { %2103 = vmatprep.subr.bf16.mxu0 %v13491_v1 }
  0x5f   : > { %1967 = vmatmul.mubr.bf16.gmra.mrb[8].mxu0 %v996_v41  ;;  %v1036_v41 = vld [vmem:[%s8991_s7 + $0xc1] sm:$0xff] }
  0x60   : > { %1974 = vmatprep.mubr.bf16.mxu0 %v1051_v42  ;;  %2104 = vmatpush1.bf16.msra.mxu0 %v8700_v40  ;;  %v981_v40 = vld [vmem:[%s8991_s7 + $0xb8] sm:$0xff]  ;;  %v1037_v42 = vld [vmem:[%s8991_s7 + $0xc9] sm:$0xff] }
  0x61   : > { %2105 = vmatprep.subr.bf16.mxu0 %v13491_v1  ;;  %v1005_v43 = vpack.c.bf16 %v981_v40, %v980_v39  ;;  %v1060_v44 = vpack.c.bf16 %v1037_v42, %v1036_v41  ;;  %v8718_v39 = vld [vmem:[%s13486_s1 + $0x130] sm:$0xff]   ;;  %v8719_v40 = vld [vmem:[%s13486_s1 + $0x138] sm:$0xff]   ;;  %v1078_v41 = vld [vmem:[%s8991_s7 + $0x62] sm:$0xff] }
  0x62   : > { %v1079_v42 = vld [vmem:[%s8991_s7 + $0x6a] sm:$0xff] }
  0x64   : > { %2106 = vmatpush1.bf16.msra.mxu0 %v8701_v47  ;;  %v1038_v47 = vld [vmem:[%s8991_s7 + $0xd1] sm:$0xff] }
  0x65   : > { %2107 = vmatprep.subr.bf16.mxu0 %v13491_v1 }
  0x67   : > { %1975 = vmatmul.mubr.bf16.gmra.mrb[12].mxu0 %v997_v49  ;;  %v1006_v49 = vpack.c.bf16 %v983_v46, %v982_v45  ;;  %v8721_v45 = vld [vmem:[%s13486_s1 + $0x148] sm:$0xff]   ;;  %v1080_v46 = vld [vmem:[%s8991_s7 + $0x72] sm:$0xff] }
  0x68   : > { %1982 = vmatprep.mubr.bf16.mxu0 %v1052_v50  ;;  %2108 = vmatpush1.bf16.msra.mxu0 %v8702_v48  ;;  %v1039_v48 = vld [vmem:[%s8991_s7 + $0xd9] sm:$0xff] }
  0x69   : > { %2109 = vmatprep.subr.bf16.mxu0 %v13491_v1  ;;  %v1061_v50 = vpack.c.bf16 %v1039_v48, %v1038_v47  ;;  %v1081_v47 = vld [vmem:[%s8991_s7 + $0x7a] sm:$0xff] }
  0x6a   : > { %v1109_v48 = vpack.c.bf16 %v1081_v47, %v1080_v46  ;;  %v1182_v46 = vld [vmem:[%s8991_s7 + $0x3c] sm:$0xff] }
  0x6c   : > { %2110 = vmatpush1.bf16.msra.mxu0 %v8703_v55  ;;  %v1007_v55 = vpack.c.bf16 %v985_v52, %v984_v51  ;;  %v1082_v51 = vld [vmem:[%s8991_s7 + $0x82] sm:$0xff]  ;;  %v1083_v52 = vld [vmem:[%s8991_s7 + $0x8a] sm:$0xff] }
  0x6d   : > { %2111 = vmatprep.subr.bf16.mxu0 %v13491_v1 }
  0x6f   : > { %1983 = vmatmul.mubr.bf16.gmra.mrb[16].mxu0 %v998_v57  ;;  %v986_v57 = vld [vmem:[%s8991_s7 + $0xe0] sm:$0xff] }
  0x70   : > { %1990 = vmatprep.mubr.bf16.mxu0 %v1053_v58  ;;  %2112 = vmatpush1.bf16.msra.mxu0 %v8704_v56  ;;  %v1062_v56 = vpack.c.bf16 %v1041_v54, %v1040_v53  ;;  %v987_v58 = vld [vmem:[%s8991_s7 + $0xe8] sm:$0xff]  ;;  %v1110_v53 = vpack.c.bf16 %v1083_v52, %v1082_v51  ;;  %v8724_v54 = vld [vmem:[%s13486_s1 + $0x160] sm:$0xff]   ;;  %v8751_v52 = vld [vmem:[%s13486_s1 + $0x238] sm:$0xff]  }
  0x71   : > { %2113 = vmatprep.subr.bf16.mxu0 %v13491_v1  ;;  %v1008_v61 = vpack.c.bf16 %v987_v58, %v986_v57  ;;  %v1085_v57 = vld [vmem:[%s8991_s7 + $0x9a] sm:$0xff] }
  0x72   : > { %v1128_v51 = vld [vmem:[%s8991_s7 + $0x3b] sm:$0xff] }
  0x74   : > { %2114 = vmatpush1.bf16.msra.mxu0 %v8705_v63  ;;  %v988_v63 = vld [vmem:[%s8991_s7 + $0xf0] sm:$0xff] }
  0x75   : > { %2115 = vmatprep.subr.bf16.mxu0 %v13491_v1 }
  0x77   : > { %1991 = vmatmul.mubr.bf16.gmra.mrb[20].mxu0 %v999_v2  ;;  %v1044_v2 = vld [vmem:[%s8991_s7 + $0x101] sm:$0xff] }
  0x78   : > { %1998 = vmatprep.mubr.bf16.mxu0 %v1054_v3  ;;  %2116 = vmatpush1.bf16.msra.mxu0 %v8706_v0  ;;  %v989_v0 = vld [vmem:[%s8991_s7 + $0xf8] sm:$0xff]  ;;  %v1045_v3 = vld [vmem:[%s8991_s7 + $0x109] sm:$0xff] }
  0x79   : > { %2117 = vmatprep.subr.bf16.mxu0 %v13491_v1  ;;  %v1009_v4 = vpack.c.bf16 %v989_v0, %v988_v63  ;;  %v1064_v5 = vpack.c.bf16 %v1045_v3, %v1044_v2  ;;  %v1088_v0 = vld [vmem:[%s8991_s7 + $0xb2] sm:$0xff]  ;;  %v1089_v2 = vld [vmem:[%s8991_s7 + $0xba] sm:$0xff] }
  0x7a   : > { %v1113_v3 = vpack.c.bf16 %v1089_v2, %v1088_v0  ;;  %v8732_v0 = vld [vmem:[%s13486_s1 + $0x1a0] sm:$0xff]  }
  0x7b   : > { %v1129_v2 = vld [vmem:[%s8991_s7 + $0x43] sm:$0xff] }
  0x7c   : > { %2118 = vmatpush1.bf16.msra.mxu0 %v8707_v8  ;;  %v1046_v8 = vld [vmem:[%s8991_s7 + $0x111] sm:$0xff] }
  0x7d   : > { %2119 = vmatprep.subr.bf16.mxu0 %v13491_v1 }
  0x7f   : > { %1999 = vmatmul.mubr.bf16.gmra.mrb[24].mxu0 %v1000_v10  ;;  %v1010_v10 = vpack.c.bf16 %v991_v7, %v990_v6  ;;  %v1092_v7 = vld [vmem:[%s8991_s7 + $0xd2] sm:$0xff] }
  0x80   : > { %2006 = vmatprep.mubr.bf16.mxu0 %v1055_v11  ;;  %2120 = vmatpush1.bf16.msra.mxu0 %v8708_v9  ;;  %v1047_v9 = vld [vmem:[%s8991_s7 + $0x119] sm:$0xff] }
  0x81   : > { %2121 = vmatprep.subr.bf16.mxu0 %v13491_v1  ;;  %v1065_v11 = vpack.c.bf16 %v1047_v9, %v1046_v8  ;;  %v1093_v8 = vld [vmem:[%s8991_s7 + $0xda] sm:$0xff] }
  0x82   : > { %v1115_v9 = vpack.c.bf16 %v1093_v8, %v1092_v7 }
  0x84   : > { %2122 = vmatpush1.bf16.msra.mxu0 %v8709_v16  ;;  %v1011_v16 = vpack.c.bf16 %v993_v13, %v992_v12  ;;  %v1096_v13 = vld [vmem:[%s8991_s7 + $0xf2] sm:$0xff] }
  0x85   : > { %2123 = vmatprep.subr.bf16.mxu0 %v13491_v1 }
  0x87   : > { %2007 = vmatmul.mubr.bf16.gmra.mrb[28].mxu0 %v1001_v18  ;;  %v1066_v18 = vld [vmem:[%s8991_s7 + $0x2] sm:$0xff] }
  0x88   : > { %2014 = vmatprep.mubr.bf16.mxu0 %v1056_v19  ;;  %2124 = vmatpush1.bf16.msra.mxu0 %v8710_v17  ;;  %v1103_v17 = vpack.c.bf16 %v1069_v15, %v1068_v14  ;;  %v1067_v19 = vld [vmem:[%s8991_s7 + $0xa] sm:$0xff]  ;;  %v1097_v14 = vld [vmem:[%s8991_s7 + $0xfa] sm:$0xff] }
  0x89   : > { %2125 = vmatprep.subr.bf16.mxu0 %v13491_v1  ;;  %v1102_v22 = vpack.c.bf16 %v1067_v19, %v1066_v18  ;;  %v1117_v15 = vpack.c.bf16 %v1097_v14, %v1096_v13  ;;  %v1100_v19 = vld [vmem:[%s8991_s7 + $0x112] sm:$0xff] }
  0x8a   : > { %v1293_v13 = vld [vmem:[%s8991_s7 + $0x4e] sm:$0xff]  ;;  %v8735_v14 = vld [vmem:[%s13486_s1 + $0x1b8] sm:$0xff]  }
  0x8c   : > { %2126 = vmatpush1.bf16.msra.mxu0 %v8711_v24  ;;  %v1104_v24 = vpack.c.bf16 %v1071_v21, %v1070_v20  ;;  %v1101_v20 = vld [vmem:[%s8991_s7 + $0x11a] sm:$0xff] }
  0x8d   : > { %2272 = vmatprep.subr.bf16.mxu0 %v13491_v1  ;;  %v1119_v21 = vpack.c.bf16 %v1101_v20, %v1100_v19  ;;  %v1188_v19 = vld [vmem:[%s8991_s7 + $0x6c] sm:$0xff] }
  0x8f   : > { %2015 = vmatmul.mubr.bf16.gmra.mrb[32].mxu0 %v1002_v25  ;;  %v8713_v25 = vld [vmem:[%s13486_s1 + $0x108] sm:$0xff]  }
  0x90   : > { %2022 = vmatprep.mubr.bf16.mxu0 %v1057_v26  ;;  %v1072_v26 = vld [vmem:[%s8991_s7 + $0x32] sm:$0xff] }
  0x91   : > { %v1105_v28 = vpack.c.bf16 %v1073_v27, %v1072_v26  ;;  %v8742_v26 = vld [vmem:[%s13486_s1 + $0x208] sm:$0xff]   ;;  %v8744_v27 = vld [vmem:[%s13486_s1 + $0x210] sm:$0xff]  }
  0x97   : > { %2023 = vmatmul.mubr.bf16.gmra.mrb[36].mxu0 %v1003_v31  ;;  %v1074_v31 = vld [vmem:[%s8991_s7 + $0x42] sm:$0xff] }
  0x98   : > { %2030 = vmatprep.mubr.bf16.mxu0 %v1058_v32  ;;  %v1075_v32 = vld [vmem:[%s8991_s7 + $0x4a] sm:$0xff] }
  0x99   : > { %v1106_v33 = vpack.c.bf16 %v1075_v32, %v1074_v31  ;;  %v8745_v31 = vld [vmem:[%s13486_s1 + $0x218] sm:$0xff]  }
  0x9a   : > { %v1123_v32 = vld [vmem:[%s8991_s7 + $0x13] sm:$0xff] }
  0x9f   : > { %2031 = vmatmul.mubr.bf16.gmra.mrb[40].mxu0 %v1004_v37  ;;  %v1077_v37 = vld [vmem:[%s8991_s7 + $0x5a] sm:$0xff] }
  0xa0   : > { %2038 = vmatprep.mubr.bf16.mxu0 %v1059_v38  ;;  %v1107_v38 = vpack.c.bf16 %v1077_v37, %v1076_v36  ;;  %v1180_v36 = vld [vmem:[%s8991_s7 + $0x2c] sm:$0xff] }
  0xa7   : > { %2039 = vmatmul.mubr.bf16.gmra.mrb[44].mxu0 %v1005_v43  ;;  %v1108_v43 = vpack.c.bf16 %v1079_v42, %v1078_v41  ;;  %v8748_v41 = vld [vmem:[%s13486_s1 + $0x228] sm:$0xff]  }
  0xa8   : > { %2046 = vmatprep.mubr.bf16.mxu0 %v1060_v44  ;;  %v8720_v44 = vld [vmem:[%s13486_s1 + $0x140] sm:$0xff]   ;;  %v1126_v42 = vld [vmem:[%s8991_s7 + $0x2b] sm:$0xff] }
  0xaf   : > { %2047 = vmatmul.mubr.bf16.gmra.mrb[48].mxu0 %v1006_v49  ;;  %v8722_v49 = vld [vmem:[%s13486_s1 + $0x150] sm:$0xff]  }
  0xb0   : > { %2054 = vmatprep.mubr.bf16.mxu0 %v1061_v50  ;;  %v8723_v50 = vld [vmem:[%s13486_s1 + $0x158] sm:$0xff]  }
  0xb7   : > { %2055 = vmatmul.mubr.bf16.gmra.mrb[52].mxu0 %v1007_v55  ;;  %v8725_v55 = vld [vmem:[%s13486_s1 + $0x168] sm:$0xff]  }
  0xb8   : > { %2062 = vmatprep.mubr.bf16.mxu0 %v1062_v56  ;;  %v1084_v56 = vld [vmem:[%s8991_s7 + $0x92] sm:$0xff] }
  0xb9   : > { %v1111_v58 = vpack.c.bf16 %v1085_v57, %v1084_v56  ;;  %v1289_v56 = vld [vmem:[%s8991_s7 + $0x2e] sm:$0xff] }
  0xba   : > { %v1184_v57 = vld [vmem:[%s8991_s7 + $0x4c] sm:$0xff] }
  0xbf   : > { %2063 = vmatmul.mubr.bf16.gmra.mrb[56].mxu0 %v1008_v61  ;;  %v1086_v61 = vld [vmem:[%s8991_s7 + $0xa2] sm:$0xff] }
  0xc0   : > { %2070 = vmatprep.mubr.bf16.mxu0 %v1063_v62  ;;  %v1087_v62 = vld [vmem:[%s8991_s7 + $0xaa] sm:$0xff] }
  0xc1   : > { %v1112_v63 = vpack.c.bf16 %v1087_v62, %v1086_v61 }
  0xc7   : > { %2071 = vmatmul.mubr.bf16.gmra.mrb[60].mxu0 %v1009_v4  ;;  %v1090_v4 = vld [vmem:[%s8991_s7 + $0xc2] sm:$0xff] }
  0xc8   : > { %2078 = vmatprep.mubr.bf16.mxu0 %v1064_v5  ;;  %v1091_v5 = vld [vmem:[%s8991_s7 + $0xca] sm:$0xff] }
  0xc9   : > { %v1114_v6 = vpack.c.bf16 %v1091_v5, %v1090_v4  ;;  %v8733_v4 = vld [vmem:[%s13486_s1 + $0x1a8] sm:$0xff]   ;;  %v1185_v5 = vld [vmem:[%s8991_s7 + $0x54] sm:$0xff] }
  0xcf   : > { %2079 = vmatmul.mubr.bf16.gmra.mrb[64].mxu0 %v1010_v10  ;;  %v1094_v10 = vld [vmem:[%s8991_s7 + $0xe2] sm:$0xff] }
  0xd0   : > { %2086 = vmatprep.mubr.bf16.mxu0 %v1065_v11  ;;  %v1095_v11 = vld [vmem:[%s8991_s7 + $0xea] sm:$0xff] }
  0xd1   : > { %v1116_v12 = vpack.c.bf16 %v1095_v11, %v1094_v10  ;;  %v1131_v10 = vld [vmem:[%s8991_s7 + $0x53] sm:$0xff]  ;;  %v1132_v11 = vld [vmem:[%s8991_s7 + $0x5b] sm:$0xff] }
  0xd7   : > { %2087 = vmatmul.mubr.bf16.gmra.mrb[68].mxu0 %v1011_v16  ;;  %v1098_v16 = vld [vmem:[%s8991_s7 + $0x102] sm:$0xff] }
  0xd8   : > { %2127 = vmatprep.mubr.bf16.mxu0 %v1103_v17 }
  0xdf   : > { %2128 = vmatmul.mubr.bf16.vlgmr.msra.gmra.mrb[0].mxu0 %v1102_v22  ;;  %v8741_v22 = vld [vmem:[%s13486_s1 + $0x200] sm:$0xff]  }
  0xe0   : > { %2273 = vmatpush1.bf16.msra.mxu0 %v8712_v23  ;;  %2135 = vmatprep.mubr.bf16.mxu0 %v1104_v24  ;;  %v1120_v23 = vld [vmem:[%s8991_s7 + $0x122] sm:$0xff] }
  0xe1   : > { %2274 = vmatprep.subr.bf16.mxu0 %v13491_v1  ;;  %7818 = vmatprep.subr.bf16.mxu1 %v8741_v22 }
  0xe2   : > { %7819 = vmatpush3.bf16.msra.mxu1 %v8741_v22 }
  0xe3   : > { %7820 = vmatprep.subr.bf16.mxu1 %v8742_v26 }
  0xe4   : > { %2275 = vmatpush1.bf16.msra.mxu0 %v8713_v25 }
  0xe5   : > { %2276 = vmatprep.subr.bf16.mxu0 %v13491_v1 }
  0xe6   : > { %7821 = vmatpush3.bf16.msra.mxu1 %v8742_v26  ;;  %v8737_v26 = vld [vmem:[%s13486_s1 + $0x1c8] sm:$0xff]  }
  0xe7   : > { %2136 = vmatmul.mubr.bf16.gmra.mrb[4].mxu0 %v1103_v17  ;;  %v1099_v17 = vld [vmem:[%s8991_s7 + $0x10a] sm:$0xff]  ;;  %7822 = vmatprep.subr.bf16.mxu1 %v8744_v27 }
  0xe8   : > { %2143 = vmatprep.mubr.bf16.mxu0 %v1105_v28  ;;  %2277 = vmatpush1.bf16.msra.mxu0 %v8714_v29  ;;  %v1118_v18 = vpack.c.bf16 %v1099_v17, %v1098_v16  ;;  %v1178_v29 = vld [vmem:[%s8991_s7 + $0x1c] sm:$0xff] }
  0xe9   : > { %2278 = vmatprep.subr.bf16.mxu0 %v13491_v1  ;;  %v1294_v16 = vld [vmem:[%s8991_s7 + $0x56] sm:$0xff]  ;;  %v1295_v17 = vld [vmem:[%s8991_s7 + $0x5e] sm:$0xff] }
  0xea   : > { %7823 = vmatpush3.bf16.msra.mxu1 %v8744_v27  ;;  %v1327_v20 = vpack.c.bf16 %v1295_v17, %v1294_v16  ;;  %v1189_v27 = vld [vmem:[%s8991_s7 + $0x74] sm:$0xff] }
  0xeb   : > { %7824 = vmatprep.subr.bf16.mxu1 %v8745_v31  ;;  %v1305_v16 = vld [vmem:[%s8991_s7 + $0xae] sm:$0xff]  ;;  %v1144_v17 = vld [vmem:[%s8991_s7 + $0xbb] sm:$0xff] }
  0xec   : > { %2279 = vmatpush1.bf16.msra.mxu0 %v8715_v30 }
  0xed   : > { %2280 = vmatprep.subr.bf16.mxu0 %v13491_v1 }
  0xee   : > { %7825 = vmatpush3.bf16.msra.mxu1 %v8745_v31  ;;  %v8738_v31 = vld [vmem:[%s13486_s1 + $0x1d0] sm:$0xff]  }
  0xef   : > { %2144 = vmatmul.mubr.bf16.gmra.mrb[8].mxu0 %v1104_v24  ;;  %v1121_v24 = vld [vmem:[%s8991_s7 + $0x12a] sm:$0xff] }
  0xf0   : > { %2151 = vmatprep.mubr.bf16.mxu0 %v1106_v33  ;;  %2281 = vmatpush1.bf16.msra.mxu0 %v8716_v34  ;;  %v1122_v25 = vpack.c.bf16 %v1121_v24, %v1120_v23  ;;  %v8747_v34 = vld [vmem:[%s13486_s1 + $0x220] sm:$0xff]  }
  0xf1   : > { %2282 = vmatprep.subr.bf16.mxu0 %v13491_v1  ;;  %7826 = vmatprep.subr.bf16.mxu1 %v8747_v34  ;;  %v8736_v23 = vld [vmem:[%s13486_s1 + $0x1c0] sm:$0xff]  }
  0xf2   : > { %7827 = vmatpush3.bf16.msra.mxu1 %v8747_v34  ;;  %v1133_v24 = vld [vmem:[%s8991_s7 + $0x63] sm:$0xff] }
  0xf3   : > { %7828 = vmatprep.subr.bf16.mxu1 %v8748_v41  ;;  %v1296_v34 = vld [vmem:[%s8991_s7 + $0x66] sm:$0xff] }
  0xf4   : > { %2283 = vmatpush1.bf16.msra.mxu0 %v8717_v35  ;;  %v1179_v35 = vld [vmem:[%s8991_s7 + $0x24] sm:$0xff] }
  0xf5   : > { %2284 = vmatprep.subr.bf16.mxu0 %v13491_v1 }
  0xf6   : > { %7829 = vmatpush3.bf16.msra.mxu1 %v8748_v41  ;;  %v1191_v41 = vld [vmem:[%s8991_s7 + $0x84] sm:$0xff] }
  0xf7   : > { %2152 = vmatmul.mubr.bf16.gmra.mrb[12].mxu0 %v1105_v28  ;;  %v1177_v28 = vld [vmem:[%s8991_s7 + $0x14] sm:$0xff] }
  0xf8   : > { %2159 = vmatprep.mubr.bf16.mxu0 %v1107_v38  ;;  %2285 = vmatpush1.bf16.msra.mxu0 %v8718_v39  ;;  %v1213_v30 = vpack.c.bf16 %v1178_v29, %v1177_v28  ;;  %v9304_v39 = vpack.c.bf16 %v1180_v36, %v1179_v35  ;;  %v1190_v28 = vld [vmem:[%s8991_s7 + $0x7c] sm:$0xff]  ;;  %v1297_v35 = vld [vmem:[%s8991_s7 + $0x6e] sm:$0xff] }
  0xf9   : > { %2286 = vmatprep.subr.bf16.mxu0 %v13491_v1  ;;  %v8739_v36 = vld [vmem:[%s13486_s1 + $0x1d8] sm:$0xff]  }
  0xfc   : > { %2287 = vmatpush1.bf16.msra.mxu0 %v8719_v40  ;;  %v1125_v40 = vld [vmem:[%s8991_s7 + $0x23] sm:$0xff] }
  0xfd   : > { %2288 = vmatprep.subr.bf16.mxu0 %v13491_v1  ;;  %v1160_v47 = vpack.c.bf16 %v1126_v42, %v1125_v40  ;;  %v1299_v40 = vld [vmem:[%s8991_s7 + $0x7e] sm:$0xff]  ;;  %v1192_v42 = vld [vmem:[%s8991_s7 + $0x8c] sm:$0xff] }
  0xff   : > { %2160 = vmatmul.mubr.bf16.gmra.mrb[16].mxu0 %v1106_v33  ;;  %v1124_v33 = vld [vmem:[%s8991_s7 + $0x1b] sm:$0xff] }
 0x100   : > { %2167 = vmatprep.mubr.bf16.mxu0 %v1108_v43  ;;  %2289 = vmatpush1.bf16.msra.mxu0 %v8720_v44  ;;  %v1159_v37 = vpack.c.bf16 %v1124_v33, %v1123_v32  ;;  %v8749_v44 = vld [vmem:[%s13486_s1 + $0x230] sm:$0xff]   ;;  %v1136_v33 = vld [vmem:[%s8991_s7 + $0x7b] sm:$0xff] }
 0x101   : > { %2290 = vmatprep.subr.bf16.mxu0 %v13491_v1  ;;  %7830 = vmatprep.subr.bf16.mxu1 %v8749_v44  ;;  %v1135_v32 = vld [vmem:[%s8991_s7 + $0x73] sm:$0xff] }
 0x102   : > { %7831 = vmatpush3.bf16.msra.mxu1 %v8749_v44  ;;  %v1165_v44 = vpack.c.bf16 %v1136_v33, %v1135_v32 }
 0x103   : > { %7832 = vmatprep.subr.bf16.mxu1 %v8751_v52 }
 0x104   : > { %2291 = vmatpush1.bf16.msra.mxu0 %v8721_v45  ;;  %v1181_v45 = vld [vmem:[%s8991_s7 + $0x34] sm:$0xff] }
 0x105   : > { %2292 = vmatprep.subr.bf16.mxu0 %v13491_v1 }
 0x106   : > { %7833 = vmatpush3.bf16.msra.mxu1 %v8751_v52  ;;  %v1194_v52 = vld [vmem:[%s8991_s7 + $0x9c] sm:$0xff] }
 0x107   : > { %2168 = vmatmul.mubr.bf16.gmra.mrb[20].mxu0 %v1107_v38  ;;  %v8728_v38 = vld [vmem:[%s13486_s1 + $0x180] sm:$0xff]   ;;  %4422 = vmatprep.subr.bf16.mxu1 %v13491_v1 }
 0x108   : > { %2175 = vmatprep.mubr.bf16.mxu0 %v1109_v48  ;;  %2293 = vmatpush1.bf16.msra.mxu0 %v8722_v49  ;;  %v8730_v49 = vld [vmem:[%s13486_s1 + $0x190] sm:$0xff]  }
 0x109   : > { %2294 = vmatprep.subr.bf16.mxu0 %v13491_v1 }
 0x10c   : > { %2295 = vmatpush1.bf16.msra.mxu0 %v8723_v50  ;;  %v1127_v50 = vld [vmem:[%s8991_s7 + $0x33] sm:$0xff] }
 0x10d   : > { %2296 = vmatprep.subr.bf16.mxu0 %v13491_v1  ;;  %v1161_v62 = vpack.c.bf16 %v1128_v51, %v1127_v50  ;;  %v8743_v50 = vld [vmem:[%s13486_s1 + $0x1e8] sm:$0xff]   ;;  %v1193_v51 = vld [vmem:[%s8991_s7 + $0x94] sm:$0xff] }
 0x10f   : > { %2176 = vmatmul.mubr.bf16.gmra.mrb[24].mxu0 %v1108_v43  ;;  %v8729_v43 = vld [vmem:[%s13486_s1 + $0x188] sm:$0xff]  }
 0x110   : > { %2183 = vmatprep.mubr.bf16.mxu0 %v1110_v53  ;;  %2297 = vmatpush1.bf16.msra.mxu0 %v8724_v54  ;;  %v1183_v54 = vld [vmem:[%s8991_s7 + $0x44] sm:$0xff] }
 0x111   : > { %2298 = vmatprep.subr.bf16.mxu0 %v13491_v1 }
 0x114   : > { %2299 = vmatpush1.bf16.msra.mxu0 %v8725_v55  ;;  %v8731_v55 = vld [vmem:[%s13486_s1 + $0x198] sm:$0xff]  }
 0x115   : > { %2300 = vmatprep.subr.bf16.mxu0 %v13491_v1 }
 0x117   : > { %2184 = vmatmul.mubr.bf16.gmra.mrb[28].mxu0 %v1109_v48  ;;  %v9321_v48 = vpack.c.bf16 %v1182_v46, %v1181_v45  ;;  %v9412_v45 = vpack.c.bf16 %v1192_v42, %v1191_v41  ;;  %v8740_v46 = vld [vmem:[%s13486_s1 + $0x1e0] sm:$0xff]  }
 0x118   : > { %2191 = vmatprep.mubr.bf16.mxu0 %v1111_v58  ;;  %2301 = vmatpush1.bf16.msra.mxu0 %v8726_v59  ;;  %v1290_v59 = vld [vmem:[%s8991_s7 + $0x36] sm:$0xff]  ;;  %v1311_v41 = vld [vmem:[%s8991_s7 + $0xde] sm:$0xff] }
 0x119   : > { %2302 = vmatprep.subr.bf16.mxu0 %v13491_v1  ;;  %v1203_v42 = vld [vmem:[%s8991_s7 + $0xe4] sm:$0xff] }
 0x11c   : > { %2303 = vmatpush1.bf16.msra.mxu0 %v8727_v60  ;;  %v1291_v60 = vld [vmem:[%s8991_s7 + $0x3e] sm:$0xff] }
 0x11d   : > { %2449 = vmatprep.subr.bf16.mxu0 %v13491_v1  ;;  %v1325_v61 = vpack.c.bf16 %v1291_v60, %v1290_v59  ;;  %v1301_v59 = vld [vmem:[%s8991_s7 + $0x8e] sm:$0xff]  ;;  %v8750_v60 = vld [vmem:[%s13486_s1 + $0x1f8] sm:$0xff]  }
 0x11f   : > { %2192 = vmatmul.mubr.bf16.gmra.mrb[32].mxu0 %v1110_v53  ;;  %v1288_v53 = vld [vmem:[%s8991_s7 + $0x26] sm:$0xff] }
 0x120   : > { %2199 = vmatprep.mubr.bf16.mxu0 %v1112_v63 }
 0x127   : > { %2200 = vmatmul.mubr.bf16.gmra.mrb[36].mxu0 %v1111_v58  ;;  %v1324_v58 = vpack.c.bf16 %v1289_v56, %v1288_v53  ;;  %v1139_v56 = vld [vmem:[%s8991_s7 + $0x93] sm:$0xff] }
 0x128   : > { %2207 = vmatprep.mubr.bf16.mxu0 %v1113_v3 }
 0x129   : > { %7834 = vmatprep.mubr.bf16.mxu1 %v1324_v58  ;;  %v1300_v58 = vld [vmem:[%s8991_s7 + $0x86] sm:$0xff] }
 0x12a   : > { %7835 = vmatmul.mubr.bf16.vlgmr.msra.gmra.mrb[0].mxu1 %v1325_v61  ;;  %v1330_v61 = vpack.c.bf16 %v1301_v59, %v1300_v58  ;;  %v1313_v58 = vld [vmem:[%s8991_s7 + $0xee] sm:$0xff]  ;;  %v1152_v59 = vld [vmem:[%s8991_s7 + $0xfb] sm:$0xff] }
 0x12f   : > { %2208 = vmatmul.mubr.bf16.gmra.mrb[40].mxu0 %v1112_v63  ;;  %v9344_v63 = vpack.c.bf16 %v1184_v57, %v1183_v54  ;;  %v9427_v54 = vpack.c.bf16 %v1194_v52, %v1193_v51  ;;  %v1140_v57 = vld [vmem:[%s8991_s7 + $0x9b] sm:$0xff] }
 0x130   : > { %2215 = vmatprep.mubr.bf16.mxu0 %v1114_v6  ;;  %v1205_v51 = vld [vmem:[%s8991_s7 + $0xf4] sm:$0xff]  ;;  %v1206_v52 = vld [vmem:[%s8991_s7 + $0xfc] sm:$0xff] }
 0x137   : > { %2216 = vmatmul.mubr.bf16.gmra.mrb[44].mxu0 %v1113_v3  ;;  %v1130_v3 = vld [vmem:[%s8991_s7 + $0x4b] sm:$0xff] }
 0x138   : > { %2223 = vmatprep.mubr.bf16.mxu0 %v1115_v9  ;;  %v1162_v7 = vpack.c.bf16 %v1130_v3, %v1129_v2  ;;  %v1195_v2 = vld [vmem:[%s8991_s7 + $0xa4] sm:$0xff]  ;;  %v1196_v3 = vld [vmem:[%s8991_s7 + $0xac] sm:$0xff] }
 0x13f   : > { %2224 = vmatmul.mubr.bf16.gmra.mrb[48].mxu0 %v1114_v6  ;;  %v1186_v6 = vld [vmem:[%s8991_s7 + $0x5c] sm:$0xff] }
 0x140   : > { %2231 = vmatprep.mubr.bf16.mxu0 %v1116_v12  ;;  %v9359_v8 = vpack.c.bf16 %v1186_v6, %v1185_v5  ;;  %v1167_v5 = vpack.c.bf16 %v1140_v57, %v1139_v56  ;;  %v9446_v6 = vpack.c.bf16 %v1196_v3, %v1195_v2  ;;  %v1151_v56 = vld [vmem:[%s8991_s7 + $0xf3] sm:$0xff]  ;;  %v1312_v57 = vld [vmem:[%s8991_s7 + $0xe6] sm:$0xff] }
 0x141   : > { %v1208_v2 = vld [vmem:[%s8991_s7 + $0x10c] sm:$0xff] }
 0x147   : > { %2232 = vmatmul.mubr.bf16.gmra.mrb[52].mxu0 %v1115_v9  ;;  %v8734_v9 = vld [vmem:[%s13486_s1 + $0x1b0] sm:$0xff]  }
 0x148   : > { %2239 = vmatprep.mubr.bf16.mxu0 %v1117_v15 }
 0x14f   : > { %2240 = vmatmul.mubr.bf16.gmra.mrb[56].mxu0 %v1116_v12  ;;  %v1292_v12 = vld [vmem:[%s8991_s7 + $0x46] sm:$0xff] }
 0x150   : > { %2247 = vmatprep.mubr.bf16.mxu0 %v1118_v18 }
 0x157   : > { %2248 = vmatmul.mubr.bf16.gmra.mrb[60].mxu0 %v1117_v15  ;;  %v1326_v15 = vpack.c.bf16 %v1293_v13, %v1292_v12 }
 0x158   : > { %2255 = vmatprep.mubr.bf16.mxu0 %v1119_v21 }
 0x159   : > { %7838 = vmatprep.mubr.bf16.mxu1 %v1326_v15  ;;  %v1304_v15 = vld [vmem:[%s8991_s7 + $0xa6] sm:$0xff] }
 0x15a   : > { %7839 = vmatmul.mubr.bf16.gmra.mrb[4].mxu1 %v1327_v20  ;;  %v1307_v20 = vld [vmem:[%s8991_s7 + $0xbe] sm:$0xff] }
 0x15f   : > { %2256 = vmatmul.mubr.bf16.gmra.mrb[64].mxu0 %v1118_v18  ;;  %v1187_v18 = vld [vmem:[%s8991_s7 + $0x64] sm:$0xff] }
 0x160   : > { %2263 = vmatprep.mubr.bf16.mxu0 %v1122_v25  ;;  %v9378_v22 = vpack.c.bf16 %v1188_v19, %v1187_v18  ;;  %v1134_v25 = vld [vmem:[%s8991_s7 + $0x6b] sm:$0xff]  ;;  %v1332_v18 = vpack.c.bf16 %v1305_v16, %v1304_v15  ;;  %v1306_v19 = vld [vmem:[%s8991_s7 + $0xb6] sm:$0xff] }
 0x161   : > { %v1164_v29 = vpack.c.bf16 %v1134_v25, %v1133_v24  ;;  %v1333_v24 = vpack.c.bf16 %v1307_v20, %v1306_v19  ;;  %v1155_v15 = vld [vmem:[%s8991_s7 + $0x113] sm:$0xff]  ;;  %v1316_v16 = vld [vmem:[%s8991_s7 + $0x106] sm:$0xff] }
 0x162   : > { %v1318_v20 = vld [vmem:[%s8991_s7 + $0x116] sm:$0xff] }
 0x167   : > { %2264 = vmatmul.mubr.bf16.gmra.mrb[68].mxu0 %v1119_v21  ;;  %v1163_v21 = vpack.c.bf16 %v1132_v11, %v1131_v10  ;;  %v1197_v10 = vld [vmem:[%s8991_s7 + $0xb4] sm:$0xff]  ;;  %v1198_v11 = vld [vmem:[%s8991_s7 + $0xbc] sm:$0xff] }
 0x168   : > { %2304 = vmatprep.mubr.bf16.mxu0 %v1213_v30  ;;  %v9393_v30 = vpack.c.bf16 %v1190_v28, %v1189_v27  ;;  %v9454_v13 = vpack.c.bf16 %v1198_v11, %v1197_v10  ;;  %v1145_v27 = vld [vmem:[%s8991_s7 + $0xc3] sm:$0xff]  ;;  %v1146_v28 = vld [vmem:[%s8991_s7 + $0xcb] sm:$0xff]  ;;  %v1209_v10 = vld [vmem:[%s8991_s7 + $0x114] sm:$0xff] }
 0x169   : > { %v1170_v32 = vpack.c.bf16 %v1146_v28, %v1145_v27  ;;  %v1210_v11 = vld [vmem:[%s8991_s7 + $0x11c] sm:$0xff] }
 0x16f   : > { %2305 = vmatmul.mubr.bf16.vlgmr.msra.gmra.mrb[0].mxu0 %v1159_v37  ;;  %v1328_v37 = vpack.c.bf16 %v1297_v35, %v1296_v34  ;;  %v1147_v34 = vld [vmem:[%s8991_s7 + $0xd3] sm:$0xff]  ;;  %v1308_v35 = vld [vmem:[%s8991_s7 + $0xc6] sm:$0xff] }
 0x170   : > { %2450 = vmatpush1.bf16.msra.mxu0 %v8728_v38  ;;  %2312 = vmatprep.mubr.bf16.mxu0 %v9304_v39  ;;  %v1298_v38 = vld [vmem:[%s8991_s7 + $0x76] sm:$0xff] }
 0x171   : > { %2451 = vmatprep.subr.bf16.mxu0 %v13491_v1  ;;  %7842 = vmatprep.mubr.bf16.mxu1 %v1328_v37  ;;  %v1148_v37 = vld [vmem:[%s8991_s7 + $0xdb] sm:$0xff] }
 0x174   : > { %2452 = vmatpush1.bf16.msra.mxu0 %v8729_v43  ;;  %v1329_v43 = vpack.c.bf16 %v1299_v40, %v1298_v38  ;;  %v1310_v40 = vld [vmem:[%s8991_s7 + $0xd6] sm:$0xff] }
 0x175   : > { %2453 = vmatprep.subr.bf16.mxu0 %v13491_v1 }
 0x176   : > { %7843 = vmatmul.mubr.bf16.gmra.mrb[8].mxu1 %v1329_v43  ;;  %v1204_v43 = vld [vmem:[%s8991_s7 + $0xec] sm:$0xff] }
 0x177   : > { %2313 = vmatmul.mubr.bf16.gmra.mrb[4].mxu0 %v1160_v47  ;;  %v1137_v47 = vld [vmem:[%s8991_s7 + $0x83] sm:$0xff]  ;;  %7846 = vmatprep.mubr.bf16.mxu1 %v1330_v61  ;;  %v1314_v61 = vld [vmem:[%s8991_s7 + $0xf6] sm:$0xff] }
 0x178   : > { %2320 = vmatprep.mubr.bf16.mxu0 %v9321_v48  ;;  %2454 = vmatpush1.bf16.msra.mxu0 %v8730_v49  ;;  %v1138_v49 = vld [vmem:[%s8991_s7 + $0x8b] sm:$0xff] }
 0x179   : > { %2455 = vmatprep.subr.bf16.mxu0 %v13491_v1  ;;  %v1166_v53 = vpack.c.bf16 %v1138_v49, %v1137_v47  ;;  %v9483_v47 = vpack.c.bf16 %v1204_v43, %v1203_v42  ;;  %v1149_v49 = vld [vmem:[%s8991_s7 + $0xe3] sm:$0xff]  ;;  %v1236_v43 = vld [vmem:[%s8991_s7 + $0x35] sm:$0xff] }
 0x17a   : > { %v1323_v42 = vld [vmem:[%s8991_s7 + $0x13e] sm:$0xff] }
 0x17c   : > { %2456 = vmatpush1.bf16.msra.mxu0 %v8731_v55  ;;  %v8746_v55 = vld [vmem:[%s13486_s1 + $0x1f0] sm:$0xff]  }
 0x17d   : > { %2457 = vmatprep.subr.bf16.mxu0 %v13491_v1 }
 0x17f   : > { %2321 = vmatmul.mubr.bf16.gmra.mrb[8].mxu0 %v1161_v62  ;;  %v1302_v62 = vld [vmem:[%s8991_s7 + $0x96] sm:$0xff] }
 0x180   : > { %2328 = vmatprep.mubr.bf16.mxu0 %v9344_v63  ;;  %2458 = vmatpush1.bf16.msra.mxu0 %v8732_v0  ;;  %v1303_v0 = vld [vmem:[%s8991_s7 + $0x9e] sm:$0xff] }
 0x181   : > { %2459 = vmatprep.subr.bf16.mxu0 %v13491_v1 }
 0x184   : > { %2460 = vmatpush1.bf16.msra.mxu0 %v8733_v4  ;;  %v1331_v4 = vpack.c.bf16 %v1303_v0, %v1302_v62  ;;  %v1315_v62 = vld [vmem:[%s8991_s7 + $0xfe] sm:$0xff] }
 0x185   : > { %2461 = vmatprep.subr.bf16.mxu0 %v13491_v1  ;;  %v1207_v0 = vld [vmem:[%s8991_s7 + $0x104] sm:$0xff]  ;;  %v1337_v3 = vpack.c.bf16 %v1315_v62, %v1314_v61 }
 0x186   : > { %7847 = vmatmul.mubr.bf16.gmra.mrb[12].mxu1 %v1331_v4  ;;  %v1173_v4 = vpack.c.bf16 %v1152_v59, %v1151_v56  ;;  %v1241_v56 = vld [vmem:[%s8991_s7 + $0x5d] sm:$0xff]  ;;  %v1246_v62 = vld [vmem:[%s8991_s7 + $0x85] sm:$0xff] }
 0x187   : > { %2329 = vmatmul.mubr.bf16.gmra.mrb[12].mxu0 %v1162_v7  ;;  %v1141_v7 = vld [vmem:[%s8991_s7 + $0xa3] sm:$0xff]  ;;  %7850 = vmatprep.mubr.bf16.mxu1 %v1332_v18  ;;  %v1156_v18 = vld [vmem:[%s8991_s7 + $0x11b] sm:$0xff] }
 0x188   : > { %2336 = vmatprep.mubr.bf16.mxu0 %v9359_v8  ;;  %2462 = vmatpush1.bf16.msra.mxu0 %v8734_v9  ;;  %v1142_v9 = vld [vmem:[%s8991_s7 + $0xab] sm:$0xff]  ;;  %v1175_v27 = vpack.c.bf16 %v1156_v18, %v1155_v15  ;;  %v1256_v15 = vld [vmem:[%s8991_s7 + $0xd5] sm:$0xff] }
 0x189   : > { %2463 = vmatprep.subr.bf16.mxu0 %v13491_v1  ;;  %v1168_v12 = vpack.c.bf16 %v1142_v9, %v1141_v7  ;;  %v1153_v7 = vld [vmem:[%s8991_s7 + $0x103] sm:$0xff]  ;;  %v1154_v9 = vld [vmem:[%s8991_s7 + $0x10b] sm:$0xff] }
 0x18a   : > { %v9566_v18 = vld [vmem:[%s8991_s7 + $0xe5] sm:$0xff] }
 0x18c   : > { %2464 = vmatpush1.bf16.msra.mxu0 %v8735_v14  ;;  %v1143_v14 = vld [vmem:[%s8991_s7 + $0xb3] sm:$0xff] }
 0x18d   : > { %2465 = vmatprep.subr.bf16.mxu0 %v13491_v1  ;;  %v1169_v25 = vpack.c.bf16 %v1144_v17, %v1143_v14  ;;  %v9508_v14 = vpack.c.bf16 %v1210_v11, %v1209_v10  ;;  %v1317_v17 = vld [vmem:[%s8991_s7 + $0x10e] sm:$0xff]  ;;  %v1254_v11 = vld [vmem:[%s8991_s7 + $0xc5] sm:$0xff] }
 0x18e   : > { %7851 = vmatmul.mubr.bf16.gmra.mrb[16].mxu1 %v1333_v24  ;;  %v1338_v19 = vpack.c.bf16 %v1317_v17, %v1316_v16  ;;  %v1212_v24 = vld [vmem:[%s8991_s7 + $0x12c] sm:$0xff]  ;;  %v1257_v16 = vld [vmem:[%s8991_s7 + $0xdd] sm:$0xff] }
 0x18f   : > { %2337 = vmatmul.mubr.bf16.gmra.mrb[16].mxu0 %v1163_v21  ;;  %v1199_v21 = vld [vmem:[%s8991_s7 + $0xc4] sm:$0xff]  ;;  %v1281_v17 = vpack.c.bf16 %v1257_v16, %v1256_v15 }
 0x190   : > { %2344 = vmatprep.mubr.bf16.mxu0 %v9378_v22  ;;  %2466 = vmatpush1.bf16.msra.mxu0 %v8736_v23  ;;  %v1200_v23 = vld [vmem:[%s8991_s7 + $0xcc] sm:$0xff] }
 0x191   : > { %2467 = vmatprep.subr.bf16.mxu0 %v13491_v1 }
 0x194   : > { %2468 = vmatpush1.bf16.msra.mxu0 %v8737_v26  ;;  %v9465_v26 = vpack.c.bf16 %v1200_v23, %v1199_v21  ;;  %v1319_v21 = vld [vmem:[%s8991_s7 + $0x11e] sm:$0xff] }
 0x195   : > { %2469 = vmatprep.subr.bf16.mxu0 %v13491_v1  ;;  %v1211_v23 = vld [vmem:[%s8991_s7 + $0x124] sm:$0xff] }
 0x196   : > { %v9519_v28 = vpack.c.bf16 %v1212_v24, %v1211_v23  ;;  %v1260_v23 = vld [vmem:[%s8991_s7 + $0xf5] sm:$0xff]  ;;  %v1261_v24 = vld [vmem:[%s8991_s7 + $0xfd] sm:$0xff] }
 0x197   : > { %2345 = vmatmul.mubr.bf16.gmra.mrb[20].mxu0 %v1164_v29  ;;  %v1201_v29 = vld [vmem:[%s8991_s7 + $0xd4] sm:$0xff] }
 0x198   : > { %2352 = vmatprep.mubr.bf16.mxu0 %v9393_v30  ;;  %2470 = vmatpush1.bf16.msra.mxu0 %v8738_v31  ;;  %v1202_v31 = vld [vmem:[%s8991_s7 + $0xdc] sm:$0xff] }
 0x199   : > { %2471 = vmatprep.subr.bf16.mxu0 %v13491_v1  ;;  %v9472_v33 = vpack.c.bf16 %v1202_v31, %v1201_v29  ;;  %v1157_v29 = vld [vmem:[%s8991_s7 + $0x123] sm:$0xff]  ;;  %v1158_v31 = vld [vmem:[%s8991_s7 + $0x12b] sm:$0xff] }
 0x19c   : > { %2472 = vmatpush1.bf16.msra.mxu0 %v8739_v36  ;;  %v1309_v36 = vld [vmem:[%s8991_s7 + $0xce] sm:$0xff] }
 0x19d   : > { %2473 = vmatprep.subr.bf16.mxu0 %v13491_v1  ;;  %v1334_v38 = vpack.c.bf16 %v1309_v36, %v1308_v35  ;;  %v1176_v35 = vpack.c.bf16 %v1158_v31, %v1157_v29  ;;  %v1262_v29 = vld [vmem:[%s8991_s7 + $0x105] sm:$0xff]  ;;  %v1263_v31 = vld [vmem:[%s8991_s7 + $0x10d] sm:$0xff] }
 0x19f   : > { %2353 = vmatmul.mubr.bf16.gmra.mrb[24].mxu0 %v1165_v44  ;;  %v1335_v44 = vpack.c.bf16 %v1311_v41, %v1310_v40  ;;  %7854 = vmatprep.mubr.bf16.mxu1 %v1334_v38  ;;  %v1321_v38 = vld [vmem:[%s8991_s7 + $0x12e] sm:$0xff]  ;;  %v1322_v41 = vld [vmem:[%s8991_s7 + $0x136] sm:$0xff] }
 0x1a0   : > { %2360 = vmatprep.mubr.bf16.mxu0 %v9412_v45  ;;  %2474 = vmatpush1.bf16.msra.mxu0 %v8740_v46  ;;  %v1171_v46 = vpack.c.bf16 %v1148_v37, %v1147_v34  ;;  %v1235_v34 = vld [vmem:[%s8991_s7 + $0x2d] sm:$0xff] }
 0x1a1   : > { %2475 = vmatprep.subr.bf16.mxu0 %v13491_v1  ;;  %7855 = vmatmul.mubr.bf16.gmra.mrb[20].mxu1 %v1335_v44  ;;  %v1320_v37 = vld [vmem:[%s8991_s7 + $0x126] sm:$0xff]  ;;  %v1237_v44 = vld [vmem:[%s8991_s7 + $0x3d] sm:$0xff] }
 0x1a2   : > { %v1340_v40 = vpack.c.bf16 %v1321_v38, %v1320_v37 }
 0x1a4   : > { %2476 = vmatpush1.bf16.msra.mxu0 %v8743_v50  ;;  %v1150_v50 = vld [vmem:[%s8991_s7 + $0xeb] sm:$0xff] }
 0x1a5   : > { %2477 = vmatprep.subr.bf16.mxu0 %v13491_v1 }
 0x1a7   : > { %2361 = vmatmul.mubr.bf16.gmra.mrb[28].mxu0 %v1166_v53  ;;  %v1172_v53 = vpack.c.bf16 %v1150_v50, %v1149_v49  ;;  %v1271_v49 = vpack.c.bf16 %v1237_v44, %v1236_v43  ;;  %v1238_v50 = vld [vmem:[%s8991_s7 + $0x45] sm:$0xff] }
 0x1a8   : > { %2368 = vmatprep.mubr.bf16.mxu0 %v9427_v54  ;;  %2478 = vmatpush1.bf16.msra.mxu0 %v8746_v55  ;;  %v9490_v55 = vpack.c.bf16 %v1206_v52, %v1205_v51  ;;  %v1239_v51 = vld [vmem:[%s8991_s7 + $0x4d] sm:$0xff] }
 0x1a9   : > { %2479 = vmatprep.subr.bf16.mxu0 %v13491_v1  ;;  %v1272_v52 = vpack.c.bf16 %v1239_v51, %v1238_v50  ;;  %v1231_v50 = vld [vmem:[%s8991_s7 + $0x134] sm:$0xff]  ;;  %v1232_v51 = vld [vmem:[%s8991_s7 + $0x13c] sm:$0xff] }
 0x1ac   : > { %2480 = vmatpush1.bf16.msra.mxu0 %v8750_v60  ;;  %v1336_v60 = vpack.c.bf16 %v1313_v58, %v1312_v57  ;;  %v1242_v58 = vld [vmem:[%s8991_s7 + $0x65] sm:$0xff] }
 0x1ad   : > { %4245 = vmatprep.subr.bf16.mxu0 %v13491_v1 }
 0x1ae   : > { %7858 = vmatprep.mubr.bf16.mxu1 %v1336_v60  ;;  %v1244_v60 = vld [vmem:[%s8991_s7 + $0x75] sm:$0xff] }
 0x1af   : > { %2369 = vmatmul.mubr.bf16.gmra.mrb[32].mxu0 %v1167_v5  ;;  %7859 = vmatmul.mubr.bf16.gmra.mrb[24].mxu1 %v1337_v3  ;;  %v9501_v5 = vpack.c.bf16 %v1208_v2, %v1207_v0  ;;  %v1248_v2 = vld [vmem:[%s8991_s7 + $0x95] sm:$0xff] }
 0x1b0   : > { %2376 = vmatprep.mubr.bf16.mxu0 %v9446_v6  ;;  %7862 = vmatprep.mubr.bf16.mxu1 %v1338_v19  ;;  %v9569_v19 = vld [vmem:[%s8991_s7 + $0xed] sm:$0xff] }
 0x1b7   : > { %2377 = vmatmul.mubr.bf16.gmra.mrb[36].mxu0 %v1168_v12  ;;  %v1174_v12 = vpack.c.bf16 %v1154_v9, %v1153_v7  ;;  %v1252_v9 = vld [vmem:[%s8991_s7 + $0xb5] sm:$0xff] }
 0x1b8   : > { %2384 = vmatprep.mubr.bf16.mxu0 %v9454_v13 }
 0x1bf   : > { %2385 = vmatmul.mubr.bf16.gmra.mrb[40].mxu0 %v1169_v25  ;;  %v1339_v25 = vpack.c.bf16 %v1319_v21, %v1318_v20  ;;  %v8927_v20 = vmov 0.0  }
 0x1c0   : > { %2392 = vmatprep.mubr.bf16.mxu0 %v9465_v26  ;;  %229 = vst [vmem:[#allocation2 + $0x10] sm:$0xff] %v8927_v20  ;;  %230 = vst [vmem:[#allocation2 + $0x18] sm:$0xff] %v8927_v20 }
 0x1c1   : > { %7863 = vmatmul.mubr.bf16.gmra.mrb[28].mxu1 %v1339_v25  ;;  %227 = vst [vmem:[#allocation2] sm:$0xff] %v8927_v20  ;;  %228 = vst [vmem:[#allocation2 + $0x8] sm:$0xff] %v8927_v20  ;;  %v1283_v25 = vpack.c.bf16 %v1261_v24, %v1260_v23 }
 0x1c2   : > { %7866 = vmatprep.mubr.bf16.mxu1 %v1340_v40  ;;  %231 = vst [vmem:[#allocation2 + $0x20] sm:$0xff] %v8927_v20  ;;  %232 = vst [vmem:[#allocation2 + $0x28] sm:$0xff] %v8927_v20  ;;  %v1266_v40 = vld [vmem:[%s8991_s7 + $0x125] sm:$0xff] }
 0x1c3   : > { %233 = vst [vmem:[#allocation2 + $0x30] sm:$0xff] %v8927_v20  ;;  %234 = vst [vmem:[#allocation2 + $0x38] sm:$0xff] %v8927_v20 }
 0x1c4   : > { %235 = vst [vmem:[#allocation2 + $0x40] sm:$0xff] %v8927_v20  ;;  %236 = vst [vmem:[#allocation2 + $0x48] sm:$0xff] %v8927_v20 }
 0x1c5   : > { %237 = vst [vmem:[#allocation2 + $0x50] sm:$0xff] %v8927_v20  ;;  %238 = vst [vmem:[#allocation2 + $0x58] sm:$0xff] %v8927_v20 }
 0x1c6   : > { %239 = vst [vmem:[#allocation2 + $0x60] sm:$0xff] %v8927_v20  ;;  %240 = vst [vmem:[#allocation2 + $0x68] sm:$0xff] %v8927_v20 }
 0x1c7   : > { %2393 = vmatmul.mubr.bf16.gmra.mrb[44].mxu0 %v1170_v32  ;;  %v1234_v32 = vld [vmem:[%s8991_s7 + $0x25] sm:$0xff]  ;;  %241 = vst [vmem:[#allocation2 + $0x70] sm:$0xff] %v8927_v20  ;;  %242 = vst [vmem:[#allocation2 + $0x78] sm:$0xff] %v8927_v20 }
 0x1c8   : > { %2400 = vmatprep.mubr.bf16.mxu0 %v9472_v33  ;;  %v1270_v36 = vpack.c.bf16 %v1235_v34, %v1234_v32  ;;  %243 = vst [vmem:[#allocation2 + $0x80] sm:$0xff] %v8927_v20  ;;  %244 = vst [vmem:[#allocation2 + $0x88] sm:$0xff] %v8927_v20 }
 0x1c9   : > { %245 = vst [vmem:[#allocation2 + $0x90] sm:$0xff] %v8927_v20  ;;  %246 = vst [vmem:[#allocation2 + $0x98] sm:$0xff] %v8927_v20 }
 0x1ca   : > { %247 = vst [vmem:[#allocation2 + $0xa0] sm:$0xff] %v8927_v20  ;;  %248 = vst [vmem:[#allocation2 + $0xa8] sm:$0xff] %v8927_v20 }
 0x1cb   : > { %249 = vst [vmem:[#allocation2 + $0xb0] sm:$0xff] %v8927_v20  ;;  %250 = vst [vmem:[#allocation2 + $0xb8] sm:$0xff] %v8927_v20 }
 0x1cc   : > { %251 = vst [vmem:[#allocation2 + $0xc0] sm:$0xff] %v8927_v20  ;;  %252 = vst [vmem:[#allocation2 + $0xc8] sm:$0xff] %v8927_v20 }
 0x1cd   : > { %253 = vst [vmem:[#allocation2 + $0xd0] sm:$0xff] %v8927_v20  ;;  %254 = vst [vmem:[#allocation2 + $0xd8] sm:$0xff] %v8927_v20 }
 0x1ce   : > { %255 = vst [vmem:[#allocation2 + $0xe0] sm:$0xff] %v8927_v20  ;;  %256 = vst [vmem:[#allocation2 + $0xe8] sm:$0xff] %v8927_v20 }
 0x1cf   : > { %2401 = vmatmul.mubr.bf16.gmra.mrb[48].mxu0 %v1171_v46  ;;  %v1341_v46 = vpack.c.bf16 %v1323_v42, %v1322_v41  ;;  %257 = vst [vmem:[#allocation2 + $0xf0] sm:$0xff] %v8927_v20  ;;  %258 = vst [vmem:[#allocation2 + $0xf8] sm:$0xff] %v8927_v20  ;;  %v1267_v41 = vld [vmem:[%s8991_s7 + $0x12d] sm:$0xff] }
 0x1d0   : > { %2408 = vmatprep.mubr.bf16.mxu0 %v9483_v47  ;;  %259 = vst [vmem:[#allocation2 + $0x100] sm:$0xff] %v8927_v20  ;;  %260 = vst [vmem:[#allocation2 + $0x108] sm:$0xff] %v8927_v20 }
 0x1d1   : > { %7867 = vmatmul.mubr.bf16.gmra.mrb[32].mxu1 %v1341_v46  ;;  %261 = vst [vmem:[#allocation2 + $0x110] sm:$0xff] %v8927_v20  ;;  %262 = vst [vmem:[#allocation2 + $0x118] sm:$0xff] %v8927_v20  ;;  %v1268_v46 = vld [vmem:[%s8991_s7 + $0x135] sm:$0xff] }
 0x1d2   : > { %263 = vst [vmem:[#allocation2 + $0x120] sm:$0xff] %v8927_v20  ;;  %264 = vst [vmem:[#allocation2 + $0x128] sm:$0xff] %v8927_v20 }
 0x1d3   : > { %265 = vst [vmem:[#allocation2 + $0x130] sm:$0xff] %v8927_v20  ;;  %266 = vst [vmem:[#allocation2 + $0x138] sm:$0xff] %v8927_v20 }
 0x1d4   : > { %267 = vst [vmem:[#allocation2 + $0x140] sm:$0xff] %v8927_v20  ;;  %268 = vst [vmem:[#allocation3] sm:$0xff] %v8927_v20 }
 0x1d5   : > { %269 = vst [vmem:[#allocation3 + $0x8] sm:$0xff] %v8927_v20  ;;  %270 = vst [vmem:[#allocation3 + $0x10] sm:$0xff] %v8927_v20 }
 0x1d6   : > { %271 = vst [vmem:[#allocation3 + $0x18] sm:$0xff] %v8927_v20  ;;  %272 = vst [vmem:[#allocation3 + $0x20] sm:$0xff] %v8927_v20 }
 0x1d7   : > { %2409 = vmatmul.mubr.bf16.gmra.mrb[52].mxu0 %v1172_v53  ;;  %v1240_v53 = vld [vmem:[%s8991_s7 + $0x55] sm:$0xff]  ;;  %273 = vst [vmem:[#allocation3 + $0x28] sm:$0xff] %v8927_v20  ;;  %274 = vst [vmem:[#allocation3 + $0x30] sm:$0xff] %v8927_v20 }
 0x1d8   : > { %2416 = vmatprep.mubr.bf16.mxu0 %v9490_v55  ;;  %v1273_v57 = vpack.c.bf16 %v1241_v56, %v1240_v53  ;;  %275 = vst [vmem:[#allocation3 + $0x38] sm:$0xff] %v8927_v20  ;;  %276 = vst [vmem:[#allocation3 + $0x40] sm:$0xff] %v8927_v20  ;;  %v1233_v56 = vpack.c.bf16 %v1232_v51, %v1231_v50 }
 0x1d9   : > { %277 = vst [vmem:[#allocation3 + $0x48] sm:$0xff] %v8927_v20  ;;  %278 = vst [vmem:[#allocation3 + $0x50] sm:$0xff] %v8927_v20 }
 0x1da   : > { %279 = vst [vmem:[#allocation3 + $0x58] sm:$0xff] %v8927_v20  ;;  %280 = vst [vmem:[#allocation3 + $0x60] sm:$0xff] %v8927_v20 }
 0x1db   : > { %281 = vst [vmem:[#allocation3 + $0x68] sm:$0xff] %v8927_v20  ;;  %282 = vst [vmem:[#allocation3 + $0x70] sm:$0xff] %v8927_v20 }
 0x1dc   : > { %283 = vst [vmem:[#allocation3 + $0x78] sm:$0xff] %v8927_v20  ;;  %284 = vst [vmem:[#allocation3 + $0x80] sm:$0xff] %v8927_v20 }
 0x1dd   : > { %285 = vst [vmem:[#allocation3 + $0x88] sm:$0xff] %v8927_v20  ;;  %286 = vst [vmem:[#allocation3 + $0x90] sm:$0xff] %v8927_v20 }
 0x1de   : > { %287 = vst [vmem:[#allocation3 + $0x98] sm:$0xff] %v8927_v20  ;;  %288 = vst [vmem:[#allocation3 + $0xa0] sm:$0xff] %v8927_v20 }
 0x1df   : > { %2417 = vmatmul.mubr.bf16.gmra.mrb[56].mxu0 %v1173_v4  ;;  %v1250_v4 = vld [vmem:[%s8991_s7 + $0xa5] sm:$0xff]  ;;  %289 = vst [vmem:[#allocation3 + $0xa8] sm:$0xff] %v8927_v20  ;;  %290 = vst [vmem:[#allocation3 + $0xb0] sm:$0xff] %v8927_v20 }
 0x1e0   : > { %2424 = vmatprep.mubr.bf16.mxu0 %v9501_v5  ;;  %291 = vst [vmem:[#allocation3 + $0xb8] sm:$0xff] %v8927_v20  ;;  %292 = vst [vmem:[#allocation3 + $0xc0] sm:$0xff] %v8927_v20 }
 0x1e1   : > { %293 = vst [vmem:[#allocation3 + $0xc8] sm:$0xff] %v8927_v20  ;;  %294 = vst [vmem:[#allocation3 + $0xd0] sm:$0xff] %v8927_v20 }
 0x1e2   : > { %295 = vst [vmem:[#allocation3 + $0xd8] sm:$0xff] %v8927_v20  ;;  %296 = vst [vmem:[#allocation3 + $0xe0] sm:$0xff] %v8927_v20 }
 0x1e3   : > { %297 = vst [vmem:[#allocation3 + $0xe8] sm:$0xff] %v8927_v20  ;;  %298 = vst [vmem:[#allocation3 + $0xf0] sm:$0xff] %v8927_v20 }
 0x1e4   : > { %299 = vst [vmem:[#allocation3 + $0xf8] sm:$0xff] %v8927_v20  ;;  %300 = vst [vmem:[#allocation3 + $0x100] sm:$0xff] %v8927_v20 }
 0x1e5   : > { %301 = vst [vmem:[#allocation3 + $0x108] sm:$0xff] %v8927_v20  ;;  %302 = vst [vmem:[#allocation3 + $0x110] sm:$0xff] %v8927_v20 }
 0x1e6   : > { %303 = vst [vmem:[#allocation3 + $0x118] sm:$0xff] %v8927_v20  ;;  %304 = vst [vmem:[#allocation3 + $0x120] sm:$0xff] %v8927_v20 }
 0x1e7   : > { %2425 = vmatmul.mubr.bf16.gmra.mrb[60].mxu0 %v1174_v12  ;;  %v1255_v12 = vld [vmem:[%s8991_s7 + $0xcd] sm:$0xff]  ;;  %305 = vst [vmem:[#allocation3 + $0x128] sm:$0xff] %v8927_v20  ;;  %306 = vst [vmem:[#allocation3 + $0x130] sm:$0xff] %v8927_v20 }
 0x1e8   : > { %2432 = vmatprep.mubr.bf16.mxu0 %v9508_v14  ;;  %307 = vst [vmem:[#allocation3 + $0x138] sm:$0xff] %v8927_v20  ;;  %308 = vst [vmem:[#allocation3 + $0x140] sm:$0xff] %v8927_v20 }
 0x1ef   : > { %2433 = vmatmul.mubr.bf16.gmra.mrb[64].mxu0 %v1175_v27 }
 0x1f0   : > { %2440 = vmatprep.mubr.bf16.mxu0 %v9519_v28 }
 0x1f7   : > { %2441 = vmatmul.mubr.bf16.gmra.mrb[68].mxu0 %v1176_v35 }
 0x1f8   : > { %2481 = vmatprep.mubr.bf16.mxu0 %v1270_v36  ;;  %v1265_v36 = vld [vmem:[%s8991_s7 + $0x11d] sm:$0xff] }
 0x1ff   : > { %2482 = vmatmul.mubr.bf16.vlgmr.msra.gmra.mrb[0].mxu0 %v9304_v39  ;;  %v1243_v39 = vld [vmem:[%s8991_s7 + $0x6d] sm:$0xff] }
 0x200   : > { %2489 = vmatprep.mubr.bf16.mxu0 %v1271_v49  ;;  %v1274_v59 = vpack.c.bf16 %v1243_v39, %v1242_v58  ;;  %v1269_v49 = vld [vmem:[%s8991_s7 + $0x13d] sm:$0xff] }
 0x207   : > { %2490 = vmatmul.mubr.bf16.gmra.mrb[4].mxu0 %v9321_v48  ;;  %v1245_v48 = vld [vmem:[%s8991_s7 + $0x7d] sm:$0xff] }
 0x208   : > { %2497 = vmatprep.mubr.bf16.mxu0 %v1272_v52  ;;  %v1275_v61 = vpack.c.bf16 %v1245_v48, %v1244_v60 }
 0x20f   : > { %2498 = vmatmul.mubr.bf16.gmra.mrb[8].mxu0 %v9344_v63  ;;  %v1247_v63 = vld [vmem:[%s8991_s7 + $0x8d] sm:$0xff] }
 0x210   : > { %2505 = vmatprep.mubr.bf16.mxu0 %v1273_v57  ;;  %v1276_v0 = vpack.c.bf16 %v1247_v63, %v1246_v62 }
 0x217   : > { %2506 = vmatmul.mubr.bf16.gmra.mrb[12].mxu0 %v9359_v8  ;;  %v1249_v8 = vld [vmem:[%s8991_s7 + $0x9d] sm:$0xff] }
 0x218   : > { %2513 = vmatprep.mubr.bf16.mxu0 %v1274_v59  ;;  %v1277_v3 = vpack.c.bf16 %v1249_v8, %v1248_v2 }
 0x21f   : > { %2514 = vmatmul.mubr.bf16.gmra.mrb[16].mxu0 %v9378_v22  ;;  %v1251_v22 = vld [vmem:[%s8991_s7 + $0xad] sm:$0xff] }
 0x220   : > { %2521 = vmatprep.mubr.bf16.mxu0 %v1275_v61  ;;  %v1278_v7 = vpack.c.bf16 %v1251_v22, %v1250_v4 }
 0x227   : > { %2522 = vmatmul.mubr.bf16.gmra.mrb[20].mxu0 %v9393_v30  ;;  %v1253_v30 = vld [vmem:[%s8991_s7 + $0xbd] sm:$0xff] }
 0x228   : > { %2529 = vmatprep.mubr.bf16.mxu0 %v1276_v0  ;;  %v1279_v10 = vpack.c.bf16 %v1253_v30, %v1252_v9 }
 0x22f   : > { %2530 = vmatmul.mubr.bf16.gmra.mrb[24].mxu0 %v9412_v45  ;;  %v1280_v45 = vpack.c.bf16 %v1255_v12, %v1254_v11 }
 0x230   : > { %2537 = vmatprep.mubr.bf16.mxu0 %v1277_v3  ;;  %v309_v3 = vlaneseq }
 0x232   : > { %v9727_v4 = vshrl.u32 %v309_v3, 7 }
 0x234   : > { %v312_v9 = vadd.s32 16, %v9727_v4  ;;  %v9738_v11 = vmul.u32.u64.low 3817748708, %v9727_v4  ;;  %v9739_v12 = vmul.u32.u64.high 3817748708, %v9727_v4, %v9738_v11  ;;  %v9753_v23 = vadd.s32 32, %v9727_v4 }
 0x236   : > { %v352_v20 = vshrl.u32 %v9739_v12, 4 }
 0x237   : > { %2538 = vmatmul.mubr.bf16.gmra.mrb[28].mxu0 %v9427_v54  ;;  %v9563_v54 = vpop.f32.mrb[0].mxu1 }
 0x238   : > { %2545 = vmatprep.mubr.bf16.mxu0 %v1278_v7  ;;  %v311_v7 = vadd.s32 8, %v9727_v4 }
 0x23a   : > { %v9743_v15 = vmul.u32.u64.low 3817748708, %v311_v7  ;;  %v9744_v16 = vmul.u32.u64.high 3817748708, %v311_v7, %v9743_v15 }
 0x23f   : > { %2546 = vmatmul.mubr.bf16.gmra.mrb[32].mxu0 %v9446_v6  ;;  %v9571_v6 = vpop.f32.mrb[1].mxu1 }
 0x240   : > { %2553 = vmatprep.mubr.bf16.mxu0 %v1279_v10 }
 0x247   : > { %2554 = vmatmul.mubr.bf16.gmra.mrb[36].mxu0 %v9454_v13  ;;  %v9655_v13 = vpop.f32.mrb[2].mxu1 }
 0x248   : > { %2561 = vmatprep.mubr.bf16.mxu0 %v1280_v45  ;;  %v9659_v21 = vpop.f32.mrb[3].mxu1 }
 0x249   : > { %v9665_v27 = vpop.f32.mrb[4].mxu1 }
 0x24a   : > { %v9669_v32 = vpop.f32.mrb[5].mxu1 }
 0x24b   : > { %v9671_v34 = vpop.f32.mrb[6].mxu1 }
 0x24c   : > { %v9673_v35 = vpop.f32.mrb[7].mxu1 }
 0x24d   : > { %v9679_v38 = vpop.f32.mrb[8].mxu1 }
 0x24e   : > { %v9683_v42 = vpop.f32.mrb[9].mxu1 }
 0x24f   : > { %2562 = vmatmul.mubr.bf16.gmra.mrb[40].mxu0 %v9465_v26  ;;  %v1282_v26 = vpack.c.bf16 %v9569_v19, %v9566_v18  ;;  %v9685_v43 = vpop.f32.mrb[10].mxu1  ;;  %v313_v19 = vadd.s32 24, %v9727_v4 }
 0x250   : > { %2569 = vmatprep.mubr.bf16.mxu0 %v1281_v17  ;;  %v9687_v44 = vpop.f32.mrb[11].mxu1  ;;  %v9746_v17 = vmul.u32.u64.low 3817748708, %v312_v9  ;;  %v9747_v18 = vmul.u32.u64.high 3817748708, %v312_v9, %v9746_v17 }
 0x252   : > { %v374_v24 = vshrl.u32 %v9747_v18, 4 }
 0x257   : > { %2570 = vmatmul.mubr.bf16.gmra.mrb[44].mxu0 %v9472_v33  ;;  %v1284_v33 = vpack.c.bf16 %v1263_v31, %v1262_v29  ;;  %v9760_v31 = vadd.s32 40, %v9727_v4 }
 0x258   : > { %2577 = vmatprep.mubr.bf16.mxu0 %v1282_v26  ;;  %v363_v26 = vshrl.u32 %v9744_v16, 4 }
 0x259   : > { %v9695_v52 = vpop.f32.mrb[12].mxu1 }
 0x25a   : > { %v9697_v53 = vpop.f32.mrb[13].mxu1 }
 0x25b   : > { %v9699_v57 = vpop.f32.mrb[14].mxu1 }
 0x25c   : > { %v9701_v58 = vpop.f32.mrb[15].mxu1 }
 0x25f   : > { %2578 = vmatmul.mubr.bf16.gmra.mrb[48].mxu0 %v9483_v47  ;;  %v1264_v47 = vld [vmem:[%s8991_s7 + $0x115] sm:$0xff] }
 0x260   : > { %2585 = vmatprep.mubr.bf16.mxu0 %v1283_v25  ;;  %v1285_v37 = vpack.c.bf16 %v1265_v36, %v1264_v47  ;;  %v9756_v25 = vmul.u32.u64.low 3817748708, %v313_v19  ;;  %v9757_v29 = vmul.u32.u64.high 3817748708, %v313_v19, %v9756_v25  ;;  %v364_v36 = vmul.u32 18, %v363_v26 }
 0x261   : > { %v9800_v25 = vadd.s32 56, %v9727_v4 }
 0x262   : > { %v9787_v16 = vsub.s32 %v311_v7, %v364_v36  ;;  %v9804_v7 = vadd.s32 64, %v9727_v4 }
 0x264   : > { %vm743_vm2 = vcmp.ne.s32.totalorder %v9787_v16, 0  ;;  %vm779_vm3 = vcmp.lt.s32.totalorder %v9787_v16, 0 }
 0x265   : > { %vm9851_vm7 = vmand %vm779_vm3, %vm743_vm2 }
 0x267   : > { %2586 = vmatmul.mubr.bf16.gmra.mrb[52].mxu0 %v9490_v55  ;;  %v1286_v55 = vpack.c.bf16 %v1267_v41, %v1266_v40  ;;  %v9769_v41 = vadd.s32 48, %v9727_v4 }
 0x268   : > { %2593 = vmatprep.mubr.bf16.mxu0 %v1284_v33  ;;  %v353_v33 = vmul.u32 18, %v352_v20 }
 0x269   : > { %v9793_v18 = vmul.u32.u64.low 3817748708, %v9769_v41  ;;  %v9794_v20 = vmul.u32.u64.high 3817748708, %v9769_v41, %v9793_v18 }
 0x26a   : > { %v9783_v11 = vsub.s32 %v9727_v4, %v353_v33 }
 0x26c   : > { %vm742_vm0 = vcmp.ne.s32.totalorder %v9783_v11, 0  ;;  %vm778_vm1 = vcmp.lt.s32.totalorder %v9783_v11, 0  ;;  %v850_v33 = vadd.s32 18, %v9783_v11 }
 0x26d   : > { %vm9836_vm6 = vmand %vm778_vm1, %vm742_vm0 }
 0x26f   : > { %2594 = vmatmul.mubr.bf16.gmra.mrb[56].mxu0 %v9501_v5  ;;  %v1287_v5 = vpack.c.bf16 %v1269_v49, %v1268_v46  ;;  %v375_v46 = vmul.u32 18, %v374_v24  ;;  %v385_v24 = vshrl.u32 %v9757_v29, 4 }
 0x270   : > { %2601 = vmatprep.mubr.bf16.mxu0 %v1285_v37  ;;  %v9765_v37 = vmul.u32.u64.low 3817748708, %v9753_v23  ;;  %v9766_v40 = vmul.u32.u64.high 3817748708, %v9753_v23, %v9765_v37 }
 0x271   : > { %v9796_v26 = vsub.s32 %v312_v9, %v375_v46  ;;  %v386_v36 = vmul.u32 18, %v385_v24 }
 0x272   : > { %v396_v9 = vshrl.u32 %v9766_v40, 4 }
 0x273   : > { %vm744_vm4 = vcmp.ne.s32.totalorder %v9796_v26, 0  ;;  %vm780_vm5 = vcmp.lt.s32.totalorder %v9796_v26, 0 }
 0x274   : > { %vm9863_vm8 = vmand %vm780_vm5, %vm744_vm4 }
 0x277   : > { %2602 = vmatmul.mubr.bf16.gmra.mrb[60].mxu0 %v9508_v14  ;;  %v9703_v14 = vpop.f32.mrb[16].mxu1 }
 0x278   : > { %2609 = vmatprep.mubr.bf16.mxu0 %v1286_v55  ;;  %v9705_v39 = vpop.f32.mrb[17].mxu1 }
 0x279   : > { %v9707_v59 = vpop.f32.mrb[18].mxu1 }
 0x27f   : > { %2610 = vmatmul.mubr.bf16.gmra.mrb[64].mxu0 %v9519_v28  ;;  %v9709_v28 = vpop.f32.mrb[19].mxu1 }
 0x280   : > { %2617 = vmatprep.mubr.bf16.mxu0 %v1287_v5  ;;  %v9711_v60 = vpop.f32.mrb[20].mxu1 }
 0x281   : > { %v9713_v48 = vpop.f32.mrb[21].mxu1 }
 0x282   : > { %v9715_v61 = vpop.f32.mrb[22].mxu1 }
 0x283   : > { %v9717_v62 = vpop.f32.mrb[23].mxu1 }
 0x284   : > { %v9719_v63 = vpop.f32.mrb[24].mxu1 }
 0x285   : > { %v9721_v0 = vpop.f32.mrb[25].mxu1 }
 0x286   : > { %v9723_v2 = vpop.f32.mrb[26].mxu1 }
 0x287   : > { %2618 = vmatmul.mubr.bf16.gmra.mrb[68].mxu0 %v1233_v56  ;;  %v9725_v8 = vpop.f32.mrb[27].mxu1  ;;  %v9777_v51 = vmul.u32.u64.low 3817748708, %v9760_v31  ;;  %v9778_v56 = vmul.u32.u64.high 3817748708, %v9760_v31, %v9777_v51 }
 0x289   : > { %v407_v46 = vshrl.u32 %v9778_v56, 4 }
 0x294   : > { %v9729_v22 = vpop.f32.mrb[28].mxu1 }
 0x295   : > { %v9733_v30 = vpop.f32.mrb[29].mxu1 }
 0x296   : > { %v9735_v10 = vpop.f32.mrb[30].mxu1 }
 0x297   : > { %13638 = vst [vmem:[#allocation5_spill] sm:$0xff] %v9735_v10  ;;  %v9741_v45 = vpop.f32.mrb[31].mxu1  ;;  %v10002_v10 = vadd.s32 120, %v9727_v4 }
 0x2a4   : > { %v9762_v47 = vpop.f32.mrb[32].mxu1 }
 0x2a5   : > { %13639 = vst [vmem:[#allocation6_spill] sm:$0xff] %v9762_v47  ;;  %v9771_v49 = vpop.f32.mrb[33].mxu1 }
 0x2a6   : > { %13640 = vst [vmem:[#allocation7_spill] sm:$0xff] %v9771_v49  ;;  %v9780_v3 = vpop.f32.mrb[34].mxu1 }
 0x2a7   : > { %13641 = vst [vmem:[#allocation8_spill] sm:$0xff] %v9780_v3  ;;  %v9785_v15 = vpop.f32.mrb[35].mxu1  ;;  %v9871_v3 = vadd.s32 88, %v9727_v4 }
 0x2a8   : > { %13642 = vst [vmem:[#allocation9_spill] sm:$0xff] %v9785_v15 }
 0x2d2   : > { %v2483_v55 = vpop.f32.mrb[0].mxu0 }
 0x2d3   : > { %v9774_v5 = vadd.f32 %v9571_v6, %v2483_v55  ;;  %v2485_v50 = vpop.f32.mrb[1].mxu0 }
 0x2d4   : > { %v2486_v12 = vpop.f32.mrb[2].mxu0  ;;  %v9821_v50 = vmul.u32.u64.low 3817748708, %v9800_v25  ;;  %v9822_v51 = vmul.u32.u64.high 3817748708, %v9800_v25, %v9821_v50 }
 0x2d5   : > { %v9790_v17 = vadd.f32 %v9659_v21, %v2486_v12  ;;  %v2488_v6 = vpop.f32.mrb[3].mxu0  ;;  %v9807_v21 = vadd.s32 72, %v9727_v4  ;;  %v9845_v50 = vadd.s32 80, %v9727_v4 }
 0x2d6   : > { %v9825_v40 = vmul.u32.u64.low 3817748708, %v9804_v7  ;;  %v9826_v6 = vmul.u32.u64.high 3817748708, %v9804_v7, %v9825_v40 }
 0x2d7   : > { %13643 = vst [vmem:[#allocation10_spill] sm:$0xff] %v9790_v17  ;;  %v9829_v18 = vmul.u32.u64.low 3817748708, %v9807_v21  ;;  %v9830_v1 = vmul.u32.u64.high 3817748708, %v9807_v21, %v9829_v18 }
 0x2d8   : > { %v851_v18 = vadd.s32 18, %v9787_v16  ;;  %v440_v40 = vshrl.u32 %v9826_v6, 4  ;;  %v13653_v6 = vmov 0 }
 0x2da   : > { %v2491_v29 = vpop.f32.mrb[4].mxu0  ;;  %v887_v49 = vsel %vm9851_vm7, %v851_v18, %v9787_v16  ;;  %v429_v16 = vshrl.u32 %v9822_v51, 4 }
 0x2db   : > { %v9817_v37 = vadd.f32 %v9563_v54, %v2491_v29  ;;  %v2493_v55 = vpop.f32.mrb[5].mxu0  ;;  %v397_v29 = vmul.u32 18, %v396_v9  ;;  %v408_v9 = vmul.u32 18, %v407_v46  ;;  %vm9917_vm14 = vcmp.lt.s32.totalorder %v887_v49, 16 }
 0x2dc   : > { %v2494_v12 = vpop.f32.mrb[6].mxu0  ;;  %v418_v55 = vshrl.u32 %v9794_v20, 4  ;;  %v13654_v6 = vsel %vm9917_vm14, 4294967295, %v13653_v6 }
 0x2dd   : > { %13644 = vst [vmem:[#allocation11_spill] sm:$0xff] %v9817_v37  ;;  %v9841_v56 = vadd.f32 %v9655_v13, %v2494_v12  ;;  %v2496_v24 = vpop.f32.mrb[7].mxu0  ;;  %v852_v13 = vadd.s32 18, %v9796_v26  ;;  %v9857_v12 = vsub.s32 %v313_v19, %v386_v36  ;;  %v9874_v47 = vsub.s32 %v9753_v23, %v397_v29  ;;  %13655 = vst [vmem:[#allocation12_spill] sm:$0xff] %v13654_v6 }
 0x2de   : > { %v886_v24 = vsel %vm9836_vm6, %v850_v33, %v9783_v11  ;;  %v419_v19 = vmul.u32 18, %v418_v55  ;;  %v9877_v36 = vmul.u32.u64.low 3817748708, %v9845_v50  ;;  %v9878_v15 = vmul.u32.u64.high 3817748708, %v9845_v50, %v9877_v36 }
 0x2df   : > { %v888_v46 = vsel %vm9863_vm8, %v852_v13, %v9796_v26  ;;  %vm745_vm9 = vcmp.ne.s32.totalorder %v9857_v12, 0  ;;  %vm781_vm10 = vcmp.lt.s32.totalorder %v9857_v12, 0  ;;  %v853_v23 = vadd.s32 18, %v9857_v12 }
 0x2e0   : > { %v9893_v29 = vsub.s32 %v9760_v31, %v408_v9  ;;  %v451_v26 = vshrl.u32 %v9830_v1, 4  ;;  %v9899_v18 = vmul.u32.u64.low 3817748708, %v9871_v3  ;;  %v9900_v13 = vmul.u32.u64.high 3817748708, %v9871_v3, %v9899_v18  ;;  %vm9902_vm11 = vmand %vm781_vm10, %vm745_vm9 }
 0x2e1   : > { %vm746_vm12 = vcmp.ne.s32.totalorder %v9874_v47, 0  ;;  %vm782_vm13 = vcmp.lt.s32.totalorder %v9874_v47, 0  ;;  %v9912_v51 = vsub.s32 %v9769_v41, %v419_v19  ;;  %v9915_v1 = vadd.s32 96, %v9727_v4 }
 0x2e2   : > { %v2499_v11 = vpop.f32.mrb[8].mxu0  ;;  %v854_v9 = vadd.s32 18, %v9874_v47  ;;  %v430_v36 = vmul.u32 18, %v429_v16  ;;  %vm9922_vm15 = vcmp.lt.s32.totalorder %v886_v24, 16  ;;  %vm9926_vm0 = vcmp.lt.s32.totalorder %v888_v46, 16  ;;  %vm9933_vm1 = vmand %vm782_vm13, %vm746_vm12 }
 0x2e3   : > { %v9890_v33 = vadd.f32 %v9669_v32, %v2499_v11  ;;  %v2501_v54 = vpop.f32.mrb[9].mxu0  ;;  %v13656_v11 = vmov 0  ;;  %v889_v41 = vsel %vm9902_vm11, %v853_v23, %v9857_v12  ;;  %vm747_vm2 = vcmp.ne.s32.totalorder %v9893_v29, 0 }
 0x2e4   : > { %v2502_v55 = vpop.f32.mrb[10].mxu0  ;;  %v13657_v11 = vsel %vm9922_vm15, 4294967295, %v13656_v11  ;;  %v441_v19 = vmul.u32 18, %v440_v40  ;;  %v452_v54 = vmul.u32 18, %v451_v26  ;;  %vm783_vm3 = vcmp.lt.s32.totalorder %v9893_v29, 0 }
 0x2e5   : > { %v9909_v32 = vadd.f32 %v9673_v35, %v2502_v55  ;;  %v2504_v31 = vpop.f32.mrb[11].mxu0  ;;  %13658 = vst [vmem:[#allocation13_spill] sm:$0xff] %v13657_v11  ;;  %v13659_v35 = vmov 0  ;;  %vm748_vm4 = vcmp.ne.s32.totalorder %v9912_v51, 0  ;;  %v462_v24 = vshrl.u32 %v9878_v15, 4  ;;  %vm9964_vm6 = vmand %vm783_vm3, %vm747_vm2 }
 0x2e6   : > { %v13660_v35 = vsel %vm9926_vm0, 4294967295, %v13659_v35  ;;  %v9942_v46 = vadd.s32 104, %v9727_v4  ;;  %vm784_vm5 = vcmp.lt.s32.totalorder %v9912_v51, 0  ;;  %v9950_v55 = vadd.s32 112, %v9727_v4 }
 0x2e7   : > { %13661 = vst [vmem:[#allocation14_spill] sm:$0xff] %v13660_v35  ;;  %v9946_v23 = vmul.u32.u64.low 3817748708, %v9915_v1  ;;  %v9947_v16 = vmul.u32.u64.high 3817748708, %v9915_v1, %v9946_v23  ;;  %v890_v40 = vsel %vm9933_vm1, %v854_v9, %v9874_v47  ;;  %v855_v26 = vadd.s32 18, %v9893_v29  ;;  %vm9982_vm7 = vmand %vm784_vm5, %vm748_vm4 }
 0x2e8   : > { %v9960_v20 = vsub.s32 %v9800_v25, %v430_v36  ;;  %v9969_v23 = vadd.s32 18, %v9912_v51  ;;  %v9972_v47 = vsub.s32 %v9804_v7, %v441_v19  ;;  %v473_v9 = vshrl.u32 %v9900_v13, 4 }
 0x2e9   : > { %v9990_v7 = vmul.u32.u64.low 3817748708, %v9942_v46  ;;  %v9991_v19 = vmul.u32.u64.high 3817748708, %v9942_v46, %v9990_v7  ;;  %vm9993_vm8 = vcmp.lt.s32.totalorder %v889_v41, 16  ;;  %vm10004_vm9 = vcmp.lt.s32.totalorder %v890_v40, 16 }
 0x2ea   : > { %v2507_v12 = vpop.f32.mrb[12].mxu0  ;;  %vm749_vm10 = vcmp.ne.s32.totalorder %v9960_v20, 0  ;;  %vm785_vm11 = vcmp.lt.s32.totalorder %v9960_v20, 0  ;;  %v892_v41 = vsel %vm9982_vm7, %v9969_v23, %v9912_v51  ;;  %vm750_vm12 = vcmp.ne.s32.totalorder %v9972_v47, 0 }
 0x2eb   : > { %v9957_v15 = vadd.f32 %v9665_v27, %v2507_v12  ;;  %v2509_v18 = vpop.f32.mrb[13].mxu0  ;;  %v9975_v27 = vsub.s32 %v9807_v21, %v452_v54  ;;  %v13668_v21 = vmov 0  ;;  %v474_v40 = vmul.u32 18, %v473_v9  ;;  %vm10031_vm3 = vmand %vm785_vm11, %vm749_vm10 }
 0x2ec   : > { %v2510_v49 = vpop.f32.mrb[14].mxu0  ;;  %v463_v18 = vmul.u32 18, %v462_v24  ;;  %v13669_v21 = vsel %vm9993_vm8, 4294967295, %v13668_v21  ;;  %v9998_v13 = vmul.u32.u64.low 3817748708, %v9950_v55  ;;  %v9999_v54 = vmul.u32.u64.high 3817748708, %v9950_v55, %v9998_v13 }
 0x2ed   : > { %v9987_v36 = vadd.f32 %v9671_v34, %v2510_v49  ;;  %v2512_v12 = vpop.f32.mrb[15].mxu0  ;;  %13670 = vst [vmem:[#allocation15_spill] sm:$0xff] %v13669_v21  ;;  %v13671_v34 = vmov 0  ;;  %v891_v24 = vsel %vm9964_vm6, %v855_v26, %v9893_v29  ;;  %v857_v49 = vadd.s32 18, %v9960_v20 }
 0x2ee   : > { %v13672_v34 = vsel %vm10004_vm9, 4294967295, %v13671_v34  ;;  %v2876_v12 = vsel %vm9917_vm14, %v9790_v17, 0.0  ;;  %vm786_vm13 = vcmp.lt.s32.totalorder %v9972_v47, 0  ;;  %vm751_vm1 = vcmp.ne.s32.totalorder %v9975_v27, 0 }
 0x2ef   : > { %13673 = vst [vmem:[#allocation16_spill] sm:$0xff] %v13672_v34  ;;  %v10025_v29 = vsub.s32 %v9845_v50, %v463_v18  ;;  %vm10027_vm2 = vcmp.lt.s32.totalorder %v891_v24, 16  ;;  %v13674_v26 = vmov 0  ;;  %vm787_vm4 = vcmp.lt.s32.totalorder %v9975_v27, 0  ;;  %vm10057_vm5 = vmand %vm786_vm13, %vm750_vm12 }
 0x2f0   : > { %v13675_v26 = vsel %vm10027_vm2, 4294967295, %v13674_v26  ;;  %v484_v23 = vshrl.u32 %v9947_v16, 4  ;;  %v10038_v9 = vmul.u32.u64.low 3817748708, %v10002_v10  ;;  %v10039_v25 = vmul.u32.u64.high 3817748708, %v10002_v10, %v10038_v9  ;;  %vm10073_vm6 = vmand %vm787_vm4, %vm751_vm1 }
 0x2f1   : > { %13676 = vst [vmem:[#allocation17_spill] sm:$0xff] %v13675_v26  ;;  %v2875_v50 = vsel %vm9922_vm15, %v9774_v5, 0.0  ;;  %v2877_v18 = vsel %vm9926_vm0, %v9817_v37, 0.0  ;;  %v10051_v24 = vadd.s32 128, %v9727_v4  ;;  %v858_v6 = vadd.s32 18, %v9972_v47 }
 0x2f2   : > { %v2515_v31 = vpop.f32.mrb[16].mxu0  ;;  %v2911_v16 = vadd.f32 %v2876_v12, %v2875_v50  ;;  %v859_v11 = vadd.s32 18, %v9975_v27  ;;  %v893_v12 = vsel %vm10031_vm3, %v857_v49, %v9960_v20  ;;  %vm752_vm7 = vcmp.ne.s32.totalorder %v10025_v29, 0 }
 0x2f3   : > { %v10048_v7 = vadd.f32 %v9683_v42, %v2515_v31  ;;  %v2517_v13 = vpop.f32.mrb[17].mxu0  ;;  %v10064_v42 = vsub.s32 %v9871_v3, %v474_v40  ;;  %v495_v3 = vshrl.u32 %v9991_v19, 4  ;;  %vm788_vm10 = vcmp.lt.s32.totalorder %v10025_v29, 0 }
 0x2f4   : > { %v2518_v35 = vpop.f32.mrb[18].mxu0  ;;  %v2912_v40 = vadd.f32 %v2911_v16, %v2877_v18  ;;  %v485_v20 = vmul.u32 18, %v484_v23  ;;  %v506_v49 = vshrl.u32 %v9999_v54, 4  ;;  %v2878_v51 = vsel %vm9993_vm8, %v9841_v56, 0.0  ;;  %vm10113_vm13 = vmand %vm788_vm10, %vm752_vm7 }
 0x2f5   : > { %13679 = vst [vmem:[#allocation18_spill] sm:$0xff] %v10048_v7  ;;  %v10078_v50 = vadd.f32 %v9687_v44, %v2518_v35  ;;  %v2520_v13 = vpop.f32.mrb[19].mxu0  ;;  %v10088_v37 = vmul.u32.u64.low 3817748708, %v10051_v24  ;;  %v10089_v17 = vmul.u32.u64.high 3817748708, %v10051_v24, %v10088_v37  ;;  %v10092_v44 = vadd.s32 136, %v9727_v4 }
 0x2f6   : > { %v894_v35 = vsel %vm10057_vm5, %v858_v6, %v9972_v47  ;;  %v895_v19 = vsel %vm10073_vm6, %v859_v11, %v9975_v27  ;;  %vm753_vm11 = vcmp.ne.s32.totalorder %v10064_v42, 0  ;;  %vm789_vm12 = vcmp.lt.s32.totalorder %v10064_v42, 0 }
 0x2f7   : > { %v2879_v54 = vsel %vm10004_vm9, %v9890_v33, 0.0  ;;  %v860_v37 = vadd.s32 18, %v10025_v29  ;;  %v10107_v23 = vadd.s32 18, %v10064_v42  ;;  %v496_v18 = vmul.u32 18, %v495_v3  ;;  %vm10124_vm1 = vmand %vm789_vm12, %vm753_vm11 }
 0x2f8   : > { %v2913_v16 = vadd.f32 %v2912_v40, %v2878_v51  ;;  %v10118_v47 = vsub.s32 %v9915_v1, %v485_v20  ;;  %v507_v27 = vmul.u32 18, %v506_v49  ;;  %v517_v9 = vshrl.u32 %v10039_v25, 4 }
 0x2f9   : > { %v10129_v40 = vmul.u32.u64.low 3817748708, %v10092_v44  ;;  %v10130_v51 = vmul.u32.u64.high 3817748708, %v10092_v44, %v10129_v40  ;;  %v10133_v34 = vadd.s32 144, %v9727_v4  ;;  %vm10135_vm3 = vcmp.lt.s32.totalorder %v892_v41, 16 }
 0x2fa   : > { %v2523_v11 = vpop.f32.mrb[20].mxu0  ;;  %v2914_v1 = vadd.f32 %v2913_v16, %v2879_v54  ;;  %v13688_v20 = vmov 0  ;;  %vm10139_vm4 = vcmp.lt.s32.totalorder %v893_v12, 16  ;;  %vm10143_vm5 = vcmp.lt.s32.totalorder %v894_v35, 16 }
 0x2fb   : > { %v10122_v31 = vadd.f32 %v9679_v38, %v2523_v11  ;;  %v2525_v13 = vpop.f32.mrb[21].mxu0  ;;  %v13689_v20 = vsel %vm10135_vm3, 4294967295, %v13688_v20  ;;  %v13691_v38 = vmov 0  ;;  %v13694_v25 = vmov 0 }
 0x2fc   : > { %13690 = vst [vmem:[#allocation19_spill] sm:$0xff] %v13689_v20  ;;  %v13692_v38 = vsel %vm10139_vm4, 4294967295, %v13691_v38  ;;  %v13695_v25 = vsel %vm10143_vm5, 4294967295, %v13694_v25  ;;  %v2526_v49 = vpop.f32.mrb[22].mxu0  ;;  %v2880_v11 = vsel %vm10027_vm2, %v9909_v32, 0.0  ;;  %v896_v41 = vsel %vm10113_vm13, %v860_v37, %v10025_v29 }
 0x2fd   : > { %13693 = vst [vmem:[#allocation20_spill] sm:$0xff] %v13692_v38  ;;  %13696 = vst [vmem:[#allocation21_spill] sm:$0xff] %v13695_v25  ;;  %v10154_v54 = vadd.f32 %v9685_v43, %v2526_v49  ;;  %v2528_v12 = vpop.f32.mrb[23].mxu0  ;;  %v10157_v16 = vsub.s32 %v9942_v46, %v496_v18  ;;  %vm10159_vm6 = vcmp.lt.s32.totalorder %v895_v19, 16  ;;  %v13697_v35 = vmov 0 }
 0x2fe   : > { %v13698_v35 = vsel %vm10159_vm6, 4294967295, %v13697_v35  ;;  %v897_v13 = vsel %vm10124_vm1, %v10107_v23, %v10064_v42  ;;  %vm754_vm7 = vcmp.ne.s32.totalorder %v10118_v47, 0  ;;  %v10169_v29 = vsub.s32 %v9950_v55, %v507_v27 }
 0x2ff   : > { %13699 = vst [vmem:[#allocation22_spill] sm:$0xff] %v13698_v35  ;;  %v518_v43 = vmul.u32 18, %v517_v9  ;;  %v2881_v46 = vsel %vm10135_vm3, %v9957_v15, 0.0  ;;  %v528_v19 = vshrl.u32 %v10089_v17, 4  ;;  %v2915_v6 = vadd.f32 %v2914_v1, %v2880_v11 }
 0x300   : > { %v10176_v37 = vmul.u32.u64.low 3817748708, %v10133_v34  ;;  %v10177_v18 = vmul.u32.u64.high 3817748708, %v10133_v34, %v10176_v37  ;;  %vm790_vm10 = vcmp.lt.s32.totalorder %v10118_v47, 0  ;;  %v10181_v42 = vadd.s32 152, %v9727_v4 }
 0x301   : > { %v10184_v55 = vadd.s32 160, %v9727_v4  ;;  %v862_v23 = vadd.s32 18, %v10118_v47  ;;  %vm755_vm11 = vcmp.ne.s32.totalorder %v10157_v16, 0  ;;  %vm791_vm12 = vcmp.lt.s32.totalorder %v10157_v16, 0  ;;  %vm10208_vm13 = vmand %vm790_vm10, %vm754_vm7 }
 0x302   : > { %v10190_v17 = vadd.s32 18, %v10157_v16  ;;  %v2916_v27 = vadd.f32 %v2915_v6, %v2881_v46  ;;  %v2531_v9 = vpop.f32.mrb[24].mxu0  ;;  %v10195_v3 = vsub.s32 %v10002_v10, %v518_v43  ;;  %v2882_v40 = vsel %vm10139_vm4, %v9987_v36, 0.0  ;;  %vm10231_vm7 = vmand %vm791_vm12, %vm755_vm11 }
 0x303   : > { %v10201_v1 = vadd.f32 %v9697_v53, %v2531_v9  ;;  %v2533_v49 = vpop.f32.mrb[25].mxu0  ;;  %v529_v11 = vmul.u32 18, %v528_v19  ;;  %v539_v12 = vshrl.u32 %v10130_v51, 4  ;;  %v2883_v51 = vsel %vm10143_vm5, %v10048_v7, 0.0 }
 0x304   : > { %v2534_v10 = vpop.f32.mrb[26].mxu0  ;;  %v10213_v43 = vmul.u32.u64.low 3817748708, %v10181_v42  ;;  %v10214_v37 = vmul.u32.u64.high 3817748708, %v10181_v42, %v10213_v43  ;;  %v10217_v53 = vmul.u32.u64.low 3817748708, %v10184_v55  ;;  %v10218_v6 = vmul.u32.u64.high 3817748708, %v10184_v55, %v10217_v53 }
 0x305   : > { %vm10223_vm1 = vcmp.lt.s32.totalorder %v896_v41, 16  ;;  %v13702_v19 = vmov 0  ;;  %v10236_v49 = vadd.f32 %v9701_v58, %v2534_v10  ;;  %v2536_v43 = vpop.f32.mrb[27].mxu0  ;;  %v10239_v53 = vadd.s32 168, %v9727_v4 }
 0x306   : > { %v13703_v19 = vsel %vm10223_vm1, 4294967295, %v13702_v19  ;;  %v2917_v25 = vadd.f32 %v2916_v27, %v2882_v40  ;;  %vm10241_vm10 = vcmp.lt.s32.totalorder %v897_v13, 16  ;;  %v13707_v41 = vmov 0 }
 0x307   : > { %13704 = vst [vmem:[#allocation23_spill] sm:$0xff] %v13703_v19  ;;  %v13708_v41 = vsel %vm10241_vm10, 4294967295, %v13707_v41  ;;  %v864_v38 = vadd.s32 18, %v10169_v29  ;;  %v10247_v20 = vadd.s32 176, %v9727_v4  ;;  %vm13710_vm11 = vcmp.ne.s32.totalorder %v10169_v29, 0 }
 0x308   : > { %13709 = vst [vmem:[#allocation24_spill] sm:$0xff] %v13708_v41  ;;  %vm13711_vm12 = vcmp.lt.s32.totalorder %v10169_v29, 0  ;;  %vm757_vm4 = vcmp.ne.s32.totalorder %v10195_v3, 0  ;;  %vm793_vm3 = vcmp.lt.s32.totalorder %v10195_v3, 0  ;;  %v10260_v13 = vsub.s32 %v10051_v24, %v529_v11 }
 0x309   : > { %vm10253_vm5 = vmand %vm13711_vm12, %vm13710_vm11  ;;  %v550_v27 = vshrl.u32 %v10177_v18, 4  ;;  %v2918_v40 = vadd.f32 %v2917_v25, %v2883_v51  ;;  %v898_v10 = vsel %vm10208_vm13, %v862_v23, %v10118_v47  ;;  %v899_v43 = vsel %vm10231_vm7, %v10190_v17, %v10157_v16 }
 0x30a   : > { %v540_v7 = vmul.u32 18, %v539_v12  ;;  %v2884_v26 = vsel %vm10159_vm6, %v10078_v50, 0.0  ;;  %v865_v24 = vadd.s32 18, %v10195_v3  ;;  %v900_v47 = vsel %vm10253_vm5, %v864_v38, %v10169_v29  ;;  %v2539_v25 = vpop.f32.mrb[28].mxu0  ;;  %vm10283_vm13 = vmand %vm793_vm3, %vm757_vm4 }
 0x30b   : > { %v10275_v11 = vmul.u32.u64.low 3817748708, %v10239_v53  ;;  %v10276_v18 = vmul.u32.u64.high 3817748708, %v10239_v53, %v10275_v11  ;;  %v10288_v23 = vmul.u32.u64.low 3817748708, %v10247_v20  ;;  %v10289_v17 = vmul.u32.u64.high 3817748708, %v10247_v20, %v10288_v23  ;;  %v2541_v29 = vpop.f32.mrb[29].mxu0 }
 0x30c   : > { %v10292_v12 = vadd.s32 184, %v9727_v4  ;;  %v2885_v46 = vsel %vm10223_vm1, %v10122_v31, 0.0  ;;  %v10298_v38 = vadd.f32 %v9695_v52, %v2539_v25  ;;  %vm758_vm3 = vcmp.ne.s32.totalorder %v10260_v13, 0  ;;  %v2542_v58 = vpop.f32.mrb[30].mxu0 }
 0x30d   : > { %v551_v51 = vmul.u32 18, %v550_v27  ;;  %v2919_v9 = vadd.f32 %v2918_v40, %v2884_v26  ;;  %vm794_vm4 = vcmp.lt.s32.totalorder %v10260_v13, 0  ;;  %v10303_v11 = vsub.s32 %v10092_v44, %v540_v7  ;;  %v2544_v26 = vpop.f32.mrb[31].mxu0 }
 0x30e   : > { %v561_v23 = vshrl.u32 %v10214_v37, 4  ;;  %vm10306_vm5 = vcmp.lt.s32.totalorder %v898_v10, 16  ;;  %v13716_v35 = vmov 0  ;;  %v901_v52 = vsel %vm10283_vm13, %v865_v24, %v10195_v3  ;;  %vm10337_vm12 = vmand %vm794_vm4, %vm758_vm3 }
 0x30f   : > { %v13717_v35 = vsel %vm10306_vm5, 4294967295, %v13716_v35  ;;  %v10314_v25 = vadd.f32 %v9699_v57, %v2542_v58  ;;  %v572_v27 = vshrl.u32 %v10218_v6, 4  ;;  %v2920_v40 = vadd.f32 %v2919_v9, %v2885_v46 }
 0x310   : > { %13718 = vst [vmem:[#allocation25_spill] sm:$0xff] %v13717_v35  ;;  %v866_v7 = vadd.s32 18, %v10260_v13  ;;  %v10319_v44 = vmul.u32.u64.low 3817748708, %v10292_v12  ;;  %v10320_v37 = vmul.u32.u64.high 3817748708, %v10292_v12, %v10319_v44  ;;  %v2886_v10 = vsel %vm10241_vm10, %v10154_v54, 0.0 }
 0x311   : > { %vm10325_vm7 = vcmp.lt.s32.totalorder %v899_v43, 16  ;;  %v13719_v16 = vmov 0  ;;  %vm10329_vm11 = vcmp.lt.s32.totalorder %v900_v47, 16  ;;  %v13722_v57 = vmov 0 }
 0x312   : > { %v13720_v16 = vsel %vm10325_vm7, 4294967295, %v13719_v16  ;;  %v13723_v57 = vsel %vm10329_vm11, 4294967295, %v13722_v57  ;;  %v10342_v6 = vsub.s32 %v10133_v34, %v551_v51  ;;  %vm10344_vm13 = vcmp.lt.s32.totalorder %v901_v52, 16  ;;  %v2547_v9 = vpop.f32.mrb[32].mxu0 }
 0x313   : > { %13721 = vst [vmem:[#allocation26_spill] sm:$0xff] %v13720_v16  ;;  %13724 = vst [vmem:[#allocation27_spill] sm:$0xff] %v13723_v57  ;;  %v13727_v43 = vmov 0  ;;  %vm759_vm10 = vcmp.ne.s32.totalorder %v10303_v11, 0  ;;  %v562_v24 = vmul.u32 18, %v561_v23  ;;  %v10350_v47 = vadd.s32 192, %v9727_v4 }
 0x314   : > { %v13728_v43 = vsel %vm10344_vm13, 4294967295, %v13727_v43  ;;  %v2887_v46 = vsel %vm10306_vm5, %v10201_v1, 0.0  ;;  %v573_v29 = vmul.u32 18, %v572_v27  ;;  %v583_v34 = vshrl.u32 %v10276_v18, 4  ;;  %v2549_v44 = vpop.f32.mrb[33].mxu0 }
 0x315   : > { %13729 = vst [vmem:[#allocation28_spill] sm:$0xff] %v13728_v43  ;;  %v2921_v51 = vadd.f32 %v2920_v40, %v2886_v10  ;;  %v902_v58 = vsel %vm10337_vm12, %v866_v7, %v10260_v13  ;;  %v594_v23 = vshrl.u32 %v10289_v17, 4  ;;  %v10362_v52 = vadd.s32 200, %v9727_v4  ;;  %v2550_v27 = vpop.f32.mrb[34].mxu0 }
 0x316   : > { %v10365_v26 = vadd.f32 %v9705_v39, %v2547_v9  ;;  %v867_v35 = vadd.s32 18, %v10303_v11  ;;  %vm760_vm4 = vcmp.ne.s32.totalorder %v10342_v6, 0  ;;  %vm13730_vm12 = vcmp.lt.s32.totalorder %v10303_v11, 0  ;;  %v2552_v3 = vpop.f32.mrb[35].mxu0 }
 0x317   : > { %v2922_v18 = vadd.f32 %v2921_v51, %v2887_v46  ;;  %vm10374_vm5 = vmand %vm13730_vm12, %vm759_vm10  ;;  %v563_v39 = vsub.s32 %v10181_v42, %v562_v24  ;;  %v10380_v17 = vmul.u32.u64.low 3817748708, %v10350_v47  ;;  %v10381_v40 = vmul.u32.u64.high 3817748708, %v10350_v47, %v10380_v17 }
 0x318   : > { %v2888_v7 = vsel %vm10325_vm7, %v10236_v49, 0.0  ;;  %v10387_v10 = vadd.f32 %v9709_v28, %v2550_v27  ;;  %v10390_v46 = vsub.s32 %v10184_v55, %v573_v29  ;;  %v584_v51 = vmul.u32 18, %v583_v34 }
 0x319   : > { %v595_v9 = vmul.u32 18, %v594_v23  ;;  %v605_v44 = vshrl.u32 %v10320_v37, 4  ;;  %v10394_v42 = vmul.u32.u64.low 3817748708, %v10362_v52  ;;  %v10395_v24 = vmul.u32.u64.high 3817748708, %v10362_v52, %v10394_v42 }
 0x31a   : > { %v2889_v17 = vsel %vm10329_vm11, %v10298_v38, 0.0  ;;  %vm10400_vm10 = vcmp.lt.s32.totalorder %v902_v58, 16  ;;  %v13733_v16 = vmov 0  ;;  %v903_v28 = vsel %vm10374_vm5, %v867_v35, %v10303_v11  ;;  %v2555_v23 = vpop.f32.mrb[36].mxu0 }
 0x31b   : > { %v13734_v16 = vsel %vm10400_vm10, 4294967295, %v13733_v16  ;;  %v10408_v55 = vadd.s32 208, %v9727_v4  ;;  %v2923_v37 = vadd.f32 %v2922_v18, %v2888_v7  ;;  %v868_v29 = vadd.s32 18, %v10342_v6  ;;  %v2557_v42 = vpop.f32.mrb[37].mxu0 }
 0x31c   : > { %13735 = vst [vmem:[#allocation29_spill] sm:$0xff] %v13734_v16  ;;  %vm761_vm12 = vcmp.ne.s32.totalorder %v563_v39, 0  ;;  %vm797_vm3 = vcmp.lt.s32.totalorder %v563_v39, 0  ;;  %vm13736_vm11 = vcmp.lt.s32.totalorder %v10342_v6, 0  ;;  %v869_v58 = vadd.s32 18, %v563_v39 }
 0x31d   : > { %vm10415_vm7 = vmand %vm13736_vm11, %vm760_vm4  ;;  %vm762_vm1 = vcmp.ne.s32.totalorder %v10390_v46, 0  ;;  %vm798_vm5 = vcmp.lt.s32.totalorder %v10390_v46, 0  ;;  %v10422_v35 = vadd.s32 216, %v9727_v4  ;;  %v2924_v11 = vadd.f32 %v2923_v37, %v2889_v17 }
 0x31e   : > { %v10425_v18 = vsub.s32 %v10239_v53, %v584_v51  ;;  %v10428_v27 = vsub.s32 %v10247_v20, %v595_v9  ;;  %v606_v13 = vmul.u32 18, %v605_v44  ;;  %v2890_v7 = vsel %vm10344_vm13, %v10314_v25, 0.0  ;;  %vm10438_vm11 = vmand %vm797_vm3, %vm761_vm12  ;;  %v2558_v9 = vpop.f32.mrb[38].mxu0 }
 0x31f   : > { %v10434_v3 = vadd.f32 %v9703_v14, %v2555_v23  ;;  %v10443_v53 = vmul.u32.u64.low 3817748708, %v10408_v55  ;;  %v10444_v51 = vmul.u32.u64.high 3817748708, %v10408_v55, %v10443_v53  ;;  %vm10446_vm4 = vcmp.lt.s32.totalorder %v903_v28, 16  ;;  %v2560_v28 = vpop.f32.mrb[39].mxu0 }
 0x320   : > { %v13741_v20 = vmov 0  ;;  %v904_v14 = vsel %vm10415_vm7, %v868_v29, %v10342_v6  ;;  %v870_v44 = vadd.s32 18, %v10390_v46  ;;  %v616_v37 = vshrl.u32 %v10381_v40, 4  ;;  %vm10471_vm7 = vmand %vm798_vm5, %vm762_vm1 }
 0x321   : > { %v13742_v20 = vsel %vm10446_vm4, 4294967295, %v13741_v20  ;;  %v2891_v23 = vsel %vm10400_vm10, %v10365_v26, 0.0  ;;  %v10459_v42 = vadd.f32 %v9707_v59, %v2558_v9  ;;  %v2925_v57 = vadd.f32 %v2924_v11, %v2890_v7 }
 0x322   : > { %13743 = vst [vmem:[#allocation30_spill] sm:$0xff] %v13742_v20  ;;  %v10462_v53 = vmul.u32.u64.low 3817748708, %v10422_v35  ;;  %v10463_v43 = vmul.u32.u64.high 3817748708, %v10422_v35, %v10462_v53  ;;  %v905_v6 = vsel %vm10438_vm11, %v869_v58, %v563_v39  ;;  %v10476_v59 = vsub.s32 %v10292_v12, %v606_v13  ;;  %v2563_v7 = vpop.f32.mrb[40].mxu0 }
 0x323   : > { %v627_v29 = vshrl.u32 %v10395_v24, 4  ;;  %vm10479_vm3 = vcmp.lt.s32.totalorder %v904_v14, 16  ;;  %v13746_v34 = vmov 0  ;;  %vm763_vm12 = vcmp.ne.s32.totalorder %v10425_v18, 0 }
 0x324   : > { %v13747_v34 = vsel %vm10479_vm3, 4294967295, %v13746_v34  ;;  %vm799_vm11 = vcmp.lt.s32.totalorder %v10425_v18, 0  ;;  %v2926_v39 = vadd.f32 %v2925_v57, %v2891_v23  ;;  %v617_v58 = vmul.u32 18, %v616_v37 }
 0x325   : > { %13748 = vst [vmem:[#allocation31_spill] sm:$0xff] %v13747_v34  ;;  %v10488_v11 = vadd.s32 224, %v9727_v4  ;;  %v2892_v12 = vsel %vm10446_vm4, %v10387_v10, 0.0  ;;  %vm10493_vm5 = vcmp.lt.s32.totalorder %v905_v6, 16  ;;  %v13749_v24 = vmov 0  ;;  %vm10501_vm1 = vmand %vm799_vm11, %vm763_vm12 }
 0x326   : > { %v13750_v24 = vsel %vm10493_vm5, 4294967295, %v13749_v24  ;;  %v906_v13 = vsel %vm10471_vm7, %v870_v44, %v10390_v46  ;;  %v871_v57 = vadd.s32 18, %v10425_v18  ;;  %v872_v14 = vadd.s32 18, %v10428_v27  ;;  %v2565_v44 = vpop.f32.mrb[41].mxu0 }
 0x327   : > { %13751 = vst [vmem:[#allocation32_spill] sm:$0xff] %v13750_v24  ;;  %vm765_vm10 = vcmp.ne.s32.totalorder %v10476_v59, 0  ;;  %v628_v9 = vmul.u32 18, %v627_v29  ;;  %v2893_v37 = vsel %vm10479_vm3, %v10434_v3, 0.0  ;;  %v10512_v46 = vadd.f32 %v9713_v48, %v2563_v7  ;;  %v2566_v40 = vpop.f32.mrb[42].mxu0 }
 0x328   : > { %vm13754_vm7 = vcmp.ne.s32.totalorder %v10428_v27, 0  ;;  %vm13755_vm12 = vcmp.lt.s32.totalorder %v10428_v27, 0  ;;  %v638_v28 = vshrl.u32 %v10444_v51, 4  ;;  %v10524_v53 = vadd.s32 232, %v9727_v4  ;;  %v2568_v20 = vpop.f32.mrb[43].mxu0 }
 0x329   : > { %vm10518_vm11 = vmand %vm13755_vm12, %vm13754_vm7  ;;  %v2927_v6 = vadd.f32 %v2926_v39, %v2892_v12  ;;  %v618_v29 = vsub.s32 %v10350_v47, %v617_v58  ;;  %v10528_v48 = vmul.u32.u64.low 3817748708, %v10488_v11  ;;  %v10529_v7 = vmul.u32.u64.high 3817748708, %v10488_v11, %v10528_v48 }
 0x32a   : > { %vm10531_vm4 = vcmp.lt.s32.totalorder %v906_v13, 16  ;;  %v13758_v44 = vmov 0  ;;  %v907_v34 = vsel %vm10501_vm1, %v871_v57, %v10425_v18  ;;  %v10539_v51 = vadd.f32 %v9717_v62, %v2566_v40  ;;  %v2571_v23 = vpop.f32.mrb[44].mxu0 }
 0x32b   : > { %v13759_v44 = vsel %vm10531_vm4, 4294967295, %v13758_v44  ;;  %v649_v39 = vshrl.u32 %v10463_v43, 4  ;;  %v2928_v12 = vadd.f32 %v2927_v6, %v2893_v37  ;;  %v908_v47 = vsel %vm10518_vm11, %v872_v14, %v10428_v27  ;;  %v2573_v48 = vpop.f32.mrb[45].mxu0 }
 0x32c   : > { %13760 = vst [vmem:[#allocation33_spill] sm:$0xff] %v13759_v44  ;;  %v873_v58 = vadd.s32 18, %v10476_v59  ;;  %v10547_v13 = vsub.s32 %v10362_v52, %v628_v9  ;;  %v2894_v18 = vsel %vm10493_vm5, %v10459_v42, 0.0  ;;  %vm13761_vm1 = vcmp.lt.s32.totalorder %v10476_v59, 0 }
 0x32d   : > { %vm10556_vm7 = vmand %vm13761_vm1, %vm765_vm10  ;;  %v639_v43 = vmul.u32 18, %v638_v28  ;;  %v10561_v27 = vmul.u32.u64.low 3817748708, %v10524_v53  ;;  %v10562_v20 = vmul.u32.u64.high 3817748708, %v10524_v53, %v10561_v27  ;;  %vm766_vm12 = vcmp.ne.s32.totalorder %v618_v29, 0 }
 0x32e   : > { %vm802_vm11 = vcmp.lt.s32.totalorder %v618_v29, 0  ;;  %v10565_v52 = vadd.s32 240, %v9727_v4  ;;  %v2895_v57 = vsel %vm10531_vm4, %v10512_v46, 0.0  ;;  %vm10570_vm5 = vcmp.lt.s32.totalorder %v907_v34, 16 }
 0x32f   : > { %v13764_v17 = vmov 0  ;;  %vm10574_vm10 = vcmp.lt.s32.totalorder %v908_v47, 16  ;;  %v13767_v14 = vmov 0  ;;  %v650_v9 = vmul.u32 18, %v649_v39  ;;  %vm10588_vm1 = vmand %vm802_vm11, %vm766_vm12 }
 0x330   : > { %v13765_v17 = vsel %vm10570_vm5, 4294967295, %v13764_v17  ;;  %v13768_v14 = vsel %vm10574_vm10, 4294967295, %v13767_v14  ;;  %v2929_v37 = vadd.f32 %v2928_v12, %v2894_v18  ;;  %v909_v28 = vsel %vm10556_vm7, %v873_v58, %v10476_v59  ;;  %v2574_v12 = vpop.f32.mrb[46].mxu0 }
 0x331   : > { %13766 = vst [vmem:[#allocation34_spill] sm:$0xff] %v13765_v17  ;;  %13769 = vst [vmem:[#allocation35_spill] sm:$0xff] %v13768_v14  ;;  %v874_v6 = vadd.s32 18, %v618_v29  ;;  %v10582_v40 = vadd.s32 248, %v9727_v4  ;;  %v10585_v34 = vadd.f32 %v9711_v60, %v2571_v23  ;;  %vm767_vm4 = vcmp.ne.s32.totalorder %v10547_v13, 0  ;;  %v2576_v23 = vpop.f32.mrb[47].mxu0 }
 0x332   : > { %vm803_vm3 = vcmp.lt.s32.totalorder %v10547_v13, 0  ;;  %v640_v39 = vsub.s32 %v10408_v55, %v639_v43  ;;  %v2930_v59 = vadd.f32 %v2929_v37, %v2895_v57  ;;  %v660_v58 = vshrl.u32 %v10529_v7, 4 }
 0x333   : > { %v10597_v18 = vmul.u32.u64.low 3817748708, %v10565_v52  ;;  %v10598_v60 = vmul.u32.u64.high 3817748708, %v10565_v52, %v10597_v18  ;;  %v2896_v62 = vsel %vm10570_vm5, %v10539_v51, 0.0  ;;  %v10604_v27 = vadd.f32 %v9715_v61, %v2574_v12  ;;  %vm10625_vm12 = vmand %vm803_vm3, %vm767_vm4  ;;  %v2579_v12 = vpop.f32.mrb[48].mxu0 }
 0x334   : > { %v651_v48 = vsub.s32 %v10422_v35, %v650_v9  ;;  %v910_v55 = vsel %vm10588_vm1, %v874_v6, %v618_v29  ;;  %v875_v43 = vadd.s32 18, %v10547_v13  ;;  %v2897_v37 = vsel %vm10574_vm10, %v10585_v34, 0.0 }
 0x335   : > { %13772 = vst [vmem:[#allocation36_spill] sm:$0xff] %v10604_v27  ;;  %v10611_v7 = vmul.u32.u64.low 3817748708, %v10582_v40  ;;  %v10612_v57 = vmul.u32.u64.high 3817748708, %v10582_v40, %v10611_v7  ;;  %vm10617_vm7 = vcmp.lt.s32.totalorder %v909_v28, 16  ;;  %v13773_v18 = vmov 0 }
 0x336   : > { %v13774_v18 = vsel %vm10617_vm7, 4294967295, %v13773_v18  ;;  %vm768_vm11 = vcmp.ne.s32.totalorder %v640_v39, 0  ;;  %v671_v35 = vshrl.u32 %v10562_v20, 4  ;;  %v2931_v29 = vadd.f32 %v2930_v59, %v2896_v62  ;;  %v2581_v62 = vpop.f32.mrb[49].mxu0 }
 0x337   : > { %13775 = vst [vmem:[#allocation37_spill] sm:$0xff] %v13774_v18  ;;  %vm804_vm1 = vcmp.lt.s32.totalorder %v640_v39, 0  ;;  %v661_v9 = vmul.u32 18, %v660_v58  ;;  %v10631_v6 = vadd.s32 256, %v9727_v4  ;;  %vm10633_vm10 = vcmp.lt.s32.totalorder %v910_v55, 16 }
 0x338   : > { %v13778_v28 = vmov 0  ;;  %vm769_vm5 = vcmp.ne.s32.totalorder %v651_v48, 0  ;;  %vm805_vm13 = vcmp.lt.s32.totalorder %v651_v48, 0  ;;  %v2932_v47 = vadd.f32 %v2931_v29, %v2897_v37  ;;  %vm10648_vm4 = vmand %vm804_vm1, %vm768_vm11 }
 0x339   : > { %v13779_v28 = vsel %vm10633_vm10, 4294967295, %v13778_v28  ;;  %v911_v23 = vsel %vm10625_vm12, %v875_v43, %v10547_v13  ;;  %v876_v7 = vadd.s32 18, %v640_v39  ;;  %v877_v20 = vadd.s32 18, %v651_v48  ;;  %v2582_v13 = vpop.f32.mrb[50].mxu0  ;;  %vm10656_vm3 = vmand %vm805_vm13, %vm769_vm5 }
 0x33a   : > { %13780 = vst [vmem:[#allocation38_spill] sm:$0xff] %v13779_v28  ;;  %v2898_v59 = vsel %vm10617_vm7, %v10604_v27, 0.0  ;;  %v10644_v58 = vadd.f32 %v9721_v0, %v2579_v12  ;;  %v672_v37 = vmul.u32 18, %v671_v35  ;;  %v10653_v61 = vadd.s32 264, %v9727_v4  ;;  %v2584_v14 = vpop.f32.mrb[51].mxu0 }
 0x33b   : > { %v662_v0 = vsub.s32 %v10488_v11, %v661_v9  ;;  %v682_v29 = vshrl.u32 %v10598_v60, 4  ;;  %v10663_v12 = vmul.u32.u64.low 3817748708, %v10631_v6  ;;  %v10664_v62 = vmul.u32.u64.high 3817748708, %v10631_v6, %v10663_v12 }
 0x33c   : > { %v2899_v35 = vsel %vm10633_vm10, %v10644_v58, 0.0  ;;  %v10670_v18 = vadd.f32 %v9725_v8, %v2582_v13  ;;  %v2933_v17 = vadd.f32 %v2932_v47, %v2898_v59  ;;  %vm10672_vm13 = vcmp.lt.s32.totalorder %v911_v23, 16 }
 0x33d   : > { %v13785_v27 = vmov 0  ;;  %v912_v11 = vsel %vm10648_vm4, %v876_v7, %v640_v39  ;;  %v693_v60 = vshrl.u32 %v10612_v57, 4  ;;  %v913_v9 = vsel %vm10656_vm3, %v877_v20, %v651_v48 }
 0x33e   : > { %v13786_v27 = vsel %vm10672_vm13, 4294967295, %v13785_v27  ;;  %v673_v12 = vsub.s32 %v10524_v53, %v672_v37  ;;  %v10683_v28 = vmul.u32.u64.low 3817748708, %v10653_v61  ;;  %v10684_v8 = vmul.u32.u64.high 3817748708, %v10653_v61, %v10683_v28  ;;  %v2587_v53 = vpop.f32.mrb[52].mxu0 }
 0x33f   : > { %13787 = vst [vmem:[#allocation39_spill] sm:$0xff] %v13786_v27  ;;  %v2934_v14 = vadd.f32 %v2933_v17, %v2899_v35  ;;  %vm770_vm5 = vcmp.ne.s32.totalorder %v662_v0, 0  ;;  %vm806_vm12 = vcmp.lt.s32.totalorder %v662_v0, 0  ;;  %v683_v47 = vmul.u32 18, %v682_v29  ;;  %v2589_v20 = vpop.f32.mrb[53].mxu0 }
 0x340   : > { %v2900_v23 = vsel %vm10672_vm13, %v10670_v18, 0.0  ;;  %v10690_v39 = vadd.s32 272, %v9727_v4  ;;  %vm10692_vm11 = vcmp.lt.s32.totalorder %v912_v11, 16  ;;  %v13788_v57 = vmov 0  ;;  %vm10703_vm4 = vmand %vm806_vm12, %vm770_vm5  ;;  %v2590_v13 = vpop.f32.mrb[54].mxu0 }
 0x341   : > { %v13789_v57 = vsel %vm10692_vm11, 4294967295, %v13788_v57  ;;  %vm10696_vm1 = vcmp.lt.s32.totalorder %v913_v9, 16  ;;  %v13791_v48 = vmov 0  ;;  %v878_v17 = vadd.s32 18, %v662_v0 }
 0x342   : > { %13790 = vst [vmem:[#allocation40_spill] sm:$0xff] %v13789_v57  ;;  %v13792_v48 = vsel %vm10696_vm1, 4294967295, %v13791_v48  ;;  %v694_v28 = vmul.u32 18, %v693_v60  ;;  %v10701_v7 = vadd.f32 %v9719_v63, %v2587_v53  ;;  %vm771_vm3 = vcmp.ne.s32.totalorder %v673_v12, 0  ;;  %v2592_v60 = vpop.f32.mrb[55].mxu0 }
 0x343   : > { %13793 = vst [vmem:[#allocation41_spill] sm:$0xff] %v13792_v48  ;;  %vm807_vm13 = vcmp.lt.s32.totalorder %v673_v12, 0  ;;  %v10708_v55 = vadd.s32 280, %v9727_v4  ;;  %v2935_v37 = vadd.f32 %v2934_v14, %v2900_v23  ;;  %v879_v43 = vadd.s32 18, %v673_v12  ;;  %v2595_v59 = vpop.f32.mrb[56].mxu0 }
 0x344   : > { %v684_v29 = vsub.s32 %v10565_v52, %v683_v47  ;;  %v704_v35 = vshrl.u32 %v10664_v62, 4  ;;  %v2901_v63 = vsel %vm10692_vm11, %v10701_v7, 0.0  ;;  %v10716_v11 = vadd.f32 %v9723_v2, %v2590_v13  ;;  %vm10725_vm5 = vmand %vm807_vm13, %vm771_vm3 }
 0x345   : > { %v10719_v9 = vmul.u32.u64.low 3817748708, %v10690_v39  ;;  %v10720_v53 = vmul.u32.u64.high 3817748708, %v10690_v39, %v10719_v9  ;;  %v2936_v4 = vadd.f32 %v2935_v37, %v2901_v63  ;;  %v914_v14 = vsel %vm10703_vm4, %v878_v17, %v662_v0 }
 0x346   : > { %v695_v62 = vsub.s32 %v10582_v40, %v694_v28  ;;  %v2902_v2 = vsel %vm10696_vm1, %v10716_v11, 0.0  ;;  %v715_v47 = vshrl.u32 %v10684_v8, 4  ;;  %v915_v0 = vsel %vm10725_vm5, %v879_v43, %v673_v12  ;;  %v2597_v8 = vpop.f32.mrb[57].mxu0 }
 0x347   : > { %v10735_v23 = vmul.u32.u64.low 3817748708, %v10708_v55  ;;  %v10736_v20 = vmul.u32.u64.high 3817748708, %v10708_v55, %v10735_v23  ;;  %v2937_v37 = vadd.f32 %v2936_v4, %v2902_v2  ;;  %vm772_vm13 = vcmp.ne.s32.totalorder %v684_v29, 0  ;;  %v2598_v60 = vpop.f32.mrb[58].mxu0 }
 0x348   : > { %vm808_vm12 = vcmp.lt.s32.totalorder %v684_v29, 0  ;;  %v705_v17 = vmul.u32 18, %v704_v35  ;;  %vm10740_vm4 = vcmp.lt.s32.totalorder %v914_v14, 16  ;;  %v13798_v40 = vmov 0  ;;  %v2600_v4 = vpop.f32.mrb[59].mxu0 }
 0x349   : > { %v13799_v40 = vsel %vm10740_vm4, 4294967295, %v13798_v40  ;;  %v880_v28 = vadd.s32 18, %v684_v29  ;;  %v10745_v13 = vadd.f32 %v9733_v30, %v2595_v59  ;;  %vm773_vm3 = vcmp.ne.s32.totalorder %v695_v62, 0  ;;  %vm10752_vm5 = vmand %vm808_vm12, %vm772_vm13 }
 0x34a   : > { %13800 = vst [vmem:[#allocation42_spill] sm:$0xff] %v13799_v40  ;;  %vm809_vm1 = vcmp.lt.s32.totalorder %v695_v62, 0  ;;  %v716_v63 = vmul.u32 18, %v715_v47  ;;  %vm10747_vm11 = vcmp.lt.s32.totalorder %v915_v0, 16  ;;  %v13801_v9 = vmov 0 }
 0x34b   : > { %v13802_v9 = vsel %vm10747_vm11, 4294967295, %v13801_v9  ;;  %v881_v43 = vadd.s32 18, %v695_v62  ;;  %v2903_v30 = vsel %vm10740_vm4, %v10745_v13, 0.0  ;;  %v10760_v35 = vadd.f32 %v9741_v45, %v2598_v60  ;;  %vm10764_vm10 = vmand %vm809_vm1, %vm773_vm3 }
 0x34c   : > { %13803 = vst [vmem:[#allocation43_spill] sm:$0xff] %v13802_v9  ;;  %v706_v14 = vsub.s32 %v10631_v6, %v705_v17  ;;  %v726_v52 = vshrl.u32 %v10720_v53, 4  ;;  %v2938_v2 = vadd.f32 %v2937_v37, %v2903_v30  ;;  %v916_v0 = vsel %vm10752_vm5, %v880_v28, %v684_v29  ;;  %v2603_v17 = vpop.f32.mrb[60].mxu0 }
 0x34d   : > { %v2904_v23 = vsel %vm10747_vm11, %v10760_v35, 0.0  ;;  %v717_v45 = vsub.s32 %v10653_v61, %v716_v63  ;;  %v737_v59 = vshrl.u32 %v10736_v20, 4  ;;  %v917_v6 = vsel %vm10764_vm10, %v881_v43, %v695_v62  ;;  %v2605_v29 = vpop.f32.mrb[61].mxu0  ;;  %v13816_v43 = vld [vmem:[#allocation5_spill] sm:$0xff] }
 0x34e   : > { %v2939_v8 = vadd.f32 %v2938_v2, %v2904_v23  ;;  %vm774_vm13 = vcmp.ne.s32.totalorder %v706_v14, 0  ;;  %vm810_vm1 = vcmp.lt.s32.totalorder %v706_v14, 0  ;;  %v727_v53 = vmul.u32 18, %v726_v52  ;;  %v2606_v62 = vpop.f32.mrb[62].mxu0 }
 0x34f   : > { %vm10777_vm12 = vcmp.lt.s32.totalorder %v916_v0, 16  ;;  %v13808_v37 = vmov 0  ;;  %v882_v60 = vadd.s32 18, %v706_v14  ;;  %v10782_v12 = vadd.f32 %v9729_v22, %v2603_v17  ;;  %vm10788_vm10 = vmand %vm810_vm1, %vm774_vm13  ;;  %v2608_v30 = vpop.f32.mrb[63].mxu0 }
 0x350   : > { %v13809_v37 = vsel %vm10777_vm12, 4294967295, %v13808_v37  ;;  %vm775_vm3 = vcmp.ne.s32.totalorder %v717_v45, 0  ;;  %vm811_vm5 = vcmp.lt.s32.totalorder %v717_v45, 0  ;;  %v738_v61 = vmul.u32 18, %v737_v59 }
 0x351   : > { %13810 = vst [vmem:[#allocation44_spill] sm:$0xff] %v13809_v37  ;;  %vm10784_vm11 = vcmp.lt.s32.totalorder %v917_v6, 16  ;;  %v13811_v20 = vmov 0  ;;  %v2905_v63 = vsel %vm10777_vm12, %v10782_v12, 0.0  ;;  %v10796_v22 = vadd.f32 %v13816_v43, %v2606_v62  ;;  %vm10799_vm4 = vmand %vm811_vm5, %vm775_vm3 }
 0x352   : > { %v13812_v20 = vsel %vm10784_vm11, 4294967295, %v13811_v20  ;;  %v883_v4 = vadd.s32 18, %v717_v45  ;;  %v728_v52 = vsub.s32 %v10690_v39, %v727_v53  ;;  %v2940_v2 = vadd.f32 %v2939_v8, %v2905_v63  ;;  %v2611_v39 = vpop.f32.mrb[64].mxu0  ;;  %v13822_v53 = vld [vmem:[#allocation7_spill] sm:$0xff] }
 0x353   : > { %13813 = vst [vmem:[#allocation45_spill] sm:$0xff] %v13812_v20  ;;  %v2906_v23 = vsel %vm10784_vm11, %v10796_v22, 0.0  ;;  %v918_v0 = vsel %vm10788_vm10, %v882_v60, %v706_v14  ;;  %v739_v59 = vsub.s32 %v10708_v55, %v738_v61  ;;  %v13819_v8 = vmov 0  ;;  %v2613_v62 = vpop.f32.mrb[65].mxu0  ;;  %v8752_v55 = vld [vmem:[%s13487_s2] sm:$0xff]   ;;  %v13826_v61 = vld [vmem:[#allocation9_spill] sm:$0xff] }
 0x354   : > { %v2941_v6 = vadd.f32 %v2940_v2, %v2906_v23  ;;  %v919_v17 = vsel %vm10799_vm4, %v883_v4, %v717_v45  ;;  %vm776_vm13 = vcmp.ne.s32.totalorder %v728_v52, 0  ;;  %vm812_vm1 = vcmp.lt.s32.totalorder %v728_v52, 0  ;;  %v2614_v14 = vpop.f32.mrb[66].mxu0  ;;  %4246 = vmatpush1.bf16.msra.mxu0 %v8752_v55  ;;  %v13831_v62 = vld [vmem:[#allocation6_spill] sm:$0xff] }
 0x355   : > { %vm10811_vm3 = vcmp.lt.s32.totalorder %v918_v0, 16  ;;  %v10816_v29 = vadd.f32 %v13822_v53, %v2611_v39  ;;  %v884_v63 = vadd.s32 18, %v728_v52  ;;  %vm777_vm5 = vcmp.ne.s32.totalorder %v739_v59, 0  ;;  %vm848_vm11 = vmand %vm812_vm1, %vm776_vm13  ;;  %v2616_v43 = vpop.f32.mrb[67].mxu0  ;;  %v8754_v0 = vld [vmem:[%s13487_s2 + $0x8] sm:$0xff]  }
 0x356   : > { %v13820_v8 = vsel %vm10811_vm3, 4294967295, %v13819_v8  ;;  %vm813_vm10 = vcmp.lt.s32.totalorder %v739_v59, 0  ;;  %vm10821_vm4 = vcmp.lt.s32.totalorder %v919_v17, 16  ;;  %v13823_v45 = vmov 0  ;;  %v13835_v43 = vld [vmem:[#allocation8_spill] sm:$0xff] }
 0x357   : > { %13821 = vst [vmem:[#allocation5_spill] sm:$0xff] %v13820_v8  ;;  %v13824_v45 = vsel %vm10821_vm4, 4294967295, %v13823_v45  ;;  %v2907_v60 = vsel %vm10811_vm3, %v10816_v29, 0.0  ;;  %v10829_v28 = vadd.f32 %v13826_v61, %v2614_v14  ;;  %v885_v30 = vadd.s32 18, %v739_v59  ;;  %vm849_vm12 = vmand %vm813_vm10, %vm777_vm5 }
 0x358   : > { %13825 = vst [vmem:[#allocation7_spill] sm:$0xff] %v13824_v45  ;;  %v2942_v4 = vadd.f32 %v2941_v6, %v2907_v60  ;;  %v13827_v2 = vmov 0   ;;  %v920_v23 = vsel %vm848_vm11, %v884_v63, %v728_v52  ;;  %v13828_v53 = vmov 0  ;;  %v8753_v52 = vld [vmem:[%s13487_s2 + $0x80] sm:$0xff]  }
 0x359   : > { %4247 = vmatprep.subr.bf16.mxu0 %v13827_v2  ;;  %v2908_v47 = vsel %vm10821_vm4, %v10829_v28, 0.0  ;;  %v921_v39 = vsel %vm849_vm12, %v885_v30, %v739_v59  ;;  %vm10838_vm13 = vcmp.lt.s32.totalorder %v920_v23, 16  ;;  %v8756_v59 = vld [vmem:[%s13487_s2 + $0x10] sm:$0xff]   ;;  %v13832_v63 = vmov 0  ;;  %4423 = vmatpush1.bf16.msra.mxu1 %v8753_v52 }
 0x35a   : > { %v2943_v17 = vadd.f32 %v2942_v4, %v2908_v47  ;;  %4248 = vmatpush1.bf16.msra.mxu0 %v8754_v0  ;;  %v13829_v53 = vsel %vm10838_vm13, 4294967295, %v13828_v53  ;;  %v2619_v6 = vpop.f32.mrb[68].mxu0  ;;  %vm10852_vm11 = vcmp.lt.s32.totalorder %v921_v39, 16  ;;  %4424 = vmatprep.subr.bf16.mxu1 %v13827_v2  ;;  %v8755_v0 = vld [vmem:[%s13487_s2 + $0x88] sm:$0xff]   ;;  %v8758_v39 = vld [vmem:[%s13487_s2 + $0x18] sm:$0xff]   ;;  %vm13855_vm10 = vnez %v13703_v19 }
 0x35b   : > { %13830 = vst [vmem:[#allocation9_spill] sm:$0xff] %v13829_v53  ;;  %4249 = vmatprep.subr.bf16.mxu0 %v13827_v2  ;;  %v10844_v55 = vadd.f32 %v13831_v62, %v2619_v6  ;;  %v2621_v14 = vpop.f32.mrb[69].mxu0  ;;  %v13833_v63 = vsel %vm10852_vm11, 4294967295, %v13832_v63  ;;  %v8757_v62 = vld [vmem:[%s13487_s2 + $0x90] sm:$0xff]  }
 0x35c   : > { %13834 = vst [vmem:[#allocation6_spill] sm:$0xff] %v13833_v63  ;;  %v2622_v60 = vpop.f32.mrb[70].mxu0  ;;  %v8760_v14 = vld [vmem:[%s13487_s2 + $0x20] sm:$0xff]  }
 0x35d   : > { %v2909_v61 = vsel %vm10838_vm13, %v10844_v55, 0.0  ;;  %v10860_v30 = vadd.f32 %v13835_v43, %v2622_v60  ;;  %v2624_v4 = vpop.f32.mrb[71].mxu0  ;;  %4425 = vmatpush1.bf16.msra.mxu1 %v8755_v0  ;;  %v8759_v60 = vld [vmem:[%s13487_s2 + $0x98] sm:$0xff]  }
 0x35e   : > { %4250 = vmatpush1.bf16.msra.mxu0 %v8756_v59  ;;  %v2944_v47 = vadd.f32 %v2943_v17, %v2909_v61  ;;  %4426 = vmatprep.subr.bf16.mxu1 %v13827_v2  ;;  %v8762_v61 = vld [vmem:[%s13487_s2 + $0x28] sm:$0xff]  }
 0x35f   : > { %4251 = vmatprep.subr.bf16.mxu0 %v13827_v2  ;;  %v2910_v23 = vsel %vm10852_vm11, %v10860_v30, 0.0 }
 0x360   : > { %v2945_v6 = vadd.f32 %v2944_v47, %v2910_v23  ;;  %v8761_v47 = vld [vmem:[%s13487_s2 + $0xa0] sm:$0xff]   ;;  %v8764_v23 = vld [vmem:[%s13487_s2 + $0x30] sm:$0xff]  }
 0x361   : > { %4427 = vmatpush1.bf16.msra.mxu1 %v8757_v62  ;;  %v8765_v62 = vld [vmem:[%s13487_s2 + $0xb0] sm:$0xff]  }
 0x362   : > { %4252 = vmatpush1.bf16.msra.mxu0 %v8758_v39  ;;  %v2946_v17 = vrot.slane %v2945_v6, 4  ;;  %4428 = vmatprep.subr.bf16.mxu1 %v13827_v2  ;;  %v8763_v39 = vld [vmem:[%s13487_s2 + $0xa8] sm:$0xff]  }
 0x363   : > { %4253 = vmatprep.subr.bf16.mxu0 %v13827_v2 }
 0x364   : > { %v2947_v52 = vadd.f32 %v2946_v17, %v2945_v6  ;;  %v8766_v6 = vld [vmem:[%s13487_s2 + $0x38] sm:$0xff]  }
 0x365   : > { %4429 = vmatpush1.bf16.msra.mxu1 %v8759_v60 }
 0x366   : > { %4254 = vmatpush1.bf16.msra.mxu0 %v8760_v14  ;;  %v2948_v59 = vrot.slane %v2947_v52, 2  ;;  %4430 = vmatprep.subr.bf16.mxu1 %v13827_v2  ;;  %v8767_v14 = vld [vmem:[%s13487_s2 + $0x40] sm:$0xff]  }
 0x367   : > { %4255 = vmatprep.subr.bf16.mxu0 %v13827_v2 }
 0x368   : > { %v2949_v43 = vadd.f32 %v2948_v59, %v2947_v52 }
 0x369   : > { %4431 = vmatpush1.bf16.msra.mxu1 %v8761_v47  ;;  %v8770_v47 = vld [vmem:[%s13487_s2 + $0xc0] sm:$0xff]  }
 0x36a   : > { %4256 = vmatpush1.bf16.msra.mxu0 %v8762_v61  ;;  %v2950_v4 = vrot.slane %v2949_v43, 1  ;;  %4432 = vmatprep.subr.bf16.mxu1 %v13827_v2 }
 0x36b   : > { %4257 = vmatprep.subr.bf16.mxu0 %v13827_v2 }
 0x36c   : > { %v2951_v0 = vadd.f32 %v2950_v4, %v2949_v43  ;;  %v13837_v4 = vld [vmem:[#allocation11_spill] sm:$0xff] }
 0x36d   : > { %4433 = vmatpush1.bf16.msra.mxu1 %v8763_v39 }
 0x36e   : > { %4258 = vmatpush1.bf16.msra.mxu0 %v8764_v23  ;;  %v10905_v17 = vmul.f32 0.00390625, %v2951_v0  ;;  %4434 = vmatprep.subr.bf16.mxu1 %v13827_v2  ;;  %v8768_v23 = vld [vmem:[%s13487_s2 + $0xb8] sm:$0xff]   ;;  %v8769_v0 = vld [vmem:[%s13487_s2 + $0x48] sm:$0xff]  }
 0x36f   : > { %4259 = vmatprep.subr.bf16.mxu0 %v13827_v2 }
 0x371   : > { %4435 = vmatpush1.bf16.msra.mxu1 %v8765_v62  ;;  %v13836_v62 = vld [vmem:[#allocation10_spill] sm:$0xff] }
 0x372   : > { %4260 = vmatpush1.bf16.msra.mxu0 %v8766_v6  ;;  %4436 = vmatprep.subr.bf16.mxu1 %v13827_v2  ;;  %v8771_v6 = vld [vmem:[%s13487_s2 + $0x50] sm:$0xff]   ;;  %v2954_v39 = vsub.f32 %v13836_v62, %v10905_v17 }
 0x373   : > { %4261 = vmatprep.subr.bf16.mxu0 %v13827_v2 }
 0x375   : > { %4437 = vmatpush1.bf16.msra.mxu1 %v8768_v23  ;;  %v8772_v23 = vld [vmem:[%s13487_s2 + $0xc8] sm:$0xff]  }
 0x376   : > { %4262 = vmatpush1.bf16.msra.mxu0 %v8767_v14  ;;  %4438 = vmatprep.subr.bf16.mxu1 %v13827_v2  ;;  %v2953_v14 = vsub.f32 %v9774_v5, %v10905_v17  ;;  %v2955_v5 = vsub.f32 %v13837_v4, %v10905_v17 }
 0x377   : > { %4263 = vmatprep.subr.bf16.mxu0 %v13827_v2 }
 0x378   : > { %v10976_v62 = vsel %vm9922_vm15, %v2953_v14, 0.0  ;;  %v8777_v14 = vld [vmem:[%s13487_s2 + $0x68] sm:$0xff]   ;;  %v11000_v59 = vsel %vm9926_vm0, %v2955_v5, 0.0  ;;  %v8778_v5 = vld [vmem:[%s13487_s2 + $0xe0] sm:$0xff]  }
 0x379   : > { %4439 = vmatpush1.bf16.msra.mxu1 %v8770_v47  ;;  %v8774_v47 = vld [vmem:[%s13487_s2 + $0xd0] sm:$0xff]   ;;  %v3025_v60 = vmul.f32 %v10976_v62, %v10976_v62  ;;  %13842 = vst [vmem:[#allocation10_spill] sm:$0xff] %v11000_v59  ;;  %v3027_v43 = vmul.f32 %v11000_v59, %v11000_v59 }
 0x37a   : > { %4264 = vmatpush1.bf16.msra.mxu0 %v8769_v0  ;;  %4440 = vmatprep.subr.bf16.mxu1 %v13827_v2  ;;  %v8773_v0 = vld [vmem:[%s13487_s2 + $0x58] sm:$0xff]   ;;  %v8900_v59 = vld [vmem:[#allocation2 + $0x10] sm:$0xff] }
 0x37b   : > { %4265 = vmatprep.subr.bf16.mxu0 %v13827_v2 }
 0x37d   : > { %4441 = vmatpush1.bf16.msra.mxu1 %v8772_v23  ;;  %v10980_v23 = vsel %vm9917_vm14, %v2954_v39, 0.0  ;;  %v8776_v39 = vld [vmem:[%s13487_s2 + $0xd8] sm:$0xff]  }
 0x37e   : > { %4266 = vmatpush1.bf16.msra.mxu0 %v8771_v6  ;;  %4442 = vmatprep.subr.bf16.mxu1 %v13827_v2  ;;  %v8775_v6 = vld [vmem:[%s13487_s2 + $0x60] sm:$0xff]   ;;  %13840 = vst [vmem:[#allocation8_spill] sm:$0xff] %v10980_v23  ;;  %v3026_v4 = vmul.f32 %v10980_v23, %v10980_v23  ;;  %v3321_v23 = vpack.c.bf16 %v8900_v59, %v8900_v59  ;;  %v8783_v59 = vld [vmem:[%s13487_s2 + $0xf8] sm:$0xff]  }
 0x37f   : > { %4267 = vmatprep.subr.bf16.mxu0 %v13827_v2 }
 0x381   : > { %4443 = vmatpush1.bf16.msra.mxu1 %v8774_v47  ;;  %v3339_v47 = vld [vmem:[#allocation2 + $0x1] sm:$0xff] }
 0x382   : > { %4268 = vmatpush1.bf16.msra.mxu0 %v8773_v0  ;;  %v2956_v0 = vsub.f32 %v9841_v56, %v10905_v17  ;;  %4444 = vmatprep.subr.bf16.mxu1 %v13827_v2  ;;  %v2957_v56 = vsub.f32 %v9890_v33, %v10905_v17  ;;  %v3061_v33 = vadd.f32 %v3026_v4, %v3025_v60 }
 0x383   : > { %4269 = vmatprep.subr.bf16.mxu0 %v13827_v2 }
 0x384   : > { %v11007_v52 = vsel %vm9993_vm8, %v2956_v0, 0.0  ;;  %v11022_v21 = vsel %vm10004_vm9, %v2957_v56, 0.0  ;;  %v3062_v4 = vadd.f32 %v3061_v33, %v3027_v43  ;;  %v8780_v0 = vld [vmem:[%s13487_s2 + $0xe8] sm:$0xff]   ;;  %v8781_v43 = vld [vmem:[%s13487_s2 + $0x78] sm:$0xff]  }
 0x385   : > { %4445 = vmatpush1.bf16.msra.mxu1 %v8776_v39  ;;  %13843 = vst [vmem:[#allocation11_spill] sm:$0xff] %v11007_v52  ;;  %v8779_v39 = vld [vmem:[%s13487_s2 + $0x70] sm:$0xff]   ;;  %13845 = vst [vmem:[#allocation46_spill] sm:$0xff] %v11022_v21  ;;  %v3028_v60 = vmul.f32 %v11007_v52, %v11007_v52 }
 0x386   : > { %4270 = vmatpush1.bf16.msra.mxu0 %v8775_v6  ;;  %v2958_v6 = vsub.f32 %v9909_v32, %v10905_v17  ;;  %4446 = vmatprep.subr.bf16.mxu1 %v13827_v2  ;;  %v2959_v32 = vsub.f32 %v9957_v15, %v10905_v17  ;;  %v3029_v15 = vmul.f32 %v11022_v21, %v11022_v21  ;;  %v8782_v52 = vld [vmem:[%s13487_s2 + $0xf0] sm:$0xff]  }
 0x387   : > { %4271 = vmatprep.subr.bf16.mxu0 %v13827_v2  ;;  %v3063_v56 = vadd.f32 %v3062_v4, %v3028_v60  ;;  %v3340_v60 = vld [vmem:[#allocation2 + $0x9] sm:$0xff] }
 0x388   : > { %v11031_v61 = vsel %vm10027_vm2, %v2958_v6, 0.0  ;;  %v13848_v6 = vld [vmem:[#allocation19_spill] sm:$0xff]  ;;  %v3375_v21 = vpack.c.bf16 %v3340_v60, %v3339_v47  ;;  %v2963_v47 = vsub.f32 %v10122_v31, %v10905_v17 }
 0x389   : > { %4447 = vmatpush1.bf16.msra.mxu1 %v8778_v5  ;;  %vm13849_vm12 = vnez %v13848_v6  ;;  %v3064_v4 = vadd.f32 %v3063_v56, %v3029_v15  ;;  %v13850_v6 = vld [vmem:[#allocation20_spill] sm:$0xff]  ;;  %v13852_v56 = vld [vmem:[#allocation21_spill] sm:$0xff] }
 0x38a   : > { %4272 = vmatpush1.bf16.msra.mxu0 %v8777_v14  ;;  %v2960_v14 = vsub.f32 %v9987_v36, %v10905_v17  ;;  %4448 = vmatprep.subr.bf16.mxu1 %v13827_v2  ;;  %v13847_v36 = vld [vmem:[#allocation18_spill] sm:$0xff]  ;;  %v11046_v5 = vsel %vm13849_vm12, %v2959_v32, 0.0  ;;  %vm13851_vm1 = vnez %v13850_v6  ;;  %vm13853_vm5 = vnez %v13852_v56 }
 0x38b   : > { %4273 = vmatprep.subr.bf16.mxu0 %v13827_v2  ;;  %v2961_v33 = vsub.f32 %v13847_v36, %v10905_v17  ;;  %v2962_v36 = vsub.f32 %v10078_v50, %v10905_v17  ;;  %v3031_v15 = vmul.f32 %v11046_v5, %v11046_v5  ;;  %4277 = vmatprep.mubr.bf16.mxu0 %v3375_v21 }
 0x38c   : > { %v11058_v32 = vsel %vm13851_vm1, %v2960_v14, 0.0 }
 0x38d   : > { %4449 = vmatpush1.bf16.msra.mxu1 %v8780_v0  ;;  %v11067_v50 = vsel %vm13853_vm5, %v2961_v33, 0.0  ;;  %v3032_v14 = vmul.f32 %v11058_v32, %v11058_v32 }
 0x38e   : > { %4274 = vmatpush1.bf16.msra.mxu0 %v8779_v39  ;;  %v3030_v39 = vmul.f32 %v11031_v61, %v11031_v61  ;;  %4450 = vmatprep.subr.bf16.mxu1 %v13827_v2  ;;  %v3033_v31 = vmul.f32 %v11067_v50, %v11067_v50 }
 0x38f   : > { %4275 = vmatprep.subr.bf16.mxu0 %v13827_v2 }
 0x390   : > { %v3065_v0 = vadd.f32 %v3064_v4, %v3030_v39  ;;  %v11078_v39 = vsel %vm10159_vm6, %v2962_v36, 0.0  ;;  %v11087_v4 = vsel %vm13855_vm10, %v2963_v47, 0.0  ;;  %vm13856_vm6 = vnez %v13708_v41 }
 0x391   : > { %4451 = vmatpush1.bf16.msra.mxu1 %v8782_v52  ;;  %v2965_v52 = vsub.f32 %v10201_v1, %v10905_v17  ;;  %v3035_v1 = vmul.f32 %v11087_v4, %v11087_v4  ;;  %v2967_v47 = vsub.f32 %v10298_v38, %v10905_v17  ;;  %v2969_v38 = vsub.f32 %v10365_v26, %v10905_v17 }
 0x392   : > { %4276 = vmatpush1.bf16.msra.mxu0 %v8781_v43  ;;  %v3066_v60 = vadd.f32 %v3065_v0, %v3031_v15  ;;  %v2964_v43 = vsub.f32 %v10154_v54, %v10905_v17  ;;  %4452 = vmatprep.subr.bf16.mxu1 %v13827_v2  ;;  %v3034_v54 = vmul.f32 %v11078_v39, %v11078_v39 }
 0x393   : > { %v2971_v26 = vsub.f32 %v10434_v3, %v10905_v17  ;;  %v2973_v3 = vsub.f32 %v10512_v46, %v10905_v17  ;;  %v2975_v46 = vsub.f32 %v10585_v34, %v10905_v17  ;;  %v2977_v34 = vsub.f32 %v10644_v58, %v10905_v17 }
 0x394   : > { %v3067_v33 = vadd.f32 %v3066_v60, %v3032_v14  ;;  %v11095_v36 = vsel %vm13856_vm6, %v2964_v43, 0.0  ;;  %v13857_v14 = vld [vmem:[#allocation25_spill] sm:$0xff]  ;;  %v2968_v43 = vsub.f32 %v10314_v25, %v10905_v17  ;;  %v2970_v25 = vsub.f32 %v10387_v10, %v10905_v17 }
 0x395   : > { %4278 = vmatmul.mubr.bf16.vlgmr.msra.gmra.mrb[72].mxu0 %v3321_v23  ;;  %4453 = vmatpush1.bf16.msra.mxu1 %v8783_v59  ;;  %v2966_v23 = vsub.f32 %v10236_v49, %v10905_v17  ;;  %vm13858_vm10 = vnez %v13857_v14  ;;  %v3036_v49 = vmul.f32 %v11095_v36, %v11095_v36  ;;  %v2972_v10 = vsub.f32 %v10459_v42, %v10905_v17 }
 0x396   : > { %v3068_v15 = vadd.f32 %v3067_v33, %v3033_v31  ;;  %4599 = vmatprep.subr.bf16.mxu1 %v13827_v2  ;;  %v11104_v60 = vsel %vm13858_vm10, %v2965_v52, 0.0  ;;  %v13859_v31 = vld [vmem:[#allocation26_spill] sm:$0xff]  ;;  %v13861_v52 = vld [vmem:[#allocation27_spill] sm:$0xff]  ;;  %v2974_v42 = vsub.f32 %v10539_v51, %v10905_v17  ;;  %v13872_v51 = vld [vmem:[#allocation36_spill] sm:$0xff] }
 0x397   : > { %vm13860_vm6 = vnez %v13859_v31  ;;  %vm13862_vm10 = vnez %v13861_v52 }
 0x398   : > { %v3069_v0 = vadd.f32 %v3068_v15, %v3034_v54  ;;  %v11112_v33 = vsel %vm13860_vm6, %v2966_v23, 0.0  ;;  %v3037_v54 = vmul.f32 %v11104_v60, %v11104_v60  ;;  %v11120_v14 = vsel %vm13862_vm10, %v2967_v47, 0.0  ;;  %v13863_v23 = vld [vmem:[#allocation28_spill] sm:$0xff] }
 0x399   : > { %vm13864_vm6 = vnez %v13863_v23  ;;  %vm13865_vm10 = vnez %v13734_v16 }
 0x39a   : > { %v3070_v59 = vadd.f32 %v3069_v0, %v3035_v1  ;;  %v3038_v1 = vmul.f32 %v11112_v33, %v11112_v33  ;;  %v11128_v31 = vsel %vm13864_vm6, %v2968_v43, 0.0  ;;  %v11136_v47 = vsel %vm13865_vm10, %v2969_v38, 0.0  ;;  %v13866_v43 = vld [vmem:[#allocation30_spill] sm:$0xff]  ;;  %v13868_v38 = vld [vmem:[#allocation31_spill] sm:$0xff] }
 0x39b   : > { %vm13867_vm6 = vnez %v13866_v43  ;;  %vm13869_vm10 = vnez %v13868_v38 }
 0x39c   : > { %v3071_v15 = vadd.f32 %v3070_v59, %v3036_v49  ;;  %v3039_v49 = vmul.f32 %v11120_v14, %v11120_v14  ;;  %v11144_v23 = vsel %vm13867_vm6, %v2970_v25, 0.0  ;;  %v11152_v16 = vsel %vm13869_vm10, %v2971_v26, 0.0 }
 0x39d   : > { %vm13870_vm6 = vnez %v13750_v24  ;;  %vm13871_vm10 = vnez %v13759_v44  ;;  %v2976_v24 = vsub.f32 %v13872_v51, %v10905_v17 }
 0x39e   : > { %v3072_v0 = vadd.f32 %v3071_v15, %v3037_v54  ;;  %v3040_v54 = vmul.f32 %v11128_v31, %v11128_v31  ;;  %v11160_v25 = vsel %vm13870_vm6, %v2972_v10, 0.0  ;;  %v11168_v26 = vsel %vm13871_vm10, %v2973_v3, 0.0  ;;  %v13873_v10 = vld [vmem:[#allocation34_spill] sm:$0xff]  ;;  %v13875_v3 = vld [vmem:[#allocation35_spill] sm:$0xff] }
 0x39f   : > { %vm13874_vm6 = vnez %v13873_v10  ;;  %vm13876_vm10 = vnez %v13875_v3  ;;  %v11190_v10 = vsel %vm10617_vm7, %v2976_v24, 0.0  ;;  %v13880_v3 = vsub.f32 %v10670_v18, %v10905_v17 }
 0x3a0   : > { %v3073_v59 = vadd.f32 %v3072_v0, %v3038_v1  ;;  %v3041_v1 = vmul.f32 %v11136_v47, %v11136_v47  ;;  %v11176_v38 = vsel %vm13874_vm6, %v2974_v42, 0.0  ;;  %v11184_v44 = vsel %vm13876_vm10, %v2975_v46, 0.0 }
 0x3a1   : > { %v3047_v42 = vmul.f32 %v11184_v44, %v11184_v44  ;;  %v3048_v58 = vmul.f32 %v11190_v10, %v11190_v10  ;;  %vm13881_vm10 = vnez %v13786_v27  ;;  %v13884_v18 = vsub.f32 %v10716_v11, %v10905_v17 }
 0x3a2   : > { %v3074_v15 = vadd.f32 %v3073_v59, %v3039_v49  ;;  %v3042_v49 = vmul.f32 %v11144_v23, %v11144_v23  ;;  %v13888_v11 = vsub.f32 %v10760_v35, %v10905_v17  ;;  %v13892_v35 = vsub.f32 %v10796_v22, %v10905_v17 }
 0x3a3   : > { %v13895_v22 = vsub.f32 %v10829_v28, %v10905_v17  ;;  %v13897_v28 = vsub.f32 %v10860_v30, %v10905_v17 }
 0x3a4   : > { %v3075_v0 = vadd.f32 %v3074_v15, %v3040_v54  ;;  %v3043_v54 = vmul.f32 %v11152_v16, %v11152_v16 }
 0x3a6   : > { %v3076_v59 = vadd.f32 %v3075_v0, %v3041_v1  ;;  %v3044_v1 = vmul.f32 %v11160_v25, %v11160_v25 }
 0x3a8   : > { %v3077_v15 = vadd.f32 %v3076_v59, %v3042_v49  ;;  %v3045_v49 = vmul.f32 %v11168_v26, %v11168_v26 }
 0x3aa   : > { %v3078_v0 = vadd.f32 %v3077_v15, %v3043_v54  ;;  %v3046_v54 = vmul.f32 %v11176_v38, %v11176_v38 }
 0x3ac   : > { %v3079_v59 = vadd.f32 %v3078_v0, %v3044_v1  ;;  %v13878_v1 = vld [vmem:[#allocation38_spill] sm:$0xff] }
 0x3ad   : > { %vm13879_vm6 = vnez %v13878_v1 }
 0x3ae   : > { %v3080_v15 = vadd.f32 %v3079_v59, %v3045_v49  ;;  %v11196_v0 = vsel %vm13879_vm6, %v2977_v34, 0.0  ;;  %v11205_v49 = vsel %vm13881_vm10, %v13880_v3, 0.0  ;;  %vm13883_vm6 = vnez %v13789_v57 }
 0x3af   : > { %v3049_v24 = vmul.f32 %v11196_v0, %v11196_v0  ;;  %vm13885_vm10 = vnez %v13792_v48 }
 0x3b0   : > { %v3081_v43 = vadd.f32 %v3080_v15, %v3046_v54  ;;  %v13882_v54 = vsub.f32 %v10701_v7, %v10905_v17  ;;  %v11223_v3 = vsel %vm13885_vm10, %v13884_v18, 0.0  ;;  %v13886_v7 = vsub.f32 %v10745_v13, %v10905_v17 }
 0x3b1   : > { %vm13889_vm10 = vnez %v13802_v9  ;;  %v13890_v13 = vsub.f32 %v10782_v12, %v10905_v17  ;;  %v13894_v12 = vsub.f32 %v10816_v29, %v10905_v17  ;;  %v13896_v29 = vsub.f32 %v10844_v55, %v10905_v17 }
 0x3b2   : > { %v3082_v46 = vadd.f32 %v3081_v43, %v3047_v42  ;;  %v11214_v34 = vsel %vm13883_vm6, %v13882_v54, 0.0  ;;  %v3050_v43 = vmul.f32 %v11205_v49, %v11205_v49  ;;  %vm13887_vm6 = vnez %v13799_v40  ;;  %v11297_v40 = vld [vmem:[#allocation2 + $0x2] sm:$0xff] }
 0x3b3   : > { %v3051_v42 = vmul.f32 %v11214_v34, %v11214_v34  ;;  %v11241_v54 = vsel %vm13889_vm10, %v13888_v11, 0.0  ;;  %vm13893_vm10 = vnez %v13812_v20  ;;  %v11268_v11 = vsel %vm10811_vm3, %v13894_v12, 0.0 }
 0x3b4   : > { %v3083_v59 = vadd.f32 %v3082_v46, %v3048_v58  ;;  %v11232_v46 = vsel %vm13887_vm6, %v13886_v7, 0.0  ;;  %vm13891_vm6 = vnez %v13809_v37  ;;  %v11259_v7 = vsel %vm13893_vm10, %v13892_v35, 0.0 }
 0x3b5   : > { %v11250_v18 = vsel %vm13891_vm6, %v13890_v13, 0.0  ;;  %v11277_v13 = vsel %vm10821_vm4, %v13895_v22, 0.0  ;;  %v11286_v35 = vsel %vm10838_vm13, %v13896_v29, 0.0  ;;  %v3024_v12 = vsel %vm10852_vm11, %v13897_v28, 0.0 }
 0x3b6   : > { %v3084_v15 = vadd.f32 %v3083_v59, %v3049_v24  ;;  %v3052_v24 = vmul.f32 %v11223_v3, %v11223_v3  ;;  %v3060_v22 = vmul.f32 %v3024_v12, %v3024_v12 }
 0x3b8   : > { %v3085_v58 = vadd.f32 %v3084_v15, %v3050_v43  ;;  %v3053_v43 = vmul.f32 %v11232_v46, %v11232_v46 }
 0x3ba   : > { %v3086_v59 = vadd.f32 %v3085_v58, %v3051_v42  ;;  %v3054_v42 = vmul.f32 %v11241_v54, %v11241_v54 }
 0x3bc   : > { %v3087_v15 = vadd.f32 %v3086_v59, %v3052_v24  ;;  %v3055_v24 = vmul.f32 %v11250_v18, %v11250_v18 }
 0x3be   : > { %v3088_v58 = vadd.f32 %v3087_v15, %v3053_v43  ;;  %v3056_v43 = vmul.f32 %v11259_v7, %v11259_v7 }
 0x3c0   : > { %v3089_v59 = vadd.f32 %v3088_v58, %v3054_v42  ;;  %v3057_v42 = vmul.f32 %v11268_v11, %v11268_v11 }
 0x3c2   : > { %v3090_v15 = vadd.f32 %v3089_v59, %v3055_v24  ;;  %v3058_v24 = vmul.f32 %v11277_v13, %v11277_v13 }
 0x3c4   : > { %v3091_v58 = vadd.f32 %v3090_v15, %v3056_v43  ;;  %v3059_v43 = vmul.f32 %v11286_v35, %v11286_v35 }
 0x3c6   : > { %v3092_v59 = vadd.f32 %v3091_v58, %v3057_v42 }
 0x3c8   : > { %v3093_v15 = vadd.f32 %v3092_v59, %v3058_v24  ;;  %v11299_v24 = vld [vmem:[#allocation2 + $0xa] sm:$0xff] }
 0x3ca   : > { %v3094_v55 = vadd.f32 %v3093_v15, %v3059_v43  ;;  %v13901_v43 = vld [vmem:[#allocation46_spill] sm:$0xff] }
 0x3cc   : > { %v3095_v45 = vadd.f32 %v3094_v55, %v3060_v22 }
 0x3ce   : > { %v3096_v53 = vrot.slane %v3095_v45, 4 }
 0x3d0   : > { %v3097_v29 = vadd.f32 %v3096_v53, %v3095_v45  ;;  %v13898_v45 = vld [vmem:[#allocation8_spill] sm:$0xff]  ;;  %v13900_v53 = vld [vmem:[#allocation11_spill] sm:$0xff] }
 0x3d2   : > { %v3098_v8 = vrot.slane %v3097_v29, 2 }
 0x3d4   : > { %v3099_v20 = vadd.f32 %v3098_v8, %v3097_v29 }
 0x3d6   : > { %v3100_v37 = vrot.slane %v3099_v20, 1 }
 0x3d8   : > { %v3101_v9 = vadd.f32 %v3100_v37, %v3099_v20  ;;  %v13899_v37 = vld [vmem:[#allocation10_spill] sm:$0xff] }
 0x3da   : > { %v3102_v42 = vmul.f32 0.00390625, %v3101_v9 }
 0x3dc   : > { %v3103_v58 = vadd.f32 1e-05, %v3102_v42 }
 0x3de   : > { %8896 = vrsqrt.f32 %v3103_v58 }
 0x3e8   : > { %v8897_v30 = vpop.eup %8896 }
 0x3e9   : > { %v3140_v17 = vmul.f32 %v8897_v30, %v3024_v12  ;;  %v11302_v59 = vmul.f32 %v8897_v30, %v10976_v62  ;;  %v11305_v8 = vmul.f32 %v8897_v30, %v13898_v45  ;;  %v11310_v20 = vmul.f32 %v8897_v30, %v13899_v37 }
 0x3ea   : > { %v11313_v12 = vmul.f32 %v8897_v30, %v13900_v53  ;;  %v11316_v15 = vmul.f32 %v8897_v30, %v13901_v43  ;;  %v11322_v62 = vmul.f32 %v8897_v30, %v11046_v5  ;;  %v11325_v22 = vmul.f32 %v8897_v30, %v11058_v32 }
 0x3eb   : > { %vm3176_vm13 = vcmp.ge.f32.partialorder %v3140_v17, 0.0  ;;  %v3212_v28 = vmul.f32 0.2, %v3140_v17  ;;  %v11328_v55 = vmul.f32 %v8897_v30, %v11067_v50  ;;  %v11331_v29 = vmul.f32 %v8897_v30, %v11078_v39 }
 0x3ec   : > { %v11334_v42 = vmul.f32 %v8897_v30, %v11087_v4  ;;  %v11337_v58 = vmul.f32 %v8897_v30, %v11095_v36  ;;  %v11343_v5 = vmul.f32 %v8897_v30, %v11112_v33  ;;  %v11346_v32 = vmul.f32 %v8897_v30, %v11120_v14 }
 0x3ed   : > { %v3248_v63 = vsel %vm3176_vm13, %v3140_v17, %v3212_v28  ;;  %v11349_v50 = vmul.f32 %v8897_v30, %v11128_v31  ;;  %v11352_v39 = vmul.f32 %v8897_v30, %v11136_v47  ;;  %v11355_v4 = vmul.f32 %v8897_v30, %v11144_v23 }
 0x3ee   : > { %3284 = vst [vmem:[#allocation2 + $0x12b] sm:$0xff] %v3248_v63  ;;  %v11319_v63 = vmul.f32 %v8897_v30, %v11031_v61  ;;  %v11340_v61 = vmul.f32 %v8897_v30, %v11104_v60  ;;  %v11358_v36 = vmul.f32 %v8897_v30, %v11152_v16  ;;  %v11361_v60 = vmul.f32 %v8897_v30, %v11160_v25 }
 0x3ef   : > { %v11364_v33 = vmul.f32 %v8897_v30, %v11168_v26  ;;  %v11367_v14 = vmul.f32 %v8897_v30, %v11176_v38  ;;  %v11370_v31 = vmul.f32 %v8897_v30, %v11184_v44  ;;  %v11373_v47 = vmul.f32 %v8897_v30, %v11190_v10 }
 0x3f0   : > { %v11376_v23 = vmul.f32 %v8897_v30, %v11196_v0  ;;  %v11379_v16 = vmul.f32 %v8897_v30, %v11205_v49  ;;  %v11382_v25 = vmul.f32 %v8897_v30, %v11214_v34  ;;  %v11385_v26 = vmul.f32 %v8897_v30, %v11223_v3  ;;  %v8796_v3 = vld [vmem:[%s13487_s2 + $0x200] sm:$0xff]  }
 0x3f1   : > { %v11388_v38 = vmul.f32 %v8897_v30, %v11232_v46  ;;  %v11391_v44 = vmul.f32 %v8897_v30, %v11241_v54  ;;  %v11394_v10 = vmul.f32 %v8897_v30, %v11250_v18  ;;  %v11397_v0 = vmul.f32 %v8897_v30, %v11259_v7  ;;  %v8797_v46 = vld [vmem:[%s13487_s2 + $0x208] sm:$0xff]   ;;  %7870 = vmatprep.subr.bf16.mxu0 %v8796_v3 }
 0x3f2   : > { %v11400_v49 = vmul.f32 %v8897_v30, %v11268_v11  ;;  %v11403_v34 = vmul.f32 %v8897_v30, %v11277_v13  ;;  %vm3143_vm4 = vcmp.ge.f32.partialorder %v11310_v20, 0.0  ;;  %v3177_v54 = vmul.f32 0.2, %v11302_v59  ;;  %7871 = vmatpush3.bf16.msra.mxu0 %v8796_v3 }
 0x3f3   : > { %v3178_v18 = vmul.f32 0.2, %v11305_v8  ;;  %v11424_v7 = vmul.f32 %v8897_v30, %v11286_v35  ;;  %vm3152_vm6 = vcmp.ge.f32.partialorder %v11337_v58, 0.0  ;;  %v3179_v11 = vmul.f32 0.2, %v11310_v20  ;;  %7872 = vmatprep.subr.bf16.mxu0 %v8797_v46 }
 0x3f4   : > { %v3180_v13 = vmul.f32 0.2, %v11313_v12  ;;  %v3181_v17 = vmul.f32 0.2, %v11316_v15  ;;  %v3182_v35 = vmul.f32 0.2, %v11319_v63 }
 0x3f5   : > { %v3183_v30 = vmul.f32 0.2, %v11322_v62  ;;  %v3184_v28 = vmul.f32 0.2, %v11325_v22  ;;  %vm13902_vm5 = vcmp.ge.f32.partialorder %v11302_v59, 0.0  ;;  %vm3162_vm3 = vcmp.ge.f32.partialorder %v11367_v14, 0.0 }
 0x3f6   : > { %v3213_v45 = vsel %vm13902_vm5, %v11302_v59, %v3177_v54  ;;  %v3185_v37 = vmul.f32 0.2, %v11328_v55  ;;  %v3186_v53 = vmul.f32 0.2, %v11331_v29  ;;  %v3187_v43 = vmul.f32 0.2, %v11334_v42  ;;  %7873 = vmatpush3.bf16.msra.mxu0 %v8797_v46 }
 0x3f7   : > { %vm13903_vm10 = vcmp.ge.f32.partialorder %v11305_v8, 0.0  ;;  %3249 = vst [vmem:[#allocation2 + $0x13] sm:$0xff] %v3213_v45  ;;  %v3188_v59 = vmul.f32 0.2, %v11337_v58  ;;  %v3189_v54 = vmul.f32 0.2, %v11340_v61  ;;  %v3215_v48 = vsel %vm3143_vm4, %v11310_v20, %v3179_v11 }
 0x3f8   : > { %v3214_v3 = vsel %vm13903_vm10, %v11305_v8, %v3178_v18  ;;  %v3190_v9 = vmul.f32 0.2, %v11343_v5  ;;  %v3191_v8 = vmul.f32 0.2, %v11346_v32  ;;  %v3192_v18 = vmul.f32 0.2, %v11349_v50 }
 0x3f9   : > { %3250 = vst [vmem:[#allocation2 + $0x1b] sm:$0xff] %v3214_v3  ;;  %v3193_v45 = vmul.f32 0.2, %v11352_v39  ;;  %vm13904_vm5 = vcmp.ge.f32.partialorder %v11313_v12, 0.0  ;;  %3251 = vst [vmem:[#allocation2 + $0x23] sm:$0xff] %v3215_v48  ;;  %vm3171_vm4 = vcmp.ge.f32.partialorder %v11394_v10, 0.0 }
 0x3fa   : > { %v3216_v20 = vsel %vm13904_vm5, %v11313_v12, %v3180_v13  ;;  %vm3172_vm10 = vcmp.ge.f32.partialorder %v11397_v0, 0.0  ;;  %v3194_v46 = vmul.f32 0.2, %v11355_v4  ;;  %v3195_v11 = vmul.f32 0.2, %v11358_v36 }
 0x3fb   : > { %v3196_v3 = vmul.f32 0.2, %v11361_v60  ;;  %vm13905_vm13 = vcmp.ge.f32.partialorder %v11316_v15, 0.0  ;;  %3252 = vst [vmem:[#allocation2 + $0x2b] sm:$0xff] %v3216_v20  ;;  %v3197_v48 = vmul.f32 0.2, %v11364_v33 }
 0x3fc   : > { %v3217_v57 = vsel %vm13905_vm13, %v11316_v15, %v3181_v17  ;;  %v3198_v12 = vmul.f32 0.2, %v11367_v14  ;;  %v3199_v13 = vmul.f32 0.2, %v11370_v31  ;;  %vm13906_vm11 = vcmp.ge.f32.partialorder %v11319_v63, 0.0 }
 0x3fd   : > { %v3218_v27 = vsel %vm13906_vm11, %v11319_v63, %v3182_v35  ;;  %3253 = vst [vmem:[#allocation2 + $0x33] sm:$0xff] %v3217_v57  ;;  %v3200_v1 = vmul.f32 0.2, %v11373_v47  ;;  %v3201_v51 = vmul.f32 0.2, %v11376_v23  ;;  %vm13907_vm13 = vcmp.ge.f32.partialorder %v11322_v62, 0.0 }
 0x3fe   : > { %v3202_v15 = vmul.f32 0.2, %v11379_v16  ;;  %v3219_v17 = vsel %vm13907_vm13, %v11322_v62, %v3183_v30  ;;  %3254 = vst [vmem:[#allocation2 + $0x3b] sm:$0xff] %v3218_v27  ;;  %v3203_v20 = vmul.f32 0.2, %v11382_v25  ;;  %vm13908_vm11 = vcmp.ge.f32.partialorder %v11325_v22, 0.0 }
 0x3ff   : > { %v3204_v52 = vmul.f32 0.2, %v11385_v26  ;;  %v3205_v41 = vmul.f32 0.2, %v11388_v38  ;;  %v3220_v57 = vsel %vm13908_vm11, %v11325_v22, %v3184_v28  ;;  %3255 = vst [vmem:[#allocation2 + $0x43] sm:$0xff] %v3219_v17  ;;  %vm13909_vm13 = vcmp.ge.f32.partialorder %v11328_v55, 0.0 }
 0x400   : > { %v3206_v63 = vmul.f32 0.2, %v11391_v44  ;;  %v3207_v35 = vmul.f32 0.2, %v11394_v10  ;;  %v3208_v19 = vmul.f32 0.2, %v11397_v0  ;;  %v3221_v27 = vsel %vm13909_vm13, %v11328_v55, %v3185_v37 }
 0x401   : > { %3256 = vst [vmem:[#allocation2 + $0x4b] sm:$0xff] %v3220_v57  ;;  %v3209_v62 = vmul.f32 0.2, %v11400_v49  ;;  %v3210_v30 = vmul.f32 0.2, %v11403_v34  ;;  %vm13910_vm11 = vcmp.ge.f32.partialorder %v11331_v29, 0.0  ;;  %v3224_v55 = vsel %vm3152_vm6, %v11337_v58, %v3188_v59 }
 0x402   : > { %v3211_v21 = vmul.f32 0.2, %v11424_v7  ;;  %v3222_v22 = vsel %vm13910_vm11, %v11331_v29, %v3186_v53  ;;  %3257 = vst [vmem:[#allocation2 + $0x53] sm:$0xff] %v3221_v27  ;;  %vm13911_vm5 = vcmp.ge.f32.partialorder %v11334_v42, 0.0  ;;  %vm13912_vm13 = vcmp.ge.f32.partialorder %v11340_v61, 0.0  ;;  %3260 = vst [vmem:[#allocation2 + $0x6b] sm:$0xff] %v3224_v55 }
 0x403   : > { %v3223_v28 = vsel %vm13911_vm5, %v11334_v42, %v3187_v43  ;;  %v3225_v37 = vsel %vm13912_vm13, %v11340_v61, %v3189_v54  ;;  %vm13913_vm7 = vcmp.ge.f32.partialorder %v11343_v5, 0.0  ;;  %3258 = vst [vmem:[#allocation2 + $0x5b] sm:$0xff] %v3222_v22  ;;  %vm13914_vm11 = vcmp.ge.f32.partialorder %v11346_v32, 0.0  ;;  %v3395_v53 = vld [vmem:[#allocation2 + $0x12] sm:$0xff]  ;;  %v3396_v43 = vld [vmem:[#allocation2 + $0x1a] sm:$0xff] }
 0x404   : > { %v3226_v17 = vsel %vm13913_vm7, %v11343_v5, %v3190_v9  ;;  %v3227_v29 = vsel %vm13914_vm11, %v11346_v32, %v3191_v8  ;;  %vm13915_vm5 = vcmp.ge.f32.partialorder %v11349_v50, 0.0  ;;  %vm13916_vm6 = vcmp.ge.f32.partialorder %v11352_v39, 0.0  ;;  %3259 = vst [vmem:[#allocation2 + $0x63] sm:$0xff] %v3223_v28  ;;  %3261 = vst [vmem:[#allocation2 + $0x73] sm:$0xff] %v3225_v37  ;;  %v3287_v59 = vld [vmem:[#allocation2 + $0x10] sm:$0xff]  ;;  %v3288_v54 = vld [vmem:[#allocation2 + $0x18] sm:$0xff] }
 0x405   : > { %v3228_v42 = vsel %vm13915_vm5, %v11349_v50, %v3192_v18  ;;  %v3229_v58 = vsel %vm13916_vm6, %v11352_v39, %v3193_v45  ;;  %vm13917_vm13 = vcmp.ge.f32.partialorder %v11355_v4, 0.0  ;;  %3262 = vst [vmem:[#allocation2 + $0x7b] sm:$0xff] %v3226_v17  ;;  %vm13918_vm7 = vcmp.ge.f32.partialorder %v11358_v36, 0.0  ;;  %3263 = vst [vmem:[#allocation2 + $0x83] sm:$0xff] %v3227_v29  ;;  %v3341_v39 = vld [vmem:[#allocation2 + $0x11] sm:$0xff]  ;;  %v3289_v45 = vld [vmem:[#allocation2 + $0x20] sm:$0xff] }
 0x406   : > { %v3230_v61 = vsel %vm13917_vm13, %v11355_v4, %v3194_v46  ;;  %v3231_v9 = vsel %vm13918_vm7, %v11358_v36, %v3195_v11  ;;  %vm13919_vm11 = vcmp.ge.f32.partialorder %v11361_v60, 0.0  ;;  %vm13920_vm5 = vcmp.ge.f32.partialorder %v11364_v33, 0.0  ;;  %3264 = vst [vmem:[#allocation2 + $0x8b] sm:$0xff] %v3228_v42  ;;  %3265 = vst [vmem:[#allocation2 + $0x93] sm:$0xff] %v3229_v58  ;;  %v3342_v4 = vld [vmem:[#allocation2 + $0x19] sm:$0xff]  ;;  %v3290_v46 = vld [vmem:[#allocation2 + $0x28] sm:$0xff] }
 0x407   : > { %v3232_v5 = vsel %vm13919_vm11, %v11361_v60, %v3196_v3  ;;  %v3233_v32 = vsel %vm13920_vm5, %v11364_v33, %v3197_v48  ;;  %v3234_v50 = vsel %vm3162_vm3, %v11367_v14, %v3198_v12  ;;  %3266 = vst [vmem:[#allocation2 + $0x9b] sm:$0xff] %v3230_v61  ;;  %vm13921_vm6 = vcmp.ge.f32.partialorder %v11370_v31, 0.0  ;;  %3267 = vst [vmem:[#allocation2 + $0xa3] sm:$0xff] %v3231_v9  ;;  %v3345_v11 = vld [vmem:[#allocation2 + $0x31] sm:$0xff]  ;;  %v3346_v3 = vld [vmem:[#allocation2 + $0x39] sm:$0xff] }
 0x408   : > { %v3235_v36 = vsel %vm13921_vm6, %v11370_v31, %v3199_v13  ;;  %vm13922_vm13 = vcmp.ge.f32.partialorder %v11373_v47, 0.0  ;;  %vm13923_vm7 = vcmp.ge.f32.partialorder %v11376_v23, 0.0  ;;  %vm13924_vm3 = vcmp.ge.f32.partialorder %v11379_v16, 0.0  ;;  %3268 = vst [vmem:[#allocation2 + $0xab] sm:$0xff] %v3232_v5  ;;  %3269 = vst [vmem:[#allocation2 + $0xb3] sm:$0xff] %v3233_v32  ;;  %v3399_v48 = vld [vmem:[#allocation2 + $0x32] sm:$0xff] }
 0x409   : > { %v3236_v60 = vsel %vm13922_vm13, %v11373_v47, %v3200_v1  ;;  %v3237_v33 = vsel %vm13923_vm7, %v11376_v23, %v3201_v51  ;;  %v3238_v14 = vsel %vm13924_vm3, %v11379_v16, %v3202_v15  ;;  %3270 = vst [vmem:[#allocation2 + $0xbb] sm:$0xff] %v3234_v50  ;;  %vm13925_vm11 = vcmp.ge.f32.partialorder %v11382_v25, 0.0  ;;  %3271 = vst [vmem:[#allocation2 + $0xc3] sm:$0xff] %v3235_v36  ;;  %v3343_v23 = vld [vmem:[#allocation2 + $0x21] sm:$0xff]  ;;  %v3291_v57 = vld [vmem:[#allocation2 + $0x30] sm:$0xff] }
 0x40a   : > { %v3239_v31 = vsel %vm13925_vm11, %v11382_v25, %v3203_v20  ;;  %vm13926_vm5 = vcmp.ge.f32.partialorder %v11385_v26, 0.0  ;;  %vm13927_vm6 = vcmp.ge.f32.partialorder %v11388_v38, 0.0  ;;  %vm13928_vm13 = vcmp.ge.f32.partialorder %v11391_v44, 0.0  ;;  %3272 = vst [vmem:[#allocation2 + $0xcb] sm:$0xff] %v3236_v60  ;;  %3273 = vst [vmem:[#allocation2 + $0xd3] sm:$0xff] %v3237_v33  ;;  %v3400_v12 = vld [vmem:[#allocation2 + $0x3a] sm:$0xff] }
 0x40b   : > { %v3240_v1 = vsel %vm13926_vm5, %v11385_v26, %v3204_v52  ;;  %v3241_v51 = vsel %vm13927_vm6, %v11388_v38, %v3205_v41  ;;  %v3242_v47 = vsel %vm13928_vm13, %v11391_v44, %v3206_v63  ;;  %3274 = vst [vmem:[#allocation2 + $0xdb] sm:$0xff] %v3238_v14  ;;  %v3243_v16 = vsel %vm3171_vm4, %v11394_v10, %v3207_v35  ;;  %v3344_v26 = vld [vmem:[#allocation2 + $0x29] sm:$0xff]  ;;  %v8787_v20 = vld [vmem:[%s13487_s2 + $0x118] sm:$0xff]   ;;  %v3347_v35 = vld [vmem:[#allocation2 + $0x41] sm:$0xff] }
 0x40c   : > { %v3244_v52 = vsel %vm3172_vm10, %v11397_v0, %v3208_v19  ;;  %vm13929_vm7 = vcmp.ge.f32.partialorder %v11400_v49, 0.0  ;;  %vm13930_vm3 = vcmp.ge.f32.partialorder %v11403_v34, 0.0  ;;  %3275 = vst [vmem:[#allocation2 + $0xe3] sm:$0xff] %v3239_v31  ;;  %3276 = vst [vmem:[#allocation2 + $0xeb] sm:$0xff] %v3240_v1  ;;  %v3397_v38 = vld [vmem:[#allocation2 + $0x22] sm:$0xff]  ;;  %v3398_v44 = vld [vmem:[#allocation2 + $0x2a] sm:$0xff]  ;;  %v3376_v19 = vpack.c.bf16 %v3342_v4, %v3341_v39 }
 0x40d   : > { %v3245_v41 = vsel %vm13929_vm7, %v11400_v49, %v3209_v62  ;;  %v3246_v25 = vsel %vm13930_vm3, %v11403_v34, %v3210_v30  ;;  %3277 = vst [vmem:[#allocation2 + $0xf3] sm:$0xff] %v3241_v51  ;;  %3278 = vst [vmem:[#allocation2 + $0xfb] sm:$0xff] %v3242_v47  ;;  %vm13931_vm4 = vcmp.ge.f32.partialorder %v11424_v7, 0.0  ;;  %v3430_v0 = vpack.c.bf16 %v3396_v43, %v3395_v53  ;;  %v8784_v34 = vld [vmem:[%s13487_s2 + $0x100] sm:$0xff]   ;;  %v3292_v63 = vld [vmem:[#allocation2 + $0x38] sm:$0xff] }
 0x40e   : > { %v3247_v10 = vsel %vm13931_vm4, %v11424_v7, %v3211_v21  ;;  %3279 = vst [vmem:[#allocation2 + $0x103] sm:$0xff] %v3243_v16  ;;  %3280 = vst [vmem:[#allocation2 + $0x10b] sm:$0xff] %v3244_v52  ;;  %v3322_v49 = vpack.c.bf16 %v3288_v54, %v3287_v59  ;;  %4285 = vmatprep.mubr.bf16.mxu0 %v3376_v19  ;;  %v3377_v8 = vpack.c.bf16 %v3344_v26, %v3343_v23  ;;  %v8785_v7 = vld [vmem:[%s13487_s2 + $0x108] sm:$0xff]   ;;  %v8788_v28 = vld [vmem:[%s13487_s2 + $0x120] sm:$0xff]  }
 0x40f   : > { %3281 = vst [vmem:[#allocation2 + $0x113] sm:$0xff] %v3245_v41  ;;  %3282 = vst [vmem:[#allocation2 + $0x11b] sm:$0xff] %v3246_v25  ;;  %4454 = vmatprep.mubr.bf16.mxu1 %v3430_v0  ;;  %v3431_v18 = vpack.c.bf16 %v3398_v44, %v3397_v38  ;;  %v13932_v21 = vpack.c.bf16 %v11299_v24, %v11297_v40  ;;  %v3323_v13 = vpack.c.bf16 %v3290_v46, %v3289_v45  ;;  %v8786_v40 = vld [vmem:[%s13487_s2 + $0x110] sm:$0xff]   ;;  %v3401_v62 = vld [vmem:[#allocation2 + $0x42] sm:$0xff] }
 0x410   : > { %3283 = vst [vmem:[#allocation2 + $0x123] sm:$0xff] %v3247_v10  ;;  %4286 = vmatmul.mubr.bf16.gmra.mrb[76].mxu0 %v3322_v49  ;;  %v3378_v24 = vpack.c.bf16 %v3346_v3, %v3345_v11  ;;  %v3432_v15 = vpack.c.bf16 %v3400_v12, %v3399_v48  ;;  %v3348_v27 = vld [vmem:[#allocation2 + $0x49] sm:$0xff]  ;;  %v3324_v22 = vpack.c.bf16 %v3292_v63, %v3291_v57  ;;  %v3293_v29 = vld [vmem:[#allocation2 + $0x40] sm:$0xff]  ;;  %v3349_v58 = vld [vmem:[#allocation2 + $0x51] sm:$0xff] }
 0x411   : > { %4455 = vmatmul.mubr.bf16.vlgmr.msra.gmra.mrb[36].mxu1 %v13932_v21  ;;  %4293 = vmatprep.mubr.bf16.mxu0 %v3377_v8  ;;  %v3402_v30 = vld [vmem:[#allocation2 + $0x4a] sm:$0xff]  ;;  %v3379_v55 = vpack.c.bf16 %v3348_v27, %v3347_v35  ;;  %v3350_v61 = vld [vmem:[#allocation2 + $0x59] sm:$0xff]  ;;  %v3351_v43 = vld [vmem:[#allocation2 + $0x61] sm:$0xff]  ;;  %vm13960_vm10 = vnez %v13852_v56 }
 0x412   : > { %4462 = vmatprep.mubr.bf16.mxu1 %v3431_v18  ;;  %4600 = vmatpush1.bf16.msra.mxu1 %v8784_v34  ;;  %v3433_v37 = vpack.c.bf16 %v3402_v30, %v3401_v62  ;;  %v8789_v17 = vld [vmem:[%s13487_s2 + $0x128] sm:$0xff]   ;;  %v3403_v9 = vld [vmem:[#allocation2 + $0x52] sm:$0xff]  ;;  %v3404_v5 = vld [vmem:[#allocation2 + $0x5a] sm:$0xff]  ;;  %v3380_v4 = vpack.c.bf16 %v3350_v61, %v3349_v58 }
 0x413   : > { %4601 = vmatprep.subr.bf16.mxu1 %v13827_v2  ;;  %v3294_v42 = vld [vmem:[#allocation2 + $0x48] sm:$0xff]  ;;  %v8799_v32 = vld [vmem:[%s13487_s2 + $0x210] sm:$0xff]   ;;  %v3434_v53 = vpack.c.bf16 %v3404_v5, %v3403_v9  ;;  %v8800_v36 = vld [vmem:[%s13487_s2 + $0x218] sm:$0xff]  }
 0x414   : > { %v3325_v50 = vpack.c.bf16 %v3294_v42, %v3293_v29  ;;  %v8790_v39 = vld [vmem:[%s13487_s2 + $0x130] sm:$0xff]   ;;  %7874 = vmatprep.subr.bf16.mxu0 %v8799_v32  ;;  %v8791_v33 = vld [vmem:[%s13487_s2 + $0x138] sm:$0xff]   ;;  %v8802_v59 = vld [vmem:[%s13487_s2 + $0x220] sm:$0xff]  }
 0x415   : > { %v3295_v60 = vld [vmem:[#allocation2 + $0x50] sm:$0xff]  ;;  %7875 = vmatpush3.bf16.msra.mxu0 %v8799_v32  ;;  %v3296_v14 = vld [vmem:[#allocation2 + $0x58] sm:$0xff]  ;;  %v3405_v31 = vld [vmem:[#allocation2 + $0x62] sm:$0xff] }
 0x416   : > { %4602 = vmatpush1.bf16.msra.mxu1 %v8785_v7  ;;  %7876 = vmatprep.subr.bf16.mxu0 %v8800_v36  ;;  %v3352_v54 = vld [vmem:[#allocation2 + $0x69] sm:$0xff]  ;;  %v3326_v51 = vpack.c.bf16 %v3296_v14, %v3295_v60  ;;  %v8792_v47 = vld [vmem:[%s13487_s2 + $0x140] sm:$0xff]   ;;  %v3353_v38 = vld [vmem:[#allocation2 + $0x71] sm:$0xff] }
 0x417   : > { %4603 = vmatprep.subr.bf16.mxu1 %v13827_v2  ;;  %v3406_v1 = vld [vmem:[#allocation2 + $0x6a] sm:$0xff]  ;;  %v3381_v23 = vpack.c.bf16 %v3352_v54, %v3351_v43  ;;  %v3297_v41 = vld [vmem:[#allocation2 + $0x60] sm:$0xff]  ;;  %v3407_v19 = vld [vmem:[#allocation2 + $0x72] sm:$0xff] }
 0x418   : > { %4294 = vmatmul.mubr.bf16.gmra.mrb[80].mxu0 %v3323_v13  ;;  %v3435_v16 = vpack.c.bf16 %v3406_v1, %v3405_v31  ;;  %v8803_v52 = vld [vmem:[%s13487_s2 + $0x228] sm:$0xff]   ;;  %v8805_v44 = vld [vmem:[%s13487_s2 + $0x230] sm:$0xff]   ;;  %v3354_v10 = vld [vmem:[#allocation2 + $0x79] sm:$0xff] }
 0x419   : > { %4463 = vmatmul.mubr.bf16.gmra.mrb[40].mxu1 %v3430_v0  ;;  %4301 = vmatprep.mubr.bf16.mxu0 %v3378_v24  ;;  %v8793_v25 = vld [vmem:[%s13487_s2 + $0x148] sm:$0xff]   ;;  %v3408_v0 = vld [vmem:[#allocation2 + $0x7a] sm:$0xff]  ;;  %v8794_v34 = vld [vmem:[%s13487_s2 + $0x150] sm:$0xff]   ;;  %v3382_v8 = vpack.c.bf16 %v3354_v10, %v3353_v38 }
 0x41a   : > { %4470 = vmatprep.mubr.bf16.mxu1 %v3432_v15  ;;  %4604 = vmatpush1.bf16.msra.mxu1 %v8786_v40  ;;  %v3298_v26 = vld [vmem:[#allocation2 + $0x68] sm:$0xff]  ;;  %v8806_v21 = vld [vmem:[%s13487_s2 + $0x238] sm:$0xff]   ;;  %v3299_v45 = vld [vmem:[#allocation2 + $0x70] sm:$0xff] }
 0x41b   : > { %4605 = vmatprep.subr.bf16.mxu1 %v13827_v2  ;;  %7877 = vmatpush3.bf16.msra.mxu0 %v8800_v36  ;;  %v3327_v49 = vpack.c.bf16 %v3298_v26, %v3297_v41  ;;  %v8795_v7 = vld [vmem:[%s13487_s2 + $0x158] sm:$0xff]   ;;  %v3355_v11 = vld [vmem:[#allocation2 + $0x81] sm:$0xff]  ;;  %v3356_v3 = vld [vmem:[#allocation2 + $0x89] sm:$0xff] }
 0x41c   : > { %7878 = vmatprep.subr.bf16.mxu0 %v8802_v59  ;;  %v3300_v46 = vld [vmem:[#allocation2 + $0x78] sm:$0xff]  ;;  %v3409_v48 = vld [vmem:[#allocation2 + $0x82] sm:$0xff]  ;;  %v3410_v12 = vld [vmem:[#allocation2 + $0x8a] sm:$0xff]  ;;  %v3383_v24 = vpack.c.bf16 %v3356_v3, %v3355_v11 }
 0x41d   : > { %v3328_v13 = vpack.c.bf16 %v3300_v46, %v3299_v45  ;;  %v8798_v40 = vld [vmem:[%s13487_s2 + $0x160] sm:$0xff]   ;;  %v3302_v63 = vld [vmem:[#allocation2 + $0x88] sm:$0xff]  ;;  %v3357_v35 = vld [vmem:[#allocation2 + $0x91] sm:$0xff] }
 0x41e   : > { %4606 = vmatpush1.bf16.msra.mxu1 %v8787_v20  ;;  %v8801_v20 = vld [vmem:[%s13487_s2 + $0x168] sm:$0xff]   ;;  %v3301_v57 = vld [vmem:[#allocation2 + $0x80] sm:$0xff]  ;;  %v3411_v62 = vld [vmem:[#allocation2 + $0x92] sm:$0xff] }
 0x41f   : > { %4607 = vmatprep.subr.bf16.mxu1 %v13827_v2  ;;  %7879 = vmatpush3.bf16.msra.mxu0 %v8802_v59  ;;  %v3358_v27 = vld [vmem:[#allocation2 + $0x99] sm:$0xff]  ;;  %v3303_v29 = vld [vmem:[#allocation2 + $0x90] sm:$0xff]  ;;  %v3359_v58 = vld [vmem:[#allocation2 + $0xa1] sm:$0xff] }
 0x420   : > { %4302 = vmatmul.mubr.bf16.gmra.mrb[84].mxu0 %v3324_v22  ;;  %7880 = vmatprep.subr.bf16.mxu0 %v8803_v52  ;;  %v3412_v30 = vld [vmem:[#allocation2 + $0x9a] sm:$0xff]  ;;  %v3329_v22 = vpack.c.bf16 %v3302_v63, %v3301_v57  ;;  %v3360_v61 = vld [vmem:[#allocation2 + $0xa9] sm:$0xff]  ;;  %v3361_v36 = vld [vmem:[#allocation2 + $0xb1] sm:$0xff] }
 0x421   : > { %4471 = vmatmul.mubr.bf16.gmra.mrb[44].mxu1 %v3431_v18  ;;  %4309 = vmatprep.mubr.bf16.mxu0 %v3379_v55  ;;  %v3436_v18 = vpack.c.bf16 %v3408_v0, %v3407_v19  ;;  %v3384_v55 = vpack.c.bf16 %v3358_v27, %v3357_v35  ;;  %v3304_v42 = vld [vmem:[#allocation2 + $0x98] sm:$0xff]  ;;  %v3413_v9 = vld [vmem:[#allocation2 + $0xa2] sm:$0xff]  ;;  %v3414_v5 = vld [vmem:[#allocation2 + $0xaa] sm:$0xff] }
 0x422   : > { %4478 = vmatprep.mubr.bf16.mxu1 %v3433_v37  ;;  %4608 = vmatpush1.bf16.msra.mxu1 %v8788_v28  ;;  %v8804_v28 = vld [vmem:[%s13487_s2 + $0x170] sm:$0xff]   ;;  %v3330_v32 = vpack.c.bf16 %v3304_v42, %v3303_v29  ;;  %v3362_v60 = vld [vmem:[#allocation2 + $0xb9] sm:$0xff]  ;;  %v3310_v38 = vld [vmem:[#allocation2 + $0xc8] sm:$0xff] }
 0x423   : > { %4609 = vmatprep.subr.bf16.mxu1 %v13827_v2  ;;  %7881 = vmatpush3.bf16.msra.mxu0 %v8803_v52  ;;  %v3416_v14 = vld [vmem:[#allocation2 + $0xba] sm:$0xff]  ;;  %v3386_v59 = vpack.c.bf16 %v3362_v60, %v3361_v36  ;;  %v3307_v31 = vld [vmem:[#allocation2 + $0xb0] sm:$0xff]  ;;  %v3314_v57 = vld [vmem:[#allocation2 + $0xe8] sm:$0xff] }
 0x424   : > { %7882 = vmatprep.subr.bf16.mxu0 %v8805_v44  ;;  %v3308_v1 = vld [vmem:[#allocation2 + $0xb8] sm:$0xff]  ;;  %v3309_v26 = vld [vmem:[#allocation2 + $0xc0] sm:$0xff]  ;;  %v3311_v46 = vld [vmem:[#allocation2 + $0xd0] sm:$0xff] }
 0x425   : > { %v3332_v52 = vpack.c.bf16 %v3308_v1, %v3307_v31  ;;  %v3366_v10 = vld [vmem:[#allocation2 + $0xd9] sm:$0xff]  ;;  %v3367_v3 = vld [vmem:[#allocation2 + $0xe1] sm:$0xff]  ;;  %v3369_v63 = vld [vmem:[#allocation2 + $0xf1] sm:$0xff] }
 0x426   : > { %4610 = vmatpush1.bf16.msra.mxu1 %v8789_v17  ;;  %v8807_v17 = vld [vmem:[%s13487_s2 + $0x178] sm:$0xff]   ;;  %v3372_v29 = vld [vmem:[#allocation2 + $0x109] sm:$0xff] }
 0x427   : > { %4611 = vmatprep.subr.bf16.mxu1 %v13827_v2  ;;  %7883 = vmatpush3.bf16.msra.mxu0 %v8805_v44  ;;  %v3365_v44 = vld [vmem:[#allocation2 + $0xd1] sm:$0xff]  ;;  %v3420_v0 = vld [vmem:[#allocation2 + $0xda] sm:$0xff]  ;;  %v3425_v42 = vld [vmem:[#allocation2 + $0x102] sm:$0xff] }
 0x428   : > { %4310 = vmatmul.mubr.bf16.gmra.mrb[88].mxu0 %v3325_v50  ;;  %7884 = vmatprep.subr.bf16.mxu0 %v8806_v21  ;;  %v3385_v50 = vpack.c.bf16 %v3360_v61, %v3359_v58  ;;  %v3419_v19 = vld [vmem:[#allocation2 + $0xd2] sm:$0xff]  ;;  %v3426_v58 = vld [vmem:[#allocation2 + $0x10a] sm:$0xff]  ;;  %v3428_v36 = vld [vmem:[#allocation2 + $0x11a] sm:$0xff] }
 0x429   : > { %4479 = vmatmul.mubr.bf16.gmra.mrb[48].mxu1 %v3432_v15  ;;  %4317 = vmatprep.mubr.bf16.mxu0 %v3380_v4  ;;  %v3437_v15 = vpack.c.bf16 %v3410_v12, %v3409_v48  ;;  %v3305_v4 = vld [vmem:[#allocation2 + $0xa0] sm:$0xff]  ;;  %v3312_v11 = vld [vmem:[#allocation2 + $0xd8] sm:$0xff]  ;;  %v3368_v48 = vld [vmem:[#allocation2 + $0xe9] sm:$0xff] }
 0x42a   : > { %4486 = vmatprep.mubr.bf16.mxu1 %v3434_v53  ;;  %4612 = vmatpush1.bf16.msra.mxu1 %v8790_v39  ;;  %v3439_v39 = vpack.c.bf16 %v3414_v5, %v3413_v9  ;;  %v3421_v12 = vld [vmem:[#allocation2 + $0xe2] sm:$0xff]  ;;  %v3370_v35 = vld [vmem:[#allocation2 + $0xf9] sm:$0xff]  ;;  %v3445_v5 = vpack.c.bf16 %v3426_v58, %v3425_v42  ;;  %v3448_v31 = vld [vmem:[#allocation2 + $0x12a] sm:$0xff] }
 0x42b   : > { %4613 = vmatprep.subr.bf16.mxu1 %v13827_v2  ;;  %7885 = vmatpush3.bf16.msra.mxu0 %v8806_v21  ;;  %v3423_v27 = vld [vmem:[#allocation2 + $0xf2] sm:$0xff]  ;;  %v3615_v1 = vld [vmem:[#allocation2 + $0x26] sm:$0xff]  ;;  %v3455_v58 = vld [vmem:[#allocation2 + $0x3b] sm:$0xff] }
 0x42c   : > { %7031 = vmatprep.subr.bf16.mxu0 %v13827_v2  ;;  %v3454_v42 = vld [vmem:[#allocation2 + $0x33] sm:$0xff] }
 0x42e   : > { %4614 = vmatpush1.bf16.msra.mxu1 %v8791_v33  ;;  %v3415_v33 = vld [vmem:[#allocation2 + $0xb2] sm:$0xff] }
 0x42f   : > { %4615 = vmatprep.subr.bf16.mxu1 %v13827_v2  ;;  %v3440_v54 = vpack.c.bf16 %v3416_v14, %v3415_v33 }
 0x430   : > { %4318 = vmatmul.mubr.bf16.gmra.mrb[92].mxu0 %v3326_v51  ;;  %v3363_v51 = vld [vmem:[#allocation2 + $0xc1] sm:$0xff] }
 0x431   : > { %4487 = vmatmul.mubr.bf16.gmra.mrb[52].mxu1 %v3433_v37  ;;  %4325 = vmatprep.mubr.bf16.mxu0 %v3381_v23  ;;  %v3438_v37 = vpack.c.bf16 %v3412_v30, %v3411_v62  ;;  %v3417_v23 = vld [vmem:[#allocation2 + $0xc2] sm:$0xff]  ;;  %v3424_v62 = vld [vmem:[#allocation2 + $0xfa] sm:$0xff] }
 0x432   : > { %4494 = vmatprep.mubr.bf16.mxu1 %v3435_v16  ;;  %4616 = vmatpush1.bf16.msra.mxu1 %v8792_v47  ;;  %v3364_v47 = vld [vmem:[#allocation2 + $0xc9] sm:$0xff] }
 0x433   : > { %4617 = vmatprep.subr.bf16.mxu1 %v13827_v2  ;;  %v3387_v41 = vpack.c.bf16 %v3364_v47, %v3363_v51  ;;  %v3616_v51 = vld [vmem:[#allocation2 + $0x2e] sm:$0xff] }
 0x436   : > { %4618 = vmatpush1.bf16.msra.mxu1 %v8793_v25 }
 0x437   : > { %4619 = vmatprep.subr.bf16.mxu1 %v13827_v2 }
 0x438   : > { %4326 = vmatmul.mubr.bf16.gmra.mrb[96].mxu0 %v3327_v49  ;;  %v3333_v49 = vpack.c.bf16 %v3310_v38, %v3309_v26  ;;  %v3505_v26 = vld [vmem:[#allocation2 + $0x1c] sm:$0xff]  ;;  %v3619_v38 = vld [vmem:[#allocation2 + $0x46] sm:$0xff] }
 0x439   : > { %4495 = vmatmul.mubr.bf16.gmra.mrb[56].mxu1 %v3434_v53  ;;  %4333 = vmatprep.mubr.bf16.mxu0 %v3382_v8  ;;  %v3306_v53 = vld [vmem:[#allocation2 + $0xa8] sm:$0xff]  ;;  %v3388_v8 = vpack.c.bf16 %v3366_v10, %v3365_v44 }
 0x43a   : > { %4502 = vmatprep.mubr.bf16.mxu1 %v3436_v18  ;;  %4620 = vmatpush1.bf16.msra.mxu1 %v8794_v34  ;;  %v3331_v43 = vpack.c.bf16 %v3306_v53, %v3305_v4  ;;  %v3374_v4 = vld [vmem:[#allocation2 + $0x119] sm:$0xff]  ;;  %v3620_v44 = vld [vmem:[#allocation2 + $0x4e] sm:$0xff] }
 0x43b   : > { %4621 = vmatprep.subr.bf16.mxu1 %v13827_v2  ;;  %v3427_v53 = vld [vmem:[#allocation2 + $0x112] sm:$0xff] }
 0x43c   : > { %v3446_v14 = vpack.c.bf16 %v3428_v36, %v3427_v53  ;;  %v3488_v53 = vpack.c.bf16 %v3455_v58, %v3454_v42  ;;  %v3648_v42 = vld [vmem:[#allocation2 + $0x12e] sm:$0xff]  ;;  %v8819_v58 = vld [vmem:[%s13487_s2 + $0x1d8] sm:$0xff]  }
 0x43e   : > { %4622 = vmatpush1.bf16.msra.mxu1 %v8795_v7 }
 0x43f   : > { %4623 = vmatprep.subr.bf16.mxu1 %v13827_v2 }
 0x440   : > { %4334 = vmatmul.mubr.bf16.gmra.mrb[100].mxu0 %v3328_v13  ;;  %v3422_v13 = vld [vmem:[#allocation2 + $0xea] sm:$0xff] }
 0x441   : > { %4503 = vmatmul.mubr.bf16.gmra.mrb[60].mxu1 %v3435_v16  ;;  %4341 = vmatprep.mubr.bf16.mxu0 %v3383_v24  ;;  %v3418_v16 = vld [vmem:[#allocation2 + $0xca] sm:$0xff]  ;;  %v3389_v24 = vpack.c.bf16 %v3368_v48, %v3367_v3 }
 0x442   : > { %4510 = vmatprep.mubr.bf16.mxu1 %v3437_v15  ;;  %4624 = vmatpush1.bf16.msra.mxu1 %v8798_v40  ;;  %v3441_v25 = vpack.c.bf16 %v3418_v16, %v3417_v23  ;;  %v3334_v40 = vpack.c.bf16 %v3312_v11, %v3311_v46  ;;  %v3651_v16 = vpack.c.bf16 %v3616_v51, %v3615_v1  ;;  %v3507_v46 = vld [vmem:[#allocation2 + $0x2c] sm:$0xff]  ;;  %v8808_v11 = vld [vmem:[%s13487_s2 + $0x180] sm:$0xff]   ;;  %v3512_v51 = vld [vmem:[#allocation2 + $0x54] sm:$0xff] }
 0x443   : > { %4625 = vmatprep.subr.bf16.mxu1 %v13827_v2  ;;  %v3623_v3 = vld [vmem:[#allocation2 + $0x66] sm:$0xff]  ;;  %v3624_v48 = vld [vmem:[#allocation2 + $0x6e] sm:$0xff]  ;;  %v3634_v1 = vld [vmem:[#allocation2 + $0xbe] sm:$0xff] }
 0x446   : > { %4626 = vmatpush1.bf16.msra.mxu1 %v8801_v20  ;;  %v3313_v20 = vld [vmem:[#allocation2 + $0xe0] sm:$0xff] }
 0x447   : > { %4627 = vmatprep.subr.bf16.mxu1 %v13827_v2  ;;  %v3335_v30 = vpack.c.bf16 %v3314_v57, %v3313_v20  ;;  %v3452_v20 = vld [vmem:[#allocation2 + $0x23] sm:$0xff]  ;;  %v3453_v57 = vld [vmem:[#allocation2 + $0x2b] sm:$0xff] }
 0x448   : > { %4342 = vmatmul.mubr.bf16.gmra.mrb[104].mxu0 %v3329_v22  ;;  %v3390_v22 = vpack.c.bf16 %v3370_v35, %v3369_v63  ;;  %v3625_v63 = vld [vmem:[#allocation2 + $0x76] sm:$0xff]  ;;  %v3626_v35 = vld [vmem:[#allocation2 + $0x7e] sm:$0xff] }
 0x449   : > { %4511 = vmatmul.mubr.bf16.gmra.mrb[64].mxu1 %v3436_v18  ;;  %4349 = vmatprep.mubr.bf16.mxu0 %v3384_v55  ;;  %v3442_v18 = vpack.c.bf16 %v3420_v0, %v3419_v19  ;;  %v3315_v55 = vld [vmem:[#allocation2 + $0xf0] sm:$0xff]  ;;  %v3653_v0 = vpack.c.bf16 %v3620_v44, %v3619_v38 }
 0x44a   : > { %4518 = vmatprep.mubr.bf16.mxu1 %v3438_v37  ;;  %4628 = vmatpush1.bf16.msra.mxu1 %v8804_v28  ;;  %v3444_v28 = vpack.c.bf16 %v3424_v62, %v3423_v27  ;;  %v3508_v27 = vld [vmem:[#allocation2 + $0x34] sm:$0xff]  ;;  %v3509_v62 = vld [vmem:[#allocation2 + $0x3c] sm:$0xff] }
 0x44b   : > { %4629 = vmatprep.subr.bf16.mxu1 %v13827_v2  ;;  %v3458_v44 = vld [vmem:[#allocation2 + $0x53] sm:$0xff] }
 0x44e   : > { %4630 = vmatpush1.bf16.msra.mxu1 %v8807_v17  ;;  %v3371_v17 = vld [vmem:[#allocation2 + $0x101] sm:$0xff] }
 0x44f   : > { %4776 = vmatprep.subr.bf16.mxu1 %v13827_v2  ;;  %v3391_v9 = vpack.c.bf16 %v3372_v29, %v3371_v17  ;;  %v11693_v17 = vpack.c.bf16 %v3509_v62, %v3508_v27  ;;  %v3643_v27 = vld [vmem:[#allocation2 + $0x106] sm:$0xff]  ;;  %v3644_v62 = vld [vmem:[#allocation2 + $0x10e] sm:$0xff] }
 0x450   : > { %4350 = vmatmul.mubr.bf16.gmra.mrb[108].mxu0 %v3330_v32  ;;  %v3317_v32 = vld [vmem:[#allocation2 + $0x100] sm:$0xff] }
 0x451   : > { %4519 = vmatmul.mubr.bf16.gmra.mrb[68].mxu1 %v3437_v15  ;;  %4357 = vmatprep.mubr.bf16.mxu0 %v3385_v50  ;;  %v3443_v15 = vpack.c.bf16 %v3422_v13, %v3421_v12  ;;  %v3318_v50 = vld [vmem:[#allocation2 + $0x108] sm:$0xff] }
 0x452   : > { %4526 = vmatprep.mubr.bf16.mxu1 %v3439_v39  ;;  %v3337_v60 = vpack.c.bf16 %v3318_v50, %v3317_v32  ;;  %v3510_v32 = vld [vmem:[#allocation2 + $0x44] sm:$0xff]  ;;  %v3511_v50 = vld [vmem:[#allocation2 + $0x4c] sm:$0xff] }
 0x458   : > { %4358 = vmatmul.mubr.bf16.gmra.mrb[112].mxu0 %v3331_v43  ;;  %v3319_v43 = vld [vmem:[#allocation2 + $0x110] sm:$0xff] }
 0x459   : > { %4527 = vmatmul.mubr.bf16.gmra.mrb[72].mxu1 %v3438_v37  ;;  %4365 = vmatprep.mubr.bf16.mxu0 %v3386_v59  ;;  %v3316_v37 = vld [vmem:[#allocation2 + $0xf8] sm:$0xff] }
 0x45a   : > { %4534 = vmatprep.mubr.bf16.mxu1 %v3440_v54  ;;  %v3336_v61 = vpack.c.bf16 %v3316_v37, %v3315_v55  ;;  %v3320_v59 = vld [vmem:[#allocation2 + $0x118] sm:$0xff]  ;;  %v3656_v55 = vpack.c.bf16 %v3626_v35, %v3625_v63  ;;  %v8810_v37 = vld [vmem:[%s13487_s2 + $0x190] sm:$0xff]  }
 0x45b   : > { %v3338_v47 = vpack.c.bf16 %v3320_v59, %v3319_v43  ;;  %v3456_v43 = vld [vmem:[#allocation2 + $0x43] sm:$0xff]  ;;  %v3457_v59 = vld [vmem:[#allocation2 + $0x4b] sm:$0xff]  ;;  %v3516_v63 = vld [vmem:[#allocation2 + $0x74] sm:$0xff] }
 0x45c   : > { %v3517_v35 = vld [vmem:[#allocation2 + $0x7c] sm:$0xff] }
 0x460   : > { %4366 = vmatmul.mubr.bf16.gmra.mrb[116].mxu0 %v3332_v52  ;;  %v3617_v52 = vld [vmem:[#allocation2 + $0x36] sm:$0xff] }
 0x461   : > { %4535 = vmatmul.mubr.bf16.gmra.mrb[76].mxu1 %v3439_v39  ;;  %4373 = vmatprep.mubr.bf16.mxu0 %v3387_v41  ;;  %v3373_v39 = vld [vmem:[#allocation2 + $0x111] sm:$0xff]  ;;  %v3618_v41 = vld [vmem:[#allocation2 + $0x3e] sm:$0xff] }
 0x462   : > { %4542 = vmatprep.mubr.bf16.mxu1 %v3441_v25  ;;  %v3392_v33 = vpack.c.bf16 %v3374_v4, %v3373_v39  ;;  %v3652_v10 = vpack.c.bf16 %v3618_v41, %v3617_v52  ;;  %v3631_v39 = vld [vmem:[#allocation2 + $0xa6] sm:$0xff]  ;;  %v3632_v4 = vld [vmem:[#allocation2 + $0xae] sm:$0xff]  ;;  %v3489_v52 = vpack.c.bf16 %v3457_v59, %v3456_v43 }
 0x463   : > { %v8821_v43 = vld [vmem:[%s13487_s2 + $0x1e8] sm:$0xff]  }
 0x464   : > { %v3464_v59 = vld [vmem:[#allocation2 + $0x83] sm:$0xff] }
 0x468   : > { %v11675_v34 = vpop.f32.mrb[72].mxu0  ;;  %4374 = vmatmul.mubr.bf16.gmra.mrb[120].mxu0 %v3333_v49  ;;  %v3450_v49 = vld [vmem:[#allocation2 + $0x13] sm:$0xff] }
 0x469   : > { %v4281_v21 = vpop.f32.mrb[73].mxu0  ;;  %4543 = vmatmul.mubr.bf16.gmra.mrb[80].mxu1 %v3440_v54  ;;  %4381 = vmatprep.mubr.bf16.mxu0 %v3388_v8  ;;  %v3447_v54 = vld [vmem:[#allocation2 + $0x122] sm:$0xff] }
 0x46a   : > { %v11677_v7 = vpop.f32.mrb[74].mxu0  ;;  %4550 = vmatprep.mubr.bf16.mxu1 %v3442_v18  ;;  %v3449_v23 = vpack.c.bf16 %v3448_v31, %v3447_v54  ;;  %v3451_v8 = vld [vmem:[#allocation2 + $0x1b] sm:$0xff]  ;;  %v8813_v54 = vld [vmem:[%s13487_s2 + $0x1a8] sm:$0xff]  }
 0x46b   : > { %v4284_v45 = vpop.f32.mrb[75].mxu0  ;;  %v3622_v21 = vld [vmem:[#allocation2 + $0x5e] sm:$0xff]  ;;  %v3486_v12 = vpack.c.bf16 %v3451_v8, %v3450_v49  ;;  %v3633_v31 = vld [vmem:[#allocation2 + $0xb6] sm:$0xff] }
 0x46c   : > { %v3506_v45 = vld [vmem:[#allocation2 + $0x24] sm:$0xff]  ;;  %v3660_v41 = vpack.c.bf16 %v3634_v1, %v3633_v31  ;;  %v3520_v31 = vld [vmem:[#allocation2 + $0x94] sm:$0xff]  ;;  %v3521_v1 = vld [vmem:[#allocation2 + $0x9c] sm:$0xff] }
 0x46d   : > { %v3638_v49 = vld [vmem:[#allocation2 + $0xde] sm:$0xff] }
 0x46e   : > { %v3514_v8 = vld [vmem:[#allocation2 + $0x64] sm:$0xff] }
 0x470   : > { %4382 = vmatmul.mubr.bf16.gmra.mrb[124].mxu0 %v3334_v40  ;;  %v11682_v40 = vpack.c.bf16 %v3507_v46, %v3506_v45  ;;  %v3640_v45 = vld [vmem:[#allocation2 + $0xee] sm:$0xff] }
 0x471   : > { %4551 = vmatmul.mubr.bf16.gmra.mrb[84].mxu1 %v3441_v25  ;;  %4389 = vmatprep.mubr.bf16.mxu0 %v3389_v24  ;;  %v3504_v25 = vld [vmem:[#allocation2 + $0x14] sm:$0xff]  ;;  %v3655_v24 = vpack.c.bf16 %v3624_v48, %v3623_v3  ;;  %v8816_v3 = vld [vmem:[%s13487_s2 + $0x1c0] sm:$0xff]  }
 0x472   : > { %4558 = vmatprep.mubr.bf16.mxu1 %v3443_v15  ;;  %v3540_v19 = vpack.c.bf16 %v3505_v26, %v3504_v25  ;;  %v8814_v25 = vld [vmem:[%s13487_s2 + $0x1b0] sm:$0xff]  }
 0x478   : > { %4390 = vmatmul.mubr.bf16.gmra.mrb[128].mxu0 %v3335_v30  ;;  %v3627_v30 = vld [vmem:[#allocation2 + $0x86] sm:$0xff] }
 0x479   : > { %4559 = vmatmul.mubr.bf16.gmra.mrb[88].mxu1 %v3442_v18  ;;  %4397 = vmatprep.mubr.bf16.mxu0 %v3390_v22  ;;  %v3621_v18 = vld [vmem:[#allocation2 + $0x56] sm:$0xff]  ;;  %v3628_v22 = vld [vmem:[#allocation2 + $0x8e] sm:$0xff] }
 0x47a   : > { %4566 = vmatprep.mubr.bf16.mxu1 %v3444_v28  ;;  %v3654_v13 = vpack.c.bf16 %v3622_v21, %v3621_v18  ;;  %v3657_v29 = vpack.c.bf16 %v3628_v22, %v3627_v30  ;;  %v3515_v18 = vld [vmem:[#allocation2 + $0x6c] sm:$0xff] }
 0x47b   : > { %v3639_v21 = vld [vmem:[#allocation2 + $0xe6] sm:$0xff]  ;;  %v11725_v48 = vpack.c.bf16 %v3515_v18, %v3514_v8  ;;  %v3524_v18 = vld [vmem:[#allocation2 + $0xb4] sm:$0xff] }
 0x480   : > { %4398 = vmatmul.mubr.bf16.gmra.mrb[132].mxu0 %v3336_v61  ;;  %v8811_v61 = vld [vmem:[%s13487_s2 + $0x198] sm:$0xff]  }
 0x481   : > { %4567 = vmatmul.mubr.bf16.gmra.mrb[92].mxu1 %v3443_v15  ;;  %4405 = vmatprep.mubr.bf16.mxu0 %v3391_v9  ;;  %v8809_v15 = vld [vmem:[%s13487_s2 + $0x188] sm:$0xff]   ;;  %v3629_v9 = vld [vmem:[#allocation2 + $0x96] sm:$0xff] }
 0x482   : > { %4574 = vmatprep.mubr.bf16.mxu1 %v3445_v5 }
 0x488   : > { %4406 = vmatmul.mubr.bf16.gmra.mrb[136].mxu0 %v3337_v60  ;;  %v8812_v60 = vld [vmem:[%s13487_s2 + $0x1a0] sm:$0xff]  }
 0x489   : > { %4575 = vmatmul.mubr.bf16.gmra.mrb[96].mxu1 %v3444_v28  ;;  %4413 = vmatprep.mubr.bf16.mxu0 %v3392_v33  ;;  %v3487_v28 = vpack.c.bf16 %v3453_v57, %v3452_v20  ;;  %v11703_v33 = vpack.c.bf16 %v3511_v50, %v3510_v32  ;;  %v3641_v20 = vld [vmem:[#allocation2 + $0xf6] sm:$0xff]  ;;  %v3642_v57 = vld [vmem:[#allocation2 + $0xfe] sm:$0xff]  ;;  %v3519_v50 = vld [vmem:[#allocation2 + $0x8c] sm:$0xff] }
 0x48a   : > { %4582 = vmatprep.mubr.bf16.mxu1 %v3446_v14  ;;  %v3664_v22 = vpack.c.bf16 %v3642_v57, %v3641_v20  ;;  %v3518_v32 = vld [vmem:[#allocation2 + $0x84] sm:$0xff]  ;;  %v3527_v57 = vld [vmem:[#allocation2 + $0xcc] sm:$0xff] }
 0x48b   : > { %v3526_v20 = vld [vmem:[#allocation2 + $0xc4] sm:$0xff] }
 0x490   : > { %4414 = vmatmul.mubr.bf16.gmra.mrb[140].mxu0 %v3338_v47  ;;  %v3513_v47 = vld [vmem:[#allocation2 + $0x5c] sm:$0xff] }
 0x491   : > { %4583 = vmatmul.mubr.bf16.gmra.mrb[100].mxu1 %v3445_v5  ;;  %7886 = vmatprep.mubr.bf16.mxu0 %v3651_v16  ;;  %v3630_v5 = vld [vmem:[#allocation2 + $0x9e] sm:$0xff]  ;;  %v3636_v16 = vld [vmem:[#allocation2 + $0xce] sm:$0xff]  ;;  %v11714_v26 = vpack.c.bf16 %v3513_v47, %v3512_v51 }
 0x492   : > { %4590 = vmatprep.mubr.bf16.mxu1 %v3449_v23  ;;  %v3658_v36 = vpack.c.bf16 %v3630_v5, %v3629_v9  ;;  %v3635_v23 = vld [vmem:[#allocation2 + $0xc6] sm:$0xff]  ;;  %v3645_v9 = vld [vmem:[#allocation2 + $0x116] sm:$0xff]  ;;  %v3646_v5 = vld [vmem:[#allocation2 + $0x11e] sm:$0xff] }
 0x493   : > { %v3661_v38 = vpack.c.bf16 %v3636_v16, %v3635_v23  ;;  %v8822_v47 = vld [vmem:[%s13487_s2 + $0x1f0] sm:$0xff]   ;;  %v11758_v23 = vpack.c.bf16 %v3521_v1, %v3520_v31  ;;  %v8823_v16 = vld [vmem:[%s13487_s2 + $0x1f8] sm:$0xff]   ;;  %v3476_v1 = vld [vmem:[#allocation2 + $0xe3] sm:$0xff] }
 0x498   : > { %7887 = vmatmul.mubr.bf16.vlgmr.msra.gmra.mrb[144].mxu0 %v3652_v10  ;;  %v3459_v10 = vld [vmem:[#allocation2 + $0x5b] sm:$0xff] }
 0x499   : > { %4591 = vmatmul.mubr.bf16.gmra.mrb[104].mxu1 %v3446_v14  ;;  %7890 = vmatprep.mubr.bf16.mxu0 %v3653_v0  ;;  %v3659_v14 = vpack.c.bf16 %v3632_v4, %v3631_v39  ;;  %v3637_v0 = vld [vmem:[#allocation2 + $0xd6] sm:$0xff]  ;;  %v3490_v46 = vpack.c.bf16 %v3459_v10, %v3458_v44  ;;  %v3647_v39 = vld [vmem:[#allocation2 + $0x126] sm:$0xff] }
 0x49a   : > { %4631 = vmatprep.mubr.bf16.mxu1 %v3540_v19  ;;  %v8815_v19 = vld [vmem:[%s13487_s2 + $0x1b8] sm:$0xff]  }
 0x4a0   : > { %7891 = vmatmul.mubr.bf16.gmra.mrb[148].mxu0 %v3654_v13  ;;  %v3460_v13 = vld [vmem:[#allocation2 + $0x63] sm:$0xff] }
 0x4a1   : > { %4632 = vmatmul.mubr.bf16.vlgmr.msra.gmra.mrb[36].mxu1 %v3486_v12  ;;  %7894 = vmatprep.mubr.bf16.mxu0 %v3655_v24  ;;  %v3663_v12 = vpack.c.bf16 %v3640_v45, %v3639_v21  ;;  %v3461_v24 = vld [vmem:[#allocation2 + $0x6b] sm:$0xff]  ;;  %v3525_v21 = vld [vmem:[#allocation2 + $0xbc] sm:$0xff] }
 0x4a2   : > { %4639 = vmatprep.mubr.bf16.mxu1 %v11682_v40  ;;  %4777 = vmatpush1.bf16.msra.mxu1 %v8808_v11  ;;  %v3662_v11 = vpack.c.bf16 %v3638_v49, %v3637_v0  ;;  %v3491_v30 = vpack.c.bf16 %v3461_v24, %v3460_v13  ;;  %v3468_v0 = vld [vmem:[#allocation2 + $0xa3] sm:$0xff]  ;;  %v3469_v49 = vld [vmem:[#allocation2 + $0xab] sm:$0xff]  ;;  %v3470_v13 = vld [vmem:[#allocation2 + $0xb3] sm:$0xff] }
 0x4a3   : > { %4778 = vmatprep.subr.bf16.mxu1 %v13827_v2  ;;  %v3471_v24 = vld [vmem:[#allocation2 + $0xbb] sm:$0xff] }
 0x4a6   : > { %4779 = vmatpush1.bf16.msra.mxu1 %v8809_v15  ;;  %v8817_v15 = vld [vmem:[%s13487_s2 + $0x1c8] sm:$0xff]  }
 0x4a7   : > { %4780 = vmatprep.subr.bf16.mxu1 %v13827_v2 }
 0x4a8   : > { %7895 = vmatmul.mubr.bf16.gmra.mrb[152].mxu0 %v3656_v55  ;;  %v11736_v55 = vpack.c.bf16 %v3517_v35, %v3516_v63 }
 0x4a9   : > { %4640 = vmatmul.mubr.bf16.gmra.mrb[40].mxu1 %v3487_v28  ;;  %7898 = vmatprep.mubr.bf16.mxu0 %v3657_v29  ;;  %v8818_v28 = vld [vmem:[%s13487_s2 + $0x1d0] sm:$0xff]  }
 0x4aa   : > { %4647 = vmatprep.mubr.bf16.mxu1 %v11693_v17  ;;  %4781 = vmatpush1.bf16.msra.mxu1 %v8810_v37  ;;  %v3665_v37 = vpack.c.bf16 %v3644_v62, %v3643_v27  ;;  %v3462_v29 = vld [vmem:[#allocation2 + $0x73] sm:$0xff]  ;;  %v3496_v27 = vpack.c.bf16 %v3471_v24, %v3470_v13  ;;  %v11781_v62 = vpack.c.bf16 %v3527_v57, %v3526_v20  ;;  %v3480_v57 = vld [vmem:[#allocation2 + $0x103] sm:$0xff] }
 0x4ab   : > { %4782 = vmatprep.subr.bf16.mxu1 %v13827_v2 }
 0x4ae   : > { %4783 = vmatpush1.bf16.msra.mxu1 %v8811_v61  ;;  %v3463_v61 = vld [vmem:[#allocation2 + $0x7b] sm:$0xff] }
 0x4af   : > { %4784 = vmatprep.subr.bf16.mxu1 %v13827_v2  ;;  %v3492_v4 = vpack.c.bf16 %v3463_v61, %v3462_v29  ;;  %v3528_v29 = vld [vmem:[#allocation2 + $0xd4] sm:$0xff] }
 0x4b0   : > { %7899 = vmatmul.mubr.bf16.gmra.mrb[156].mxu0 %v3658_v36  ;;  %v8820_v36 = vld [vmem:[%s13487_s2 + $0x1e0] sm:$0xff]  }
 0x4b1   : > { %4648 = vmatmul.mubr.bf16.gmra.mrb[44].mxu1 %v3488_v53  ;;  %7902 = vmatprep.mubr.bf16.mxu0 %v3659_v14  ;;  %v3666_v53 = vpack.c.bf16 %v3646_v5, %v3645_v9  ;;  %v3667_v14 = vpack.c.bf16 %v3648_v42, %v3647_v39  ;;  %v3529_v42 = vld [vmem:[#allocation2 + $0xdc] sm:$0xff] }
 0x4b2   : > { %4655 = vmatprep.mubr.bf16.mxu1 %v11703_v33  ;;  %4785 = vmatpush1.bf16.msra.mxu1 %v8812_v60  ;;  %v11747_v60 = vpack.c.bf16 %v3519_v50, %v3518_v32  ;;  %v11788_v5 = vpack.c.bf16 %v3529_v42, %v3528_v29  ;;  %v3474_v50 = vld [vmem:[#allocation2 + $0xd3] sm:$0xff]  ;;  %v3475_v39 = vld [vmem:[#allocation2 + $0xdb] sm:$0xff] }
 0x4b3   : > { %4786 = vmatprep.subr.bf16.mxu1 %v13827_v2 }
 0x4b6   : > { %4787 = vmatpush1.bf16.msra.mxu1 %v8813_v54  ;;  %v3465_v54 = vld [vmem:[#allocation2 + $0x8b] sm:$0xff] }
 0x4b7   : > { %4788 = vmatprep.subr.bf16.mxu1 %v13827_v2  ;;  %v3493_v51 = vpack.c.bf16 %v3465_v54, %v3464_v59  ;;  %v3498_v59 = vpack.c.bf16 %v3475_v39, %v3474_v50  ;;  %v3482_v50 = vld [vmem:[#allocation2 + $0x113] sm:$0xff]  ;;  %v3483_v39 = vld [vmem:[#allocation2 + $0x11b] sm:$0xff] }
 0x4b8   : > { %7903 = vmatmul.mubr.bf16.gmra.mrb[160].mxu0 %v3660_v41  ;;  %v3467_v41 = vld [vmem:[#allocation2 + $0x9b] sm:$0xff] }
 0x4b9   : > { %4656 = vmatmul.mubr.bf16.gmra.mrb[48].mxu1 %v3489_v52  ;;  %7906 = vmatprep.mubr.bf16.mxu0 %v3661_v38  ;;  %v3466_v52 = vld [vmem:[#allocation2 + $0x93] sm:$0xff] }
 0x4ba   : > { %4663 = vmatprep.mubr.bf16.mxu1 %v11714_v26  ;;  %4789 = vmatpush1.bf16.msra.mxu1 %v8814_v25  ;;  %v3522_v25 = vld [vmem:[#allocation2 + $0xa4] sm:$0xff]  ;;  %v3523_v38 = vld [vmem:[#allocation2 + $0xac] sm:$0xff]  ;;  %v3494_v44 = vpack.c.bf16 %v3467_v41, %v3466_v52  ;;  %v3533_v52 = vld [vmem:[#allocation2 + $0xfc] sm:$0xff] }
 0x4bb   : > { %4790 = vmatprep.subr.bf16.mxu1 %v13827_v2  ;;  %v11766_v10 = vpack.c.bf16 %v3523_v38, %v3522_v25 }
 0x4be   : > { %4791 = vmatpush1.bf16.msra.mxu1 %v8815_v19 }
 0x4bf   : > { %4792 = vmatprep.subr.bf16.mxu1 %v13827_v2 }
 0x4c0   : > { %7907 = vmatmul.mubr.bf16.gmra.mrb[164].mxu0 %v3662_v11  ;;  %v3495_v11 = vpack.c.bf16 %v3469_v49, %v3468_v0  ;;  %v3478_v49 = vld [vmem:[#allocation2 + $0xf3] sm:$0xff] }
 0x4c1   : > { %4664 = vmatmul.mubr.bf16.gmra.mrb[52].mxu1 %v3490_v46  ;;  %7910 = vmatprep.mubr.bf16.mxu0 %v3663_v12 }
 0x4c2   : > { %4671 = vmatprep.mubr.bf16.mxu1 %v11725_v48  ;;  %4793 = vmatpush1.bf16.msra.mxu1 %v8816_v3  ;;  %v11774_v3 = vpack.c.bf16 %v3525_v21, %v3524_v18  ;;  %v3534_v21 = vld [vmem:[#allocation2 + $0x104] sm:$0xff] }
 0x4c3   : > { %4794 = vmatprep.subr.bf16.mxu1 %v13827_v2 }
 0x4c6   : > { %4795 = vmatpush1.bf16.msra.mxu1 %v8817_v15 }
 0x4c7   : > { %4796 = vmatprep.subr.bf16.mxu1 %v13827_v2 }
 0x4c8   : > { %7911 = vmatmul.mubr.bf16.gmra.mrb[168].mxu0 %v3664_v22  ;;  %v3472_v22 = vld [vmem:[#allocation2 + $0xc3] sm:$0xff] }
 0x4c9   : > { %4672 = vmatmul.mubr.bf16.gmra.mrb[56].mxu1 %v3491_v30  ;;  %7914 = vmatprep.mubr.bf16.mxu0 %v3665_v37 }
 0x4ca   : > { %4679 = vmatprep.mubr.bf16.mxu1 %v11736_v55  ;;  %4797 = vmatpush1.bf16.msra.mxu1 %v8818_v28  ;;  %v3473_v28 = vld [vmem:[#allocation2 + $0xcb] sm:$0xff] }
 0x4cb   : > { %4798 = vmatprep.subr.bf16.mxu1 %v13827_v2  ;;  %v3497_v9 = vpack.c.bf16 %v3473_v28, %v3472_v22  ;;  %v3536_v22 = vld [vmem:[#allocation2 + $0x114] sm:$0xff]  ;;  %v3537_v28 = vld [vmem:[#allocation2 + $0x11c] sm:$0xff] }
 0x4ce   : > { %4799 = vmatpush1.bf16.msra.mxu1 %v8819_v58 }
 0x4cf   : > { %4800 = vmatprep.subr.bf16.mxu1 %v13827_v2 }
 0x4d0   : > { %7915 = vmatmul.mubr.bf16.gmra.mrb[172].mxu0 %v3666_v53  ;;  %v3530_v53 = vld [vmem:[#allocation2 + $0xe4] sm:$0xff] }
 0x4d1   : > { %4680 = vmatmul.mubr.bf16.gmra.mrb[60].mxu1 %v3492_v4  ;;  %7918 = vmatprep.mubr.bf16.mxu0 %v3667_v14 }
 0x4d2   : > { %4687 = vmatprep.mubr.bf16.mxu1 %v11747_v60  ;;  %4801 = vmatpush1.bf16.msra.mxu1 %v8820_v36  ;;  %v3531_v36 = vld [vmem:[#allocation2 + $0xec] sm:$0xff] }
 0x4d3   : > { %4802 = vmatprep.subr.bf16.mxu1 %v13827_v2  ;;  %v11795_v54 = vpack.c.bf16 %v3531_v36, %v3530_v53  ;;  %v3538_v53 = vld [vmem:[#allocation2 + $0x124] sm:$0xff]  ;;  %v3539_v36 = vld [vmem:[#allocation2 + $0x12c] sm:$0xff] }
 0x4d6   : > { %4803 = vmatpush1.bf16.msra.mxu1 %v8821_v43 }
 0x4d7   : > { %4804 = vmatprep.subr.bf16.mxu1 %v13827_v2 }
 0x4d9   : > { %4688 = vmatmul.mubr.bf16.gmra.mrb[64].mxu1 %v3493_v51  ;;  %v3477_v51 = vld [vmem:[#allocation2 + $0xeb] sm:$0xff] }
 0x4da   : > { %4695 = vmatprep.mubr.bf16.mxu1 %v11758_v23  ;;  %4805 = vmatpush1.bf16.msra.mxu1 %v8822_v47  ;;  %v3499_v38 = vpack.c.bf16 %v3477_v51, %v3476_v1  ;;  %v3502_v1 = vpack.c.bf16 %v3483_v39, %v3482_v50  ;;  %v11823_v51 = vpack.c.bf16 %v3539_v36, %v3538_v53  ;;  %v3565_v53 = vld [vmem:[#allocation2 + $0x45] sm:$0xff]  ;;  %v3566_v36 = vld [vmem:[#allocation2 + $0x4d] sm:$0xff] }
 0x4db   : > { %4806 = vmatprep.subr.bf16.mxu1 %v13827_v2 }
 0x4de   : > { %4807 = vmatpush1.bf16.msra.mxu1 %v8823_v16  ;;  %v3532_v16 = vld [vmem:[#allocation2 + $0xf4] sm:$0xff] }
 0x4df   : > { %6500 = vmatprep.subr.bf16.mxu1 %v13827_v2 }
 0x4e1   : > { %4696 = vmatmul.mubr.bf16.gmra.mrb[68].mxu1 %v3494_v44  ;;  %v11802_v44 = vpack.c.bf16 %v3533_v52, %v3532_v16  ;;  %v3484_v16 = vld [vmem:[#allocation2 + $0x123] sm:$0xff]  ;;  %v3485_v52 = vld [vmem:[#allocation2 + $0x12b] sm:$0xff] }
 0x4e2   : > { %4703 = vmatprep.mubr.bf16.mxu1 %v11766_v10 }
 0x4e3   : > { %v11770_v19 = vpop.f32.mrb[76].mxu0 }
 0x4e4   : > { %v4289_v8 = vpop.f32.mrb[77].mxu0 }
 0x4e5   : > { %v11772_v45 = vpop.f32.mrb[78].mxu0  ;;  %v3479_v8 = vld [vmem:[#allocation2 + $0xfb] sm:$0xff] }
 0x4e6   : > { %v4292_v46 = vpop.f32.mrb[79].mxu0  ;;  %v3500_v24 = vpack.c.bf16 %v3479_v8, %v3478_v49  ;;  %v3562_v49 = vld [vmem:[#allocation2 + $0x2d] sm:$0xff] }
 0x4e7   : > { %v3535_v46 = vld [vmem:[#allocation2 + $0x10c] sm:$0xff] }
 0x4e9   : > { %4704 = vmatmul.mubr.bf16.gmra.mrb[72].mxu1 %v3495_v11 }
 0x4ea   : > { %4711 = vmatprep.mubr.bf16.mxu1 %v11774_v3 }
 0x4eb   : > { %v11777_v12 = vpop.f32.mrb[80].mxu0 }
 0x4ec   : > { %v4297_v15 = vpop.f32.mrb[81].mxu0 }
 0x4ed   : > { %v11779_v63 = vpop.f32.mrb[82].mxu0  ;;  %v11809_v15 = vpack.c.bf16 %v3535_v46, %v3534_v21  ;;  %v3503_v21 = vpack.c.bf16 %v3485_v52, %v3484_v16  ;;  %v3599_v16 = vpack.c.bf16 %v3566_v36, %v3565_v53 }
 0x4ee   : > { %v4300_v35 = vpop.f32.mrb[83].mxu0 }
 0x4ef   : > { %v3481_v35 = vld [vmem:[#allocation2 + $0x10b] sm:$0xff] }
 0x4f0   : > { %v3501_v42 = vpack.c.bf16 %v3481_v35, %v3480_v57  ;;  %v3563_v57 = vld [vmem:[#allocation2 + $0x35] sm:$0xff]  ;;  %v3564_v35 = vld [vmem:[#allocation2 + $0x3d] sm:$0xff] }
 0x4f1   : > { %4712 = vmatmul.mubr.bf16.gmra.mrb[76].mxu1 %v3496_v27 }
 0x4f2   : > { %4719 = vmatprep.mubr.bf16.mxu1 %v11781_v62 }
 0x4f3   : > { %v11784_v30 = vpop.f32.mrb[84].mxu0 }
 0x4f4   : > { %v4305_v37 = vpop.f32.mrb[85].mxu0 }
 0x4f5   : > { %v11786_v58 = vpop.f32.mrb[86].mxu0 }
 0x4f6   : > { %v4308_v61 = vpop.f32.mrb[87].mxu0 }
 0x4f7   : > { %v11816_v61 = vpack.c.bf16 %v3537_v28, %v3536_v22  ;;  %v3598_v28 = vpack.c.bf16 %v3564_v35, %v3563_v57  ;;  %v3569_v57 = vld [vmem:[#allocation2 + $0x65] sm:$0xff]  ;;  %v3570_v35 = vld [vmem:[#allocation2 + $0x6d] sm:$0xff] }
 0x4f9   : > { %4720 = vmatmul.mubr.bf16.gmra.mrb[80].mxu1 %v3497_v9 }
 0x4fa   : > { %4727 = vmatprep.mubr.bf16.mxu1 %v11788_v5 }
 0x4fb   : > { %v11791_v32 = vpop.f32.mrb[88].mxu0 }
 0x4fc   : > { %v4313_v4 = vpop.f32.mrb[89].mxu0 }
 0x4fd   : > { %v11793_v14 = vpop.f32.mrb[90].mxu0 }
 0x4fe   : > { %v4316_v43 = vpop.f32.mrb[91].mxu0 }
 0x501   : > { %4728 = vmatmul.mubr.bf16.gmra.mrb[84].mxu1 %v3498_v59 }
 0x502   : > { %4735 = vmatprep.mubr.bf16.mxu1 %v11795_v54 }
 0x503   : > { %v11798_v31 = vpop.f32.mrb[92].mxu0 }
 0x504   : > { %v4321_v47 = vpop.f32.mrb[93].mxu0 }
 0x505   : > { %v11800_v41 = vpop.f32.mrb[94].mxu0 }
 0x506   : > { %v4324_v25 = vpop.f32.mrb[95].mxu0 }
 0x509   : > { %4736 = vmatmul.mubr.bf16.gmra.mrb[88].mxu1 %v3499_v38  ;;  %v3561_v38 = vld [vmem:[#allocation2 + $0x25] sm:$0xff] }
 0x50a   : > { %4743 = vmatprep.mubr.bf16.mxu1 %v11802_v44  ;;  %v3597_v46 = vpack.c.bf16 %v3562_v49, %v3561_v38  ;;  %v3568_v38 = vld [vmem:[#allocation2 + $0x5d] sm:$0xff] }
 0x50b   : > { %v11805_v0 = vpop.f32.mrb[96].mxu0 }
 0x50c   : > { %v4329_v18 = vpop.f32.mrb[97].mxu0 }
 0x50d   : > { %v11807_v11 = vpop.f32.mrb[98].mxu0 }
 0x50e   : > { %v4332_v13 = vpop.f32.mrb[99].mxu0 }
 0x511   : > { %4744 = vmatmul.mubr.bf16.gmra.mrb[92].mxu1 %v3500_v24 }
 0x512   : > { %4751 = vmatprep.mubr.bf16.mxu1 %v11809_v15 }
 0x513   : > { %v11812_v20 = vpop.f32.mrb[100].mxu0 }
 0x514   : > { %v4337_v27 = vpop.f32.mrb[101].mxu0 }
 0x515   : > { %v11814_v37 = vpop.f32.mrb[102].mxu0 }
 0x516   : > { %v4340_v29 = vpop.f32.mrb[103].mxu0 }
 0x517   : > { %v3649_v29 = vld [vmem:[#allocation2 + $0x136] sm:$0xff] }
 0x519   : > { %4752 = vmatmul.mubr.bf16.gmra.mrb[96].mxu1 %v3501_v42  ;;  %v3650_v42 = vld [vmem:[#allocation2 + $0x13e] sm:$0xff] }
 0x51a   : > { %4759 = vmatprep.mubr.bf16.mxu1 %v11816_v61  ;;  %v3668_v50 = vpack.c.bf16 %v3650_v42, %v3649_v29 }
 0x51b   : > { %v11819_v9 = vpop.f32.mrb[104].mxu0 }
 0x51c   : > { %v4345_v4 = vpop.f32.mrb[105].mxu0  ;;  %7919 = vmatmul.mubr.bf16.gmra.mrb[176].mxu0 %v3668_v50  ;;  %v3571_v50 = vld [vmem:[#allocation2 + $0x75] sm:$0xff] }
 0x51d   : > { %v11821_v43 = vpop.f32.mrb[106].mxu0 }
 0x51e   : > { %v4348_v59 = vpop.f32.mrb[107].mxu0 }
 0x521   : > { %4760 = vmatmul.mubr.bf16.gmra.mrb[100].mxu1 %v3502_v1 }
 0x522   : > { %4767 = vmatprep.mubr.bf16.mxu1 %v11823_v51 }
 0x523   : > { %v11826_v47 = vpop.f32.mrb[108].mxu0 }
 0x524   : > { %v4353_v25 = vpop.f32.mrb[109].mxu0 }
 0x525   : > { %v11828_v8 = vpop.f32.mrb[110].mxu0  ;;  %v3567_v25 = vld [vmem:[#allocation2 + $0x55] sm:$0xff] }
 0x526   : > { %v4356_v18 = vpop.f32.mrb[111].mxu0 }
 0x529   : > { %4768 = vmatmul.mubr.bf16.gmra.mrb[104].mxu1 %v3503_v21  ;;  %v3600_v21 = vpack.c.bf16 %v3568_v38, %v3567_v25  ;;  %v3574_v25 = vld [vmem:[#allocation2 + $0x8d] sm:$0xff] }
 0x52a   : > { %4808 = vmatprep.mubr.bf16.mxu1 %v3597_v46 }
 0x52b   : > { %v11830_v13 = vpop.f32.mrb[112].mxu0 }
 0x52c   : > { %v4361_v24 = vpop.f32.mrb[113].mxu0 }
 0x52d   : > { %v11832_v27 = vpop.f32.mrb[114].mxu0 }
 0x52e   : > { %v4364_v22 = vpop.f32.mrb[115].mxu0 }
 0x531   : > { %4809 = vmatmul.mubr.bf16.vlgmr.msra.gmra.mrb[36].mxu1 %v11682_v40 }
 0x532   : > { %4816 = vmatprep.mubr.bf16.mxu1 %v3598_v28  ;;  %v3601_v28 = vpack.c.bf16 %v3570_v35, %v3569_v57  ;;  %v3575_v57 = vld [vmem:[#allocation2 + $0x95] sm:$0xff]  ;;  %v3576_v35 = vld [vmem:[#allocation2 + $0x9d] sm:$0xff] }
 0x533   : > { %v11835_v39 = vpop.f32.mrb[116].mxu0 }
 0x534   : > { %v4369_v4 = vpop.f32.mrb[117].mxu0 }
 0x535   : > { %v11837_v59 = vpop.f32.mrb[118].mxu0  ;;  %v3572_v4 = vld [vmem:[#allocation2 + $0x7d] sm:$0xff] }
 0x536   : > { %13933 = vst [vmem:[#allocation18_spill] sm:$0xff] %v11837_v59  ;;  %v4372_v1 = vpop.f32.mrb[119].mxu0  ;;  %v3602_v36 = vpack.c.bf16 %v3572_v4, %v3571_v50  ;;  %v3577_v4 = vld [vmem:[#allocation2 + $0xa5] sm:$0xff] }
 0x539   : > { %4817 = vmatmul.mubr.bf16.gmra.mrb[40].mxu1 %v11693_v17 }
 0x53a   : > { %4824 = vmatprep.mubr.bf16.mxu1 %v3599_v16 }
 0x53b   : > { %v11840_v52 = vpop.f32.mrb[120].mxu0 }
 0x53c   : > { %13934 = vst [vmem:[#allocation20_spill] sm:$0xff] %v11840_v52  ;;  %v4377_v40 = vpop.f32.mrb[121].mxu0 }
 0x53d   : > { %v11842_v49 = vpop.f32.mrb[122].mxu0  ;;  %v3573_v40 = vld [vmem:[#allocation2 + $0x85] sm:$0xff] }
 0x53e   : > { %13935 = vst [vmem:[#allocation21_spill] sm:$0xff] %v11842_v49  ;;  %v4380_v18 = vpop.f32.mrb[123].mxu0 }
 0x53f   : > { %v3603_v18 = vpack.c.bf16 %v3574_v25, %v3573_v40 }
 0x541   : > { %4825 = vmatmul.mubr.bf16.gmra.mrb[44].mxu1 %v11703_v33 }
 0x542   : > { %4832 = vmatprep.mubr.bf16.mxu1 %v3600_v21 }
 0x543   : > { %v11845_v46 = vpop.f32.mrb[124].mxu0 }
 0x544   : > { %13936 = vst [vmem:[#allocation36_spill] sm:$0xff] %v11845_v46  ;;  %v4385_v24 = vpop.f32.mrb[125].mxu0 }
 0x545   : > { %v11847_v22 = vpop.f32.mrb[126].mxu0 }
 0x546   : > { %13937 = vst [vmem:[#allocation8_spill] sm:$0xff] %v11847_v22  ;;  %v4388_v17 = vpop.f32.mrb[127].mxu0 }
 0x549   : > { %4833 = vmatmul.mubr.bf16.gmra.mrb[48].mxu1 %v11714_v26 }
 0x54a   : > { %4840 = vmatprep.mubr.bf16.mxu1 %v3601_v28  ;;  %v3604_v28 = vpack.c.bf16 %v3576_v35, %v3575_v57 }
 0x54b   : > { %v11850_v29 = vpop.f32.mrb[128].mxu0 }
 0x54c   : > { %13938 = vst [vmem:[#allocation10_spill] sm:$0xff] %v11850_v29  ;;  %v4393_v42 = vpop.f32.mrb[129].mxu0 }
 0x54d   : > { %v11852_v53 = vpop.f32.mrb[130].mxu0 }
 0x54e   : > { %13939 = vst [vmem:[#allocation11_spill] sm:$0xff] %v11852_v53  ;;  %v4396_v33 = vpop.f32.mrb[131].mxu0 }
 0x54f   : > { %v3578_v33 = vld [vmem:[#allocation2 + $0xad] sm:$0xff] }
 0x551   : > { %4841 = vmatmul.mubr.bf16.gmra.mrb[52].mxu1 %v11725_v48 }
 0x552   : > { %4848 = vmatprep.mubr.bf16.mxu1 %v3602_v36 }
 0x553   : > { %v11855_v1 = vpop.f32.mrb[132].mxu0 }
 0x554   : > { %13940 = vst [vmem:[#allocation46_spill] sm:$0xff] %v11855_v1  ;;  %v4401_v16 = vpop.f32.mrb[133].mxu0 }
 0x555   : > { %v11857_v38 = vpop.f32.mrb[134].mxu0  ;;  %v3605_v16 = vpack.c.bf16 %v3578_v33, %v3577_v4 }
 0x556   : > { %13941 = vst [vmem:[#allocation47_spill] sm:$0xff] %v11857_v38  ;;  %v4404_v26 = vpop.f32.mrb[135].mxu0 }
 0x557   : > { %v3579_v26 = vld [vmem:[#allocation2 + $0xb5] sm:$0xff] }
 0x559   : > { %4849 = vmatmul.mubr.bf16.gmra.mrb[56].mxu1 %v11736_v55 }
 0x55a   : > { %4856 = vmatprep.mubr.bf16.mxu1 %v3603_v18  ;;  %v3580_v18 = vld [vmem:[#allocation2 + $0xbd] sm:$0xff] }
 0x55b   : > { %v11860_v21 = vpop.f32.mrb[136].mxu0  ;;  %v3606_v57 = vpack.c.bf16 %v3580_v18, %v3579_v26  ;;  %v3584_v26 = vld [vmem:[#allocation2 + $0xdd] sm:$0xff] }
 0x55c   : > { %13942 = vst [vmem:[#allocation48_spill] sm:$0xff] %v11860_v21  ;;  %v4409_v24 = vpop.f32.mrb[137].mxu0 }
 0x55d   : > { %v11862_v17 = vpop.f32.mrb[138].mxu0 }
 0x55e   : > { %13943 = vst [vmem:[#allocation49_spill] sm:$0xff] %v11862_v17  ;;  %v4412_v48 = vpop.f32.mrb[139].mxu0 }
 0x561   : > { %4857 = vmatmul.mubr.bf16.gmra.mrb[60].mxu1 %v11747_v60 }
 0x562   : > { %4864 = vmatprep.mubr.bf16.mxu1 %v3604_v28  ;;  %v3582_v28 = vld [vmem:[#allocation2 + $0xcd] sm:$0xff] }
 0x563   : > { %v11865_v42 = vpop.f32.mrb[140].mxu0 }
 0x564   : > { %13944 = vst [vmem:[#allocation50_spill] sm:$0xff] %v11865_v42  ;;  %v4417_v50 = vpop.f32.mrb[141].mxu0 }
 0x565   : > { %v11867_v36 = vpop.f32.mrb[142].mxu0 }
 0x566   : > { %13945 = vst [vmem:[#allocation51_spill] sm:$0xff] %v11867_v36  ;;  %v4420_v55 = vpop.f32.mrb[143].mxu0 }
 0x569   : > { %4865 = vmatmul.mubr.bf16.gmra.mrb[64].mxu1 %v11758_v23  ;;  %v3581_v23 = vld [vmem:[#allocation2 + $0xc5] sm:$0xff] }
 0x56a   : > { %4872 = vmatprep.mubr.bf16.mxu1 %v3605_v16  ;;  %v3607_v33 = vpack.c.bf16 %v3582_v28, %v3581_v23  ;;  %v3586_v28 = vld [vmem:[#allocation2 + $0xed] sm:$0xff] }
 0x56b   : > { %v11870_v40 = vpop.f32.mrb[144].mxu0 }
 0x56c   : > { %v11872_v25 = vpop.f32.mrb[145].mxu0 }
 0x56d   : > { %v11874_v60 = vpop.f32.mrb[146].mxu0 }
 0x56e   : > { %v11876_v24 = vpop.f32.mrb[147].mxu0 }
 0x571   : > { %4873 = vmatmul.mubr.bf16.gmra.mrb[68].mxu1 %v11766_v10  ;;  %v3583_v10 = vld [vmem:[#allocation2 + $0xd5] sm:$0xff] }
 0x572   : > { %4880 = vmatprep.mubr.bf16.mxu1 %v3606_v57  ;;  %v3608_v36 = vpack.c.bf16 %v3584_v26, %v3583_v10 }
 0x573   : > { %v11879_v35 = vpop.f32.mrb[148].mxu0 }
 0x574   : > { %v11881_v48 = vpop.f32.mrb[149].mxu0 }
 0x575   : > { %v11883_v50 = vpop.f32.mrb[150].mxu0 }
 0x576   : > { %v11885_v4 = vpop.f32.mrb[151].mxu0 }
 0x579   : > { %4881 = vmatmul.mubr.bf16.gmra.mrb[72].mxu1 %v11774_v3  ;;  %v3585_v3 = vld [vmem:[#allocation2 + $0xe5] sm:$0xff] }
 0x57a   : > { %4888 = vmatprep.mubr.bf16.mxu1 %v3607_v33  ;;  %v3609_v21 = vpack.c.bf16 %v3586_v28, %v3585_v3 }
 0x57b   : > { %v11888_v55 = vpop.f32.mrb[152].mxu0 }
 0x57c   : > { %v11890_v16 = vpop.f32.mrb[153].mxu0 }
 0x57d   : > { %v11892_v18 = vpop.f32.mrb[154].mxu0 }
 0x57e   : > { %v11894_v57 = vpop.f32.mrb[155].mxu0 }
 0x581   : > { %4889 = vmatmul.mubr.bf16.gmra.mrb[76].mxu1 %v11781_v62  ;;  %v3587_v62 = vld [vmem:[#allocation2 + $0xf5] sm:$0xff] }
 0x582   : > { %4896 = vmatprep.mubr.bf16.mxu1 %v3608_v36  ;;  %v3588_v36 = vld [vmem:[#allocation2 + $0xfd] sm:$0xff] }
 0x583   : > { %v11897_v42 = vpop.f32.mrb[156].mxu0  ;;  %v3610_v53 = vpack.c.bf16 %v3588_v36, %v3587_v62 }
 0x584   : > { %v11899_v23 = vpop.f32.mrb[157].mxu0 }
 0x585   : > { %v11901_v33 = vpop.f32.mrb[158].mxu0 }
 0x586   : > { %v11903_v17 = vpop.f32.mrb[159].mxu0 }
 0x589   : > { %4897 = vmatmul.mubr.bf16.gmra.mrb[80].mxu1 %v11788_v5  ;;  %v3589_v5 = vld [vmem:[#allocation2 + $0x105] sm:$0xff] }
 0x58a   : > { %4904 = vmatprep.mubr.bf16.mxu1 %v3609_v21  ;;  %v3590_v21 = vld [vmem:[#allocation2 + $0x10d] sm:$0xff] }
 0x58b   : > { %v11906_v38 = vpop.f32.mrb[160].mxu0  ;;  %v3611_v46 = vpack.c.bf16 %v3590_v21, %v3589_v5 }
 0x58c   : > { %v11908_v10 = vpop.f32.mrb[161].mxu0 }
 0x58d   : > { %v11910_v26 = vpop.f32.mrb[162].mxu0 }
 0x58e   : > { %v11912_v1 = vpop.f32.mrb[163].mxu0 }
 0x591   : > { %4905 = vmatmul.mubr.bf16.gmra.mrb[84].mxu1 %v11795_v54  ;;  %v3591_v54 = vld [vmem:[#allocation2 + $0x115] sm:$0xff] }
 0x592   : > { %4912 = vmatprep.mubr.bf16.mxu1 %v3610_v53  ;;  %v3592_v53 = vld [vmem:[#allocation2 + $0x11d] sm:$0xff] }
 0x593   : > { %v11915_v29 = vpop.f32.mrb[164].mxu0  ;;  %v3612_v59 = vpack.c.bf16 %v3592_v53, %v3591_v54 }
 0x594   : > { %v11917_v3 = vpop.f32.mrb[165].mxu0 }
 0x595   : > { %v11919_v28 = vpop.f32.mrb[166].mxu0 }
 0x596   : > { %13946 = vst [vmem:[#allocation52_spill] sm:$0xff] %v11919_v28  ;;  %v11921_v22 = vpop.f32.mrb[167].mxu0 }
 0x599   : > { %4913 = vmatmul.mubr.bf16.gmra.mrb[88].mxu1 %v11802_v44  ;;  %v3593_v44 = vld [vmem:[#allocation2 + $0x125] sm:$0xff] }
 0x59a   : > { %4920 = vmatprep.mubr.bf16.mxu1 %v3611_v46  ;;  %v3594_v46 = vld [vmem:[#allocation2 + $0x12d] sm:$0xff] }
 0x59b   : > { %v11924_v49 = vpop.f32.mrb[168].mxu0 }
 0x59c   : > { %13947 = vst [vmem:[#allocation53_spill] sm:$0xff] %v11924_v49  ;;  %v11926_v62 = vpop.f32.mrb[169].mxu0 }
 0x59d   : > { %13948 = vst [vmem:[#allocation54_spill] sm:$0xff] %v11926_v62  ;;  %v11928_v36 = vpop.f32.mrb[170].mxu0  ;;  %v3613_v62 = vpack.c.bf16 %v3594_v46, %v3593_v44 }
 0x59e   : > { %13949 = vst [vmem:[#allocation55_spill] sm:$0xff] %v11928_v36  ;;  %v11930_v52 = vpop.f32.mrb[171].mxu0  ;;  %v3595_v36 = vld [vmem:[#allocation2 + $0x135] sm:$0xff] }
 0x59f   : > { %13950 = vst [vmem:[#allocation56_spill] sm:$0xff] %v11930_v52  ;;  %v3596_v52 = vld [vmem:[#allocation2 + $0x13d] sm:$0xff] }
 0x5a0   : > { %v3614_v54 = vpack.c.bf16 %v3596_v52, %v3595_v36 }
 0x5a1   : > { %4921 = vmatmul.mubr.bf16.gmra.mrb[92].mxu1 %v11809_v15  ;;  %v3558_v15 = vld [vmem:[#allocation2 + $0x134] sm:$0xff] }
 0x5a2   : > { %4928 = vmatprep.mubr.bf16.mxu1 %v3612_v59  ;;  %v3559_v59 = vld [vmem:[#allocation2 + $0x13c] sm:$0xff] }
 0x5a3   : > { %v11933_v28 = vpop.f32.mrb[172].mxu0  ;;  %v3560_v53 = vpack.c.bf16 %v3559_v59, %v3558_v15 }
 0x5a4   : > { %13951 = vst [vmem:[#allocation57_spill] sm:$0xff] %v11933_v28  ;;  %v11935_v5 = vpop.f32.mrb[173].mxu0 }
 0x5a5   : > { %v11937_v21 = vpop.f32.mrb[174].mxu0 }
 0x5a6   : > { %13952 = vst [vmem:[#allocation58_spill] sm:$0xff] %v11937_v21  ;;  %v11939_v49 = vpop.f32.mrb[175].mxu0  ;;  %v8824_v21 = vld [vmem:[%s13488_s3] sm:$0xff]  }
 0x5a7   : > { %6501 = vmatpush1.bf16.msra.mxu1 %v8824_v21 }
 0x5a8   : > { %6502 = vmatprep.subr.bf16.mxu1 %v13827_v2 }
 0x5a9   : > { %4929 = vmatmul.mubr.bf16.gmra.mrb[96].mxu1 %v11816_v61 }
 0x5aa   : > { %4936 = vmatprep.mubr.bf16.mxu1 %v3613_v62 }
 0x5b1   : > { %4937 = vmatmul.mubr.bf16.gmra.mrb[100].mxu1 %v11823_v51 }
 0x5b2   : > { %4944 = vmatprep.mubr.bf16.mxu1 %v3614_v54 }
 0x5b9   : > { %4945 = vmatmul.mubr.bf16.gmra.mrb[104].mxu1 %v3560_v53 }
 0x5ef   : > { %v11952_v36 = vpop.f32.mrb[176].mxu0 }
 0x5f0   : > { %v11954_v54 = vpop.f32.mrb[177].mxu0 }
 0x5f1   : > { %v11959_v59 = vpop.f32.mrb[178].mxu0 }
 0x604   : > { %v4810_v28 = vpop.f32.mrb[36].mxu1 }
 0x605   : > { %v8006_v44 = vadd.f32 %v4810_v28, %v11675_v34  ;;  %v4812_v46 = vpop.f32.mrb[37].mxu1  ;;  %v11961_v34 = vpop.f32.mrb[179].mxu0 }
 0x606   : > { %v4813_v61 = vpop.f32.mrb[38].mxu1 }
 0x607   : > { %v11949_v52 = vadd.f32 %v8006_v44, %v11872_v25  ;;  %v8007_v51 = vadd.f32 %v4813_v61, %v11677_v7  ;;  %v4815_v62 = vpop.f32.mrb[39].mxu1 }
 0x609   : > { %v11957_v15 = vadd.f32 %v8007_v51, %v11876_v24  ;;  %v8825_v24 = vld [vmem:[%s13488_s3 + $0x8] sm:$0xff]  }
 0x60a   : > { %6503 = vmatpush1.bf16.msra.mxu1 %v8825_v24 }
 0x60b   : > { %6504 = vmatprep.subr.bf16.mxu1 %v13827_v2 }
 0x60c   : > { %v4818_v28 = vpop.f32.mrb[40].mxu1 }
 0x60d   : > { %v8008_v21 = vadd.f32 %v4818_v28, %v11770_v19  ;;  %v4820_v53 = vpop.f32.mrb[41].mxu1 }
 0x60e   : > { %v4821_v25 = vpop.f32.mrb[42].mxu1 }
 0x60f   : > { %v11965_v44 = vadd.f32 %v8008_v21, %v11870_v40  ;;  %v8009_v7 = vadd.f32 %v4821_v25, %v11772_v45  ;;  %v4823_v46 = vpop.f32.mrb[43].mxu1 }
 0x611   : > { %v11969_v61 = vadd.f32 %v8009_v7, %v11874_v60 }
 0x614   : > { %v4826_v51 = vpop.f32.mrb[44].mxu1 }
 0x615   : > { %v8010_v62 = vadd.f32 %v4826_v51, %v11777_v12  ;;  %v4828_v19 = vpop.f32.mrb[45].mxu1 }
 0x616   : > { %v4829_v28 = vpop.f32.mrb[46].mxu1 }
 0x617   : > { %v11977_v40 = vadd.f32 %v8010_v62, %v11881_v48  ;;  %v8011_v45 = vadd.f32 %v4829_v28, %v11779_v63  ;;  %v4831_v21 = vpop.f32.mrb[47].mxu1 }
 0x619   : > { %v11981_v60 = vadd.f32 %v8011_v45, %v11885_v4  ;;  %v5131_v4 = vsel %vm9917_vm14, %v11957_v15, 0.0  ;;  %v5134_v21 = vsel %vm10004_vm9, %v11977_v40, 0.0 }
 0x61c   : > { %v4834_v53 = vpop.f32.mrb[48].mxu1 }
 0x61d   : > { %v8012_v25 = vadd.f32 %v4834_v53, %v11784_v30  ;;  %v4836_v7 = vpop.f32.mrb[49].mxu1 }
 0x61e   : > { %v4837_v46 = vpop.f32.mrb[50].mxu1 }
 0x61f   : > { %v11985_v12 = vadd.f32 %v8012_v25, %v11879_v35  ;;  %v8013_v24 = vadd.f32 %v4837_v46, %v11786_v58  ;;  %v4839_v51 = vpop.f32.mrb[51].mxu1  ;;  %v5130_v35 = vsel %vm9922_vm15, %v11949_v52, 0.0  ;;  %v5132_v58 = vsel %vm9926_vm0, %v11965_v44, 0.0 }
 0x620   : > { %v5166_v7 = vadd.f32 %v5131_v4, %v5130_v35  ;;  %v5133_v51 = vsel %vm9993_vm8, %v11969_v61, 0.0 }
 0x621   : > { %v11989_v48 = vadd.f32 %v8013_v24, %v11883_v50 }
 0x624   : > { %v4842_v62 = vpop.f32.mrb[52].mxu1 }
 0x625   : > { %v8014_v19 = vadd.f32 %v4842_v62, %v11791_v32  ;;  %v4844_v28 = vpop.f32.mrb[53].mxu1  ;;  %v5167_v32 = vadd.f32 %v5166_v7, %v5132_v58  ;;  %v8844_v7 = vld [vmem:[%s13488_s3 + $0x1b8] sm:$0xff]  }
 0x626   : > { %v4845_v30 = vpop.f32.mrb[54].mxu1 }
 0x627   : > { %v12002_v50 = vadd.f32 %v8014_v19, %v11890_v16  ;;  %v8015_v53 = vadd.f32 %v4845_v30, %v11793_v14  ;;  %v4847_v25 = vpop.f32.mrb[55].mxu1  ;;  %v5168_v63 = vadd.f32 %v5167_v32, %v5133_v51 }
 0x629   : > { %v12006_v46 = vadd.f32 %v8015_v53, %v11894_v57  ;;  %v5169_v35 = vadd.f32 %v5168_v63, %v5134_v21  ;;  %v5135_v53 = vsel %vm10027_vm2, %v11981_v60, 0.0  ;;  %v5137_v63 = vsel %vm13851_vm1, %v11989_v48, 0.0 }
 0x62b   : > { %v5170_v32 = vadd.f32 %v5169_v35, %v5135_v53  ;;  %v13961_v53 = vld [vmem:[#allocation22_spill] sm:$0xff] }
 0x62c   : > { %v4850_v62 = vpop.f32.mrb[56].mxu1  ;;  %vm13962_vm11 = vnez %v13961_v53 }
 0x62d   : > { %v8016_v16 = vadd.f32 %v4850_v62, %v11798_v31  ;;  %v4852_v19 = vpop.f32.mrb[57].mxu1  ;;  %v5136_v31 = vsel %vm13849_vm12, %v11985_v12, 0.0 }
 0x62e   : > { %v4853_v14 = vpop.f32.mrb[58].mxu1 }
 0x62f   : > { %v12016_v4 = vadd.f32 %v8016_v16, %v11888_v55  ;;  %v8017_v57 = vadd.f32 %v4853_v14, %v11800_v41  ;;  %v4855_v30 = vpop.f32.mrb[59].mxu1  ;;  %v5171_v16 = vadd.f32 %v5170_v32, %v5136_v31  ;;  %v5138_v14 = vsel %vm13960_vm10, %v12002_v50, 0.0 }
 0x630   : > { %v5139_v31 = vsel %vm13962_vm11, %v12006_v46, 0.0 }
 0x631   : > { %v12023_v25 = vadd.f32 %v8017_v57, %v11892_v18 }
 0x634   : > { %v4858_v51 = vpop.f32.mrb[60].mxu1 }
 0x635   : > { %v8018_v55 = vadd.f32 %v4858_v51, %v11805_v0  ;;  %v4860_v62 = vpop.f32.mrb[61].mxu1  ;;  %v5172_v0 = vadd.f32 %v5171_v16, %v5137_v63 }
 0x636   : > { %v4861_v41 = vpop.f32.mrb[62].mxu1 }
 0x637   : > { %v12033_v21 = vadd.f32 %v8018_v55, %v11899_v23  ;;  %v8019_v18 = vadd.f32 %v4861_v41, %v11807_v11  ;;  %v4863_v19 = vpop.f32.mrb[63].mxu1  ;;  %v5173_v30 = vadd.f32 %v5172_v0, %v5138_v14  ;;  %v13963_v11 = vld [vmem:[#allocation23_spill] sm:$0xff]  ;;  %v13967_v0 = vld [vmem:[#allocation25_spill] sm:$0xff] }
 0x638   : > { %vm13964_vm5 = vnez %v13963_v11  ;;  %v13965_v19 = vld [vmem:[#allocation24_spill] sm:$0xff]  ;;  %vm13968_vm13 = vnez %v13967_v0 }
 0x639   : > { %v12040_v57 = vadd.f32 %v8019_v18, %v11903_v17  ;;  %v5140_v55 = vsel %vm13964_vm5, %v12016_v4, 0.0  ;;  %v5174_v41 = vadd.f32 %v5173_v30, %v5139_v31  ;;  %vm13966_vm6 = vnez %v13965_v19 }
 0x63b   : > { %v5175_v18 = vadd.f32 %v5174_v41, %v5140_v55  ;;  %v13969_v55 = vld [vmem:[#allocation26_spill] sm:$0xff]  ;;  %v13971_v41 = vld [vmem:[#allocation27_spill] sm:$0xff] }
 0x63c   : > { %v4866_v35 = vpop.f32.mrb[64].mxu1  ;;  %vm13970_vm7 = vnez %v13969_v55  ;;  %vm13972_vm3 = vnez %v13971_v41 }
 0x63d   : > { %v8020_v23 = vadd.f32 %v4866_v35, %v11812_v20  ;;  %v4868_v32 = vpop.f32.mrb[65].mxu1  ;;  %v5141_v20 = vsel %vm13966_vm6, %v12023_v25, 0.0  ;;  %v5142_v35 = vsel %vm13968_vm13, %v12033_v21, 0.0 }
 0x63e   : > { %v4869_v51 = vpop.f32.mrb[66].mxu1  ;;  %v5176_v32 = vadd.f32 %v5175_v18, %v5141_v20 }
 0x63f   : > { %v12050_v62 = vadd.f32 %v8020_v23, %v11897_v42  ;;  %v8021_v17 = vadd.f32 %v4869_v51, %v11814_v37  ;;  %v4871_v16 = vpop.f32.mrb[67].mxu1 }
 0x640   : > { %v5177_v51 = vadd.f32 %v5176_v32, %v5142_v35  ;;  %v13973_v35 = vld [vmem:[#allocation28_spill] sm:$0xff] }
 0x641   : > { %v12054_v63 = vadd.f32 %v8021_v17, %v11901_v33  ;;  %v5143_v17 = vsel %vm13970_vm7, %v12040_v57, 0.0  ;;  %vm13974_vm4 = vnez %v13973_v35 }
 0x642   : > { %v5178_v18 = vadd.f32 %v5177_v51, %v5143_v17 }
 0x644   : > { %v4874_v14 = vpop.f32.mrb[68].mxu1 }
 0x645   : > { %v8022_v42 = vadd.f32 %v4874_v14, %v11819_v9  ;;  %v4876_v23 = vpop.f32.mrb[69].mxu1  ;;  %v5144_v9 = vsel %vm13972_vm3, %v12050_v62, 0.0 }
 0x646   : > { %v4877_v37 = vpop.f32.mrb[70].mxu1  ;;  %v5145_v23 = vsel %vm13974_vm4, %v12054_v63, 0.0 }
 0x647   : > { %v12064_v30 = vadd.f32 %v8022_v42, %v11908_v10  ;;  %v8023_v33 = vadd.f32 %v4877_v37, %v11821_v43  ;;  %v4879_v31 = vpop.f32.mrb[71].mxu1  ;;  %v5179_v42 = vadd.f32 %v5178_v18, %v5144_v9  ;;  %v13977_v18 = vld [vmem:[#allocation30_spill] sm:$0xff] }
 0x648   : > { %vm13978_vm7 = vnez %v13977_v18 }
 0x649   : > { %v12071_v16 = vadd.f32 %v8023_v33, %v11912_v1  ;;  %v13975_v33 = vld [vmem:[#allocation29_spill] sm:$0xff] }
 0x64a   : > { %vm13976_vm3 = vnez %v13975_v33 }
 0x64b   : > { %v5146_v31 = vsel %vm13976_vm3, %v12064_v30, 0.0 }
 0x64c   : > { %v4882_v20 = vpop.f32.mrb[72].mxu1 }
 0x64d   : > { %v8024_v10 = vadd.f32 %v4882_v20, %v11826_v47  ;;  %v4884_v14 = vpop.f32.mrb[73].mxu1  ;;  %v5180_v47 = vadd.f32 %v5179_v42, %v5145_v23  ;;  %v5147_v20 = vsel %vm13978_vm7, %v12071_v16, 0.0 }
 0x64e   : > { %v4885_v43 = vpop.f32.mrb[74].mxu1 }
 0x64f   : > { %v12081_v32 = vadd.f32 %v8024_v10, %v11906_v38  ;;  %v8025_v1 = vadd.f32 %v4885_v43, %v11828_v8  ;;  %v4887_v37 = vpop.f32.mrb[75].mxu1  ;;  %v5181_v17 = vadd.f32 %v5180_v47, %v5146_v31  ;;  %v13979_v8 = vld [vmem:[#allocation31_spill] sm:$0xff]  ;;  %v13983_v47 = vld [vmem:[#allocation32_spill] sm:$0xff] }
 0x650   : > { %vm13980_vm4 = vnez %v13979_v8  ;;  %vm13984_vm7 = vnez %v13983_v47 }
 0x651   : > { %v12088_v51 = vadd.f32 %v8025_v1, %v11910_v26  ;;  %v5148_v43 = vsel %vm13980_vm4, %v12081_v32, 0.0  ;;  %v5182_v23 = vadd.f32 %v5181_v17, %v5147_v20 }
 0x653   : > { %v5183_v31 = vadd.f32 %v5182_v23, %v5148_v43  ;;  %v13991_v23 = vld [vmem:[#allocation52_spill] sm:$0xff] }
 0x654   : > { %v4890_v9 = vpop.f32.mrb[76].mxu1 }
 0x655   : > { %v8026_v38 = vadd.f32 %v4890_v9, %v11830_v13  ;;  %v4892_v10 = vpop.f32.mrb[77].mxu1  ;;  %v5149_v13 = vsel %vm13984_vm7, %v12088_v51, 0.0 }
 0x656   : > { %v4893_v14 = vpop.f32.mrb[78].mxu1  ;;  %v13985_v10 = vld [vmem:[#allocation33_spill] sm:$0xff]  ;;  %v5184_v18 = vadd.f32 %v5183_v31, %v5149_v13 }
 0x657   : > { %v12098_v37 = vadd.f32 %v8026_v38, %v11917_v3  ;;  %v8027_v26 = vadd.f32 %v4893_v14, %v11832_v27  ;;  %v4895_v42 = vpop.f32.mrb[79].mxu1  ;;  %vm13986_vm3 = vnez %v13985_v10  ;;  %v13993_v10 = vld [vmem:[#allocation35_spill] sm:$0xff] }
 0x659   : > { %13981 = vst [vmem:[#allocation13_spill] sm:$0xff] %v12098_v37  ;;  %v12102_v1 = vadd.f32 %v8027_v26, %v11921_v22  ;;  %v5150_v8 = vsel %vm13986_vm3, %v12098_v37, 0.0  ;;  %v13988_v22 = vld [vmem:[#allocation18_spill] sm:$0xff]  ;;  %vm13994_vm3 = vnez %v13993_v10 }
 0x65a   : > { %v5185_v43 = vadd.f32 %v5184_v18, %v5150_v8  ;;  %v13989_v26 = vld [vmem:[#allocation34_spill] sm:$0xff]  ;;  %v13996_v18 = vld [vmem:[#allocation37_spill] sm:$0xff] }
 0x65b   : > { %13982 = vst [vmem:[#allocation15_spill] sm:$0xff] %v12102_v1  ;;  %vm13990_vm7 = vnez %v13989_v26  ;;  %vm13997_vm4 = vnez %v13996_v18  ;;  %v14001_v10 = vld [vmem:[#allocation38_spill] sm:$0xff]  ;;  %v14006_v18 = vld [vmem:[#allocation36_spill] sm:$0xff] }
 0x65c   : > { %v4898_v9 = vpop.f32.mrb[80].mxu1  ;;  %v5151_v42 = vsel %vm13990_vm7, %v12102_v1, 0.0 }
 0x65d   : > { %v8028_v3 = vadd.f32 %v4898_v9, %v11835_v39  ;;  %v4900_v38 = vpop.f32.mrb[81].mxu1  ;;  %v5186_v31 = vadd.f32 %v5185_v43, %v5151_v42  ;;  %v13995_v9 = vld [vmem:[#allocation20_spill] sm:$0xff] }
 0x65e   : > { %v4901_v27 = vpop.f32.mrb[82].mxu1  ;;  %v14003_v42 = vld [vmem:[#allocation56_spill] sm:$0xff] }
 0x65f   : > { %v12112_v17 = vadd.f32 %v8028_v3, %v11915_v29  ;;  %v8029_v20 = vadd.f32 %v4901_v27, %v13988_v22  ;;  %v4903_v14 = vpop.f32.mrb[83].mxu1  ;;  %v13998_v22 = vld [vmem:[#allocation54_spill] sm:$0xff] }
 0x661   : > { %13987 = vst [vmem:[#allocation16_spill] sm:$0xff] %v12112_v17  ;;  %v12119_v47 = vadd.f32 %v8029_v20, %v13991_v23  ;;  %v5152_v39 = vsel %vm13994_vm3, %v12112_v17, 0.0  ;;  %v14000_v20 = vld [vmem:[#allocation21_spill] sm:$0xff]  ;;  %vm14002_vm3 = vnez %v14001_v10 }
 0x662   : > { %v5187_v38 = vadd.f32 %v5186_v31, %v5152_v39 }
 0x663   : > { %13992 = vst [vmem:[#allocation17_spill] sm:$0xff] %v12119_v47  ;;  %v5153_v8 = vsel %vm13997_vm4, %v12119_v47, 0.0 }
 0x664   : > { %v4906_v13 = vpop.f32.mrb[84].mxu1 }
 0x665   : > { %v8030_v29 = vadd.f32 %v4906_v13, %v13995_v9  ;;  %v4908_v3 = vpop.f32.mrb[85].mxu1  ;;  %v5188_v13 = vadd.f32 %v5187_v38, %v5153_v8  ;;  %v14004_v9 = vld [vmem:[#allocation39_spill] sm:$0xff] }
 0x666   : > { %v4909_v27 = vpop.f32.mrb[86].mxu1  ;;  %vm14005_vm7 = vnez %v14004_v9  ;;  %v14011_v8 = vld [vmem:[#allocation55_spill] sm:$0xff] }
 0x667   : > { %v12129_v14 = vadd.f32 %v8030_v29, %v13998_v22  ;;  %v8031_v23 = vadd.f32 %v4909_v27, %v14000_v20  ;;  %v4911_v26 = vpop.f32.mrb[87].mxu1  ;;  %v14007_v27 = vld [vmem:[#allocation53_spill] sm:$0xff]  ;;  %v14008_v20 = vld [vmem:[#allocation8_spill] sm:$0xff] }
 0x669   : > { %13999 = vst [vmem:[#allocation19_spill] sm:$0xff] %v12129_v14  ;;  %v5154_v43 = vsel %vm14002_vm3, %v12129_v14, 0.0  ;;  %v12136_v17 = vadd.f32 %v8031_v23, %v14003_v42  ;;  %v14009_v23 = vld [vmem:[#allocation40_spill] sm:$0xff] }
 0x66a   : > { %v5189_v39 = vadd.f32 %v5188_v13, %v5154_v43  ;;  %vm14010_vm3 = vnez %v14009_v23  ;;  %v14012_v13 = vld [vmem:[#allocation41_spill] sm:$0xff] }
 0x66b   : > { %v5155_v3 = vsel %vm14005_vm7, %v12136_v17, 0.0  ;;  %vm14013_vm7 = vnez %v14012_v13 }
 0x66c   : > { %v4914_v31 = vpop.f32.mrb[88].mxu1  ;;  %v5190_v1 = vadd.f32 %v5189_v39, %v5155_v3  ;;  %v14015_v39 = vld [vmem:[#allocation11_spill] sm:$0xff] }
 0x66d   : > { %v8032_v29 = vadd.f32 %v4914_v31, %v14006_v18  ;;  %v4916_v22 = vpop.f32.mrb[89].mxu1 }
 0x66e   : > { %v4917_v47 = vpop.f32.mrb[90].mxu1 }
 0x66f   : > { %v12143_v26 = vadd.f32 %v8032_v29, %v14007_v27  ;;  %v8033_v10 = vadd.f32 %v4917_v47, %v14008_v20  ;;  %v4919_v14 = vpop.f32.mrb[91].mxu1  ;;  %v14014_v29 = vld [vmem:[#allocation10_spill] sm:$0xff] }
 0x671   : > { %v5156_v38 = vsel %vm14010_vm3, %v12143_v26, 0.0  ;;  %v12150_v43 = vadd.f32 %v8033_v10, %v14011_v8  ;;  %v14016_v10 = vld [vmem:[#allocation42_spill] sm:$0xff] }
 0x672   : > { %v5191_v42 = vadd.f32 %v5190_v1, %v5156_v38  ;;  %vm14017_vm3 = vnez %v14016_v10 }
 0x673   : > { %v5157_v18 = vsel %vm14013_vm7, %v12150_v43, 0.0 }
 0x674   : > { %v5192_v31 = vadd.f32 %v5191_v42, %v5157_v18  ;;  %v4922_v22 = vpop.f32.mrb[92].mxu1  ;;  %v14018_v42 = vld [vmem:[#allocation43_spill] sm:$0xff] }
 0x675   : > { %v8034_v27 = vadd.f32 %v4922_v22, %v14014_v29  ;;  %v4924_v9 = vpop.f32.mrb[93].mxu1  ;;  %vm14019_vm7 = vnez %v14018_v42  ;;  %v14020_v29 = vld [vmem:[#allocation46_spill] sm:$0xff] }
 0x676   : > { %v4925_v47 = vpop.f32.mrb[94].mxu1 }
 0x677   : > { %v12157_v14 = vadd.f32 %v8034_v27, %v11935_v5  ;;  %v8035_v3 = vadd.f32 %v4925_v47, %v14015_v39  ;;  %v4927_v20 = vpop.f32.mrb[95].mxu1  ;;  %v14021_v47 = vld [vmem:[#allocation57_spill] sm:$0xff] }
 0x678   : > { %v14022_v20 = vld [vmem:[#allocation47_spill] sm:$0xff] }
 0x679   : > { %v5158_v1 = vsel %vm14017_vm3, %v12157_v14, 0.0  ;;  %v12164_v38 = vadd.f32 %v8035_v3, %v11939_v49  ;;  %v14023_v49 = vld [vmem:[#allocation44_spill] sm:$0xff]  ;;  %v14025_v3 = vld [vmem:[#allocation58_spill] sm:$0xff] }
 0x67a   : > { %v5193_v8 = vadd.f32 %v5192_v31, %v5158_v1  ;;  %vm14024_vm3 = vnez %v14023_v49 }
 0x67b   : > { %v5159_v18 = vsel %vm14019_vm7, %v12164_v38, 0.0 }
 0x67c   : > { %v5194_v9 = vadd.f32 %v5193_v8, %v5159_v18  ;;  %v4930_v22 = vpop.f32.mrb[96].mxu1  ;;  %v14026_v8 = vld [vmem:[#allocation45_spill] sm:$0xff] }
 0x67d   : > { %v8036_v5 = vadd.f32 %v4930_v22, %v14020_v29  ;;  %v4932_v27 = vpop.f32.mrb[97].mxu1  ;;  %vm14027_vm7 = vnez %v14026_v8 }
 0x67e   : > { %v4933_v13 = vpop.f32.mrb[98].mxu1  ;;  %v14028_v27 = vld [vmem:[#allocation48_spill] sm:$0xff] }
 0x67f   : > { %v12171_v39 = vadd.f32 %v8036_v5, %v14021_v47  ;;  %v8037_v10 = vadd.f32 %v4933_v13, %v14022_v20  ;;  %v4935_v23 = vpop.f32.mrb[99].mxu1  ;;  %v14029_v13 = vld [vmem:[#allocation49_spill] sm:$0xff] }
 0x681   : > { %v5160_v31 = vsel %vm14024_vm3, %v12171_v39, 0.0  ;;  %v12178_v1 = vadd.f32 %v8037_v10, %v14025_v3  ;;  %v14030_v10 = vld [vmem:[#allocation5_spill] sm:$0xff] }
 0x682   : > { %v5195_v42 = vadd.f32 %v5194_v9, %v5160_v31  ;;  %vm14031_vm3 = vnez %v14030_v10 }
 0x683   : > { %v5161_v18 = vsel %vm14027_vm7, %v12178_v1, 0.0 }
 0x684   : > { %v4938_v22 = vpop.f32.mrb[100].mxu1  ;;  %v5196_v29 = vadd.f32 %v5195_v42, %v5161_v18  ;;  %v14032_v42 = vld [vmem:[#allocation7_spill] sm:$0xff] }
 0x685   : > { %v8038_v5 = vadd.f32 %v4938_v22, %v14028_v27  ;;  %v4940_v47 = vpop.f32.mrb[101].mxu1  ;;  %vm14033_vm7 = vnez %v14032_v42 }
 0x686   : > { %v4941_v37 = vpop.f32.mrb[102].mxu1  ;;  %v14034_v47 = vld [vmem:[#allocation50_spill] sm:$0xff] }
 0x687   : > { %v8039_v23 = vadd.f32 %v4941_v37, %v14029_v13  ;;  %v12186_v20 = vadd.f32 %v8038_v5, %v11954_v54  ;;  %v4943_v49 = vpop.f32.mrb[103].mxu1  ;;  %v14035_v5 = vld [vmem:[#allocation51_spill] sm:$0xff] }
 0x689   : > { %v5162_v9 = vsel %vm14031_vm3, %v12186_v20, 0.0  ;;  %v12192_v31 = vadd.f32 %v8039_v23, %v11961_v34  ;;  %v14036_v34 = vld [vmem:[#allocation9_spill] sm:$0xff] }
 0x68a   : > { %v5197_v3 = vadd.f32 %v5196_v29, %v5162_v9  ;;  %vm14037_vm3 = vnez %v14036_v34  ;;  %v8863_v34 = vld [vmem:[%s13488_s3 + $0xb8] sm:$0xff]  }
 0x68b   : > { %v5163_v18 = vsel %vm14033_vm7, %v12192_v31, 0.0 }
 0x68c   : > { %v5198_v22 = vadd.f32 %v5197_v3, %v5163_v18  ;;  %v4946_v27 = vpop.f32.mrb[104].mxu1  ;;  %v14038_v3 = vld [vmem:[#allocation6_spill] sm:$0xff] }
 0x68d   : > { %v8040_v37 = vadd.f32 %v4946_v27, %v14034_v47  ;;  %v4948_v13 = vpop.f32.mrb[105].mxu1  ;;  %vm14039_vm7 = vnez %v14038_v3 }
 0x68e   : > { %v4949_v54 = vpop.f32.mrb[106].mxu1 }
 0x68f   : > { %v12199_v49 = vadd.f32 %v8040_v37, %v11952_v36  ;;  %v8041_v10 = vadd.f32 %v4949_v54, %v14035_v5  ;;  %v4951_v8 = vpop.f32.mrb[107].mxu1  ;;  %v8826_v5 = vld [vmem:[%s13488_s3 + $0x10] sm:$0xff]  }
 0x690   : > { %6505 = vmatpush1.bf16.msra.mxu1 %v8826_v5  ;;  %v8836_v5 = vld [vmem:[%s13488_s3 + $0x188] sm:$0xff]  }
 0x691   : > { %v5164_v29 = vsel %vm14037_vm3, %v12199_v49, 0.0  ;;  %v12206_v23 = vadd.f32 %v8041_v10, %v11959_v59  ;;  %v8834_v59 = vld [vmem:[%s13488_s3 + $0x180] sm:$0xff]   ;;  %6506 = vmatprep.subr.bf16.mxu1 %v13827_v2 }
 0x692   : > { %v5199_v9 = vadd.f32 %v5198_v22, %v5164_v29  ;;  %7032 = vmatpush1.bf16.msra.mxu0 %v8834_v59 }
 0x693   : > { %v5165_v18 = vsel %vm14039_vm7, %v12206_v23, 0.0  ;;  %7033 = vmatprep.subr.bf16.mxu0 %v13827_v2 }
 0x694   : > { %v5200_v27 = vadd.f32 %v5199_v9, %v5165_v18 }
 0x696   : > { %v5201_v47 = vrot.slane %v5200_v27, 4  ;;  %7034 = vmatpush1.bf16.msra.mxu0 %v8836_v5  ;;  %v8839_v5 = vld [vmem:[%s13488_s3 + $0x198] sm:$0xff]  }
 0x697   : > { %7035 = vmatprep.subr.bf16.mxu0 %v13827_v2 }
 0x698   : > { %v5202_v13 = vadd.f32 %v5201_v47, %v5200_v27  ;;  %v8842_v27 = vld [vmem:[%s13488_s3 + $0x1a8] sm:$0xff]  }
 0x69a   : > { %v5203_v36 = vrot.slane %v5202_v13, 2 }
 0x69c   : > { %v5204_v37 = vadd.f32 %v5203_v36, %v5202_v13  ;;  %v8837_v36 = vld [vmem:[%s13488_s3 + $0x190] sm:$0xff]   ;;  %v8829_v13 = vld [vmem:[%s13488_s3 + $0x28] sm:$0xff]  }
 0x69d   : > { %7036 = vmatpush1.bf16.msra.mxu0 %v8837_v36  ;;  %v8830_v36 = vld [vmem:[%s13488_s3 + $0x30] sm:$0xff]  }
 0x69e   : > { %v5205_v42 = vrot.slane %v5204_v37, 1  ;;  %7037 = vmatprep.subr.bf16.mxu0 %v13827_v2 }
 0x6a0   : > { %v5206_v54 = vadd.f32 %v5205_v42, %v5204_v37  ;;  %v8828_v37 = vld [vmem:[%s13488_s3 + $0x20] sm:$0xff]  }
 0x6a1   : > { %7038 = vmatpush1.bf16.msra.mxu0 %v8839_v5 }
 0x6a2   : > { %v12211_v8 = vmul.f32 0.00390625, %v5206_v54  ;;  %v8827_v54 = vld [vmem:[%s13488_s3 + $0x18] sm:$0xff]   ;;  %7039 = vmatprep.subr.bf16.mxu0 %v13827_v2 }
 0x6a3   : > { %6507 = vmatpush1.bf16.msra.mxu1 %v8827_v54 }
 0x6a4   : > { %v5233_v10 = vsub.f32 %v12136_v17, %v12211_v8  ;;  %v5234_v22 = vsub.f32 %v12143_v26, %v12211_v8  ;;  %v5235_v29 = vsub.f32 %v12150_v43, %v12211_v8  ;;  %v5236_v42 = vsub.f32 %v12157_v14, %v12211_v8  ;;  %6508 = vmatprep.subr.bf16.mxu1 %v13827_v2 }
 0x6a5   : > { %v5237_v9 = vsub.f32 %v12164_v38, %v12211_v8  ;;  %v5208_v59 = vsub.f32 %v11949_v52, %v12211_v8  ;;  %v5209_v54 = vsub.f32 %v11957_v15, %v12211_v8  ;;  %v5210_v52 = vsub.f32 %v11965_v44, %v12211_v8 }
 0x6a6   : > { %v5211_v44 = vsub.f32 %v11969_v61, %v12211_v8  ;;  %v8831_v61 = vld [vmem:[%s13488_s3 + $0x38] sm:$0xff]   ;;  %v5218_v6 = vsub.f32 %v12016_v4, %v12211_v8 }
 0x6a7   : > { %6509 = vmatpush1.bf16.msra.mxu1 %v8828_v37  ;;  %v12273_v15 = vsel %vm9922_vm15, %v5208_v59, 0.0  ;;  %v12277_v47 = vsel %vm9917_vm14, %v5209_v54, 0.0  ;;  %v5212_v54 = vsub.f32 %v11977_v40, %v12211_v8  ;;  %v12297_v37 = vsel %vm9926_vm0, %v5210_v52, 0.0  ;;  %v5595_v4 = vld [vmem:[#allocation3 + $0x9] sm:$0xff] }
 0x6a8   : > { %6510 = vmatprep.subr.bf16.mxu1 %v13827_v2  ;;  %v5280_v45 = vmul.f32 %v12273_v15, %v12273_v15  ;;  %v5281_v59 = vmul.f32 %v12277_v47, %v12277_v47  ;;  %v12310_v40 = vsel %vm9993_vm8, %v5211_v44, 0.0  ;;  %v5282_v52 = vmul.f32 %v12297_v37, %v12297_v37  ;;  %v8832_v44 = vld [vmem:[%s13488_s3 + $0x40] sm:$0xff]  }
 0x6a9   : > { %v12319_v18 = vsel %vm10004_vm9, %v5212_v54, 0.0  ;;  %v12394_v53 = vsel %vm13964_vm5, %v5218_v6, 0.0  ;;  %v5222_v6 = vsub.f32 %v12050_v62, %v12211_v8  ;;  %vm14042_vm14 = vnez %v13969_v55 }
 0x6aa   : > { %v5316_v5 = vadd.f32 %v5281_v59, %v5280_v45  ;;  %v8843_v45 = vld [vmem:[%s13488_s3 + $0x1b0] sm:$0xff]   ;;  %v5284_v59 = vmul.f32 %v12319_v18, %v12319_v18  ;;  %v5290_v11 = vmul.f32 %v12394_v53, %v12394_v53  ;;  %vm14043_vm15 = vnez %v13971_v41 }
 0x6ab   : > { %6511 = vmatpush1.bf16.msra.mxu1 %v8829_v13  ;;  %v8840_v13 = vld [vmem:[%s13488_s3 + $0x1a0] sm:$0xff]   ;;  %vm14044_vm0 = vnez %v13973_v35  ;;  %vm14045_vm8 = vnez %v13975_v33 }
 0x6ac   : > { %6512 = vmatprep.subr.bf16.mxu1 %v13827_v2  ;;  %7040 = vmatpush1.bf16.msra.mxu0 %v8840_v13  ;;  %v5214_v13 = vsub.f32 %v11985_v12, %v12211_v8  ;;  %v5317_v24 = vadd.f32 %v5316_v5, %v5282_v52  ;;  %v5215_v12 = vsub.f32 %v11989_v48, %v12211_v8 }
 0x6ad   : > { %7041 = vmatprep.subr.bf16.mxu0 %v13827_v2  ;;  %v5217_v52 = vsub.f32 %v12006_v46, %v12211_v8 }
 0x6af   : > { %6513 = vmatpush1.bf16.msra.mxu1 %v8830_v36  ;;  %v5213_v36 = vsub.f32 %v11981_v60, %v12211_v8  ;;  %v5283_v60 = vmul.f32 %v12310_v40, %v12310_v40  ;;  %v12382_v56 = vsel %vm13962_vm11, %v5217_v52, 0.0 }
 0x6b0   : > { %6514 = vmatprep.subr.bf16.mxu1 %v13827_v2  ;;  %7042 = vmatpush1.bf16.msra.mxu0 %v8842_v27  ;;  %v5216_v27 = vsub.f32 %v12002_v50, %v12211_v8  ;;  %v12355_v50 = vsel %vm13851_vm1, %v5215_v12, 0.0  ;;  %v5594_v12 = vld [vmem:[#allocation3 + $0x1] sm:$0xff] }
 0x6b1   : > { %v12334_v28 = vsel %vm10027_vm2, %v5213_v36, 0.0  ;;  %7043 = vmatprep.subr.bf16.mxu0 %v13827_v2  ;;  %v5318_v54 = vadd.f32 %v5317_v24, %v5283_v60  ;;  %v8833_v36 = vld [vmem:[%s13488_s3 + $0x48] sm:$0xff]   ;;  %v8835_v60 = vld [vmem:[%s13488_s3 + $0x50] sm:$0xff]   ;;  %v5287_v24 = vmul.f32 %v12355_v50, %v12355_v50 }
 0x6b2   : > { %v5285_v48 = vmul.f32 %v12334_v28, %v12334_v28  ;;  %v12370_v46 = vsel %vm13960_vm10, %v5216_v27, 0.0 }
 0x6b3   : > { %6515 = vmatpush1.bf16.msra.mxu1 %v8831_v61  ;;  %v12343_v61 = vsel %vm13849_vm12, %v5214_v13, 0.0  ;;  %v5319_v58 = vadd.f32 %v5318_v54, %v5284_v59  ;;  %v5219_v59 = vsub.f32 %v12023_v25, %v12211_v8  ;;  %v5288_v54 = vmul.f32 %v12370_v46, %v12370_v46 }
 0x6b4   : > { %6516 = vmatprep.subr.bf16.mxu1 %v13827_v2  ;;  %7044 = vmatpush1.bf16.msra.mxu0 %v8843_v45  ;;  %v5286_v5 = vmul.f32 %v12343_v61, %v12343_v61  ;;  %v8846_v45 = vld [vmem:[%s13488_s3 + $0x1c0] sm:$0xff]   ;;  %v5220_v25 = vsub.f32 %v12033_v21, %v12211_v8 }
 0x6b5   : > { %7045 = vmatprep.subr.bf16.mxu0 %v13827_v2  ;;  %v5320_v13 = vadd.f32 %v5319_v58, %v5285_v48  ;;  %v8838_v48 = vld [vmem:[%s13488_s3 + $0x58] sm:$0xff]   ;;  %v5630_v58 = vpack.c.bf16 %v5595_v4, %v5594_v12  ;;  %v12406_v21 = vsel %vm13966_vm6, %v5219_v59, 0.0  ;;  %v8845_v59 = vld [vmem:[%s13488_s3 + $0x68] sm:$0xff]   ;;  %v5224_v4 = vsub.f32 %v12064_v30, %v12211_v8 }
 0x6b6   : > { %v5291_v19 = vmul.f32 %v12406_v21, %v12406_v21 }
 0x6b7   : > { %6517 = vmatpush1.bf16.msra.mxu1 %v8832_v44  ;;  %v5321_v44 = vadd.f32 %v5320_v13, %v5286_v5  ;;  %6532 = vmatprep.mubr.bf16.mxu1 %v5630_v58  ;;  %v5221_v5 = vsub.f32 %v12040_v57, %v12211_v8  ;;  %v12418_v57 = vsel %vm13968_vm13, %v5220_v25, 0.0  ;;  %v8848_v25 = vld [vmem:[%s13488_s3 + $0x70] sm:$0xff]  }
 0x6b8   : > { %6518 = vmatprep.subr.bf16.mxu1 %v13827_v2  ;;  %7046 = vmatpush1.bf16.msra.mxu0 %v8844_v7  ;;  %v8847_v7 = vld [vmem:[%s13488_s3 + $0x1c8] sm:$0xff]   ;;  %v5292_v0 = vmul.f32 %v12418_v57, %v12418_v57 }
 0x6b9   : > { %7047 = vmatprep.subr.bf16.mxu0 %v13827_v2  ;;  %v5322_v27 = vadd.f32 %v5321_v44, %v5287_v24  ;;  %v8849_v44 = vld [vmem:[%s13488_s3 + $0x1d0] sm:$0xff]   ;;  %v12430_v62 = vsel %vm14042_vm14, %v5221_v5, 0.0  ;;  %v5227_v5 = vsub.f32 %v12088_v51, %v12211_v8 }
 0x6ba   : > { %v5293_v55 = vmul.f32 %v12430_v62, %v12430_v62 }
 0x6bb   : > { %6519 = vmatpush1.bf16.msra.mxu1 %v8833_v36  ;;  %v5289_v36 = vmul.f32 %v12382_v56, %v12382_v56  ;;  %v5323_v52 = vadd.f32 %v5322_v27, %v5288_v54  ;;  %v8850_v27 = vld [vmem:[%s13488_s3 + $0x1d8] sm:$0xff]  }
 0x6bc   : > { %6520 = vmatprep.subr.bf16.mxu1 %v13827_v2  ;;  %7048 = vmatpush1.bf16.msra.mxu0 %v8846_v45  ;;  %v5223_v45 = vsub.f32 %v12054_v63, %v12211_v8  ;;  %v12442_v63 = vsel %vm14043_vm15, %v5222_v6, 0.0  ;;  %v14048_v6 = vld [vmem:[#allocation13_spill] sm:$0xff] }
 0x6bd   : > { %7049 = vmatprep.subr.bf16.mxu0 %v13827_v2  ;;  %v5324_v13 = vadd.f32 %v5323_v52, %v5289_v36  ;;  %v5294_v41 = vmul.f32 %v12442_v63, %v12442_v63  ;;  %v5226_v36 = vsub.f32 %v12081_v32, %v12211_v8 }
 0x6be   : > { %v12454_v30 = vsel %vm14044_vm0, %v5223_v45, 0.0 }
 0x6bf   : > { %6521 = vmatpush1.bf16.msra.mxu1 %v8835_v60  ;;  %v8841_v60 = vld [vmem:[%s13488_s3 + $0x60] sm:$0xff]   ;;  %v5325_v24 = vadd.f32 %v5324_v13, %v5290_v11  ;;  %v5295_v35 = vmul.f32 %v12454_v30, %v12454_v30  ;;  %v14046_v11 = vld [vmem:[#allocation30_spill] sm:$0xff] }
 0x6c0   : > { %6522 = vmatprep.subr.bf16.mxu1 %v13827_v2  ;;  %7050 = vmatpush1.bf16.msra.mxu0 %v8847_v7  ;;  %v8852_v7 = vld [vmem:[%s13488_s3 + $0x1e0] sm:$0xff]   ;;  %vm14047_vm9 = vnez %v14046_v11  ;;  %v8855_v11 = vld [vmem:[%s13488_s3 + $0x1f0] sm:$0xff]  }
 0x6c1   : > { %7051 = vmatprep.subr.bf16.mxu0 %v13827_v2  ;;  %v5326_v12 = vadd.f32 %v5325_v24, %v5291_v19  ;;  %v5228_v19 = vsub.f32 %v14048_v6, %v12211_v8  ;;  %v14049_v24 = vld [vmem:[#allocation31_spill] sm:$0xff] }
 0x6c2   : > { %vm14050_vm2 = vnez %v14049_v24 }
 0x6c3   : > { %6523 = vmatpush1.bf16.msra.mxu1 %v8838_v48  ;;  %v5327_v54 = vadd.f32 %v5326_v12, %v5292_v0  ;;  %v5225_v48 = vsub.f32 %v12071_v16, %v12211_v8  ;;  %v12466_v16 = vsel %vm14045_vm8, %v5224_v4, 0.0  ;;  %v12490_v51 = vsel %vm14050_vm2, %v5226_v36, 0.0  ;;  %v8853_v0 = vld [vmem:[%s13488_s3 + $0x1e8] sm:$0xff]   ;;  %v14051_v12 = vld [vmem:[#allocation15_spill] sm:$0xff] }
 0x6c4   : > { %6524 = vmatprep.subr.bf16.mxu1 %v13827_v2  ;;  %7052 = vmatpush1.bf16.msra.mxu0 %v8849_v44  ;;  %v5296_v33 = vmul.f32 %v12466_v16, %v12466_v16  ;;  %v14052_v4 = vld [vmem:[#allocation32_spill] sm:$0xff] }
 0x6c5   : > { %7053 = vmatprep.subr.bf16.mxu0 %v13827_v2  ;;  %v5328_v58 = vadd.f32 %v5327_v54, %v5293_v55  ;;  %v12478_v32 = vsel %vm14047_vm9, %v5225_v48, 0.0  ;;  %vm14053_vm12 = vnez %v14052_v4  ;;  %v8901_v54 = vld [vmem:[#allocation2] sm:$0xff]  ;;  %v5298_v48 = vmul.f32 %v12490_v51, %v12490_v51 }
 0x6c6   : > { %v5297_v44 = vmul.f32 %v12478_v32, %v12478_v32  ;;  %v12502_v55 = vsel %vm14053_vm12, %v5227_v5, 0.0 }
 0x6c7   : > { %6525 = vmatpush1.bf16.msra.mxu1 %v8841_v60  ;;  %v5329_v52 = vadd.f32 %v5328_v58, %v5294_v41  ;;  %v8851_v60 = vld [vmem:[%s13488_s3 + $0x78] sm:$0xff]   ;;  %v8854_v58 = vld [vmem:[%s13488_s3 + $0x80] sm:$0xff]  }
 0x6c8   : > { %6526 = vmatprep.subr.bf16.mxu1 %v13827_v2  ;;  %7054 = vmatpush1.bf16.msra.mxu0 %v8850_v27  ;;  %v5576_v27 = vpack.c.bf16 %v8901_v54, %v8901_v54 }
 0x6c9   : > { %7055 = vmatprep.subr.bf16.mxu0 %v13827_v2  ;;  %v5330_v13 = vadd.f32 %v5329_v52, %v5295_v35  ;;  %v14055_v35 = vld [vmem:[#allocation33_spill] sm:$0xff] }
 0x6ca   : > { %vm14056_vm1 = vnez %v14055_v35  ;;  %v14064_v35 = vld [vmem:[#allocation38_spill] sm:$0xff] }
 0x6cb   : > { %6527 = vmatpush1.bf16.msra.mxu1 %v8845_v59  ;;  %v5331_v45 = vadd.f32 %v5330_v13, %v5296_v33  ;;  %v5229_v59 = vsub.f32 %v14051_v12, %v12211_v8  ;;  %v12514_v52 = vsel %vm14056_vm1, %v5228_v19, 0.0  ;;  %v14057_v33 = vld [vmem:[#allocation17_spill] sm:$0xff]  ;;  %v14061_v12 = vld [vmem:[#allocation35_spill] sm:$0xff]  ;;  %vm14065_vm5 = vnez %v14064_v35  ;;  %v14077_v35 = vld [vmem:[#allocation44_spill] sm:$0xff] }
 0x6cc   : > { %6528 = vmatprep.subr.bf16.mxu1 %v13827_v2  ;;  %7056 = vmatpush1.bf16.msra.mxu0 %v8852_v7  ;;  %v5299_v7 = vmul.f32 %v12502_v55, %v12502_v55  ;;  %v5231_v13 = vsub.f32 %v14057_v33, %v12211_v8  ;;  %v5300_v19 = vmul.f32 %v12514_v52, %v12514_v52  ;;  %v14066_v33 = vld [vmem:[#allocation39_spill] sm:$0xff] }
 0x6cd   : > { %7057 = vmatprep.subr.bf16.mxu0 %v13827_v2  ;;  %v5332_v41 = vadd.f32 %v5331_v45, %v5297_v44  ;;  %v8857_v44 = vld [vmem:[%s13488_s3 + $0x88] sm:$0xff]   ;;  %v14060_v45 = vld [vmem:[#allocation19_spill] sm:$0xff]  ;;  %vm14062_vm11 = vnez %v14061_v12  ;;  %vm14067_vm6 = vnez %v14066_v33  ;;  %vm14078_vm0 = vnez %v14077_v35  ;;  %v14080_v33 = vld [vmem:[#allocation45_spill] sm:$0xff] }
 0x6ce   : > { %vm14081_vm8 = vnez %v14080_v33 }
 0x6cf   : > { %6529 = vmatpush1.bf16.msra.mxu1 %v8848_v25  ;;  %v14054_v25 = vld [vmem:[#allocation16_spill] sm:$0xff]  ;;  %v5333_v5 = vadd.f32 %v5332_v41, %v5298_v48  ;;  %v12548_v41 = vsel %vm13997_vm4, %v5231_v13, 0.0  ;;  %v12568_v13 = vsel %vm14067_vm6, %v5233_v10, 0.0  ;;  %v14074_v48 = vld [vmem:[#allocation43_spill] sm:$0xff] }
 0x6d0   : > { %6530 = vmatprep.subr.bf16.mxu1 %v13827_v2  ;;  %v5230_v36 = vsub.f32 %v14054_v25, %v12211_v8  ;;  %7058 = vmatpush1.bf16.msra.mxu0 %v8853_v0  ;;  %v5232_v0 = vsub.f32 %v14060_v45, %v12211_v8  ;;  %v5305_v17 = vmul.f32 %v12568_v13, %v12568_v13 }
 0x6d1   : > { %7059 = vmatprep.subr.bf16.mxu0 %v13827_v2  ;;  %v5334_v24 = vadd.f32 %v5333_v5, %v5299_v7  ;;  %v5303_v5 = vmul.f32 %v12548_v41, %v12548_v41  ;;  %vm14075_vm15 = vnez %v14074_v48 }
 0x6d2   : > { %v12538_v4 = vsel %vm14062_vm11, %v5230_v36, 0.0  ;;  %v8858_v36 = vld [vmem:[%s13488_s3 + $0x90] sm:$0xff]   ;;  %v12558_v7 = vsel %vm14065_vm5, %v5232_v0, 0.0 }
 0x6d3   : > { %6531 = vmatpush1.bf16.msra.mxu1 %v8851_v60  ;;  %v14058_v60 = vld [vmem:[#allocation34_spill] sm:$0xff]  ;;  %v5335_v54 = vadd.f32 %v5334_v24, %v5300_v19  ;;  %v14070_v0 = vld [vmem:[#allocation41_spill] sm:$0xff] }
 0x6d4   : > { %6677 = vmatprep.subr.bf16.mxu1 %v13827_v2  ;;  %vm14059_vm10 = vnez %v14058_v60  ;;  %7060 = vmatpush1.bf16.msra.mxu0 %v8855_v11  ;;  %v5304_v60 = vmul.f32 %v12558_v7, %v12558_v7  ;;  %v8859_v24 = vld [vmem:[%s13488_s3 + $0x98] sm:$0xff]   ;;  %vm14071_vm4 = vnez %v14070_v0 }
 0x6d5   : > { %v12526_v6 = vsel %vm14059_vm10, %v5229_v59, 0.0  ;;  %7061 = vmatprep.subr.bf16.mxu0 %v13827_v2  ;;  %v12590_v12 = vsel %vm14071_vm4, %v5235_v29, 0.0 }
 0x6d6   : > { %6533 = vmatmul.mubr.bf16.vlgmr.msra.gmra.mrb[108].mxu1 %v5576_v27  ;;  %v5301_v59 = vmul.f32 %v12526_v6, %v12526_v6  ;;  %v8856_v27 = vld [vmem:[%s13488_s3 + $0x1f8] sm:$0xff]   ;;  %v5307_v43 = vmul.f32 %v12590_v12, %v12590_v12 }
 0x6d7   : > { %6678 = vmatpush1.bf16.msra.mxu1 %v8854_v58  ;;  %v5302_v58 = vmul.f32 %v12538_v4, %v12538_v4 }
 0x6d8   : > { %6679 = vmatprep.subr.bf16.mxu1 %v13827_v2  ;;  %v5336_v25 = vadd.f32 %v5335_v54, %v5301_v59  ;;  %7062 = vmatpush1.bf16.msra.mxu0 %v8856_v27  ;;  %v14072_v54 = vld [vmem:[#allocation42_spill] sm:$0xff] }
 0x6d9   : > { %vm14073_vm14 = vnez %v14072_v54 }
 0x6da   : > { %v5337_v11 = vadd.f32 %v5336_v25, %v5302_v58  ;;  %v12602_v27 = vsel %vm14073_vm14, %v5236_v42, 0.0  ;;  %v12612_v58 = vsel %vm14075_vm15, %v5237_v9, 0.0  ;;  %v8861_v42 = vld [vmem:[%s13488_s3 + $0xa8] sm:$0xff]  }
 0x6db   : > { %6680 = vmatpush1.bf16.msra.mxu1 %v8857_v44  ;;  %v14068_v44 = vld [vmem:[#allocation40_spill] sm:$0xff]  ;;  %v5308_v14 = vmul.f32 %v12602_v27, %v12602_v27  ;;  %v5309_v38 = vmul.f32 %v12612_v58, %v12612_v58 }
 0x6dc   : > { %6681 = vmatprep.subr.bf16.mxu1 %v13827_v2  ;;  %v5338_v19 = vadd.f32 %v5337_v11, %v5303_v5  ;;  %vm14069_vm13 = vnez %v14068_v44  ;;  %v14079_v11 = vsub.f32 %v12178_v1, %v12211_v8  ;;  %v14082_v44 = vsub.f32 %v12186_v20, %v12211_v8 }
 0x6dd   : > { %v12580_v45 = vsel %vm14069_vm13, %v5234_v22, 0.0  ;;  %v8860_v22 = vld [vmem:[%s13488_s3 + $0xa0] sm:$0xff]  }
 0x6de   : > { %v5339_v10 = vadd.f32 %v5338_v19, %v5304_v60  ;;  %v5306_v26 = vmul.f32 %v12580_v45, %v12580_v45  ;;  %v12634_v60 = vsel %vm14081_vm8, %v14079_v11, 0.0 }
 0x6df   : > { %6682 = vmatpush1.bf16.msra.mxu1 %v8858_v36  ;;  %v14076_v36 = vsub.f32 %v12171_v39, %v12211_v8  ;;  %v5311_v1 = vmul.f32 %v12634_v60, %v12634_v60 }
 0x6e0   : > { %6683 = vmatprep.subr.bf16.mxu1 %v13827_v2  ;;  %v5340_v59 = vadd.f32 %v5339_v10, %v5305_v17  ;;  %v14083_v17 = vld [vmem:[#allocation5_spill] sm:$0xff] }
 0x6e1   : > { %v12624_v5 = vsel %vm14078_vm0, %v14076_v36, 0.0  ;;  %vm14084_vm9 = vnez %v14083_v17  ;;  %v12683_v36 = vld [vmem:[%s13488_s3 + $0x200] sm:$0xff]  }
 0x6e2   : > { %v5341_v29 = vadd.f32 %v5340_v59, %v5306_v26  ;;  %v5310_v39 = vmul.f32 %v12624_v5, %v12624_v5  ;;  %v12646_v10 = vsel %vm14084_vm9, %v14082_v44, 0.0  ;;  %v14085_v26 = vsub.f32 %v12192_v31, %v12211_v8  ;;  %v14086_v59 = vld [vmem:[#allocation7_spill] sm:$0xff]  ;;  %7922 = vmatprep.subr.bf16.mxu0 %v12683_v36 }
 0x6e3   : > { %6684 = vmatpush1.bf16.msra.mxu1 %v8859_v24  ;;  %v8862_v24 = vld [vmem:[%s13488_s3 + $0xb0] sm:$0xff]   ;;  %vm14087_vm2 = vnez %v14086_v59  ;;  %v5312_v20 = vmul.f32 %v12646_v10, %v12646_v10  ;;  %v8875_v59 = vld [vmem:[%s13488_s3 + $0xd8] sm:$0xff]  }
 0x6e4   : > { %6685 = vmatprep.subr.bf16.mxu1 %v13827_v2  ;;  %v5342_v25 = vadd.f32 %v5341_v29, %v5307_v43  ;;  %v14088_v43 = vsub.f32 %v12199_v49, %v12211_v8 }
 0x6e6   : > { %v5343_v9 = vadd.f32 %v5342_v25, %v5308_v14  ;;  %v12665_v29 = vsel %vm14037_vm3, %v14088_v43, 0.0  ;;  %v14089_v14 = vsub.f32 %v12206_v23, %v12211_v8 }
 0x6e7   : > { %6686 = vmatpush1.bf16.msra.mxu1 %v8860_v22  ;;  %v12656_v22 = vsel %vm14087_vm2, %v14085_v26, 0.0 }
 0x6e8   : > { %6687 = vmatprep.subr.bf16.mxu1 %v13827_v2  ;;  %v5344_v19 = vadd.f32 %v5343_v9, %v5309_v38  ;;  %v5313_v31 = vmul.f32 %v12656_v22, %v12656_v22  ;;  %v5279_v25 = vsel %vm14039_vm7, %v14089_v14, 0.0  ;;  %v8867_v9 = vld [vmem:[%s13488_s3 + $0xc0] sm:$0xff]  }
 0x6e9   : > { %v5315_v35 = vmul.f32 %v5279_v25, %v5279_v25 }
 0x6ea   : > { %v5345_v0 = vadd.f32 %v5344_v19, %v5310_v39 }
 0x6eb   : > { %6688 = vmatpush1.bf16.msra.mxu1 %v8861_v42  ;;  %v5314_v42 = vmul.f32 %v12665_v29, %v12665_v29 }
 0x6ec   : > { %6689 = vmatprep.subr.bf16.mxu1 %v13827_v2  ;;  %v5346_v54 = vadd.f32 %v5345_v0, %v5311_v1  ;;  %v8873_v1 = vld [vmem:[%s13488_s3 + $0xd0] sm:$0xff]  }
 0x6ee   : > { %v5347_v48 = vadd.f32 %v5346_v54, %v5312_v20 }
 0x6ef   : > { %6690 = vmatpush1.bf16.msra.mxu1 %v8862_v24  ;;  %v8870_v24 = vld [vmem:[%s13488_s3 + $0xc8] sm:$0xff]  }
 0x6f0   : > { %6691 = vmatprep.subr.bf16.mxu1 %v13827_v2  ;;  %v5348_v49 = vadd.f32 %v5347_v48, %v5313_v31 }
 0x6f2   : > { %v5349_v38 = vadd.f32 %v5348_v49, %v5314_v42 }
 0x6f3   : > { %6692 = vmatpush1.bf16.msra.mxu1 %v8863_v34 }
 0x6f4   : > { %6693 = vmatprep.subr.bf16.mxu1 %v13827_v2  ;;  %v5350_v23 = vadd.f32 %v5349_v38, %v5315_v35 }
 0x6f6   : > { %v5351_v3 = vrot.slane %v5350_v23, 4 }
 0x6f7   : > { %6694 = vmatpush1.bf16.msra.mxu1 %v8867_v9 }
 0x6f8   : > { %v5352_v8 = vadd.f32 %v5351_v3, %v5350_v23  ;;  %6695 = vmatprep.subr.bf16.mxu1 %v13827_v2 }
 0x6fa   : > { %v5353_v11 = vrot.slane %v5352_v8, 2 }
 0x6fb   : > { %6696 = vmatpush1.bf16.msra.mxu1 %v8870_v24 }
 0x6fc   : > { %v5354_v33 = vadd.f32 %v5353_v11, %v5352_v8  ;;  %6697 = vmatprep.subr.bf16.mxu1 %v13827_v2 }
 0x6fe   : > { %v5355_v39 = vrot.slane %v5354_v33, 1 }
 0x6ff   : > { %6698 = vmatpush1.bf16.msra.mxu1 %v8873_v1 }
 0x700   : > { %v5356_v19 = vadd.f32 %v5355_v39, %v5354_v33  ;;  %6699 = vmatprep.subr.bf16.mxu1 %v13827_v2 }
 0x702   : > { %v5357_v44 = vmul.f32 0.00390625, %v5356_v19 }
 0x703   : > { %6700 = vmatpush1.bf16.msra.mxu1 %v8875_v59 }
 0x704   : > { %v5358_v17 = vadd.f32 1e-05, %v5357_v44  ;;  %6701 = vmatprep.subr.bf16.mxu1 %v13827_v2 }
 0x706   : > { %8898 = vrsqrt.f32 %v5358_v17 }
 0x710   : > { %v8899_v0 = vpop.eup %8898 }
 0x711   : > { %v5395_v26 = vmul.f32 %v8899_v0, %v5279_v25  ;;  %v12704_v43 = vmul.f32 %v8899_v0, %v12273_v15  ;;  %v12707_v31 = vmul.f32 %v8899_v0, %v12277_v47  ;;  %v12710_v48 = vmul.f32 %v8899_v0, %v12297_v37  ;;  %v8876_v15 = vld [vmem:[%s13488_s3 + $0xe0] sm:$0xff]  }
 0x712   : > { %v12713_v14 = vmul.f32 %v8899_v0, %v12310_v40  ;;  %v12716_v25 = vmul.f32 %v8899_v0, %v12319_v18  ;;  %v12719_v42 = vmul.f32 %v8899_v0, %v12334_v28  ;;  %v12725_v49 = vmul.f32 %v8899_v0, %v12343_v61  ;;  %6702 = vmatpush1.bf16.msra.mxu1 %v8876_v15 }
 0x713   : > { %vm5431_vm7 = vcmp.ge.f32.partialorder %v5395_v26, 0.0  ;;  %v5467_v20 = vmul.f32 0.2, %v5395_v26  ;;  %v12728_v47 = vmul.f32 %v8899_v0, %v12355_v50  ;;  %v12731_v37 = vmul.f32 %v8899_v0, %v12370_v46  ;;  %6703 = vmatprep.subr.bf16.mxu1 %v13827_v2 }
 0x714   : > { %v12734_v40 = vmul.f32 %v8899_v0, %v12382_v56  ;;  %v12737_v18 = vmul.f32 %v8899_v0, %v12394_v53  ;;  %v12740_v28 = vmul.f32 %v8899_v0, %v12406_v21  ;;  %v12743_v34 = vmul.f32 %v8899_v0, %v12418_v57 }
 0x715   : > { %v5503_v54 = vsel %vm5431_vm7, %v5395_v26, %v5467_v20  ;;  %v12746_v61 = vmul.f32 %v8899_v0, %v12430_v62  ;;  %v12749_v50 = vmul.f32 %v8899_v0, %v12442_v63  ;;  %v12752_v46 = vmul.f32 %v8899_v0, %v12454_v30 }
 0x716   : > { %5539 = vst [vmem:[#allocation3 + $0x12b] sm:$0xff] %v5503_v54  ;;  %v12755_v56 = vmul.f32 %v8899_v0, %v12466_v16  ;;  %v12758_v53 = vmul.f32 %v8899_v0, %v12478_v32  ;;  %v12762_v21 = vmul.f32 %v8899_v0, %v12490_v51  ;;  %v12765_v57 = vmul.f32 %v8899_v0, %v12502_v55 }
 0x717   : > { %v12768_v62 = vmul.f32 %v8899_v0, %v12514_v52  ;;  %v12771_v63 = vmul.f32 %v8899_v0, %v12526_v6  ;;  %v12774_v30 = vmul.f32 %v8899_v0, %v12538_v4  ;;  %v12777_v16 = vmul.f32 %v8899_v0, %v12548_v41 }
 0x718   : > { %v12780_v32 = vmul.f32 %v8899_v0, %v12558_v7  ;;  %v12783_v51 = vmul.f32 %v8899_v0, %v12568_v13  ;;  %v12786_v55 = vmul.f32 %v8899_v0, %v12580_v45  ;;  %v12789_v52 = vmul.f32 %v8899_v0, %v12590_v12  ;;  %v8877_v12 = vld [vmem:[%s13488_s3 + $0xe8] sm:$0xff]  }
 0x719   : > { %v12792_v6 = vmul.f32 %v8899_v0, %v12602_v27  ;;  %v12795_v4 = vmul.f32 %v8899_v0, %v12612_v58  ;;  %v12798_v41 = vmul.f32 %v8899_v0, %v12624_v5  ;;  %v12801_v7 = vmul.f32 %v8899_v0, %v12634_v60  ;;  %6704 = vmatpush1.bf16.msra.mxu1 %v8877_v12 }
 0x71a   : > { %v12804_v13 = vmul.f32 %v8899_v0, %v12646_v10  ;;  %v12807_v45 = vmul.f32 %v8899_v0, %v12656_v22  ;;  %vm5396_vm3 = vcmp.ge.f32.partialorder %v12704_v43, 0.0  ;;  %vm5397_vm12 = vcmp.ge.f32.partialorder %v12707_v31, 0.0  ;;  %6705 = vmatprep.subr.bf16.mxu1 %v13827_v2 }
 0x71b   : > { %vm5398_vm1 = vcmp.ge.f32.partialorder %v12710_v48, 0.0  ;;  %vm5399_vm10 = vcmp.ge.f32.partialorder %v12713_v14, 0.0  ;;  %vm5400_vm11 = vcmp.ge.f32.partialorder %v12716_v25, 0.0  ;;  %vm5401_vm5 = vcmp.ge.f32.partialorder %v12719_v42, 0.0 }
 0x71c   : > { %vm5402_vm6 = vcmp.ge.f32.partialorder %v12725_v49, 0.0  ;;  %vm5403_vm13 = vcmp.ge.f32.partialorder %v12728_v47, 0.0  ;;  %vm5404_vm4 = vcmp.ge.f32.partialorder %v12731_v37, 0.0  ;;  %vm5405_vm14 = vcmp.ge.f32.partialorder %v12734_v40, 0.0 }
 0x71d   : > { %v5432_v27 = vmul.f32 0.2, %v12704_v43  ;;  %v5433_v58 = vmul.f32 0.2, %v12707_v31  ;;  %v12825_v5 = vmul.f32 %v8899_v0, %v12665_v29  ;;  %vm5408_vm8 = vcmp.ge.f32.partialorder %v12743_v34, 0.0 }
 0x71e   : > { %v5434_v60 = vmul.f32 0.2, %v12710_v48  ;;  %v5435_v10 = vmul.f32 0.2, %v12713_v14  ;;  %v5436_v22 = vmul.f32 0.2, %v12716_v25 }
 0x71f   : > { %vm5413_vm0 = vcmp.ge.f32.partialorder %v12758_v53, 0.0  ;;  %v5437_v29 = vmul.f32 0.2, %v12719_v42  ;;  %v5438_v35 = vmul.f32 0.2, %v12725_v49  ;;  %v5468_v23 = vsel %vm5396_vm3, %v12704_v43, %v5432_v27 }
 0x720   : > { %v5439_v38 = vmul.f32 0.2, %v12728_v47  ;;  %vm5417_vm15 = vcmp.ge.f32.partialorder %v12771_v63, 0.0  ;;  %v5440_v3 = vmul.f32 0.2, %v12731_v37  ;;  %v5469_v11 = vsel %vm5397_vm12, %v12707_v31, %v5433_v58  ;;  %5504 = vst [vmem:[#allocation3 + $0x13] sm:$0xff] %v5468_v23 }
 0x721   : > { %v5441_v8 = vmul.f32 0.2, %v12734_v40  ;;  %v5442_v9 = vmul.f32 0.2, %v12737_v18  ;;  %vm5421_vm7 = vcmp.ge.f32.partialorder %v12783_v51, 0.0  ;;  %v5470_v24 = vsel %vm5398_vm1, %v12710_v48, %v5434_v60  ;;  %5505 = vst [vmem:[#allocation3 + $0x1b] sm:$0xff] %v5469_v11 }
 0x722   : > { %v5443_v33 = vmul.f32 0.2, %v12740_v28  ;;  %v5444_v39 = vmul.f32 0.2, %v12743_v34  ;;  %v5445_v19 = vmul.f32 0.2, %v12746_v61  ;;  %v5471_v0 = vsel %vm5399_vm10, %v12713_v14, %v5435_v10 }
 0x723   : > { %vm5425_vm2 = vcmp.ge.f32.partialorder %v12795_v4, 0.0  ;;  %v5446_v44 = vmul.f32 0.2, %v12749_v50  ;;  %v5447_v17 = vmul.f32 0.2, %v12752_v46  ;;  %5506 = vst [vmem:[#allocation3 + $0x23] sm:$0xff] %v5470_v24  ;;  %v5472_v54 = vsel %vm5400_vm11, %v12716_v25, %v5436_v22 }
 0x724   : > { %v5448_v1 = vmul.f32 0.2, %v12755_v56  ;;  %vm5426_vm1 = vcmp.ge.f32.partialorder %v12798_v41, 0.0  ;;  %vm5427_vm12 = vcmp.ge.f32.partialorder %v12801_v7, 0.0  ;;  %vm5428_vm3 = vcmp.ge.f32.partialorder %v12804_v13, 0.0  ;;  %5507 = vst [vmem:[#allocation3 + $0x2b] sm:$0xff] %v5471_v0 }
 0x725   : > { %vm5429_vm9 = vcmp.ge.f32.partialorder %v12807_v45, 0.0  ;;  %v5449_v26 = vmul.f32 0.2, %v12758_v53  ;;  %v5450_v59 = vmul.f32 0.2, %v12762_v21  ;;  %vm5430_vm10 = vcmp.ge.f32.partialorder %v12825_v5, 0.0 }
 0x726   : > { %v5451_v20 = vmul.f32 0.2, %v12765_v57  ;;  %v5452_v43 = vmul.f32 0.2, %v12768_v62  ;;  %v5453_v31 = vmul.f32 0.2, %v12771_v63  ;;  %v5473_v14 = vsel %vm5401_vm5, %v12719_v42, %v5437_v29 }
 0x727   : > { %v5454_v48 = vmul.f32 0.2, %v12774_v30  ;;  %5508 = vst [vmem:[#allocation3 + $0x33] sm:$0xff] %v5472_v54  ;;  %v5455_v15 = vmul.f32 0.2, %v12777_v16  ;;  %v5474_v27 = vsel %vm5402_vm6, %v12725_v49, %v5438_v35  ;;  %5509 = vst [vmem:[#allocation3 + $0x3b] sm:$0xff] %v5473_v14  ;;  %v5475_v42 = vsel %vm5403_vm13, %v12728_v47, %v5439_v38 }
 0x728   : > { %v5456_v12 = vmul.f32 0.2, %v12780_v32  ;;  %v5457_v25 = vmul.f32 0.2, %v12783_v51  ;;  %v5458_v58 = vmul.f32 0.2, %v12786_v55  ;;  %v5476_v49 = vsel %vm5404_vm4, %v12731_v37, %v5440_v3 }
 0x729   : > { %v5459_v60 = vmul.f32 0.2, %v12789_v52  ;;  %v5460_v10 = vmul.f32 0.2, %v12792_v6  ;;  %5510 = vst [vmem:[#allocation3 + $0x43] sm:$0xff] %v5474_v27  ;;  %5511 = vst [vmem:[#allocation3 + $0x4b] sm:$0xff] %v5475_v42  ;;  %v5477_v47 = vsel %vm5405_vm14, %v12734_v40, %v5441_v8  ;;  %v5480_v3 = vsel %vm5408_vm8, %v12743_v34, %v5444_v39 }
 0x72a   : > { %v5461_v22 = vmul.f32 0.2, %v12795_v4  ;;  %v5462_v29 = vmul.f32 0.2, %v12798_v41  ;;  %v5463_v23 = vmul.f32 0.2, %v12801_v7  ;;  %v5485_v34 = vsel %vm5413_vm0, %v12758_v53, %v5449_v26 }
 0x72b   : > { %v5464_v35 = vmul.f32 0.2, %v12804_v13  ;;  %v5465_v11 = vmul.f32 0.2, %v12807_v45  ;;  %v5466_v24 = vmul.f32 0.2, %v12825_v5 }
 0x72c   : > { %5512 = vst [vmem:[#allocation3 + $0x53] sm:$0xff] %v5476_v49  ;;  %vm14090_vm11 = vcmp.ge.f32.partialorder %v12737_v18, 0.0  ;;  %vm14091_vm5 = vcmp.ge.f32.partialorder %v12740_v28, 0.0  ;;  %vm14092_vm6 = vcmp.ge.f32.partialorder %v12746_v61, 0.0  ;;  %5513 = vst [vmem:[#allocation3 + $0x5b] sm:$0xff] %v5477_v47  ;;  %vm14093_vm13 = vcmp.ge.f32.partialorder %v12749_v50, 0.0 }
 0x72d   : > { %v5478_v38 = vsel %vm14090_vm11, %v12737_v18, %v5442_v9  ;;  %v5479_v37 = vsel %vm14091_vm5, %v12740_v28, %v5443_v33  ;;  %v5481_v0 = vsel %vm14092_vm6, %v12746_v61, %v5445_v19  ;;  %v5482_v40 = vsel %vm14093_vm13, %v12749_v50, %v5446_v44  ;;  %5516 = vst [vmem:[#allocation3 + $0x73] sm:$0xff] %v5480_v3  ;;  %v5596_v53 = vld [vmem:[#allocation3 + $0x11] sm:$0xff]  ;;  %v5597_v8 = vld [vmem:[#allocation3 + $0x19] sm:$0xff]  ;;  %v5816_v33 = vld [vmem:[#allocation3 + $0x25] sm:$0xff] }
 0x72e   : > { %vm14094_vm4 = vcmp.ge.f32.partialorder %v12752_v46, 0.0  ;;  %vm14095_vm14 = vcmp.ge.f32.partialorder %v12755_v56, 0.0  ;;  %5514 = vst [vmem:[#allocation3 + $0x63] sm:$0xff] %v5478_v38  ;;  %5515 = vst [vmem:[#allocation3 + $0x6b] sm:$0xff] %v5479_v37  ;;  %vm14096_vm8 = vcmp.ge.f32.partialorder %v12762_v21, 0.0  ;;  %vm14097_vm11 = vcmp.ge.f32.partialorder %v12765_v57, 0.0 }
 0x72f   : > { %v5483_v18 = vsel %vm14094_vm4, %v12752_v46, %v5447_v17  ;;  %v5484_v28 = vsel %vm14095_vm14, %v12755_v56, %v5448_v1  ;;  %5517 = vst [vmem:[#allocation3 + $0x7b] sm:$0xff] %v5481_v0  ;;  %v5486_v61 = vsel %vm14096_vm8, %v12762_v21, %v5450_v59  ;;  %v5487_v50 = vsel %vm14097_vm11, %v12765_v57, %v5451_v20  ;;  %v5542_v9 = vld [vmem:[#allocation3 + $0x10] sm:$0xff]  ;;  %v5543_v19 = vld [vmem:[#allocation3 + $0x18] sm:$0xff]  ;;  %v5761_v44 = vld [vmem:[#allocation3 + $0x24] sm:$0xff] }
 0x730   : > { %vm14098_vm5 = vcmp.ge.f32.partialorder %v12768_v62, 0.0  ;;  %v5489_v56 = vsel %vm5417_vm15, %v12771_v63, %v5453_v31  ;;  %5518 = vst [vmem:[#allocation3 + $0x83] sm:$0xff] %v5482_v40  ;;  %5519 = vst [vmem:[#allocation3 + $0x8b] sm:$0xff] %v5483_v18  ;;  %vm14099_vm0 = vcmp.ge.f32.partialorder %v12774_v30, 0.0  ;;  %vm14100_vm6 = vcmp.ge.f32.partialorder %v12777_v16, 0.0  ;;  %v5817_v39 = vld [vmem:[#allocation3 + $0x2d] sm:$0xff] }
 0x731   : > { %v5488_v46 = vsel %vm14098_vm5, %v12768_v62, %v5452_v43  ;;  %5520 = vst [vmem:[#allocation3 + $0x93] sm:$0xff] %v5484_v28  ;;  %5521 = vst [vmem:[#allocation3 + $0x9b] sm:$0xff] %v5485_v34  ;;  %v5490_v21 = vsel %vm14099_vm0, %v12774_v30, %v5454_v48  ;;  %v5491_v57 = vsel %vm14100_vm6, %v12777_v16, %v5455_v15  ;;  %vm14101_vm13 = vcmp.ge.f32.partialorder %v12780_v32, 0.0  ;;  %v5762_v17 = vld [vmem:[#allocation3 + $0x2c] sm:$0xff]  ;;  %v5598_v1 = vld [vmem:[#allocation3 + $0x21] sm:$0xff] }
 0x732   : > { %v5492_v62 = vsel %vm14101_vm13, %v12780_v32, %v5456_v12  ;;  %v5493_v63 = vsel %vm5421_vm7, %v12783_v51, %v5457_v25  ;;  %5522 = vst [vmem:[#allocation3 + $0xa3] sm:$0xff] %v5486_v61  ;;  %5523 = vst [vmem:[#allocation3 + $0xab] sm:$0xff] %v5487_v50  ;;  %vm14102_vm15 = vcmp.ge.f32.partialorder %v12786_v55, 0.0  ;;  %vm14103_vm4 = vcmp.ge.f32.partialorder %v12789_v52, 0.0  ;;  %v5599_v26 = vld [vmem:[#allocation3 + $0x29] sm:$0xff]  ;;  %v5818_v59 = vld [vmem:[#allocation3 + $0x35] sm:$0xff] }
 0x733   : > { %5524 = vst [vmem:[#allocation3 + $0xb3] sm:$0xff] %v5488_v46  ;;  %5525 = vst [vmem:[#allocation3 + $0xbb] sm:$0xff] %v5489_v56  ;;  %v5494_v30 = vsel %vm14102_vm15, %v12786_v55, %v5458_v58  ;;  %v5495_v16 = vsel %vm14103_vm4, %v12789_v52, %v5459_v60  ;;  %vm14104_vm14 = vcmp.ge.f32.partialorder %v12792_v6, 0.0  ;;  %v5497_v51 = vsel %vm5425_vm2, %v12795_v4, %v5461_v22  ;;  %v5819_v20 = vld [vmem:[#allocation3 + $0x3d] sm:$0xff]  ;;  %v5545_v14 = vld [vmem:[#allocation3 + $0x28] sm:$0xff] }
 0x734   : > { %v5496_v32 = vsel %vm14104_vm14, %v12792_v6, %v5460_v10  ;;  %5526 = vst [vmem:[#allocation3 + $0xc3] sm:$0xff] %v5490_v21  ;;  %5527 = vst [vmem:[#allocation3 + $0xcb] sm:$0xff] %v5491_v57  ;;  %v5498_v55 = vsel %vm5426_vm1, %v12798_v41, %v5462_v29  ;;  %v5499_v52 = vsel %vm5427_vm12, %v12801_v7, %v5463_v23  ;;  %v8865_v48 = vld [vmem:[%s13488_s3 + $0x208] sm:$0xff]   ;;  %v8866_v15 = vld [vmem:[%s13488_s3 + $0x210] sm:$0xff]  }
 0x735   : > { %5528 = vst [vmem:[#allocation3 + $0xd3] sm:$0xff] %v5492_v62  ;;  %5529 = vst [vmem:[#allocation3 + $0xdb] sm:$0xff] %v5493_v63  ;;  %v5500_v6 = vsel %vm5428_vm3, %v12804_v13, %v5464_v35  ;;  %v5501_v4 = vsel %vm5429_vm9, %v12807_v45, %v5465_v11  ;;  %v5502_v41 = vsel %vm5430_vm10, %v12825_v5, %v5466_v24  ;;  %v5544_v5 = vld [vmem:[#allocation3 + $0x20] sm:$0xff]  ;;  %v5763_v12 = vld [vmem:[#allocation3 + $0x34] sm:$0xff]  ;;  %vm7423_vm9 = vcmask 7168  }
 0x736   : > { %5530 = vst [vmem:[#allocation3 + $0xe3] sm:$0xff] %v5494_v30  ;;  %5531 = vst [vmem:[#allocation3 + $0xeb] sm:$0xff] %v5495_v16  ;;  %v5631_v7 = vpack.c.bf16 %v5597_v8, %v5596_v53  ;;  %v5852_v13 = vpack.c.bf16 %v5817_v39, %v5816_v33  ;;  %v5577_v54 = vpack.c.bf16 %v5543_v19, %v5542_v9  ;;  %v5764_v25 = vld [vmem:[#allocation3 + $0x3c] sm:$0xff]  ;;  %v5600_v27 = vld [vmem:[#allocation3 + $0x31] sm:$0xff] }
 0x737   : > { %5532 = vst [vmem:[#allocation3 + $0xf3] sm:$0xff] %v5496_v32  ;;  %5533 = vst [vmem:[#allocation3 + $0xfb] sm:$0xff] %v5497_v51  ;;  %v12991_v45 = vpack.c.bf16 %v5762_v17, %v5761_v44  ;;  %v5632_v43 = vpack.c.bf16 %v5599_v26, %v5598_v1  ;;  %v5853_v31 = vpack.c.bf16 %v5819_v20, %v5818_v59  ;;  %v5601_v58 = vld [vmem:[#allocation3 + $0x39] sm:$0xff]  ;;  %v5820_v60 = vld [vmem:[#allocation3 + $0x45] sm:$0xff] }
 0x738   : > { %5534 = vst [vmem:[#allocation3 + $0x103] sm:$0xff] %v5498_v55  ;;  %5535 = vst [vmem:[#allocation3 + $0x10b] sm:$0xff] %v5499_v52  ;;  %6540 = vmatprep.mubr.bf16.mxu1 %v5631_v7  ;;  %7063 = vmatprep.mubr.bf16.mxu0 %v5852_v13  ;;  %v5821_v10 = vld [vmem:[#allocation3 + $0x4d] sm:$0xff]  ;;  %v5578_v42 = vpack.c.bf16 %v5545_v14, %v5544_v5  ;;  %v13001_v22 = vpack.c.bf16 %v5764_v25, %v5763_v12  ;;  %v5547_v35 = vld [vmem:[#allocation3 + $0x38] sm:$0xff] }
 0x739   : > { %5536 = vst [vmem:[#allocation3 + $0x113] sm:$0xff] %v5500_v6  ;;  %5537 = vst [vmem:[#allocation3 + $0x11b] sm:$0xff] %v5501_v4  ;;  %6541 = vmatmul.mubr.bf16.gmra.mrb[112].mxu1 %v5577_v54  ;;  %7064 = vmatmul.mubr.bf16.vlgmr.msra.gmra.mrb[180].mxu0 %v12991_v45  ;;  %v5633_v29 = vpack.c.bf16 %v5601_v58, %v5600_v27  ;;  %v5854_v23 = vpack.c.bf16 %v5821_v10, %v5820_v60  ;;  %v5546_v49 = vld [vmem:[#allocation3 + $0x30] sm:$0xff]  ;;  %v8869_v11 = vld [vmem:[%s13488_s3 + $0x220] sm:$0xff]  }
 0x73a   : > { %5538 = vst [vmem:[#allocation3 + $0x123] sm:$0xff] %v5502_v41  ;;  %6548 = vmatprep.mubr.bf16.mxu1 %v5632_v43  ;;  %7071 = vmatprep.mubr.bf16.mxu0 %v5853_v31  ;;  %v5765_v24 = vld [vmem:[#allocation3 + $0x44] sm:$0xff]  ;;  %v5766_v47 = vld [vmem:[#allocation3 + $0x4c] sm:$0xff]  ;;  %v5822_v3 = vld [vmem:[#allocation3 + $0x55] sm:$0xff]  ;;  %v5579_v40 = vpack.c.bf16 %v5547_v35, %v5546_v49 }
 0x73b   : > { %7923 = vmatpush3.bf16.msra.mxu0 %v12683_v36  ;;  %v8868_v36 = vld [vmem:[%s13488_s3 + $0x218] sm:$0xff]   ;;  %v5602_v38 = vld [vmem:[#allocation3 + $0x41] sm:$0xff]  ;;  %v13010_v18 = vpack.c.bf16 %v5766_v47, %v5765_v24  ;;  %v5605_v21 = vld [vmem:[#allocation3 + $0x59] sm:$0xff] }
 0x73c   : > { %7924 = vmatprep.subr.bf16.mxu0 %v8865_v48  ;;  %v5603_v37 = vld [vmem:[#allocation3 + $0x49] sm:$0xff]  ;;  %v5823_v0 = vld [vmem:[#allocation3 + $0x5d] sm:$0xff]  ;;  %v5767_v53 = vld [vmem:[#allocation3 + $0x54] sm:$0xff] }
 0x73d   : > { %v5634_v28 = vpack.c.bf16 %v5603_v37, %v5602_v38  ;;  %v5855_v34 = vpack.c.bf16 %v5823_v0, %v5822_v3  ;;  %v8871_v61 = vld [vmem:[%s13488_s3 + $0x228] sm:$0xff]   ;;  %v5549_v46 = vld [vmem:[#allocation3 + $0x48] sm:$0xff]  ;;  %v5604_v9 = vld [vmem:[#allocation3 + $0x51] sm:$0xff] }
 0x73e   : > { %v5548_v50 = vld [vmem:[#allocation3 + $0x40] sm:$0xff]  ;;  %v8872_v56 = vld [vmem:[%s13488_s3 + $0x230] sm:$0xff]   ;;  %v5635_v39 = vpack.c.bf16 %v5605_v21, %v5604_v9  ;;  %v8874_v30 = vld [vmem:[%s13488_s3 + $0x238] sm:$0xff]  }
 0x73f   : > { %7925 = vmatpush3.bf16.msra.mxu0 %v8865_v48  ;;  %v5768_v8 = vld [vmem:[#allocation3 + $0x5c] sm:$0xff]  ;;  %v5824_v57 = vld [vmem:[#allocation3 + $0x65] sm:$0xff]  ;;  %v5825_v62 = vld [vmem:[#allocation3 + $0x6d] sm:$0xff]  ;;  %v5580_v63 = vpack.c.bf16 %v5549_v46, %v5548_v50 }
 0x740   : > { %7926 = vmatprep.subr.bf16.mxu0 %v8866_v15  ;;  %v13019_v33 = vpack.c.bf16 %v5768_v8, %v5767_v53  ;;  %v5856_v19 = vpack.c.bf16 %v5825_v62, %v5824_v57  ;;  %v5550_v16 = vld [vmem:[#allocation3 + $0x50] sm:$0xff]  ;;  %v5551_v32 = vld [vmem:[#allocation3 + $0x58] sm:$0xff]  ;;  %v5769_v51 = vld [vmem:[#allocation3 + $0x64] sm:$0xff] }
 0x741   : > { %6549 = vmatmul.mubr.bf16.gmra.mrb[116].mxu1 %v5578_v42  ;;  %7072 = vmatmul.mubr.bf16.gmra.mrb[184].mxu0 %v13001_v22  ;;  %v5770_v44 = vld [vmem:[#allocation3 + $0x6c] sm:$0xff]  ;;  %v5606_v17 = vld [vmem:[#allocation3 + $0x61] sm:$0xff]  ;;  %v5826_v55 = vld [vmem:[#allocation3 + $0x75] sm:$0xff]  ;;  %v5581_v6 = vpack.c.bf16 %v5551_v32, %v5550_v16 }
 0x742   : > { %6556 = vmatprep.mubr.bf16.mxu1 %v5633_v29  ;;  %7079 = vmatprep.mubr.bf16.mxu0 %v5854_v23  ;;  %v5607_v1 = vld [vmem:[#allocation3 + $0x69] sm:$0xff]  ;;  %v5827_v52 = vld [vmem:[#allocation3 + $0x7d] sm:$0xff]  ;;  %v13025_v4 = vpack.c.bf16 %v5770_v44, %v5769_v51  ;;  %v5771_v13 = vld [vmem:[#allocation3 + $0x74] sm:$0xff] }
 0x743   : > { %7927 = vmatpush3.bf16.msra.mxu0 %v8866_v15  ;;  %v5636_v26 = vpack.c.bf16 %v5607_v1, %v5606_v17  ;;  %v5857_v59 = vpack.c.bf16 %v5827_v52, %v5826_v55  ;;  %v8878_v20 = vld [vmem:[%s13488_s3 + $0xf0] sm:$0xff]   ;;  %v5552_v41 = vld [vmem:[#allocation3 + $0x60] sm:$0xff]  ;;  %v5608_v43 = vld [vmem:[#allocation3 + $0x71] sm:$0xff] }
 0x744   : > { %7928 = vmatprep.subr.bf16.mxu0 %v8868_v36  ;;  %v5553_v7 = vld [vmem:[#allocation3 + $0x68] sm:$0xff]  ;;  %6706 = vmatpush1.bf16.msra.mxu1 %v8878_v20  ;;  %v5772_v54 = vld [vmem:[#allocation3 + $0x7c] sm:$0xff]  ;;  %v8879_v14 = vld [vmem:[%s13488_s3 + $0xf8] sm:$0xff]  }
 0x745   : > { %v5609_v31 = vld [vmem:[#allocation3 + $0x79] sm:$0xff]  ;;  %6707 = vmatprep.subr.bf16.mxu1 %v13827_v2  ;;  %v5828_v48 = vld [vmem:[#allocation3 + $0x85] sm:$0xff]  ;;  %v5829_v5 = vld [vmem:[#allocation3 + $0x8d] sm:$0xff]  ;;  %v5582_v15 = vpack.c.bf16 %v5553_v7, %v5552_v41  ;;  %v13035_v12 = vpack.c.bf16 %v5772_v54, %v5771_v13 }
 0x746   : > { %v5637_v25 = vpack.c.bf16 %v5609_v31, %v5608_v43  ;;  %v5858_v27 = vpack.c.bf16 %v5829_v5, %v5828_v48  ;;  %v5554_v58 = vld [vmem:[#allocation3 + $0x70] sm:$0xff]  ;;  %v5555_v60 = vld [vmem:[#allocation3 + $0x78] sm:$0xff]  ;;  %v5773_v10 = vld [vmem:[#allocation3 + $0x84] sm:$0xff] }
 0x747   : > { %7929 = vmatpush3.bf16.msra.mxu0 %v8868_v36  ;;  %v5774_v42 = vld [vmem:[#allocation3 + $0x8c] sm:$0xff]  ;;  %v5610_v29 = vld [vmem:[#allocation3 + $0x81] sm:$0xff]  ;;  %v5830_v36 = vld [vmem:[#allocation3 + $0x95] sm:$0xff]  ;;  %v5583_v35 = vpack.c.bf16 %v5555_v60, %v5554_v58 }
 0x748   : > { %7930 = vmatprep.subr.bf16.mxu0 %v8869_v11  ;;  %6708 = vmatpush1.bf16.msra.mxu1 %v8879_v14  ;;  %v5611_v23 = vld [vmem:[#allocation3 + $0x89] sm:$0xff]  ;;  %v5831_v49 = vld [vmem:[#allocation3 + $0x9d] sm:$0xff]  ;;  %v5775_v3 = vld [vmem:[#allocation3 + $0x94] sm:$0xff] }
 0x749   : > { %6557 = vmatmul.mubr.bf16.gmra.mrb[120].mxu1 %v5579_v40  ;;  %7080 = vmatmul.mubr.bf16.gmra.mrb[188].mxu0 %v13010_v18  ;;  %v5638_v24 = vpack.c.bf16 %v5611_v23, %v5610_v29  ;;  %v5859_v47 = vpack.c.bf16 %v5831_v49, %v5830_v36  ;;  %v5556_v38 = vld [vmem:[#allocation3 + $0x80] sm:$0xff]  ;;  %v5557_v37 = vld [vmem:[#allocation3 + $0x88] sm:$0xff]  ;;  %v5612_v40 = vld [vmem:[#allocation3 + $0x91] sm:$0xff] }
 0x74a   : > { %6564 = vmatprep.mubr.bf16.mxu1 %v5634_v28  ;;  %7087 = vmatprep.mubr.bf16.mxu0 %v5855_v34  ;;  %v5776_v0 = vld [vmem:[#allocation3 + $0x9c] sm:$0xff]  ;;  %v5832_v34 = vld [vmem:[#allocation3 + $0xa5] sm:$0xff]  ;;  %v5584_v50 = vpack.c.bf16 %v5557_v37, %v5556_v38  ;;  %v5558_v8 = vld [vmem:[#allocation3 + $0x90] sm:$0xff] }
 0x74b   : > { %7931 = vmatpush3.bf16.msra.mxu0 %v8869_v11  ;;  %6854 = vmatprep.subr.bf16.mxu1 %v13827_v2  ;;  %v13039_v11 = vpack.c.bf16 %v5774_v42, %v5773_v10  ;;  %v5613_v28 = vld [vmem:[#allocation3 + $0x99] sm:$0xff]  ;;  %v13042_v46 = vpack.c.bf16 %v5776_v0, %v5775_v3  ;;  %v5777_v21 = vld [vmem:[#allocation3 + $0xa4] sm:$0xff]  ;;  %v5778_v57 = vld [vmem:[#allocation3 + $0xac] sm:$0xff] }
 0x74c   : > { %7932 = vmatprep.subr.bf16.mxu0 %v8871_v61  ;;  %v5559_v9 = vld [vmem:[#allocation3 + $0x98] sm:$0xff]  ;;  %v5614_v62 = vld [vmem:[#allocation3 + $0xa1] sm:$0xff]  ;;  %v13045_v16 = vpack.c.bf16 %v5778_v57, %v5777_v21  ;;  %v5562_v54 = vld [vmem:[#allocation3 + $0xb0] sm:$0xff] }
 0x74d   : > { %v5560_v44 = vld [vmem:[#allocation3 + $0xa0] sm:$0xff]  ;;  %v5561_v17 = vld [vmem:[#allocation3 + $0xa8] sm:$0xff]  ;;  %v5779_v1 = vld [vmem:[#allocation3 + $0xb4] sm:$0xff] }
 0x74e   : > { %v5780_v55 = vld [vmem:[#allocation3 + $0xbc] sm:$0xff]  ;;  %v5616_v52 = vld [vmem:[#allocation3 + $0xb1] sm:$0xff]  ;;  %v5586_v20 = vpack.c.bf16 %v5561_v17, %v5560_v44  ;;  %v5781_v31 = vld [vmem:[#allocation3 + $0xc4] sm:$0xff] }
 0x74f   : > { %7933 = vmatpush3.bf16.msra.mxu0 %v8871_v61  ;;  %v5833_v61 = vld [vmem:[#allocation3 + $0xad] sm:$0xff]  ;;  %v13048_v41 = vpack.c.bf16 %v5780_v55, %v5779_v1  ;;  %v5563_v43 = vld [vmem:[#allocation3 + $0xb8] sm:$0xff]  ;;  %v5618_v5 = vld [vmem:[#allocation3 + $0xc1] sm:$0xff] }
 0x750   : > { %7934 = vmatprep.subr.bf16.mxu0 %v8872_v56  ;;  %v5860_v53 = vpack.c.bf16 %v5833_v61, %v5832_v34  ;;  %v5782_v48 = vld [vmem:[#allocation3 + $0xcc] sm:$0xff]  ;;  %v5564_v42 = vld [vmem:[#allocation3 + $0xc0] sm:$0xff]  ;;  %v5872_v23 = vld [vmem:[#allocation3 + $0x36] sm:$0xff] }
 0x751   : > { %6565 = vmatmul.mubr.bf16.gmra.mrb[124].mxu1 %v5580_v63  ;;  %7088 = vmatmul.mubr.bf16.gmra.mrb[192].mxu0 %v13019_v33  ;;  %v5615_v63 = vld [vmem:[#allocation3 + $0xa9] sm:$0xff]  ;;  %v13051_v58 = vpack.c.bf16 %v5782_v48, %v5781_v31  ;;  %v5873_v36 = vld [vmem:[#allocation3 + $0x3e] sm:$0xff]  ;;  %v5620_v49 = vld [vmem:[#allocation3 + $0xd1] sm:$0xff] }
 0x752   : > { %6572 = vmatprep.mubr.bf16.mxu1 %v5635_v39  ;;  %7095 = vmatprep.mubr.bf16.mxu0 %v5856_v19  ;;  %v5834_v39 = vld [vmem:[#allocation3 + $0xb5] sm:$0xff]  ;;  %v5835_v19 = vld [vmem:[#allocation3 + $0xbd] sm:$0xff]  ;;  %v5640_v32 = vpack.c.bf16 %v5615_v63, %v5614_v62  ;;  %v5619_v14 = vld [vmem:[#allocation3 + $0xc9] sm:$0xff]  ;;  %v5907_v37 = vpack.c.bf16 %v5873_v36, %v5872_v23 }
 0x753   : > { %7935 = vmatpush3.bf16.msra.mxu0 %v8872_v56  ;;  %v5639_v56 = vpack.c.bf16 %v5613_v28, %v5612_v40  ;;  %v5861_v51 = vpack.c.bf16 %v5835_v19, %v5834_v39  ;;  %v5642_v60 = vpack.c.bf16 %v5619_v14, %v5618_v5  ;;  %v5565_v29 = vld [vmem:[#allocation3 + $0xc8] sm:$0xff]  ;;  %v5566_v40 = vld [vmem:[#allocation3 + $0xd0] sm:$0xff]  ;;  %v5567_v28 = vld [vmem:[#allocation3 + $0xd8] sm:$0xff] }
 0x754   : > { %7936 = vmatprep.subr.bf16.mxu0 %v8874_v30  ;;  %v5588_v38 = vpack.c.bf16 %v5565_v29, %v5564_v42  ;;  %v5876_v34 = vld [vmem:[#allocation3 + $0x56] sm:$0xff]  ;;  %v5877_v61 = vld [vmem:[#allocation3 + $0x5e] sm:$0xff]  ;;  %v5569_v39 = vld [vmem:[#allocation3 + $0xe8] sm:$0xff] }
 0x755   : > { %v5909_v21 = vpack.c.bf16 %v5877_v61, %v5876_v34  ;;  %v5568_v63 = vld [vmem:[#allocation3 + $0xe0] sm:$0xff]  ;;  %v5880_v19 = vld [vmem:[#allocation3 + $0x76] sm:$0xff]  ;;  %v5883_v17 = vld [vmem:[#allocation3 + $0x8e] sm:$0xff] }
 0x756   : > { %v5882_v44 = vld [vmem:[#allocation3 + $0x86] sm:$0xff]  ;;  %v5590_v1 = vpack.c.bf16 %v5569_v39, %v5568_v63  ;;  %v5887_v31 = vld [vmem:[#allocation3 + $0xae] sm:$0xff]  ;;  %v5629_v29 = vld [vmem:[#allocation3 + $0x119] sm:$0xff] }
 0x757   : > { %7937 = vmatpush3.bf16.msra.mxu0 %v8874_v30  ;;  %v5585_v30 = vpack.c.bf16 %v5559_v9, %v5558_v8  ;;  %v5879_v8 = vld [vmem:[#allocation3 + $0x6e] sm:$0xff]  ;;  %v5589_v9 = vpack.c.bf16 %v5567_v28, %v5566_v40  ;;  %v5890_v23 = vld [vmem:[#allocation3 + $0xc6] sm:$0xff]  ;;  %v5651_v28 = vld [vmem:[#allocation3 + $0x1a] sm:$0xff] }
 0x758   : > { %v5628_v42 = vld [vmem:[#allocation3 + $0x111] sm:$0xff]  ;;  %v5894_v34 = vld [vmem:[#allocation3 + $0xe6] sm:$0xff] }
 0x759   : > { %6573 = vmatmul.mubr.bf16.gmra.mrb[128].mxu1 %v5581_v6  ;;  %7096 = vmatmul.mubr.bf16.gmra.mrb[196].mxu0 %v13025_v4  ;;  %v5617_v6 = vld [vmem:[#allocation3 + $0xb9] sm:$0xff]  ;;  %v5891_v36 = vld [vmem:[#allocation3 + $0xce] sm:$0xff]  ;;  %v5652_v39 = vld [vmem:[#allocation3 + $0x22] sm:$0xff] }
 0x75a   : > { %6580 = vmatprep.mubr.bf16.mxu1 %v5636_v26  ;;  %7103 = vmatprep.mubr.bf16.mxu0 %v5857_v59  ;;  %v5836_v26 = vld [vmem:[#allocation3 + $0xc5] sm:$0xff]  ;;  %v5837_v59 = vld [vmem:[#allocation3 + $0xcd] sm:$0xff]  ;;  %v5641_v7 = vpack.c.bf16 %v5617_v6, %v5616_v52  ;;  %v5912_v6 = vpack.c.bf16 %v5883_v17, %v5882_v44 }
 0x75b   : > { %v5862_v13 = vpack.c.bf16 %v5837_v59, %v5836_v26  ;;  %v5570_v26 = vld [vmem:[#allocation3 + $0xf0] sm:$0xff]  ;;  %v5571_v59 = vld [vmem:[#allocation3 + $0xf8] sm:$0xff] }
 0x75c   : > { %v5591_v48 = vpack.c.bf16 %v5571_v59, %v5570_v26  ;;  %v5650_v40 = vld [vmem:[#allocation3 + $0x12] sm:$0xff] }
 0x75d   : > { %v5895_v61 = vld [vmem:[#allocation3 + $0xee] sm:$0xff] }
 0x75e   : > { %v5903_v26 = vld [vmem:[#allocation3 + $0x12e] sm:$0xff] }
 0x75f   : > { %v5654_v59 = vld [vmem:[#allocation3 + $0x32] sm:$0xff] }
 0x761   : > { %6581 = vmatmul.mubr.bf16.gmra.mrb[132].mxu1 %v5582_v15  ;;  %7104 = vmatmul.mubr.bf16.gmra.mrb[200].mxu0 %v13035_v12  ;;  %v5870_v15 = vld [vmem:[#allocation3 + $0x26] sm:$0xff] }
 0x762   : > { %6588 = vmatprep.mubr.bf16.mxu1 %v5637_v25  ;;  %7111 = vmatprep.mubr.bf16.mxu0 %v5858_v27  ;;  %v5871_v25 = vld [vmem:[#allocation3 + $0x2e] sm:$0xff]  ;;  %v5587_v27 = vpack.c.bf16 %v5563_v43, %v5562_v54  ;;  %v5886_v43 = vld [vmem:[#allocation3 + $0xa6] sm:$0xff] }
 0x763   : > { %v5906_v10 = vpack.c.bf16 %v5871_v25, %v5870_v15  ;;  %v5627_v54 = vld [vmem:[#allocation3 + $0x109] sm:$0xff]  ;;  %v5914_v15 = vpack.c.bf16 %v5887_v31, %v5886_v43  ;;  %v5572_v25 = vld [vmem:[#allocation3 + $0x100] sm:$0xff] }
 0x769   : > { %6589 = vmatmul.mubr.bf16.gmra.mrb[136].mxu1 %v5583_v35  ;;  %7112 = vmatmul.mubr.bf16.gmra.mrb[204].mxu0 %v13039_v11  ;;  %v5621_v35 = vld [vmem:[#allocation3 + $0xd9] sm:$0xff] }
 0x76a   : > { %6596 = vmatprep.mubr.bf16.mxu1 %v5638_v24  ;;  %7119 = vmatprep.mubr.bf16.mxu0 %v5859_v47  ;;  %v5874_v24 = vld [vmem:[#allocation3 + $0x46] sm:$0xff]  ;;  %v5875_v47 = vld [vmem:[#allocation3 + $0x4e] sm:$0xff]  ;;  %v5643_v3 = vpack.c.bf16 %v5621_v35, %v5620_v49 }
 0x76b   : > { %v5908_v0 = vpack.c.bf16 %v5875_v47, %v5874_v24  ;;  %v5647_v24 = vpack.c.bf16 %v5629_v29, %v5628_v42  ;;  %v5916_v47 = vpack.c.bf16 %v5891_v36, %v5890_v23  ;;  %v8886_v42 = vld [vmem:[%s13488_s3 + $0x130] sm:$0xff]   ;;  %v8887_v23 = vld [vmem:[%s13488_s3 + $0x138] sm:$0xff]  }
 0x76c   : > { %v5660_v36 = vld [vmem:[#allocation3 + $0x62] sm:$0xff] }
 0x771   : > { %6597 = vmatmul.mubr.bf16.gmra.mrb[140].mxu1 %v5584_v50  ;;  %7120 = vmatmul.mubr.bf16.gmra.mrb[208].mxu0 %v13042_v46  ;;  %v5622_v50 = vld [vmem:[#allocation3 + $0xe1] sm:$0xff] }
 0x772   : > { %6604 = vmatprep.mubr.bf16.mxu1 %v5639_v56  ;;  %7127 = vmatprep.mubr.bf16.mxu0 %v5860_v53  ;;  %v5623_v56 = vld [vmem:[#allocation3 + $0xe9] sm:$0xff] }
 0x773   : > { %v5878_v53 = vld [vmem:[#allocation3 + $0x66] sm:$0xff]  ;;  %v5644_v57 = vpack.c.bf16 %v5623_v56, %v5622_v50 }
 0x774   : > { %v5910_v62 = vpack.c.bf16 %v5879_v8, %v5878_v53  ;;  %v5685_v53 = vpack.c.bf16 %v5651_v28, %v5650_v40  ;;  %v5918_v8 = vpack.c.bf16 %v5895_v61, %v5894_v34  ;;  %v8891_v40 = vld [vmem:[%s13488_s3 + $0x158] sm:$0xff]   ;;  %v5664_v28 = vld [vmem:[#allocation3 + $0x82] sm:$0xff]  ;;  %v8892_v61 = vld [vmem:[%s13488_s3 + $0x160] sm:$0xff]  }
 0x775   : > { %v5665_v34 = vld [vmem:[#allocation3 + $0x8a] sm:$0xff] }
 0x779   : > { %6605 = vmatmul.mubr.bf16.gmra.mrb[144].mxu1 %v5585_v30  ;;  %7128 = vmatmul.mubr.bf16.gmra.mrb[212].mxu0 %v13045_v16  ;;  %v5881_v30 = vld [vmem:[#allocation3 + $0x7e] sm:$0xff] }
 0x77a   : > { %6612 = vmatprep.mubr.bf16.mxu1 %v5640_v32  ;;  %7135 = vmatprep.mubr.bf16.mxu0 %v5861_v51  ;;  %v5624_v32 = vld [vmem:[#allocation3 + $0xf1] sm:$0xff]  ;;  %v5625_v51 = vld [vmem:[#allocation3 + $0xf9] sm:$0xff]  ;;  %v5911_v55 = vpack.c.bf16 %v5881_v30, %v5880_v19 }
 0x77b   : > { %v5645_v52 = vpack.c.bf16 %v5625_v51, %v5624_v32  ;;  %v5653_v19 = vld [vmem:[#allocation3 + $0x2a] sm:$0xff]  ;;  %v8880_v30 = vld [vmem:[%s13488_s3 + $0x100] sm:$0xff]  }
 0x77c   : > { %v5898_v32 = vld [vmem:[#allocation3 + $0x106] sm:$0xff]  ;;  %v5899_v51 = vld [vmem:[#allocation3 + $0x10e] sm:$0xff]  ;;  %v5686_v17 = vpack.c.bf16 %v5653_v19, %v5652_v39 }
 0x77d   : > { %v5670_v19 = vld [vmem:[#allocation3 + $0xb2] sm:$0xff] }
 0x781   : > { %6613 = vmatmul.mubr.bf16.gmra.mrb[148].mxu1 %v5586_v20  ;;  %7136 = vmatmul.mubr.bf16.gmra.mrb[216].mxu0 %v13048_v41  ;;  %v5884_v20 = vld [vmem:[#allocation3 + $0x96] sm:$0xff] }
 0x782   : > { %6620 = vmatprep.mubr.bf16.mxu1 %v5641_v7  ;;  %7143 = vmatprep.mubr.bf16.mxu0 %v5862_v13  ;;  %v5885_v7 = vld [vmem:[#allocation3 + $0x9e] sm:$0xff] }
 0x783   : > { %v5626_v13 = vld [vmem:[#allocation3 + $0x101] sm:$0xff]  ;;  %v5913_v5 = vpack.c.bf16 %v5885_v7, %v5884_v20 }
 0x784   : > { %v5646_v14 = vpack.c.bf16 %v5627_v54, %v5626_v13  ;;  %v5655_v20 = vld [vmem:[#allocation3 + $0x3a] sm:$0xff]  ;;  %v5902_v7 = vld [vmem:[#allocation3 + $0x126] sm:$0xff] }
 0x785   : > { %v8882_v54 = vld [vmem:[%s13488_s3 + $0x110] sm:$0xff]   ;;  %v5687_v43 = vpack.c.bf16 %v5655_v20, %v5654_v59  ;;  %v5922_v31 = vpack.c.bf16 %v5903_v26, %v5902_v7  ;;  %v5674_v20 = vld [vmem:[#allocation3 + $0xd2] sm:$0xff]  ;;  %v5675_v7 = vld [vmem:[#allocation3 + $0xda] sm:$0xff] }
 0x789   : > { %6621 = vmatmul.mubr.bf16.gmra.mrb[152].mxu1 %v5587_v27  ;;  %7144 = vmatmul.mubr.bf16.gmra.mrb[220].mxu0 %v13051_v58  ;;  %v5573_v27 = vld [vmem:[#allocation3 + $0x108] sm:$0xff] }
 0x78a   : > { %6628 = vmatprep.mubr.bf16.mxu1 %v5642_v60  ;;  %7938 = vmatprep.mubr.bf16.mxu0 %v5906_v10  ;;  %v5888_v60 = vld [vmem:[#allocation3 + $0xb6] sm:$0xff]  ;;  %v5889_v10 = vld [vmem:[#allocation3 + $0xbe] sm:$0xff]  ;;  %v5592_v49 = vpack.c.bf16 %v5573_v27, %v5572_v25 }
 0x78b   : > { %v5915_v35 = vpack.c.bf16 %v5889_v10, %v5888_v60  ;;  %v8885_v27 = vld [vmem:[%s13488_s3 + $0x128] sm:$0xff]   ;;  %v5658_v60 = vld [vmem:[#allocation3 + $0x52] sm:$0xff] }
 0x78c   : > { %v5659_v10 = vld [vmem:[#allocation3 + $0x5a] sm:$0xff] }
 0x78d   : > { %v5689_v29 = vpack.c.bf16 %v5659_v10, %v5658_v60 }
 0x791   : > { %6629 = vmatmul.mubr.bf16.gmra.mrb[156].mxu1 %v5588_v38  ;;  %7939 = vmatmul.mubr.bf16.vlgmr.msra.gmra.mrb[224].mxu0 %v5907_v37  ;;  %v5574_v38 = vld [vmem:[#allocation3 + $0x110] sm:$0xff]  ;;  %v5575_v37 = vld [vmem:[#allocation3 + $0x118] sm:$0xff] }
 0x792   : > { %6636 = vmatprep.mubr.bf16.mxu1 %v5643_v3  ;;  %7942 = vmatprep.mubr.bf16.mxu0 %v5908_v0  ;;  %v5892_v3 = vld [vmem:[#allocation3 + $0xd6] sm:$0xff]  ;;  %v5893_v0 = vld [vmem:[#allocation3 + $0xde] sm:$0xff]  ;;  %v5593_v50 = vpack.c.bf16 %v5575_v37, %v5574_v38 }
 0x793   : > { %v5917_v56 = vpack.c.bf16 %v5893_v0, %v5892_v3  ;;  %v5662_v38 = vld [vmem:[#allocation3 + $0x72] sm:$0xff]  ;;  %v5663_v37 = vld [vmem:[#allocation3 + $0x7a] sm:$0xff]  ;;  %v8890_v3 = vld [vmem:[%s13488_s3 + $0x150] sm:$0xff]  }
 0x794   : > { %v5691_v0 = vpack.c.bf16 %v5663_v37, %v5662_v38  ;;  %v5681_v38 = vld [vmem:[#allocation3 + $0x10a] sm:$0xff] }
 0x799   : > { %6637 = vmatmul.mubr.bf16.gmra.mrb[160].mxu1 %v5589_v9  ;;  %7943 = vmatmul.mubr.bf16.gmra.mrb[228].mxu0 %v5909_v21  ;;  %v5648_v9 = vld [vmem:[#allocation3 + $0x2] sm:$0xff]  ;;  %v5649_v21 = vld [vmem:[#allocation3 + $0xa] sm:$0xff] }
 0x79a   : > { %6644 = vmatprep.mubr.bf16.mxu1 %v5644_v57  ;;  %7946 = vmatprep.mubr.bf16.mxu0 %v5910_v62  ;;  %v5896_v57 = vld [vmem:[#allocation3 + $0xf6] sm:$0xff]  ;;  %v5897_v62 = vld [vmem:[#allocation3 + $0xfe] sm:$0xff]  ;;  %v5684_v63 = vpack.c.bf16 %v5649_v21, %v5648_v9  ;;  %v8894_v9 = vld [vmem:[%s13488_s3 + $0x170] sm:$0xff]  }
 0x79b   : > { %v5919_v44 = vpack.c.bf16 %v5897_v62, %v5896_v57  ;;  %v8895_v57 = vld [vmem:[%s13488_s3 + $0x178] sm:$0xff]   ;;  %v5668_v62 = vld [vmem:[#allocation3 + $0xa2] sm:$0xff] }
 0x7a1   : > { %6645 = vmatmul.mubr.bf16.gmra.mrb[164].mxu1 %v5590_v1  ;;  %7947 = vmatmul.mubr.bf16.gmra.mrb[232].mxu0 %v5911_v55  ;;  %v5920_v1 = vpack.c.bf16 %v5899_v51, %v5898_v32  ;;  %v8881_v55 = vld [vmem:[%s13488_s3 + $0x108] sm:$0xff]  }
 0x7a2   : > { %6652 = vmatprep.mubr.bf16.mxu1 %v5645_v52  ;;  %7950 = vmatprep.mubr.bf16.mxu0 %v5912_v6  ;;  %v5900_v52 = vld [vmem:[#allocation3 + $0x116] sm:$0xff]  ;;  %v5901_v6 = vld [vmem:[#allocation3 + $0x11e] sm:$0xff] }
 0x7a3   : > { %v5921_v13 = vpack.c.bf16 %v5901_v6, %v5900_v52 }
 0x7a9   : > { %6653 = vmatmul.mubr.bf16.gmra.mrb[168].mxu1 %v5591_v48  ;;  %7951 = vmatmul.mubr.bf16.gmra.mrb[236].mxu0 %v5913_v5  ;;  %v8883_v48 = vld [vmem:[%s13488_s3 + $0x118] sm:$0xff]   ;;  %v5656_v5 = vld [vmem:[#allocation3 + $0x42] sm:$0xff] }
 0x7aa   : > { %6660 = vmatprep.mubr.bf16.mxu1 %v5646_v14  ;;  %7954 = vmatprep.mubr.bf16.mxu0 %v5914_v15  ;;  %v5657_v14 = vld [vmem:[#allocation3 + $0x4a] sm:$0xff]  ;;  %v8884_v15 = vld [vmem:[%s13488_s3 + $0x120] sm:$0xff]  }
 0x7ab   : > { %v5688_v25 = vpack.c.bf16 %v5657_v14, %v5656_v5  ;;  %v5676_v5 = vld [vmem:[#allocation3 + $0xe2] sm:$0xff]  ;;  %v5677_v14 = vld [vmem:[#allocation3 + $0xea] sm:$0xff] }
 0x7b1   : > { %6661 = vmatmul.mubr.bf16.gmra.mrb[172].mxu1 %v5592_v49  ;;  %7955 = vmatmul.mubr.bf16.gmra.mrb[240].mxu0 %v5915_v35  ;;  %v5661_v49 = vld [vmem:[#allocation3 + $0x6a] sm:$0xff]  ;;  %v8888_v35 = vld [vmem:[%s13488_s3 + $0x140] sm:$0xff]  }
 0x7b2   : > { %6668 = vmatprep.mubr.bf16.mxu1 %v5647_v24  ;;  %7958 = vmatprep.mubr.bf16.mxu0 %v5916_v47  ;;  %v5690_v24 = vpack.c.bf16 %v5661_v49, %v5660_v36  ;;  %v8889_v47 = vld [vmem:[%s13488_s3 + $0x148] sm:$0xff]  }
 0x7b9   : > { %6669 = vmatmul.mubr.bf16.gmra.mrb[176].mxu1 %v5593_v50  ;;  %7959 = vmatmul.mubr.bf16.gmra.mrb[244].mxu0 %v5917_v56  ;;  %v5692_v50 = vpack.c.bf16 %v5665_v34, %v5664_v28  ;;  %v8893_v56 = vld [vmem:[%s13488_s3 + $0x168] sm:$0xff]   ;;  %v5682_v34 = vld [vmem:[#allocation3 + $0x112] sm:$0xff] }
 0x7ba   : > { %6709 = vmatprep.mubr.bf16.mxu1 %v5685_v53  ;;  %7962 = vmatprep.mubr.bf16.mxu0 %v5918_v8  ;;  %v5667_v8 = vld [vmem:[#allocation3 + $0x9a] sm:$0xff] }
 0x7c1   : > { %6710 = vmatmul.mubr.bf16.vlgmr.msra.gmra.mrb[108].mxu1 %v5684_v63  ;;  %7963 = vmatmul.mubr.bf16.gmra.mrb[248].mxu0 %v5919_v44  ;;  %v5669_v63 = vld [vmem:[#allocation3 + $0xaa] sm:$0xff] }
 0x7c2   : > { %6717 = vmatprep.mubr.bf16.mxu1 %v5686_v17  ;;  %6855 = vmatpush1.bf16.msra.mxu1 %v8880_v30  ;;  %v5694_v39 = vpack.c.bf16 %v5669_v63, %v5668_v62  ;;  %v5671_v30 = vld [vmem:[#allocation3 + $0xba] sm:$0xff] }
 0x7c3   : > { %7966 = vmatprep.mubr.bf16.mxu0 %v5920_v1  ;;  %6856 = vmatprep.subr.bf16.mxu1 %v13827_v2  ;;  %v5695_v32 = vpack.c.bf16 %v5671_v30, %v5670_v19  ;;  %v5673_v1 = vld [vmem:[#allocation3 + $0xca] sm:$0xff] }
 0x7c6   : > { %6857 = vmatpush1.bf16.msra.mxu1 %v8881_v55 }
 0x7c7   : > { %6858 = vmatprep.subr.bf16.mxu1 %v13827_v2 }
 0x7c9   : > { %6718 = vmatmul.mubr.bf16.gmra.mrb[112].mxu1 %v5685_v53  ;;  %7967 = vmatmul.mubr.bf16.gmra.mrb[252].mxu0 %v5921_v13  ;;  %v5666_v53 = vld [vmem:[#allocation3 + $0x92] sm:$0xff] }
 0x7ca   : > { %6725 = vmatprep.mubr.bf16.mxu1 %v5687_v43  ;;  %7970 = vmatprep.mubr.bf16.mxu0 %v5922_v31  ;;  %v5693_v21 = vpack.c.bf16 %v5667_v8, %v5666_v53 }
 0x7cb   : > { %6859 = vmatpush1.bf16.msra.mxu1 %v8882_v54 }
 0x7cc   : > { %6860 = vmatprep.subr.bf16.mxu1 %v13827_v2 }
 0x7cf   : > { %6861 = vmatpush1.bf16.msra.mxu1 %v8883_v48 }
 0x7d0   : > { %6862 = vmatprep.subr.bf16.mxu1 %v13827_v2 }
 0x7d1   : > { %6726 = vmatmul.mubr.bf16.gmra.mrb[116].mxu1 %v5686_v17  ;;  %v5672_v17 = vld [vmem:[#allocation3 + $0xc2] sm:$0xff] }
 0x7d2   : > { %6733 = vmatprep.mubr.bf16.mxu1 %v5688_v25  ;;  %v5696_v6 = vpack.c.bf16 %v5673_v1, %v5672_v17 }
 0x7d3   : > { %6863 = vmatpush1.bf16.msra.mxu1 %v8884_v15 }
 0x7d4   : > { %6864 = vmatprep.subr.bf16.mxu1 %v13827_v2 }
 0x7d7   : > { %6865 = vmatpush1.bf16.msra.mxu1 %v8885_v27  ;;  %v5698_v27 = vpack.c.bf16 %v5677_v14, %v5676_v5  ;;  %v8902_v5 = vld [vmem:[%s13488_s3 + $0x180] sm:$0xff]  }
 0x7d8   : > { %6866 = vmatprep.subr.bf16.mxu1 %v13827_v2 }
 0x7d9   : > { %6734 = vmatmul.mubr.bf16.gmra.mrb[120].mxu1 %v5687_v43  ;;  %v5697_v43 = vpack.c.bf16 %v5675_v7, %v5674_v20  ;;  %v5706_v20 = vld [vmem:[#allocation3 + $0x1b] sm:$0xff] }
 0x7da   : > { %6741 = vmatprep.mubr.bf16.mxu1 %v5689_v29 }
 0x7db   : > { %6867 = vmatpush1.bf16.msra.mxu1 %v8886_v42  ;;  %v5678_v42 = vld [vmem:[#allocation3 + $0xf2] sm:$0xff] }
 0x7dc   : > { %6868 = vmatprep.subr.bf16.mxu1 %v13827_v2 }
 0x7df   : > { %6869 = vmatpush1.bf16.msra.mxu1 %v8887_v23 }
 0x7e0   : > { %6870 = vmatprep.subr.bf16.mxu1 %v13827_v2 }
 0x7e1   : > { %6742 = vmatmul.mubr.bf16.gmra.mrb[124].mxu1 %v5688_v25 }
 0x7e2   : > { %6749 = vmatprep.mubr.bf16.mxu1 %v5690_v24 }
 0x7e3   : > { %6871 = vmatpush1.bf16.msra.mxu1 %v8888_v35 }
 0x7e4   : > { %6872 = vmatprep.subr.bf16.mxu1 %v13827_v2 }
 0x7e7   : > { %6873 = vmatpush1.bf16.msra.mxu1 %v8889_v47  ;;  %v5680_v47 = vld [vmem:[#allocation3 + $0x102] sm:$0xff] }
 0x7e8   : > { %6874 = vmatprep.subr.bf16.mxu1 %v13827_v2 }
 0x7e9   : > { %6750 = vmatmul.mubr.bf16.gmra.mrb[128].mxu1 %v5689_v29  ;;  %v5679_v29 = vld [vmem:[#allocation3 + $0xfa] sm:$0xff] }
 0x7ea   : > { %6757 = vmatprep.mubr.bf16.mxu1 %v5691_v0  ;;  %v5699_v49 = vpack.c.bf16 %v5679_v29, %v5678_v42  ;;  %v8903_v29 = vld [vmem:[%s13488_s3 + $0x188] sm:$0xff]  }
 0x7eb   : > { %6875 = vmatpush1.bf16.msra.mxu1 %v8890_v3 }
 0x7ec   : > { %6876 = vmatprep.subr.bf16.mxu1 %v13827_v2 }
 0x7ef   : > { %6877 = vmatpush1.bf16.msra.mxu1 %v8891_v40 }
 0x7f0   : > { %6878 = vmatprep.subr.bf16.mxu1 %v13827_v2 }
 0x7f1   : > { %6758 = vmatmul.mubr.bf16.gmra.mrb[132].mxu1 %v5690_v24 }
 0x7f2   : > { %6765 = vmatprep.mubr.bf16.mxu1 %v5692_v50 }
 0x7f3   : > { %6879 = vmatpush1.bf16.msra.mxu1 %v8892_v61  ;;  %v5683_v61 = vld [vmem:[#allocation3 + $0x11a] sm:$0xff] }
 0x7f4   : > { %6880 = vmatprep.subr.bf16.mxu1 %v13827_v2  ;;  %v5701_v53 = vpack.c.bf16 %v5683_v61, %v5682_v34  ;;  %v8906_v61 = vld [vmem:[%s13488_s3 + $0x1a0] sm:$0xff]  }
 0x7f7   : > { %6881 = vmatpush1.bf16.msra.mxu1 %v8893_v56 }
 0x7f8   : > { %6882 = vmatprep.subr.bf16.mxu1 %v13827_v2 }
 0x7f9   : > { %6766 = vmatmul.mubr.bf16.gmra.mrb[136].mxu1 %v5691_v0  ;;  %v5700_v0 = vpack.c.bf16 %v5681_v38, %v5680_v47  ;;  %v5709_v47 = vld [vmem:[#allocation3 + $0x33] sm:$0xff]  ;;  %v5710_v38 = vld [vmem:[#allocation3 + $0x3b] sm:$0xff] }
 0x7fa   : > { %6773 = vmatprep.mubr.bf16.mxu1 %v5693_v21  ;;  %v5743_v34 = vpack.c.bf16 %v5710_v38, %v5709_v47  ;;  %v5717_v47 = vld [vmem:[#allocation3 + $0x73] sm:$0xff]  ;;  %v5718_v38 = vld [vmem:[#allocation3 + $0x7b] sm:$0xff] }
 0x7fb   : > { %6883 = vmatpush1.bf16.msra.mxu1 %v8894_v9 }
 0x7fc   : > { %6884 = vmatprep.subr.bf16.mxu1 %v13827_v2 }
 0x7ff   : > { %6885 = vmatpush1.bf16.msra.mxu1 %v8895_v57  ;;  %v5703_v57 = vld [vmem:[#allocation3 + $0x12a] sm:$0xff] }
 0x800   : > { %7974 = vmatprep.subr.bf16.mxu1 %v13827_v2 }
 0x801   : > { %6774 = vmatmul.mubr.bf16.gmra.mrb[140].mxu1 %v5692_v50 }
 0x802   : > { %6781 = vmatprep.mubr.bf16.mxu1 %v5694_v39 }
 0x809   : > { %6782 = vmatmul.mubr.bf16.gmra.mrb[144].mxu1 %v5693_v21  ;;  %v5702_v21 = vld [vmem:[#allocation3 + $0x122] sm:$0xff] }
 0x80a   : > { %6789 = vmatprep.mubr.bf16.mxu1 %v5695_v32 }
 0x80c   : > { %v13118_v51 = vpop.f32.mrb[180].mxu0 }
 0x80d   : > { %v7067_v44 = vpop.f32.mrb[181].mxu0 }
 0x80e   : > { %v13120_v55 = vpop.f32.mrb[182].mxu0  ;;  %v5760_v44 = vld [vmem:[#allocation3 + $0x1c] sm:$0xff] }
 0x80f   : > { %v7070_v52 = vpop.f32.mrb[183].mxu0 }
 0x811   : > { %6790 = vmatmul.mubr.bf16.gmra.mrb[148].mxu1 %v5694_v39  ;;  %v5704_v39 = vpack.c.bf16 %v5703_v57, %v5702_v21 }
 0x812   : > { %6797 = vmatprep.mubr.bf16.mxu1 %v5696_v6 }
 0x814   : > { %v13122_v26 = vpop.f32.mrb[184].mxu0 }
 0x815   : > { %v7075_v59 = vpop.f32.mrb[185].mxu0 }
 0x816   : > { %v13124_v13 = vpop.f32.mrb[186].mxu0  ;;  %v5705_v59 = vld [vmem:[#allocation3 + $0x13] sm:$0xff] }
 0x817   : > { %v7078_v54 = vpop.f32.mrb[187].mxu0 }
 0x819   : > { %6798 = vmatmul.mubr.bf16.gmra.mrb[152].mxu1 %v5695_v32  ;;  %v5759_v32 = vld [vmem:[#allocation3 + $0x14] sm:$0xff] }
 0x81a   : > { %6805 = vmatprep.mubr.bf16.mxu1 %v5697_v43  ;;  %v5795_v52 = vpack.c.bf16 %v5760_v44, %v5759_v32  ;;  %v5713_v44 = vld [vmem:[#allocation3 + $0x53] sm:$0xff] }
 0x81c   : > { %v13126_v31 = vpop.f32.mrb[188].mxu0 }
 0x81d   : > { %v7083_v48 = vpop.f32.mrb[189].mxu0 }
 0x81e   : > { %v13128_v15 = vpop.f32.mrb[190].mxu0  ;;  %v5741_v48 = vpack.c.bf16 %v5706_v20, %v5705_v59  ;;  %v8909_v20 = vld [vmem:[%s13488_s3 + $0x1b8] sm:$0xff]  }
 0x81f   : > { %v7086_v25 = vpop.f32.mrb[191].mxu0 }
 0x820   : > { %v5707_v25 = vld [vmem:[#allocation3 + $0x23] sm:$0xff] }
 0x821   : > { %6806 = vmatmul.mubr.bf16.gmra.mrb[156].mxu1 %v5696_v6 }
 0x822   : > { %6813 = vmatprep.mubr.bf16.mxu1 %v5698_v27 }
 0x824   : > { %v13130_v60 = vpop.f32.mrb[192].mxu0 }
 0x825   : > { %v7091_v10 = vpop.f32.mrb[193].mxu0 }
 0x826   : > { %v13132_v23 = vpop.f32.mrb[194].mxu0 }
 0x827   : > { %v7094_v36 = vpop.f32.mrb[195].mxu0 }
 0x829   : > { %6814 = vmatmul.mubr.bf16.gmra.mrb[160].mxu1 %v5697_v43 }
 0x82a   : > { %6821 = vmatprep.mubr.bf16.mxu1 %v5699_v49 }
 0x82c   : > { %v13134_v35 = vpop.f32.mrb[196].mxu0 }
 0x82d   : > { %v7099_v24 = vpop.f32.mrb[197].mxu0 }
 0x82e   : > { %v13136_v37 = vpop.f32.mrb[198].mxu0 }
 0x82f   : > { %v7102_v3 = vpop.f32.mrb[199].mxu0 }
 0x831   : > { %6822 = vmatmul.mubr.bf16.gmra.mrb[164].mxu1 %v5698_v27  ;;  %v5708_v27 = vld [vmem:[#allocation3 + $0x2b] sm:$0xff] }
 0x832   : > { %6829 = vmatprep.mubr.bf16.mxu1 %v5700_v0  ;;  %v5742_v36 = vpack.c.bf16 %v5708_v27, %v5707_v25  ;;  %v5716_v25 = vld [vmem:[#allocation3 + $0x6b] sm:$0xff] }
 0x834   : > { %v13138_v40 = vpop.f32.mrb[200].mxu0 }
 0x835   : > { %v7107_v28 = vpop.f32.mrb[201].mxu0 }
 0x836   : > { %v13140_v50 = vpop.f32.mrb[202].mxu0  ;;  %v8905_v28 = vld [vmem:[%s13488_s3 + $0x198] sm:$0xff]  }
 0x837   : > { %v7110_v56 = vpop.f32.mrb[203].mxu0 }
 0x839   : > { %6830 = vmatmul.mubr.bf16.gmra.mrb[168].mxu1 %v5699_v49  ;;  %v8904_v49 = vld [vmem:[%s13488_s3 + $0x190] sm:$0xff]  }
 0x83a   : > { %6837 = vmatprep.mubr.bf16.mxu1 %v5701_v53 }
 0x83c   : > { %v13142_v8 = vpop.f32.mrb[204].mxu0 }
 0x83d   : > { %v7115_v9 = vpop.f32.mrb[205].mxu0 }
 0x83e   : > { %v13144_v62 = vpop.f32.mrb[206].mxu0  ;;  %v5712_v9 = vld [vmem:[#allocation3 + $0x4b] sm:$0xff] }
 0x83f   : > { %v7118_v63 = vpop.f32.mrb[207].mxu0 }
 0x840   : > { %v8907_v63 = vld [vmem:[%s13488_s3 + $0x1a8] sm:$0xff]  }
 0x841   : > { %6838 = vmatmul.mubr.bf16.gmra.mrb[172].mxu1 %v5700_v0 }
 0x842   : > { %6845 = vmatprep.mubr.bf16.mxu1 %v5704_v39 }
 0x844   : > { %v13146_v19 = vpop.f32.mrb[208].mxu0 }
 0x845   : > { %v7123_v30 = vpop.f32.mrb[209].mxu0 }
 0x846   : > { %v13148_v17 = vpop.f32.mrb[210].mxu0  ;;  %v8908_v30 = vld [vmem:[%s13488_s3 + $0x1b0] sm:$0xff]  }
 0x847   : > { %v7126_v1 = vpop.f32.mrb[211].mxu0 }
 0x848   : > { %v5714_v1 = vld [vmem:[#allocation3 + $0x5b] sm:$0xff] }
 0x849   : > { %6846 = vmatmul.mubr.bf16.gmra.mrb[176].mxu1 %v5701_v53  ;;  %v5711_v53 = vld [vmem:[#allocation3 + $0x43] sm:$0xff] }
 0x84a   : > { %6886 = vmatprep.mubr.bf16.mxu1 %v5795_v52  ;;  %v5744_v39 = vpack.c.bf16 %v5712_v9, %v5711_v53  ;;  %v5904_v53 = vld [vmem:[#allocation3 + $0x136] sm:$0xff]  ;;  %v5905_v9 = vld [vmem:[#allocation3 + $0x13e] sm:$0xff] }
 0x84c   : > { %v13150_v6 = vpop.f32.mrb[212].mxu0 }
 0x84d   : > { %v7131_v7 = vpop.f32.mrb[213].mxu0 }
 0x84e   : > { %v13152_v54 = vpop.f32.mrb[214].mxu0  ;;  %v5745_v7 = vpack.c.bf16 %v5714_v1, %v5713_v44  ;;  %v5720_v44 = vld [vmem:[#allocation3 + $0x8b] sm:$0xff] }
 0x84f   : > { %v7134_v43 = vpop.f32.mrb[215].mxu0 }
 0x850   : > { %v8910_v43 = vld [vmem:[%s13488_s3 + $0x1c0] sm:$0xff]  }
 0x851   : > { %6887 = vmatmul.mubr.bf16.vlgmr.msra.gmra.mrb[108].mxu1 %v5741_v48 }
 0x852   : > { %6894 = vmatprep.mubr.bf16.mxu1 %v12991_v45  ;;  %7990 = vmatpush1.bf16.msra.mxu1 %v8902_v5  ;;  %v5715_v5 = vld [vmem:[#allocation3 + $0x63] sm:$0xff] }
 0x853   : > { %7975 = vmatprep.subr.bf16.mxu1 %v13827_v2 }
 0x854   : > { %v13159_v14 = vpop.f32.mrb[216].mxu0 }
 0x855   : > { %v7139_v10 = vpop.f32.mrb[217].mxu0 }
 0x856   : > { %v13161_v42 = vpop.f32.mrb[218].mxu0  ;;  %7991 = vmatpush1.bf16.msra.mxu1 %v8903_v29  ;;  %v8911_v29 = vld [vmem:[%s13488_s3 + $0x1c8] sm:$0xff]  }
 0x857   : > { %v7142_v45 = vpop.f32.mrb[219].mxu0  ;;  %7976 = vmatprep.subr.bf16.mxu1 %v13827_v2 }
 0x858   : > { %v5746_v45 = vpack.c.bf16 %v5716_v25, %v5715_v5  ;;  %v8916_v5 = vld [vmem:[%s13488_s3 + $0x1f0] sm:$0xff]  }
 0x859   : > { %6895 = vmatmul.mubr.bf16.gmra.mrb[112].mxu1 %v5742_v36  ;;  %v8912_v36 = vld [vmem:[%s13488_s3 + $0x1d0] sm:$0xff]  }
 0x85a   : > { %6902 = vmatprep.mubr.bf16.mxu1 %v13001_v22  ;;  %7992 = vmatpush1.bf16.msra.mxu1 %v8904_v49 }
 0x85b   : > { %7977 = vmatprep.subr.bf16.mxu1 %v13827_v2 }
 0x85c   : > { %v13172_v24 = vpop.f32.mrb[220].mxu0 }
 0x85d   : > { %v7147_v3 = vpop.f32.mrb[221].mxu0 }
 0x85e   : > { %v13174_v0 = vpop.f32.mrb[222].mxu0  ;;  %7993 = vmatpush1.bf16.msra.mxu1 %v8905_v28 }
 0x85f   : > { %14105 = vst [vmem:[#allocation22_spill] sm:$0xff] %v13174_v0  ;;  %v7150_v22 = vpop.f32.mrb[223].mxu0  ;;  %7978 = vmatprep.subr.bf16.mxu1 %v13827_v2 }
 0x860   : > { %v8913_v22 = vld [vmem:[%s13488_s3 + $0x1d8] sm:$0xff]  }
 0x861   : > { %6903 = vmatmul.mubr.bf16.gmra.mrb[116].mxu1 %v5743_v34  ;;  %v5747_v34 = vpack.c.bf16 %v5718_v38, %v5717_v47  ;;  %v8917_v38 = vld [vmem:[%s13488_s3 + $0x1f8] sm:$0xff]  }
 0x862   : > { %6910 = vmatprep.mubr.bf16.mxu1 %v13010_v18  ;;  %7994 = vmatpush1.bf16.msra.mxu1 %v8906_v61  ;;  %v8914_v61 = vld [vmem:[%s13488_s3 + $0x1e0] sm:$0xff]  }
 0x863   : > { %7979 = vmatprep.subr.bf16.mxu1 %v13827_v2 }
 0x864   : > { %v13185_v56 = vpop.f32.mrb[224].mxu0 }
 0x865   : > { %v13187_v21 = vpop.f32.mrb[225].mxu0 }
 0x866   : > { %v13189_v57 = vpop.f32.mrb[226].mxu0  ;;  %7995 = vmatpush1.bf16.msra.mxu1 %v8907_v63  ;;  %v5923_v63 = vpack.c.bf16 %v5905_v9, %v5904_v53 }
 0x867   : > { %v13194_v18 = vpop.f32.mrb[227].mxu0  ;;  %7980 = vmatprep.subr.bf16.mxu1 %v13827_v2 }
 0x868   : > { %7971 = vmatmul.mubr.bf16.gmra.mrb[0].mxu0 %v5923_v63 }
 0x869   : > { %6911 = vmatmul.mubr.bf16.gmra.mrb[120].mxu1 %v5744_v39 }
 0x86a   : > { %6918 = vmatprep.mubr.bf16.mxu1 %v13019_v33  ;;  %7996 = vmatpush1.bf16.msra.mxu1 %v8908_v30  ;;  %v5719_v30 = vld [vmem:[#allocation3 + $0x83] sm:$0xff] }
 0x86b   : > { %7981 = vmatprep.subr.bf16.mxu1 %v13827_v2 }
 0x86c   : > { %v13202_v32 = vpop.f32.mrb[228].mxu0 }
 0x86d   : > { %v13204_v52 = vpop.f32.mrb[229].mxu0 }
 0x86e   : > { %v13206_v59 = vpop.f32.mrb[230].mxu0  ;;  %7997 = vmatpush1.bf16.msra.mxu1 %v8909_v20 }
 0x86f   : > { %v13211_v33 = vpop.f32.mrb[231].mxu0  ;;  %7982 = vmatprep.subr.bf16.mxu1 %v13827_v2 }
 0x871   : > { %6919 = vmatmul.mubr.bf16.gmra.mrb[124].mxu1 %v5745_v7 }
 0x872   : > { %6926 = vmatprep.mubr.bf16.mxu1 %v13025_v4  ;;  %7998 = vmatpush1.bf16.msra.mxu1 %v8910_v43  ;;  %v5748_v43 = vpack.c.bf16 %v5720_v44, %v5719_v30 }
 0x873   : > { %7983 = vmatprep.subr.bf16.mxu1 %v13827_v2 }
 0x874   : > { %v13219_v48 = vpop.f32.mrb[232].mxu0 }
 0x875   : > { %v13221_v27 = vpop.f32.mrb[233].mxu0 }
 0x876   : > { %v13223_v10 = vpop.f32.mrb[234].mxu0  ;;  %7999 = vmatpush1.bf16.msra.mxu1 %v8911_v29  ;;  %v5721_v29 = vld [vmem:[#allocation3 + $0x93] sm:$0xff] }
 0x877   : > { %v13228_v4 = vpop.f32.mrb[235].mxu0  ;;  %7984 = vmatprep.subr.bf16.mxu1 %v13827_v2 }
 0x879   : > { %6927 = vmatmul.mubr.bf16.gmra.mrb[128].mxu1 %v5746_v45  ;;  %v5722_v45 = vld [vmem:[#allocation3 + $0x9b] sm:$0xff] }
 0x87a   : > { %6934 = vmatprep.mubr.bf16.mxu1 %v13035_v12  ;;  %8000 = vmatpush1.bf16.msra.mxu1 %v8912_v36 }
 0x87b   : > { %7985 = vmatprep.subr.bf16.mxu1 %v13827_v2 }
 0x87c   : > { %v13236_v49 = vpop.f32.mrb[236].mxu0 }
 0x87d   : > { %v13238_v3 = vpop.f32.mrb[237].mxu0 }
 0x87e   : > { %v13240_v28 = vpop.f32.mrb[238].mxu0  ;;  %8001 = vmatpush1.bf16.msra.mxu1 %v8913_v22  ;;  %v5749_v22 = vpack.c.bf16 %v5722_v45, %v5721_v29 }
 0x87f   : > { %v13245_v12 = vpop.f32.mrb[239].mxu0  ;;  %7986 = vmatprep.subr.bf16.mxu1 %v13827_v2 }
 0x881   : > { %6935 = vmatmul.mubr.bf16.gmra.mrb[132].mxu1 %v5747_v34  ;;  %v5723_v34 = vld [vmem:[#allocation3 + $0xa3] sm:$0xff] }
 0x882   : > { %6942 = vmatprep.mubr.bf16.mxu1 %v13039_v11  ;;  %8002 = vmatpush1.bf16.msra.mxu1 %v8914_v61  ;;  %v8915_v11 = vld [vmem:[%s13488_s3 + $0x1e8] sm:$0xff]   ;;  %v5724_v61 = vld [vmem:[#allocation3 + $0xab] sm:$0xff] }
 0x883   : > { %7987 = vmatprep.subr.bf16.mxu1 %v13827_v2  ;;  %v5750_v30 = vpack.c.bf16 %v5724_v61, %v5723_v34  ;;  %v5783_v34 = vld [vmem:[#allocation3 + $0xd4] sm:$0xff]  ;;  %v5784_v61 = vld [vmem:[#allocation3 + $0xdc] sm:$0xff] }
 0x884   : > { %v13253_v39 = vpop.f32.mrb[240].mxu0 }
 0x885   : > { %v13255_v1 = vpop.f32.mrb[241].mxu0 }
 0x886   : > { %v13257_v20 = vpop.f32.mrb[242].mxu0  ;;  %8003 = vmatpush1.bf16.msra.mxu1 %v8915_v11  ;;  %v5725_v11 = vld [vmem:[#allocation3 + $0xb3] sm:$0xff] }
 0x887   : > { %v13262_v7 = vpop.f32.mrb[243].mxu0  ;;  %7988 = vmatprep.subr.bf16.mxu1 %v13827_v2 }
 0x889   : > { %6943 = vmatmul.mubr.bf16.gmra.mrb[136].mxu1 %v5748_v43  ;;  %v5726_v43 = vld [vmem:[#allocation3 + $0xbb] sm:$0xff] }
 0x88a   : > { %6950 = vmatprep.mubr.bf16.mxu1 %v13042_v46  ;;  %8004 = vmatpush1.bf16.msra.mxu1 %v8916_v5  ;;  %v5751_v45 = vpack.c.bf16 %v5726_v43, %v5725_v11  ;;  %v5731_v11 = vld [vmem:[#allocation3 + $0xe3] sm:$0xff]  ;;  %v5732_v43 = vld [vmem:[#allocation3 + $0xeb] sm:$0xff] }
 0x88b   : > { %7989 = vmatprep.subr.bf16.mxu1 %v13827_v2 }
 0x88c   : > { %v13270_v25 = vpop.f32.mrb[244].mxu0 }
 0x88d   : > { %14106 = vst [vmem:[#allocation23_spill] sm:$0xff] %v13270_v25  ;;  %v13272_v36 = vpop.f32.mrb[245].mxu0 }
 0x88e   : > { %14107 = vst [vmem:[#allocation24_spill] sm:$0xff] %v13272_v36  ;;  %v13274_v47 = vpop.f32.mrb[246].mxu0  ;;  %8005 = vmatpush1.bf16.msra.mxu1 %v8917_v38  ;;  %v5727_v38 = vld [vmem:[#allocation3 + $0xc3] sm:$0xff] }
 0x88f   : > { %14108 = vst [vmem:[#allocation25_spill] sm:$0xff] %v13274_v47  ;;  %v13279_v46 = vpop.f32.mrb[247].mxu0 }
 0x890   : > { %14109 = vst [vmem:[#allocation26_spill] sm:$0xff] %v13279_v46 }
 0x891   : > { %6951 = vmatmul.mubr.bf16.gmra.mrb[140].mxu1 %v5749_v22  ;;  %v5728_v22 = vld [vmem:[#allocation3 + $0xcb] sm:$0xff] }
 0x892   : > { %6958 = vmatprep.mubr.bf16.mxu1 %v13045_v16 }
 0x894   : > { %v13282_v2 = vpop.f32.mrb[248].mxu0 }
 0x895   : > { %14110 = vst [vmem:[#allocation27_spill] sm:$0xff] %v13282_v2  ;;  %v13284_v53 = vpop.f32.mrb[249].mxu0  ;;  %v5785_v2 = vld [vmem:[#allocation3 + $0xe4] sm:$0xff] }
 0x896   : > { %14111 = vst [vmem:[#allocation28_spill] sm:$0xff] %v13284_v53  ;;  %v13286_v9 = vpop.f32.mrb[250].mxu0 }
 0x897   : > { %14112 = vst [vmem:[#allocation29_spill] sm:$0xff] %v13286_v9  ;;  %v13288_v63 = vpop.f32.mrb[251].mxu0  ;;  %v5730_v9 = vld [vmem:[#allocation3 + $0xdb] sm:$0xff] }
 0x898   : > { %14113 = vst [vmem:[#allocation18_spill] sm:$0xff] %v13288_v63 }
 0x899   : > { %6959 = vmatmul.mubr.bf16.gmra.mrb[144].mxu1 %v5750_v30  ;;  %v5752_v30 = vpack.c.bf16 %v5728_v22, %v5727_v38  ;;  %v5733_v38 = vld [vmem:[#allocation3 + $0xf3] sm:$0xff]  ;;  %v5734_v22 = vld [vmem:[#allocation3 + $0xfb] sm:$0xff] }
 0x89a   : > { %6966 = vmatprep.mubr.bf16.mxu1 %v13048_v41  ;;  %v5807_v41 = vpack.c.bf16 %v5784_v61, %v5783_v34  ;;  %v5789_v34 = vld [vmem:[#allocation3 + $0x104] sm:$0xff]  ;;  %v5790_v61 = vld [vmem:[#allocation3 + $0x10c] sm:$0xff] }
 0x89b   : > { %v5810_v47 = vpack.c.bf16 %v5790_v61, %v5789_v34  ;;  %v5838_v34 = vld [vmem:[#allocation3 + $0xd5] sm:$0xff]  ;;  %v5839_v61 = vld [vmem:[#allocation3 + $0xdd] sm:$0xff] }
 0x89c   : > { %v13291_v44 = vpop.f32.mrb[252].mxu0  ;;  %v5863_v0 = vpack.c.bf16 %v5839_v61, %v5838_v34  ;;  %v5850_v34 = vld [vmem:[#allocation3 + $0x135] sm:$0xff]  ;;  %v5851_v61 = vld [vmem:[#allocation3 + $0x13d] sm:$0xff] }
 0x89d   : > { %14114 = vst [vmem:[#allocation52_spill] sm:$0xff] %v13291_v44  ;;  %v13293_v5 = vpop.f32.mrb[253].mxu0  ;;  %v5729_v44 = vld [vmem:[#allocation3 + $0xd3] sm:$0xff] }
 0x89e   : > { %14115 = vst [vmem:[#allocation20_spill] sm:$0xff] %v13293_v5  ;;  %v13295_v16 = vpop.f32.mrb[254].mxu0  ;;  %v5786_v5 = vld [vmem:[#allocation3 + $0xec] sm:$0xff]  ;;  %v5753_v63 = vpack.c.bf16 %v5730_v9, %v5729_v44  ;;  %v5735_v9 = vld [vmem:[#allocation3 + $0x103] sm:$0xff] }
 0x89f   : > { %14116 = vst [vmem:[#allocation54_spill] sm:$0xff] %v13295_v16  ;;  %v13297_v29 = vpop.f32.mrb[255].mxu0  ;;  %v5808_v16 = vpack.c.bf16 %v5786_v5, %v5785_v2  ;;  %v5736_v2 = vld [vmem:[#allocation3 + $0x10b] sm:$0xff]  ;;  %v5792_v44 = vld [vmem:[#allocation3 + $0x11c] sm:$0xff] }
 0x8a0   : > { %14117 = vst [vmem:[#allocation21_spill] sm:$0xff] %v13297_v29  ;;  %v5754_v29 = vpack.c.bf16 %v5732_v43, %v5731_v11  ;;  %v5756_v5 = vpack.c.bf16 %v5736_v2, %v5735_v9  ;;  %v5737_v11 = vld [vmem:[#allocation3 + $0x113] sm:$0xff]  ;;  %v5738_v43 = vld [vmem:[#allocation3 + $0x11b] sm:$0xff]  ;;  %v5840_v9 = vld [vmem:[#allocation3 + $0xe5] sm:$0xff] }
 0x8a1   : > { %6967 = vmatmul.mubr.bf16.gmra.mrb[148].mxu1 %v5751_v45  ;;  %v5787_v45 = vld [vmem:[#allocation3 + $0xf4] sm:$0xff] }
 0x8a2   : > { %6974 = vmatprep.mubr.bf16.mxu1 %v13051_v58  ;;  %v5788_v58 = vld [vmem:[#allocation3 + $0xfc] sm:$0xff]  ;;  %v5841_v2 = vld [vmem:[#allocation3 + $0xed] sm:$0xff] }
 0x8a3   : > { %v5809_v53 = vpack.c.bf16 %v5788_v58, %v5787_v45  ;;  %v5794_v45 = vld [vmem:[#allocation3 + $0x12c] sm:$0xff]  ;;  %v5757_v58 = vpack.c.bf16 %v5738_v43, %v5737_v11 }
 0x8a4   : > { %v5844_v11 = vld [vmem:[#allocation3 + $0x105] sm:$0xff]  ;;  %v5845_v43 = vld [vmem:[#allocation3 + $0x10d] sm:$0xff] }
 0x8a9   : > { %6975 = vmatmul.mubr.bf16.gmra.mrb[152].mxu1 %v5752_v30  ;;  %v5755_v30 = vpack.c.bf16 %v5734_v22, %v5733_v38  ;;  %v5739_v38 = vld [vmem:[#allocation3 + $0x123] sm:$0xff]  ;;  %v5740_v22 = vld [vmem:[#allocation3 + $0x12b] sm:$0xff] }
 0x8aa   : > { %6982 = vmatprep.mubr.bf16.mxu1 %v5807_v41 }
 0x8b1   : > { %6983 = vmatmul.mubr.bf16.gmra.mrb[156].mxu1 %v5753_v63  ;;  %v5791_v63 = vld [vmem:[#allocation3 + $0x114] sm:$0xff] }
 0x8b2   : > { %6990 = vmatprep.mubr.bf16.mxu1 %v5808_v16  ;;  %v5811_v25 = vpack.c.bf16 %v5792_v44, %v5791_v63  ;;  %v5864_v63 = vpack.c.bf16 %v5841_v2, %v5840_v9  ;;  %v5842_v44 = vld [vmem:[#allocation3 + $0xf5] sm:$0xff] }
 0x8b9   : > { %6991 = vmatmul.mubr.bf16.gmra.mrb[160].mxu1 %v5754_v29  ;;  %v5793_v29 = vld [vmem:[#allocation3 + $0x124] sm:$0xff] }
 0x8ba   : > { %6998 = vmatprep.mubr.bf16.mxu1 %v5809_v53  ;;  %v5812_v46 = vpack.c.bf16 %v5794_v45, %v5793_v29  ;;  %v5866_v29 = vpack.c.bf16 %v5845_v43, %v5844_v11  ;;  %v5846_v45 = vld [vmem:[#allocation3 + $0x115] sm:$0xff] }
 0x8c1   : > { %6999 = vmatmul.mubr.bf16.gmra.mrb[164].mxu1 %v5755_v30  ;;  %v5758_v30 = vpack.c.bf16 %v5740_v22, %v5739_v38  ;;  %v5849_v22 = vld [vmem:[#allocation3 + $0x12d] sm:$0xff] }
 0x8c2   : > { %7006 = vmatprep.mubr.bf16.mxu1 %v5810_v47 }
 0x8c9   : > { %7007 = vmatmul.mubr.bf16.gmra.mrb[168].mxu1 %v5756_v5  ;;  %v5843_v5 = vld [vmem:[#allocation3 + $0xfd] sm:$0xff] }
 0x8ca   : > { %7014 = vmatprep.mubr.bf16.mxu1 %v5811_v25  ;;  %v5865_v36 = vpack.c.bf16 %v5843_v5, %v5842_v44 }
 0x8d1   : > { %7015 = vmatmul.mubr.bf16.gmra.mrb[172].mxu1 %v5757_v58  ;;  %v5847_v58 = vld [vmem:[#allocation3 + $0x11d] sm:$0xff] }
 0x8d2   : > { %7022 = vmatprep.mubr.bf16.mxu1 %v5812_v46  ;;  %v5867_v38 = vpack.c.bf16 %v5847_v58, %v5846_v45 }
 0x8d9   : > { %7023 = vmatmul.mubr.bf16.gmra.mrb[176].mxu1 %v5758_v30  ;;  %v5814_v30 = vld [vmem:[#allocation3 + $0x13c] sm:$0xff] }
 0x8da   : > { %7151 = vmatprep.mubr.bf16.mxu1 %v5863_v0  ;;  %v5848_v0 = vld [vmem:[#allocation3 + $0x125] sm:$0xff] }
 0x8e1   : > { %7152 = vmatmul.mubr.bf16.vlgmr.msra.gmra.mrb[152].mxu1 %v5807_v41  ;;  %v5868_v41 = vpack.c.bf16 %v5849_v22, %v5848_v0 }
 0x8e2   : > { %7159 = vmatprep.mubr.bf16.mxu1 %v5864_v63  ;;  %v13302_v63 = vstv %s7385_s13 }
 0x8e9   : > { %7160 = vmatmul.mubr.bf16.gmra.mrb[156].mxu1 %v5808_v16  ;;  %v5869_v16 = vpack.c.bf16 %v5851_v61, %v5850_v34 }
 0x8ea   : > { %7167 = vmatprep.mubr.bf16.mxu1 %v5865_v36  ;;  %v5813_v36 = vld [vmem:[#allocation3 + $0x134] sm:$0xff] }
 0x8f1   : > { %7168 = vmatmul.mubr.bf16.gmra.mrb[160].mxu1 %v5809_v53  ;;  %v5815_v53 = vpack.c.bf16 %v5814_v30, %v5813_v36 }
 0x8f2   : > { %7175 = vmatprep.mubr.bf16.mxu1 %v5866_v29 }
 0x8f9   : > { %7176 = vmatmul.mubr.bf16.gmra.mrb[164].mxu1 %v5810_v47 }
 0x8fa   : > { %7183 = vmatprep.mubr.bf16.mxu1 %v5867_v38 }
 0x901   : > { %7184 = vmatmul.mubr.bf16.gmra.mrb[168].mxu1 %v5811_v25 }
 0x902   : > { %7191 = vmatprep.mubr.bf16.mxu1 %v5868_v41 }
 0x909   : > { %7192 = vmatmul.mubr.bf16.gmra.mrb[172].mxu1 %v5812_v46 }
 0x90a   : > { %7199 = vmatprep.mubr.bf16.mxu1 %v5869_v16 }
 0x911   : > { %7200 = vmatmul.mubr.bf16.gmra.mrb[176].mxu1 %v5815_v53 }
 0x924   : > { %v6888_v9 = vpop.f32.mrb[108].mxu1 }
 0x925   : > { %v8042_v47 = vadd.f32 %v13118_v51, %v6888_v9  ;;  %v6890_v2 = vpop.f32.mrb[109].mxu1 }
 0x926   : > { %v6891_v44 = vpop.f32.mrb[110].mxu1 }
 0x927   : > { %v7243_v25 = vadd.f32 %v8042_v47, %v13187_v21  ;;  %v8043_v5 = vadd.f32 %v13120_v55, %v6891_v44  ;;  %v6893_v11 = vpop.f32.mrb[111].mxu1 }
 0x929   : > { %v7387_v51 = vadd.f32 %v13302_v63, %v7243_v25  ;;  %v7246_v46 = vadd.f32 %v8043_v5, %v13194_v18 }
 0x92b   : > { %7424 = vst.msk [vmem:[%s13309_s17] sm:$0xff] %vm7423_vm9, %v7387_v51  ;;  %v7388_v21 = vadd.f32 %v13302_v63, %v7246_v46 }
 0x92c   : > { %v6896_v55 = vpop.f32.mrb[112].mxu1 }
 0x92d   : > { %7425 = vst.msk [vmem:[%s13309_s17 + $0x8] sm:$0xff] %vm7423_vm9, %v7388_v21  ;;  %v8044_v43 = vadd.f32 %v13122_v26, %v6896_v55  ;;  %v6898_v29 = vpop.f32.mrb[113].mxu1 }
 0x92e   : > { %v6899_v45 = vpop.f32.mrb[114].mxu1 }
 0x92f   : > { %v7251_v58 = vadd.f32 %v8044_v43, %v13185_v56  ;;  %v8045_v38 = vadd.f32 %v13124_v13, %v6899_v45  ;;  %v6901_v0 = vpop.f32.mrb[115].mxu1 }
 0x931   : > { %v7389_v18 = vadd.f32 %v13302_v63, %v7251_v58  ;;  %v7254_v22 = vadd.f32 %v8045_v38, %v13189_v57 }
 0x933   : > { %7426 = vst.msk [vmem:[%s13309_s17 + $0x10] sm:$0xff] %vm7423_vm9, %v7389_v18  ;;  %v7390_v41 = vadd.f32 %v13302_v63, %v7254_v22 }
 0x934   : > { %v6904_v34 = vpop.f32.mrb[116].mxu1 }
 0x935   : > { %7427 = vst.msk [vmem:[%s13309_s17 + $0x18] sm:$0xff] %vm7423_vm9, %v7390_v41  ;;  %v8046_v26 = vadd.f32 %v13126_v31, %v6904_v34  ;;  %v6906_v61 = vpop.f32.mrb[117].mxu1 }
 0x936   : > { %v6907_v56 = vpop.f32.mrb[118].mxu1 }
 0x937   : > { %v7259_v13 = vadd.f32 %v8046_v26, %v13204_v52  ;;  %v8047_v16 = vadd.f32 %v13128_v15, %v6907_v56  ;;  %v6909_v36 = vpop.f32.mrb[119].mxu1 }
 0x939   : > { %v7391_v57 = vadd.f32 %v13302_v63, %v7259_v13  ;;  %v7262_v30 = vadd.f32 %v8047_v16, %v13211_v33 }
 0x93b   : > { %7428 = vst.msk [vmem:[%s13309_s17 + $0x20] sm:$0xff] %vm7423_vm9, %v7391_v57  ;;  %v7392_v53 = vadd.f32 %v13302_v63, %v7262_v30  ;;  %v13376_v13 = vpop.f32.mrb[0].mxu0 }
 0x93c   : > { %v6912_v9 = vpop.f32.mrb[120].mxu1 }
 0x93d   : > { %7429 = vst.msk [vmem:[%s13309_s17 + $0x28] sm:$0xff] %vm7423_vm9, %v7392_v53  ;;  %v8048_v31 = vadd.f32 %v13130_v60, %v6912_v9  ;;  %v6914_v47 = vpop.f32.mrb[121].mxu1 }
 0x93e   : > { %v6915_v52 = vpop.f32.mrb[122].mxu1 }
 0x93f   : > { %v7267_v15 = vadd.f32 %v8048_v31, %v13202_v32  ;;  %v8049_v2 = vadd.f32 %v13132_v23, %v6915_v52  ;;  %v6917_v44 = vpop.f32.mrb[123].mxu1 }
 0x941   : > { %v7393_v33 = vadd.f32 %v13302_v63, %v7267_v15  ;;  %v7270_v25 = vadd.f32 %v8049_v2, %v13206_v59 }
 0x943   : > { %7430 = vst.msk [vmem:[%s13309_s17 + $0x30] sm:$0xff] %vm7423_vm9, %v7393_v33  ;;  %v7394_v5 = vadd.f32 %v13302_v63, %v7270_v25 }
 0x944   : > { %v6920_v11 = vpop.f32.mrb[124].mxu1 }
 0x945   : > { %7431 = vst.msk [vmem:[%s13309_s17 + $0x38] sm:$0xff] %vm7423_vm9, %v7394_v5  ;;  %v8050_v60 = vadd.f32 %v13134_v35, %v6920_v11  ;;  %v6922_v51 = vpop.f32.mrb[125].mxu1 }
 0x946   : > { %v6923_v32 = vpop.f32.mrb[126].mxu1 }
 0x947   : > { %v7275_v23 = vadd.f32 %v8050_v60, %v13221_v27  ;;  %v8051_v46 = vadd.f32 %v13136_v37, %v6923_v32  ;;  %v6925_v21 = vpop.f32.mrb[127].mxu1 }
 0x949   : > { %v7395_v59 = vadd.f32 %v13302_v63, %v7275_v23  ;;  %v7278_v55 = vadd.f32 %v8051_v46, %v13228_v4 }
 0x94b   : > { %7432 = vst.msk [vmem:[%s13309_s17 + $0x40] sm:$0xff] %vm7423_vm9, %v7395_v59  ;;  %v7396_v43 = vadd.f32 %v13302_v63, %v7278_v55  ;;  %v14118_v55 = vld [vmem:[#allocation24_spill] sm:$0xff] }
 0x94c   : > { %v6928_v29 = vpop.f32.mrb[128].mxu1 }
 0x94d   : > { %7433 = vst.msk [vmem:[%s13309_s17 + $0x48] sm:$0xff] %vm7423_vm9, %v7396_v43  ;;  %v8052_v35 = vadd.f32 %v13138_v40, %v6928_v29  ;;  %v6930_v45 = vpop.f32.mrb[129].mxu1  ;;  %v14119_v43 = vld [vmem:[#allocation22_spill] sm:$0xff] }
 0x94e   : > { %v6931_v27 = vpop.f32.mrb[130].mxu1  ;;  %v14120_v45 = vld [vmem:[#allocation26_spill] sm:$0xff] }
 0x94f   : > { %v7283_v37 = vadd.f32 %v8052_v35, %v13219_v48  ;;  %v8053_v58 = vadd.f32 %v13140_v50, %v6931_v27  ;;  %v6933_v38 = vpop.f32.mrb[131].mxu1 }
 0x951   : > { %v7397_v4 = vadd.f32 %v13302_v63, %v7283_v37  ;;  %v7286_v0 = vadd.f32 %v8053_v58, %v13223_v10  ;;  %v14121_v58 = vld [vmem:[#allocation23_spill] sm:$0xff] }
 0x953   : > { %7434 = vst.msk [vmem:[%s13309_s17 + $0x50] sm:$0xff] %vm7423_vm9, %v7397_v4  ;;  %v7398_v18 = vadd.f32 %v13302_v63, %v7286_v0 }
 0x954   : > { %v6936_v22 = vpop.f32.mrb[132].mxu1 }
 0x955   : > { %7435 = vst.msk [vmem:[%s13309_s17 + $0x58] sm:$0xff] %vm7423_vm9, %v7398_v18  ;;  %v8054_v40 = vadd.f32 %v13142_v8, %v6936_v22  ;;  %v6938_v41 = vpop.f32.mrb[133].mxu1  ;;  %v13378_v8 = vpop.f32.mrb[1].mxu0  ;;  %v14122_v22 = vld [vmem:[#allocation25_spill] sm:$0xff] }
 0x956   : > { %v6939_v48 = vpop.f32.mrb[134].mxu1  ;;  %v13387_v31 = vpop.f32.mrb[2].mxu0 }
 0x957   : > { %v7291_v50 = vadd.f32 %v8054_v40, %v13238_v3  ;;  %v8055_v34 = vadd.f32 %v13144_v62, %v6939_v48  ;;  %v6941_v26 = vpop.f32.mrb[135].mxu1  ;;  %v13389_v47 = vpop.f32.mrb[3].mxu0 }
 0x959   : > { %v7399_v61 = vadd.f32 %v13302_v63, %v7291_v50  ;;  %v7294_v10 = vadd.f32 %v8055_v34, %v13245_v12  ;;  %v14123_v34 = vld [vmem:[#allocation28_spill] sm:$0xff] }
 0x95b   : > { %7436 = vst.msk [vmem:[%s13309_s17 + $0x60] sm:$0xff] %vm7423_vm9, %v7399_v61  ;;  %v7400_v56 = vadd.f32 %v13302_v63, %v7294_v10 }
 0x95c   : > { %v6944_v16 = vpop.f32.mrb[136].mxu1 }
 0x95d   : > { %7437 = vst.msk [vmem:[%s13309_s17 + $0x68] sm:$0xff] %vm7423_vm9, %v7400_v56  ;;  %v8056_v62 = vadd.f32 %v13146_v19, %v6944_v16  ;;  %v6946_v3 = vpop.f32.mrb[137].mxu1  ;;  %v14124_v16 = vld [vmem:[#allocation18_spill] sm:$0xff] }
 0x95e   : > { %v6947_v36 = vpop.f32.mrb[138].mxu1 }
 0x95f   : > { %v7299_v57 = vadd.f32 %v8056_v62, %v13236_v49  ;;  %v8057_v12 = vadd.f32 %v13148_v17, %v6947_v36  ;;  %v6949_v30 = vpop.f32.mrb[139].mxu1 }
 0x961   : > { %v7401_v53 = vadd.f32 %v13302_v63, %v7299_v57  ;;  %v7302_v9 = vadd.f32 %v8057_v12, %v13240_v28  ;;  %v14125_v12 = vld [vmem:[#allocation27_spill] sm:$0xff] }
 0x963   : > { %7438 = vst.msk [vmem:[%s13309_s17 + $0x70] sm:$0xff] %vm7423_vm9, %v7401_v53  ;;  %v7402_v19 = vadd.f32 %v13302_v63, %v7302_v9 }
 0x964   : > { %v6952_v52 = vpop.f32.mrb[140].mxu1 }
 0x965   : > { %7439 = vst.msk [vmem:[%s13309_s17 + $0x78] sm:$0xff] %vm7423_vm9, %v7402_v19  ;;  %v8058_v17 = vadd.f32 %v13150_v6, %v6952_v52  ;;  %v6954_v49 = vpop.f32.mrb[141].mxu1  ;;  %v14126_v52 = vld [vmem:[#allocation29_spill] sm:$0xff] }
 0x966   : > { %v6955_v15 = vpop.f32.mrb[142].mxu1 }
 0x967   : > { %v7307_v2 = vadd.f32 %v8058_v17, %v13255_v1  ;;  %v8059_v28 = vadd.f32 %v13152_v54, %v6955_v15  ;;  %v6957_v44 = vpop.f32.mrb[143].mxu1 }
 0x969   : > { %v7403_v33 = vadd.f32 %v13302_v63, %v7307_v2  ;;  %v7310_v25 = vadd.f32 %v8059_v28, %v13262_v7  ;;  %v14127_v28 = vld [vmem:[#allocation20_spill] sm:$0xff] }
 0x96b   : > { %7440 = vst.msk [vmem:[%s13309_s17 + $0x80] sm:$0xff] %vm7423_vm9, %v7403_v33  ;;  %v7404_v5 = vadd.f32 %v13302_v63, %v7310_v25 }
 0x96c   : > { %v6960_v11 = vpop.f32.mrb[144].mxu1 }
 0x96d   : > { %7441 = vst.msk [vmem:[%s13309_s17 + $0x88] sm:$0xff] %vm7423_vm9, %v7404_v5  ;;  %v8060_v6 = vadd.f32 %v13159_v14, %v6960_v11  ;;  %v6962_v60 = vpop.f32.mrb[145].mxu1  ;;  %v14128_v11 = vld [vmem:[#allocation21_spill] sm:$0xff] }
 0x96e   : > { %v6963_v1 = vpop.f32.mrb[146].mxu1 }
 0x96f   : > { %v7315_v54 = vadd.f32 %v8060_v6, %v13253_v39  ;;  %v8061_v51 = vadd.f32 %v13161_v42, %v6963_v1  ;;  %v6965_v32 = vpop.f32.mrb[147].mxu1 }
 0x971   : > { %v7405_v7 = vadd.f32 %v13302_v63, %v7315_v54  ;;  %v7318_v23 = vadd.f32 %v8061_v51, %v13257_v20  ;;  %v14129_v51 = vld [vmem:[#allocation52_spill] sm:$0xff] }
 0x973   : > { %7442 = vst.msk [vmem:[%s13309_s17 + $0x90] sm:$0xff] %vm7423_vm9, %v7405_v7  ;;  %v7406_v46 = vadd.f32 %v13302_v63, %v7318_v23 }
 0x974   : > { %v6968_v21 = vpop.f32.mrb[148].mxu1 }
 0x975   : > { %7443 = vst.msk [vmem:[%s13309_s17 + $0x98] sm:$0xff] %vm7423_vm9, %v7406_v46  ;;  %v8062_v14 = vadd.f32 %v13172_v24, %v6968_v21  ;;  %v6970_v59 = vpop.f32.mrb[149].mxu1  ;;  %v14130_v21 = vld [vmem:[#allocation54_spill] sm:$0xff] }
 0x976   : > { %v6971_v39 = vpop.f32.mrb[150].mxu1 }
 0x977   : > { %v7323_v42 = vadd.f32 %v8062_v14, %v14118_v55  ;;  %v8063_v29 = vadd.f32 %v14119_v43, %v6971_v39  ;;  %v6973_v35 = vpop.f32.mrb[151].mxu1 }
 0x979   : > { %v7407_v20 = vadd.f32 %v13302_v63, %v7323_v42  ;;  %v7326_v27 = vadd.f32 %v8063_v29, %v14120_v45 }
 0x97b   : > { %7444 = vst.msk [vmem:[%s13309_s17 + $0xa0] sm:$0xff] %vm7423_vm9, %v7407_v20  ;;  %v7408_v37 = vadd.f32 %v13302_v63, %v7326_v27 }
 0x97d   : > { %7445 = vst.msk [vmem:[%s13309_s17 + $0xa8] sm:$0xff] %vm7423_vm9, %v7408_v37 }
 0x9b4   : > { %v7153_v24 = vpop.f32.mrb[152].mxu1 }
 0x9b5   : > { %v7331_v38 = vadd.f32 %v14121_v58, %v7153_v24  ;;  %v7155_v4 = vpop.f32.mrb[153].mxu1 }
 0x9b6   : > { %v7156_v0 = vpop.f32.mrb[154].mxu1 }
 0x9b7   : > { %v7409_v18 = vadd.f32 %v13302_v63, %v7331_v38  ;;  %v7334_v40 = vadd.f32 %v14122_v22, %v7156_v0  ;;  %v7158_v41 = vpop.f32.mrb[155].mxu1 }
 0x9b9   : > { %7446 = vst.msk [vmem:[%s13309_s17 + $0xb0] sm:$0xff] %vm7423_vm9, %v7409_v18  ;;  %v7410_v48 = vadd.f32 %v13302_v63, %v7334_v40 }
 0x9bb   : > { %7447 = vst.msk [vmem:[%s13309_s17 + $0xb8] sm:$0xff] %vm7423_vm9, %v7410_v48 }
 0x9bc   : > { %v7161_v50 = vpop.f32.mrb[156].mxu1 }
 0x9bd   : > { %v7339_v26 = vadd.f32 %v14123_v34, %v7161_v50  ;;  %v7163_v61 = vpop.f32.mrb[157].mxu1 }
 0x9be   : > { %v7164_v10 = vpop.f32.mrb[158].mxu1 }
 0x9bf   : > { %v7411_v56 = vadd.f32 %v13302_v63, %v7339_v26  ;;  %v7342_v62 = vadd.f32 %v14124_v16, %v7164_v10  ;;  %v7166_v3 = vpop.f32.mrb[159].mxu1 }
 0x9c1   : > { %7448 = vst.msk [vmem:[%s13309_s17 + $0xc0] sm:$0xff] %vm7423_vm9, %v7411_v56  ;;  %v7412_v36 = vadd.f32 %v13302_v63, %v7342_v62 }
 0x9c3   : > { %7449 = vst.msk [vmem:[%s13309_s17 + $0xc8] sm:$0xff] %vm7423_vm9, %v7412_v36 }
 0x9c4   : > { %v7169_v57 = vpop.f32.mrb[160].mxu1 }
 0x9c5   : > { %v7347_v30 = vadd.f32 %v14125_v12, %v7169_v57  ;;  %v7171_v53 = vpop.f32.mrb[161].mxu1 }
 0x9c6   : > { %v7172_v9 = vpop.f32.mrb[162].mxu1 }
 0x9c7   : > { %v7413_v19 = vadd.f32 %v13302_v63, %v7347_v30  ;;  %v7350_v17 = vadd.f32 %v14126_v52, %v7172_v9  ;;  %v7174_v49 = vpop.f32.mrb[163].mxu1 }
 0x9c9   : > { %7450 = vst.msk [vmem:[%s13309_s17 + $0xd0] sm:$0xff] %vm7423_vm9, %v7413_v19  ;;  %v7414_v15 = vadd.f32 %v13302_v63, %v7350_v17 }
 0x9cb   : > { %7451 = vst.msk [vmem:[%s13309_s17 + $0xd8] sm:$0xff] %vm7423_vm9, %v7414_v15 }
 0x9cc   : > { %v7177_v2 = vpop.f32.mrb[164].mxu1 }
 0x9cd   : > { %v7355_v44 = vadd.f32 %v14127_v28, %v7177_v2  ;;  %v7179_v33 = vpop.f32.mrb[165].mxu1 }
 0x9ce   : > { %v7180_v25 = vpop.f32.mrb[166].mxu1 }
 0x9cf   : > { %v7415_v5 = vadd.f32 %v13302_v63, %v7355_v44  ;;  %v7358_v6 = vadd.f32 %v14128_v11, %v7180_v25  ;;  %v7182_v60 = vpop.f32.mrb[167].mxu1 }
 0x9d1   : > { %7452 = vst.msk [vmem:[%s13309_s17 + $0xe0] sm:$0xff] %vm7423_vm9, %v7415_v5  ;;  %v7416_v1 = vadd.f32 %v13302_v63, %v7358_v6 }
 0x9d3   : > { %7453 = vst.msk [vmem:[%s13309_s17 + $0xe8] sm:$0xff] %vm7423_vm9, %v7416_v1 }
 0x9d4   : > { %v7185_v54 = vpop.f32.mrb[168].mxu1 }
 0x9d5   : > { %v7363_v32 = vadd.f32 %v14129_v51, %v7185_v54  ;;  %v7187_v7 = vpop.f32.mrb[169].mxu1 }
 0x9d6   : > { %v7188_v23 = vpop.f32.mrb[170].mxu1 }
 0x9d7   : > { %v7417_v46 = vadd.f32 %v13302_v63, %v7363_v32  ;;  %v7366_v14 = vadd.f32 %v14130_v21, %v7188_v23  ;;  %v7190_v59 = vpop.f32.mrb[171].mxu1 }
 0x9d9   : > { %7454 = vst.msk [vmem:[%s13309_s17 + $0xf0] sm:$0xff] %vm7423_vm9, %v7417_v46  ;;  %v7418_v39 = vadd.f32 %v13302_v63, %v7366_v14 }
 0x9db   : > { %7455 = vst.msk [vmem:[%s13309_s17 + $0xf8] sm:$0xff] %vm7423_vm9, %v7418_v39 }
 0x9dc   : > { %v7193_v55 = vpop.f32.mrb[172].mxu1 }
 0x9dd   : > { %v7371_v42 = vadd.f32 %v13378_v8, %v7193_v55  ;;  %v7195_v43 = vpop.f32.mrb[173].mxu1 }
 0x9de   : > { %v7196_v29 = vpop.f32.mrb[174].mxu1 }
 0x9df   : > { %v7419_v35 = vadd.f32 %v13302_v63, %v7371_v42  ;;  %v7374_v20 = vadd.f32 %v13389_v47, %v7196_v29  ;;  %v7198_v45 = vpop.f32.mrb[175].mxu1 }
 0x9e1   : > { %7456 = vst.msk [vmem:[%s13309_s17 + $0x100] sm:$0xff] %vm7423_vm9, %v7419_v35  ;;  %v7420_v27 = vadd.f32 %v13302_v63, %v7374_v20 }
 0x9e3   : > { %7457 = vst.msk [vmem:[%s13309_s17 + $0x108] sm:$0xff] %vm7423_vm9, %v7420_v27 }
 0x9e4   : > { %v7201_v37 = vpop.f32.mrb[176].mxu1 }
 0x9e5   : > { %v7379_v24 = vadd.f32 %v13376_v13, %v7201_v37  ;;  %v7203_v58 = vpop.f32.mrb[177].mxu1 }
 0x9e6   : > { %v7204_v8 = vpop.f32.mrb[178].mxu1 }
 0x9e7   : > { %v7421_v38 = vadd.f32 %v13302_v63, %v7379_v24  ;;  %v7382_v4 = vadd.f32 %v13387_v31, %v7204_v8  ;;  %v7206_v0 = vpop.f32.mrb[179].mxu1 }
 0x9e9   : > { %7458 = vst.msk [vmem:[%s13309_s17 + $0x110] sm:$0xff] %vm7423_vm9, %v7421_v38  ;;  %v7422_v47 = vadd.f32 %v13302_v63, %v7382_v4 }
 0x9eb   : > { %7459 = vst.msk [vmem:[%s13309_s17 + $0x118] sm:$0xff] %vm7423_vm9, %v7422_v47 }
 0x9ec PF: > { %s16_s20 = sadd.s32 1, %s8924_s20  }
 0x9ed   : > { %p13_p4 = scmp.ge.s32.totalorder %s16_s20, 4  }
 0x9ef   :  { %15 = sbr.rel (!%p13_p4) target bundleno = 2 (0x2), region = 70 }

</bundles_post_ra>
